<compile_context>
chip_gen: v5e
topology: v5e:2x2
jax: 0.10.0
libtpu: 0.0.40
codegen_flags: <defaults>
</compile_context>

<pallas_src>
import jax
import jax.numpy as jnp
from jax import lax
from jax.experimental import pallas as pl
from jax.experimental.pallas import tpu as pltpu

EPS = 1e-5  # PyTorch BatchNorm2d default eps


def _d_convlayer_kernel(x_ref, w1_ref, st1_ref, w2_ref, st2_ref, o_ref, xpad_ref):
    """Grid = (batch, row_tile).  One TH-row output tile per step.

    x_ref   : (1, Cin, H, W)      f32   raw NCHW input block (constant over row tiles)
    w1_ref  : (Cmid, 9*Cin)       bf16  conv1 weights, OIHW flattened to (O, I*9)
    st1_ref : (Cmid, 2)           f32   per-channel [BN1 scale, BN1 offset+bias]
    w2_ref  : (Cout, 9*Cmid)      bf16  conv2 weights
    st2_ref : (Cout, 2)           f32   per-channel [BN2 scale, BN2 offset+bias]
    o_ref   : (1, Cout, TH*W)     bf16  dense NCHW output tile (lane dim % 128 == 0)
    xpad_ref: (Cin, H+4, W+4)     bf16  2-px zero-padded input, filled once per image
    """
    Cin, H, W = x_ref.shape[1], x_ref.shape[2], x_ref.shape[3]
    Cmid = w1_ref.shape[0]
    TH = o_ref.shape[2] // W
    TH2, W2 = TH + 2, W + 2

    t = pl.program_id(1)

    # Fill the padded-input scratch once per batch element.  The row-tile axis
    # is the inner "arbitrary" grid axis, so t==0 fires once per image on
    # whichever core owns it (safe under megacore 'parallel' batch split).
    @pl.when(t == 0)
    def _():
        xpad_ref[...] = jnp.zeros(xpad_ref.shape, xpad_ref.dtype)
        xpad_ref[:, 2:2 + H, 2:2 + W] = x_ref[0].astype(xpad_ref.dtype)

    a = pl.multiple_of(t * TH, TH)  # first output row of this tile

    def im2col9(xt, oh, ow):
        # (C, oh+2, ow+2) -> (9*C, oh*ow); row order (c, ky, kx) matches the
        # row-major OIHW -> (O, 9*I) weight reshape done in the wrapper.
        c = xt.shape[0]
        taps = [xt[:, ky:ky + oh, kx:kx + ow].reshape(c, 1, oh * ow)
                for ky in range(3) for kx in range(3)]
        return jnp.concatenate(taps, axis=1).reshape(c * 9, oh * ow)

    # ---- conv1 + BN1 + ReLU on the halo-extended (TH+2, W+2) tile ----
    x_tile = xpad_ref[:, pl.ds(a, TH + 4), :]                 # (Cin, TH+4, W+4) bf16
    p1 = im2col9(x_tile, TH2, W2)                             # (9*Cin, TH2*W2)  bf16
    acc1 = jnp.dot(w1_ref[...], p1, preferred_element_type=jnp.float32)
    y1 = jnp.maximum(acc1 * st1_ref[:, 0:1] + st1_ref[:, 1:2], 0.0)  # (Cmid, TH2*W2) f32

    # Zero the halo positions that fall outside the valid image — this *is* the
    # zero padding of the intermediate for conv2, done in registers (no VMEM
    # scratch round-trip, no masked border stores).
    ri = lax.broadcasted_iota(jnp.int32, (TH2, W2), 0)
    ci = lax.broadcasted_iota(jnp.int32, (TH2, W2), 1)
    valid = (a - 1 + ri >= 0) & (a - 1 + ri < H) & (ci >= 1) & (ci <= W)
    y1e = jnp.where(valid[None, :, :], y1.reshape(Cmid, TH2, W2), 0.0)
    y1e = y1e.astype(jnp.bfloat16)

    # ---- conv2 + BN2 + ReLU ----
    p2 = im2col9(y1e, TH, W)                                  # (9*Cmid, TH*W) bf16
    acc2 = jnp.dot(w2_ref[...], p2, preferred_element_type=jnp.float32)
    out = jnp.maximum(acc2 * st2_ref[:, 0:1] + st2_ref[:, 1:2], 0.0)
    o_ref[0] = out.astype(o_ref.dtype)                        # (Cout, TH*W), lane-dense


def _pick_row_tile(H, W):
    # Smallest row tile that (a) divides H and (b) keeps the flattened output
    # lane dim TH*W a multiple of 128 (unmasked full-lane stores).  Smaller
    # tiles -> more grid steps per core -> DMA/compute overlap at small batch.
    # TODO(synk): for large H/W/C bound TH by the per-chip VMEM budget as well.
    for th in range(1, H + 1):
        if H % th == 0 and (th * W) % 128 == 0:
            return th
    return H


def _vmem_limit_bytes(Cin, Cmid, Cout, H, W, TH):
    bf16, f32 = 2, 4
    TH2, W2 = TH + 2, W + 2
    io = 2 * Cin * H * W * f32 + 2 * Cout * TH * W * bf16          # dbl-buffered blocks
    weights = 2 * (9 * (Cin * Cmid + Cmid * Cout) * bf16           # default 2 buffers
                   + 2 * (Cmid + Cout) * f32)
    scratch = Cin * (H + 4) * (W + 4) * bf16
    live = (9 * Cin * TH2 * W2 * bf16            # conv1 im2col patches
            + 9 * Cmid * TH * W * bf16           # conv2 im2col patches
            + (Cmid + Cout) * TH2 * W2 * f32     # f32 accumulators
            + Cmid * TH2 * W2 * (f32 + bf16))    # masked intermediate
    est = io + weights + scratch + 2 * live      # 2x live: compiler relayout temps
    cap = 64 << 20                               # conservative default (v7x per-TC)
    try:
        cap = int(getattr(pltpu.get_tpu_info(), "vmem_capacity_bytes", cap))
    except Exception:
        pass
    return int(min(max(est, 32 << 20), cap - (16 << 20)))


def d_convlayer_forward(x_nchw, params):
    """NCHW in -> NCHW out.  No wrapper transposes / pads / activation casts."""
    N, Cin, H, W = x_nchw.shape
    Cmid = params["w1"].shape[0]          # conv1 is in_ch -> in_ch
    Cout = params["w2"].shape[0]

    TH = _pick_row_tile(H, W)
    n_tiles = H // TH

    # Inference BatchNorm folded to per-channel (scale, offset); applied
    # POST-matmul in f32 so bf16 weight quantization is scale-independent.
    s1 = params["g1"] / jnp.sqrt(params["v1"] + EPS)
    t1 = (params["b1"] - params["m1"]) * s1 + params["be1"]
    s2 = params["g2"] / jnp.sqrt(params["v2"] + EPS)
    t2 = (params["b2"] - params["m2"]) * s2 + params["be2"]

    w1 = params["w1"].reshape(Cmid, 9 * Cin).astype(jnp.bfloat16)    # OIHW -> (O, I*9)
    w2 = params["w2"].reshape(Cout, 9 * Cmid).astype(jnp.bfloat16)
    st1 = jnp.stack([s1, t1], axis=1).astype(jnp.float32)            # (Cmid, 2)
    st2 = jnp.stack([s2, t2], axis=1).astype(jnp.float32)            # (Cout, 2)

    out = pl.pallas_call(
        _d_convlayer_kernel,
        out_shape=jax.ShapeDtypeStruct((N, Cout, H * W), jnp.bfloat16),
        grid_spec=pltpu.PrefetchScalarGridSpec(
            num_scalar_prefetch=0,
            grid=(N, n_tiles),
            in_specs=[
                # Constant index over the row-tile axis -> block stays resident,
                # fetched once per image (not re-DMA'd each tile step).
                pl.BlockSpec((1, Cin, H, W), lambda n, t: (n, 0, 0, 0)),
                pl.BlockSpec((Cmid, 9 * Cin), lambda n, t: (0, 0)),
                pl.BlockSpec((Cmid, 2), lambda n, t: (0, 0)),
                pl.BlockSpec((Cout, 9 * Cmid), lambda n, t: (0, 0)),
                pl.BlockSpec((Cout, 2), lambda n, t: (0, 0)),
            ],
            out_specs=pl.BlockSpec((1, Cout, TH * W), lambda n, t: (n, 0, t)),
            scratch_shapes=[pltpu.VMEM((Cin, H + 4, W + 4), jnp.bfloat16)],
        ),
        compiler_params=pltpu.CompilerParams(
            dimension_semantics=("parallel", "arbitrary"),
            vmem_limit_bytes=_vmem_limit_bytes(Cin, Cmid, Cout, H, W, TH),
        ),
    )(x_nchw, w1, st1, w2, st2)

    # Already NCHW: just un-flatten the spatial dim (pure reshape, no transpose).
    return out.reshape(N, Cout, H, W).astype(x_nchw.dtype)


def reference_forward(x_nchw, p):
    """Pure-JAX reference mirroring the PyTorch module (eval-mode BatchNorm)."""
    def conv_bn_relu(x, w, b, g, be, m, v):
        y = lax.conv_general_dilated(
            x, w, window_strides=(1, 1), padding=((1, 1), (1, 1)),
            dimension_numbers=("NCHW", "OIHW", "NCHW"),
            precision=lax.Precision.HIGHEST)
        y = y + b[None, :, None, None]
        y = (y - m[None, :, None, None]) / jnp.sqrt(v[None, :, None, None] + EPS)
        y = y * g[None, :, None, None] + be[None, :, None, None]
        return jnp.maximum(y, 0.0)

    y = conv_bn_relu(x_nchw, p["w1"], p["b1"], p["g1"], p["be1"], p["m1"], p["v1"])
    y = conv_bn_relu(y, p["w2"], p["b2"], p["g2"], p["be2"], p["m2"], p["v2"])
    return y


def make_params(key, in_ch, out_ch):
    ks = jax.random.split(key, 12)
    return {
        # conv1: in_ch -> in_ch, 3x3 (OIHW) + bias
        "w1": 0.1 * jax.random.normal(ks[0], (in_ch, in_ch, 3, 3), jnp.float32),
        "b1": 0.1 * jax.random.normal(ks[1], (in_ch,), jnp.float32),
        # BatchNorm2d(in_ch)
        "g1": 1.0 + 0.1 * jax.random.normal(ks[2], (in_ch,), jnp.float32),
        "be1": 0.1 * jax.random.normal(ks[3], (in_ch,), jnp.float32),
        "m1": 0.1 * jax.random.normal(ks[4], (in_ch,), jnp.float32),
        "v1": 0.5 + jnp.abs(jax.random.normal(ks[5], (in_ch,), jnp.float32)),
        # conv2: in_ch -> out_ch, 3x3 (OIHW) + bias
        "w2": 0.1 * jax.random.normal(ks[6], (out_ch, in_ch, 3, 3), jnp.float32),
        "b2": 0.1 * jax.random.normal(ks[7], (out_ch,), jnp.float32),
        # BatchNorm2d(out_ch)
        "g2": 1.0 + 0.1 * jax.random.normal(ks[8], (out_ch,), jnp.float32),
        "be2": 0.1 * jax.random.normal(ks[9], (out_ch,), jnp.float32),
        "m2": 0.1 * jax.random.normal(ks[10], (out_ch,), jnp.float32),
        "v2": 0.5 + jnp.abs(jax.random.normal(ks[11], (out_ch,), jnp.float32)),
    }


if __name__ == "__main__":
    N, in_ch, out_ch, H, W = 2, 4, 8, 16, 16

    key = jax.random.PRNGKey(0)
    kx, kp = jax.random.split(key)
    x = jax.random.normal(kx, (N, in_ch, H, W), jnp.float32)  # PyTorch-style NCHW
    params = make_params(kp, in_ch, out_ch)

    out = d_convlayer_forward(x, params)
    out = jax.block_until_ready(out)

    ref = reference_forward(x, params)
    assert out.shape == (N, out_ch, H, W), out.shape
    # bf16 MXU operands + bf16 intermediate/output (f32 accumulation & BN) ->
    # bf16-level tolerance vs the f32 reference.
    assert jnp.allclose(out, ref, atol=2e-2, rtol=2e-2), (
        float(jnp.max(jnp.abs(out - ref))))

    print("KERNEL_OK")
</pallas_src>

<mosaic_0001>
module attributes {stable_mosaic.version = 11 : i64} {
  func.func @_d_convlayer_kernel(%arg0: i32, %arg1: i32, %arg2: memref<1x4x16x16xf32, #tpu.memory_space<vmem>>, %arg3: memref<4x36xbf16, #tpu.memory_space<vmem>>, %arg4: memref<4x2xf32, #tpu.memory_space<vmem>>, %arg5: memref<8x36xbf16, #tpu.memory_space<vmem>>, %arg6: memref<8x2xf32, #tpu.memory_space<vmem>>, %arg7: memref<1x8x128xbf16, #tpu.memory_space<vmem>>, %arg8: memref<4x20x20xbf16, #tpu.memory_space<vmem>>) attributes {dimension_semantics = [#tpu.dimension_semantics<parallel>, #tpu.dimension_semantics<arbitrary>], iteration_bounds = array<i64: 2, 2>, scalar_prefetch = 0 : i64, scratch_operands = 1 : i64, tpu.core_type = #tpu.core_type<tc>, window_params = [{transform_indices = @transform_0, window_bounds = array<i64: 1, 4, 16, 16>}, {pipeline_mode = #tpu.pipeline_mode<synchronous>, transform_indices = @transform_1, window_bounds = array<i64: 4, 36>}, {pipeline_mode = #tpu.pipeline_mode<synchronous>, transform_indices = @transform_2, window_bounds = array<i64: 4, 2>}, {pipeline_mode = #tpu.pipeline_mode<synchronous>, transform_indices = @transform_3, window_bounds = array<i64: 8, 36>}, {pipeline_mode = #tpu.pipeline_mode<synchronous>, transform_indices = @transform_4, window_bounds = array<i64: 8, 2>}, {transform_indices = @transform_5, window_bounds = array<i64: 1, 8, 128>}]} {
    %c0_i32 = arith.constant 0 : i32
    %0 = arith.cmpi eq, %arg1, %c0_i32 : i32
    %1 = arith.extui %0 : i1 to i32
    %c0_i32_0 = arith.constant 0 : i32
    %2 = arith.cmpi ne, %1, %c0_i32_0 : i32
    scf.if %2 {
      %cst_24 = arith.constant 0.000000e+00 : bf16
      %97 = vector.broadcast %cst_24 : bf16 to vector<4x20x20xbf16>
      %c0_25 = arith.constant 0 : index
      %c0_26 = arith.constant 0 : index
      %c0_27 = arith.constant 0 : index
      %98 = vector.load %arg8[%c0_25, %c0_26, %c0_27] : memref<4x20x20xbf16, #tpu.memory_space<vmem>>, vector<4x20x20xbf16>
      tpu.vector_store %arg8[%c0_25, %c0_26, %c0_27], %97 {strides = array<i32>} : memref<4x20x20xbf16, #tpu.memory_space<vmem>>, vector<4x20x20xbf16>,
      %c0_28 = arith.constant 0 : index
      %c0_29 = arith.constant 0 : index
      %c0_30 = arith.constant 0 : index
      %c0_31 = arith.constant 0 : index
      %99 = vector.load %arg2[%c0_28, %c0_29, %c0_30, %c0_31] : memref<1x4x16x16xf32, #tpu.memory_space<vmem>>, vector<1x4x16x16xf32>
      %100 = vector.shape_cast %99 : vector<1x4x16x16xf32> to vector<4x16x16xf32>
      %101 = arith.truncf %100 : vector<4x16x16xf32> to vector<4x16x16xbf16>
      %c0_32 = arith.constant 0 : index
      %c2 = arith.constant 2 : index
      %c2_33 = arith.constant 2 : index
      %102 = vector.load %arg8[%c0_32, %c2, %c2_33] : memref<4x20x20xbf16, #tpu.memory_space<vmem>>, vector<4x16x16xbf16>
      tpu.vector_store %arg8[%c0_32, %c2, %c2_33], %101 {strides = array<i32>} : memref<4x20x20xbf16, #tpu.memory_space<vmem>>, vector<4x16x16xbf16>,
    } else {
    }
    %c8_i32 = arith.constant 8 : i32
    %3 = arith.muli %arg1, %c8_i32 : i32
    %4 = tpu.assume_multiple %3, 8 : i32
    %c0 = arith.constant 0 : index
    %5 = arith.index_cast %4 : i32 to index
    %c0_1 = arith.constant 0 : index
    %6 = vector.load %arg8[%c0, %5, %c0_1] : memref<4x20x20xbf16, #tpu.memory_space<vmem>>, vector<4x12x20xbf16>
    %7 = vector.extract_strided_slice %6 {offsets = [0, 0, 0], sizes = [4, 10, 18], strides = [1, 1, 1]} : vector<4x12x20xbf16> to vector<4x10x18xbf16>
    %8 = vector.shape_cast %7 : vector<4x10x18xbf16> to vector<4x1x180xbf16>
    %9 = vector.extract_strided_slice %6 {offsets = [0, 0, 1], sizes = [4, 10, 18], strides = [1, 1, 1]} : vector<4x12x20xbf16> to vector<4x10x18xbf16>
    %10 = vector.shape_cast %9 : vector<4x10x18xbf16> to vector<4x1x180xbf16>
    %11 = vector.extract_strided_slice %6 {offsets = [0, 0, 2], sizes = [4, 10, 18], strides = [1, 1, 1]} : vector<4x12x20xbf16> to vector<4x10x18xbf16>
    %12 = vector.shape_cast %11 : vector<4x10x18xbf16> to vector<4x1x180xbf16>
    %13 = vector.extract_strided_slice %6 {offsets = [0, 1, 0], sizes = [4, 10, 18], strides = [1, 1, 1]} : vector<4x12x20xbf16> to vector<4x10x18xbf16>
    %14 = vector.shape_cast %13 : vector<4x10x18xbf16> to vector<4x1x180xbf16>
    %15 = vector.extract_strided_slice %6 {offsets = [0, 1, 1], sizes = [4, 10, 18], strides = [1, 1, 1]} : vector<4x12x20xbf16> to vector<4x10x18xbf16>
    %16 = vector.shape_cast %15 : vector<4x10x18xbf16> to vector<4x1x180xbf16>
    %17 = vector.extract_strided_slice %6 {offsets = [0, 1, 2], sizes = [4, 10, 18], strides = [1, 1, 1]} : vector<4x12x20xbf16> to vector<4x10x18xbf16>
    %18 = vector.shape_cast %17 : vector<4x10x18xbf16> to vector<4x1x180xbf16>
    %19 = vector.extract_strided_slice %6 {offsets = [0, 2, 0], sizes = [4, 10, 18], strides = [1, 1, 1]} : vector<4x12x20xbf16> to vector<4x10x18xbf16>
    %20 = vector.shape_cast %19 : vector<4x10x18xbf16> to vector<4x1x180xbf16>
    %21 = vector.extract_strided_slice %6 {offsets = [0, 2, 1], sizes = [4, 10, 18], strides = [1, 1, 1]} : vector<4x12x20xbf16> to vector<4x10x18xbf16>
    %22 = vector.shape_cast %21 : vector<4x10x18xbf16> to vector<4x1x180xbf16>
    %23 = vector.extract_strided_slice %6 {offsets = [0, 2, 2], sizes = [4, 10, 18], strides = [1, 1, 1]} : vector<4x12x20xbf16> to vector<4x10x18xbf16>
    %24 = vector.shape_cast %23 : vector<4x10x18xbf16> to vector<4x1x180xbf16>
    %25 = tpu.concatenate %8, %10, %12, %14, %16, %18, %20, %22, %24 in 1 : vector<4x1x180xbf16>, vector<4x1x180xbf16>, vector<4x1x180xbf16>, vector<4x1x180xbf16>, vector<4x1x180xbf16>, vector<4x1x180xbf16>, vector<4x1x180xbf16>, vector<4x1x180xbf16>, vector<4x1x180xbf16> -> vector<4x9x180xbf16>
    %26 = vector.shape_cast %25 : vector<4x9x180xbf16> to vector<36x180xbf16>
    %c0_2 = arith.constant 0 : index
    %c0_3 = arith.constant 0 : index
    %27 = vector.load %arg3[%c0_2, %c0_3] : memref<4x36xbf16, #tpu.memory_space<vmem>>, vector<4x36xbf16>
    %cst = arith.constant dense<0.000000e+00> : vector<4x180xf32>
    %28 = tpu.matmul %27, %26, %cst {dimension_numbers = #tpu.dot_dimension_numbers<[1], [0], [0], [1], [0, 0, 1, 1], [], []>} : vector<4x36xbf16>, vector<36x180xbf16>, vector<4x180xf32> -> vector<4x180xf32>
    %c0_4 = arith.constant 0 : index
    %c0_5 = arith.constant 0 : index
    %29 = vector.load %arg4[%c0_4, %c0_5] : memref<4x2xf32, #tpu.memory_space<vmem>>, vector<4x1xf32>
    %30 = vector.broadcast %29 : vector<4x1xf32> to vector<4x180xf32>
    %31 = arith.mulf %28, %30 : vector<4x180xf32>
    %c0_6 = arith.constant 0 : index
    %c1 = arith.constant 1 : index
    %32 = vector.load %arg4[%c0_6, %c1] : memref<4x2xf32, #tpu.memory_space<vmem>>, vector<4x1xf32>
    %33 = vector.broadcast %32 : vector<4x1xf32> to vector<4x180xf32>
    %34 = arith.addf %31, %33 : vector<4x180xf32>
    %cst_7 = arith.constant 0.000000e+00 : f32
    %35 = vector.broadcast %cst_7 : f32 to vector<4x180xf32>
    %36 = arith.maximumf %34, %35 : vector<4x180xf32>
    %37 = tpu.iota {dimensions = array<i32: 0>} : vector<10x18xi32>
    %38 = tpu.iota {dimensions = array<i32: 1>} : vector<10x18xi32>
    %c1_i32 = arith.constant 1 : i32
    %39 = arith.subi %4, %c1_i32 : i32
    %40 = vector.broadcast %39 : i32 to vector<10x18xi32>
    %41 = arith.addi %40, %37 : vector<10x18xi32>
    %c0_i32_8 = arith.constant 0 : i32
    %42 = vector.broadcast %c0_i32_8 : i32 to vector<10x18xi32>
    %43 = arith.cmpi sge, %41, %42 : vector<10x18xi32>
    %c1_i32_9 = arith.constant 1 : i32
    %44 = arith.subi %4, %c1_i32_9 : i32
    %45 = vector.broadcast %44 : i32 to vector<10x18xi32>
    %46 = arith.addi %45, %37 : vector<10x18xi32>
    %c16_i32 = arith.constant 16 : i32
    %47 = vector.broadcast %c16_i32 : i32 to vector<10x18xi32>
    %48 = arith.cmpi slt, %46, %47 : vector<10x18xi32>
    %49 = arith.andi %43, %48 : vector<10x18xi1>
    %c1_i32_10 = arith.constant 1 : i32
    %50 = vector.broadcast %c1_i32_10 : i32 to vector<10x18xi32>
    %51 = arith.cmpi sge, %38, %50 : vector<10x18xi32>
    %52 = arith.andi %49, %51 : vector<10x18xi1>
    %c16_i32_11 = arith.constant 16 : i32
    %53 = vector.broadcast %c16_i32_11 : i32 to vector<10x18xi32>
    %54 = arith.cmpi sle, %38, %53 : vector<10x18xi32>
    %55 = arith.andi %52, %54 : vector<10x18xi1>
    %56 = vector.shape_cast %55 : vector<10x18xi1> to vector<1x10x18xi1>
    %57 = vector.shape_cast %36 : vector<4x180xf32> to vector<4x10x18xf32>
    %cst_12 = arith.constant 0.000000e+00 : f32
    %58 = vector.shape_cast %56 : vector<1x10x18xi1> to vector<1x10x18xi1>
    %59 = vector.broadcast %58 : vector<1x10x18xi1> to vector<4x10x18xi1>
    %60 = vector.broadcast %cst_12 : f32 to vector<4x10x18xf32>
    %61 = arith.select %59, %57, %60 : vector<4x10x18xi1>, vector<4x10x18xf32>
    %62 = arith.truncf %61 : vector<4x10x18xf32> to vector<4x10x18xbf16>
    %63 = vector.extract_strided_slice %62 {offsets = [0, 0, 0], sizes = [4, 8, 16], strides = [1, 1, 1]} : vector<4x10x18xbf16> to vector<4x8x16xbf16>
    %64 = vector.shape_cast %63 : vector<4x8x16xbf16> to vector<4x1x128xbf16>
    %65 = vector.extract_strided_slice %62 {offsets = [0, 0, 1], sizes = [4, 8, 16], strides = [1, 1, 1]} : vector<4x10x18xbf16> to vector<4x8x16xbf16>
    %66 = vector.shape_cast %65 : vector<4x8x16xbf16> to vector<4x1x128xbf16>
    %67 = vector.extract_strided_slice %62 {offsets = [0, 0, 2], sizes = [4, 8, 16], strides = [1, 1, 1]} : vector<4x10x18xbf16> to vector<4x8x16xbf16>
    %68 = vector.shape_cast %67 : vector<4x8x16xbf16> to vector<4x1x128xbf16>
    %69 = vector.extract_strided_slice %62 {offsets = [0, 1, 0], sizes = [4, 8, 16], strides = [1, 1, 1]} : vector<4x10x18xbf16> to vector<4x8x16xbf16>
    %70 = vector.shape_cast %69 : vector<4x8x16xbf16> to vector<4x1x128xbf16>
    %71 = vector.extract_strided_slice %62 {offsets = [0, 1, 1], sizes = [4, 8, 16], strides = [1, 1, 1]} : vector<4x10x18xbf16> to vector<4x8x16xbf16>
    %72 = vector.shape_cast %71 : vector<4x8x16xbf16> to vector<4x1x128xbf16>
    %73 = vector.extract_strided_slice %62 {offsets = [0, 1, 2], sizes = [4, 8, 16], strides = [1, 1, 1]} : vector<4x10x18xbf16> to vector<4x8x16xbf16>
    %74 = vector.shape_cast %73 : vector<4x8x16xbf16> to vector<4x1x128xbf16>
    %75 = vector.extract_strided_slice %62 {offsets = [0, 2, 0], sizes = [4, 8, 16], strides = [1, 1, 1]} : vector<4x10x18xbf16> to vector<4x8x16xbf16>
    %76 = vector.shape_cast %75 : vector<4x8x16xbf16> to vector<4x1x128xbf16>
    %77 = vector.extract_strided_slice %62 {offsets = [0, 2, 1], sizes = [4, 8, 16], strides = [1, 1, 1]} : vector<4x10x18xbf16> to vector<4x8x16xbf16>
    %78 = vector.shape_cast %77 : vector<4x8x16xbf16> to vector<4x1x128xbf16>
    %79 = vector.extract_strided_slice %62 {offsets = [0, 2, 2], sizes = [4, 8, 16], strides = [1, 1, 1]} : vector<4x10x18xbf16> to vector<4x8x16xbf16>
    %80 = vector.shape_cast %79 : vector<4x8x16xbf16> to vector<4x1x128xbf16>
    %81 = tpu.concatenate %64, %66, %68, %70, %72, %74, %76, %78, %80 in 1 : vector<4x1x128xbf16>, vector<4x1x128xbf16>, vector<4x1x128xbf16>, vector<4x1x128xbf16>, vector<4x1x128xbf16>, vector<4x1x128xbf16>, vector<4x1x128xbf16>, vector<4x1x128xbf16>, vector<4x1x128xbf16> -> vector<4x9x128xbf16>
    %82 = vector.shape_cast %81 : vector<4x9x128xbf16> to vector<36x128xbf16>
    %c0_13 = arith.constant 0 : index
    %c0_14 = arith.constant 0 : index
    %83 = vector.load %arg5[%c0_13, %c0_14] : memref<8x36xbf16, #tpu.memory_space<vmem>>, vector<8x36xbf16>
    %cst_15 = arith.constant dense<0.000000e+00> : vector<8x128xf32>
    %84 = tpu.matmul %83, %82, %cst_15 {dimension_numbers = #tpu.dot_dimension_numbers<[1], [0], [0], [1], [0, 0, 1, 1], [], []>} : vector<8x36xbf16>, vector<36x128xbf16>, vector<8x128xf32> -> vector<8x128xf32>
    %c0_16 = arith.constant 0 : index
    %c0_17 = arith.constant 0 : index
    %85 = vector.load %arg6[%c0_16, %c0_17] : memref<8x2xf32, #tpu.memory_space<vmem>>, vector<8x1xf32>
    %86 = vector.broadcast %85 : vector<8x1xf32> to vector<8x128xf32>
    %87 = arith.mulf %84, %86 : vector<8x128xf32>
    %c0_18 = arith.constant 0 : index
    %c1_19 = arith.constant 1 : index
    %88 = vector.load %arg6[%c0_18, %c1_19] : memref<8x2xf32, #tpu.memory_space<vmem>>, vector<8x1xf32>
    %89 = vector.broadcast %88 : vector<8x1xf32> to vector<8x128xf32>
    %90 = arith.addf %87, %89 : vector<8x128xf32>
    %cst_20 = arith.constant 0.000000e+00 : f32
    %91 = vector.broadcast %cst_20 : f32 to vector<8x128xf32>
    %92 = arith.maximumf %90, %91 : vector<8x128xf32>
    %93 = arith.truncf %92 : vector<8x128xf32> to vector<8x128xbf16>
    %c0_21 = arith.constant 0 : index
    %c0_22 = arith.constant 0 : index
    %c0_23 = arith.constant 0 : index
    %94 = vector.load %arg7[%c0_21, %c0_22, %c0_23] : memref<1x8x128xbf16, #tpu.memory_space<vmem>>, vector<1x8x128xbf16>
    %95 = vector.shape_cast %94 : vector<1x8x128xbf16> to vector<8x128xbf16>
    %96 = vector.shape_cast %93 : vector<8x128xbf16> to vector<1x8x128xbf16>
    tpu.vector_store %arg7[%c0_21, %c0_22, %c0_23], %96 {strides = array<i32>} : memref<1x8x128xbf16, #tpu.memory_space<vmem>>, vector<1x8x128xbf16>,
    return
  }
  func.func @transform_0(%arg0: i32, %arg1: i32) -> (i32, i32, i32, i32) {
    %c0_i32 = arith.constant 0 : i32
    %c0_i32_0 = arith.constant 0 : i32
    %c0_i32_1 = arith.constant 0 : i32
    %c0_i32_2 = arith.constant 0 : i32
    return %arg0, %c0_i32, %c0_i32_0, %c0_i32_1 : i32, i32, i32, i32
  }
  func.func @transform_1(%arg0: i32, %arg1: i32) -> (i32, i32) {
    %c0_i32 = arith.constant 0 : i32
    %c0_i32_0 = arith.constant 0 : i32
    %c0_i32_1 = arith.constant 0 : i32
    return %c0_i32, %c0_i32_0 : i32, i32
  }
  func.func @transform_2(%arg0: i32, %arg1: i32) -> (i32, i32) {
    %c0_i32 = arith.constant 0 : i32
    %c0_i32_0 = arith.constant 0 : i32
    %c0_i32_1 = arith.constant 0 : i32
    return %c0_i32, %c0_i32_0 : i32, i32
  }
  func.func @transform_3(%arg0: i32, %arg1: i32) -> (i32, i32) {
    %c0_i32 = arith.constant 0 : i32
    %c0_i32_0 = arith.constant 0 : i32
    %c0_i32_1 = arith.constant 0 : i32
    return %c0_i32, %c0_i32_0 : i32, i32
  }
  func.func @transform_4(%arg0: i32, %arg1: i32) -> (i32, i32) {
    %c0_i32 = arith.constant 0 : i32
    %c0_i32_0 = arith.constant 0 : i32
    %c0_i32_1 = arith.constant 0 : i32
    return %c0_i32, %c0_i32_0 : i32, i32
  }
  func.func @transform_5(%arg0: i32, %arg1: i32) -> (i32, i32, i32) {
    %c0_i32 = arith.constant 0 : i32
    %c0_i32_0 = arith.constant 0 : i32
    return %arg0, %c0_i32, %arg1 : i32, i32, i32
  }
}

</mosaic_0001>

<bundles_post_ra>
// kernel: tpu_custom_call.1
= control target key start
LH: loop header
LB: loop body
LE: loop exit
PB: predicated region body
PF: predicated region fallthrough
CT: control target
= control target key end

     0   :  { %10 = vsyncpa [#allocation4], 0  ;;  %s14257_s0 = inlined_call_operand.hbm [shape: f32[2,4,16,16], index: 0, kind: input, shape index: {}]   ;;  %s14258_s1 = inlined_call_operand.vmem [shape: bf16[4,36], index: 1, kind: input, shape index: {}]   ;;  %s14259_s2 = inlined_call_operand.vmem [shape: f32[4,2], index: 2, kind: input, shape index: {}]   ;;  %s14260_s3 = inlined_call_operand.vmem [shape: bf16[8,36], index: 3, kind: input, shape index: {}]   ;;  %s14261_s4 = inlined_call_operand.vmem [shape: f32[8,2], index: 4, kind: input, shape index: {}]   ;;  %s14262_s5 = inlined_call_operand.hbm [shape: bf16[2,8,256], index: 5, kind: output, shape index: {}]  }
   0x1   :  { %12 = vsyncpa [#allocation4 + $0x1], 0 }
   0x2   :  { %13 = vsyncpa [#allocation5], 0 }
   0x3   :  { %15 = vsyncpa [#allocation5 + $0x1], 0  ;;  %s9013_s18 = smov 0   ;;  %s9015_s19 = smov 0  }
   0x4   :  { %s9017_s20 = smov 0   ;;  %s9019_s21 = smov 0  }
   0x5   :  { %s9021_s22 = smov 0   ;;  %s9023_s23 = smov 0  }
   0x6   :  { %s9025_s24 = smov 0   ;;  %s9027_s25 = smov 0  }
   0x7   :  { %s9029_s26 = smov 0   ;;  %s9031_s27 = smov 0  }
   0x8   :  { %s9033_s28 = smov 0  }
   0x9 LB: > { %14382 = sst [smem:[#allocation9_spill]] %s8941_s26  ;;  %s8590_s29 = sadd.s32 4294967295, %s8949_s28   ;;  %s8949_s28 = sphi %s9033_s28, %s21_s28   ;;  %s8945_s27 = sphi %s9031_s27, %s15299_s27   ;;  %s8941_s26 = sphi %s9029_s26, %s15298_s26   ;;  %s8937_s25 = sphi %s9027_s25, %s15297_s25   ;;  %s8933_s24 = sphi %s9025_s24, %s15296_s24   ;;  %s8929_s23 = sphi %s9023_s23, %s15305_s23   ;;  %s8925_s22 = sphi %s9021_s22, %s15304_s22   ;;  %s8921_s21 = sphi %s9019_s21, %s15303_s21   ;;  %s8917_s20 = sphi %s9017_s20, %s15302_s20   ;;  %s8913_s19 = sphi %s9015_s19, %s15301_s19   ;;  %s8909_s18 = sphi %s9013_s18, %s15300_s18  }
   0xa   : > { %14383 = sst [smem:[#allocation10_spill]] %s8945_s27  ;;  %s8591_s30 = sadd.s32 4294967294, %s8949_s28  }
   0xb   : > { %s30_s6 = sadd.s32 1, %s8941_s26  ;;  %s33_s7 = sadd.s32 1, %s8945_s27 }
   0xc   : > { %p31_p0 = scmp.ge.s32.totalorder %s30_s6, 2  ;;  %s40_s8 = sadd.s32 1, %s8929_s23 }
   0xd   : > { %p47_p1 = scmp.ne.s32.totalorder %s8929_s23, %s8925_s22  ;;  %p48_p2 = scmp.eq.s32.totalorder %s8949_s28, 0 }
   0xe   : > { %s15307_s6 = smov (%p31_p0, %s30_s6), 0  ;;  %s15309_s7 = smov (!%p31_p0, %s33_s7), %s8945_s27 }
   0xf   : > { %14384 = sst [smem:[#allocation11_spill]] %s15307_s6  ;;  %p9077_p3 = por %p48_p2, %p47_p1 }
  0x10   : > { %p53_p4 = scmp.ne.s32.totalorder %s8925_s22, %s8921_s21  ;;  %p35_p5 = scmp.ge.s32.totalorder %s15309_s7, 2 }
  0x11   : > { %p54_p6 = scmp.eq.s32.totalorder %s8590_s29, 0  ;;  %s148_s10 = ssub.s32 %s8941_s26, %s15307_s6 }
  0x12   : > { %s152_s11 = sadd.s32 1, %s8917_s20  ;;  %s15311_s7 = smov (%p35_p5, %s15309_s7), 0 }
  0x13   : > { %14386 = sst [smem:[#allocation12_spill]] %s15311_s7  ;;  %p9087_p7 = por %p54_p6, %p53_p4 }
  0x14   : > { %p162_p8 = scmp.ne.s32.totalorder %s8917_s20, %s8913_s19  ;;  %s37_s13 = ssub.s32 %s8945_s27, %s15311_s7 }
  0x15   : > { %p163_p9 = scmp.eq.s32.totalorder %s8590_s29, 3  ;;  %p38_p10 = scmp.eq.s32.totalorder %s37_s13, 0 }
  0x16   : > { %s149_s14 = sor.u32 %s148_s10, %s37_s13  ;;  %p168_p13 = scmp.ne.s32.totalorder %s8913_s19, %s8909_s18 }
  0x17   : > { %p150_p11 = scmp.eq.s32.totalorder %s149_s14, 0  ;;  %p9095_p12 = por %p163_p9, %p162_p8 }
  0x18   : > { %s9100_s16 = scalar_select %p38_p10, %s8929_s23, %s40_s8  }
  0x19   : > { %s9103_s17 = scalar_select %p150_p11, %s8917_s20, %s152_s11  }
  0x1a   : > { %14389 = sst [smem:[#allocation13_spill]] %s9100_s16  ;;  %p169_p0 = scmp.eq.s32.totalorder %s8591_s30, 3 }
  0x1b   : > { %14390 = sst [smem:[#allocation14_spill]] %s9103_s17  ;;  %p8653_p1 = scmp.lt.s32.totalorder %s8949_s28, 4 }
  0x1c   : > { %p9108_p2 = por %p169_p0, %p168_p13  ;;  %s201_s29 = sand.u32 1, %s8929_s23  }
  0x1d   : > { %s8594_s10 = sshll.u32 %s201_s29, 6  ;;  %s8640_s13 = sshll.u32 %s8945_s27, 6 }
  0x1e   : > { %s210_s6 = scalar_lea.hbm %s14257_s0, %s8640_s13  ;;  %s205_s8 = scalar_lea.vmem [#allocation3], %s8594_s10 }
  0x1f   : > { %s213_s26 = sshll.u32 %s205_s8, 4  ;;  %s211_s16 = sshll.u32 %s210_s6, 4  ;;  %s214_s26 = int_to_ptr.vmem [resolvable:$true] %s213_s26  ;;  %s212_s16 = int_to_ptr.hbm [resolvable:$true] %s211_s16 }
  0x20   : > { %p8646_p4 = pnand %p8653_p1, %p9077_p3  ;;  %p8597_p5 = scmp.ge.s32.totalorder %s8949_s28, 1 }
  0x21   : > { %s202_s30 = scalar_lea.sflag [#allocation4], %s201_s29  ;;  %s8951_s11 = smov 128  }
  0x22   : > { %s8952_s17 = smov 8   ;;  %p221_p6 = scmp.lt.s32.totalorder %s8949_s28, 5 }
  0x23   : > { %8648 = dma.hbm_to_vmem [thread:$0]  (!%p8646_p4), %s212_s16, 1024, %s214_s26, %s202_s30, %s8951_s11, %s8951_s11, %s8952_s17  }
  0x24   : > { %p222_p8 = pnand %p8597_p5, %p221_p6 }
  0x26   : > { %225 = sbr.rel (%p222_p8) target bundleno = 3851 (0xf0b), region = 40 }
  0x2b   : > { %s227_s27 = sand.u32 1, %s8925_s22  }
  0x2c   : > { %s8598_s7 = sshll.u32 %s227_s27, 6  ;;  %s228_s13 = scalar_lea.sflag [#allocation4], %s227_s27 }
  0x2d   : > { %s9122_s10 = scalar_lea.vmem [#allocation3], %s8598_s7 }
  0x2e   : > { %8900 = dma.done.wait (%p9087_p7), %s228_s13, 1024  }
  0x2f   : > { %8902 = vsyncadd (%p9087_p7), %s228_s13, 4294966272  ;;  %s256_s6 = sand.u32 1, %s8913_s19   ;;  %p8600_p3 = scmp.ne.s32.totalorder %s8933_s24, 0 }
  0x30   : > { %s9131_s26 = sshll.u32 %s256_s6, 2  ;;  %s8953_s27 = smov (!%p8600_p3), 2  }
  0x31   : > { %s258_s9 = scalar_lea.vmem [#allocation6], %s9131_s26  ;;  %263 = sbr.rel (%p8600_p3) target bundleno = 201 (0xc9), region = 48 }
  0x36   : > { %v279_v0 = vld [vmem:[%s9122_s10 + $0x8] sm:$0xff]  ;;  %v278_v1 = vld [vmem:[%s9122_s10] sm:$0xff]  ;;  %v280_v4 = vld [vmem:[%s9122_s10 + $0x10] sm:$0xff]  ;;  %vm302_vm0 = vcmask 1040384   ;;  %vm303_vm1 = vcmask 1044484   ;;  %vm267_vm3 = vcmask 156672  }
  0x37   : > { %v287_v2 = vpack.c.bf16 %v279_v0, %v279_v0  ;;  %v286_v3 = vpack.c.bf16 %v278_v1, %v278_v1  ;;  %v281_v5 = vld [vmem:[%s9122_s10 + $0x18] sm:$0xff]  ;;  %v288_v9 = vpack.c.bf16 %v280_v4, %v280_v4  ;;  %v282_v11 = vld [vmem:[%s9122_s10 + $0x20] sm:$0xff]  ;;  %vm9142_vm2 = vmor %vm302_vm0, %vm303_vm1  ;;  %v8954_v37 = vmov 0  }
  0x38   : > { %v289_v8 = vpack.c.bf16 %v281_v5, %v281_v5  ;;  %v290_v17 = vpack.c.bf16 %v282_v11, %v282_v11  ;;  %v283_v18 = vld [vmem:[%s9122_s10 + $0x28] sm:$0xff]  ;;  %v284_v23 = vld [vmem:[%s9122_s10 + $0x30] sm:$0xff]  ;;  %v285_v28 = vld [vmem:[%s9122_s10 + $0x38] sm:$0xff]  ;;  %271 = vst.msk [vmem:[#allocation2 + $0x14] sm:$0x3] %vm267_vm3, %v8954_v37  ;;  %vm264_vm4 = vcmask 158720  }
  0x39   : > { %v307_v6 = vrot.slane %v287_v2, 7  ;;  %v305_v7 = vrot.slane %v286_v3, 7  ;;  %v310_v16 = vrot.slane %v288_v9, 7  ;;  %v291_v21 = vpack.c.bf16 %v283_v18, %v283_v18  ;;  %268 = vst.msk [vmem:[#allocation2 + $0x8] sm:$0x3] %vm267_vm3, %v8954_v37 }
  0x3a   : > { %v312_v12 = vrot.slane %v289_v8, 7  ;;  %v315_v22 = vrot.slane %v290_v17, 7  ;;  %v292_v27 = vpack.c.bf16 %v284_v23, %v284_v23  ;;  %v293_v30 = vpack.c.bf16 %v285_v28, %v285_v28  ;;  %274 = vst.msk [vmem:[#allocation2 + $0x20] sm:$0x3] %vm267_vm3, %v8954_v37 }
  0x3b   : > { %v309_v10 = vrot.slane %v307_v6, 4  ;;  %325 = vrot.lane.b32.xlu0 %v305_v7, %s8953_s27  ;;  %v306_v13 = vrot.slane %v305_v7, 4  ;;  %v311_v19 = vrot.slane %v310_v16, 4  ;;  %v317_v26 = vrot.slane %v291_v21, 7  ;;  %277 = vst.msk [vmem:[#allocation2 + $0x2c] sm:$0x3] %vm267_vm3, %v8954_v37 }
  0x3c   : > { %v314_v15 = vrot.slane %v312_v12, 4  ;;  %v316_v25 = vrot.slane %v315_v22, 4  ;;  %v320_v31 = vrot.slane %v292_v27, 7  ;;  %v322_v34 = vrot.slane %v293_v30, 7  ;;  %265 = vst.msk [vmem:[#allocation2] sm:$0xf] %vm264_vm4, %v8954_v37 }
  0x3d   : > { %329 = vrot.lane.b32.xlu1 %v309_v10, %s8953_s27  ;;  %v308_v20 = vsel %vm9142_vm2, %v306_v13, %v307_v6  ;;  %v313_v24 = vsel %vm9142_vm2, %v311_v19, %v312_v12  ;;  %v319_v32 = vrot.slane %v317_v26, 4  ;;  %266 = vst.msk [vmem:[#allocation2 + $0x4] sm:$0xf] %vm264_vm4, %v8954_v37  ;;  %vm365_vm5 = vcmask 139280  }
  0x3e   : > { %335 = vrot.lane.b32.xlu2 %v314_v15, %s8953_s27  ;;  %v318_v29 = vsel %vm9142_vm2, %v316_v25, %v317_v26  ;;  %v321_v33 = vrot.slane %v320_v31, 4  ;;  %v324_v36 = vrot.slane %v322_v34, 4  ;;  %269 = vst.msk [vmem:[#allocation2 + $0xc] sm:$0xf] %vm264_vm4, %v8954_v37  ;;  %vm363_vm6 = vcmask 142352  }
  0x3f   : > { %270 = vst.msk [vmem:[#allocation2 + $0x10] sm:$0xf] %vm264_vm4, %v8954_v37  ;;  %vm361_vm7 = vcmask 142353  }
  0x40   : > { %v323_v35 = vsel %vm9142_vm2, %v321_v33, %v322_v34  ;;  %272 = vst.msk [vmem:[#allocation2 + $0x18] sm:$0xf] %vm264_vm4, %v8954_v37 }
  0x41   : > { %273 = vst.msk [vmem:[#allocation2 + $0x1c] sm:$0xf] %vm264_vm4, %v8954_v37 }
  0x42   : > { %275 = vst.msk [vmem:[#allocation2 + $0x24] sm:$0xf] %vm264_vm4, %v8954_v37 }
  0x43   : > { %327 = vrot.lane.b32.xlu0 %v308_v20, %s8953_s27  ;;  %276 = vst.msk [vmem:[#allocation2 + $0x28] sm:$0xf] %vm264_vm4, %v8954_v37 }
  0x45   : > { %331 = vrot.lane.b32.xlu1 %v310_v16, %s8953_s27 }
  0x46   : > { %333 = vrot.lane.b32.xlu2 %v313_v24, %s8953_s27 }
  0x4b   : > { %337 = vrot.lane.b32.xlu0 %v315_v22, %s8953_s27 }
  0x4d   : > { %339 = vrot.lane.b32.xlu1 %v318_v29, %s8953_s27 }
  0x4e   : > { %341 = vrot.lane.b32.xlu2 %v319_v32, %s8953_s27 }
  0x53   : > { %343 = vrot.lane.b32.xlu0 %v320_v31, %s8953_s27 }
  0x55   : > { %345 = vrot.lane.b32.xlu1 %v323_v35, %s8953_s27 }
  0x56   : > { %347 = vrot.lane.b32.xlu2 %v324_v36, %s8953_s27 }
  0x98   : > { %v336_v38 = vpop.permute.xlu2 %335 }
  0x99   : > { %369 = vst.msk [vmem:[#allocation2 + $0x14] sm:$0x1] %vm365_vm5, %v336_v38 }
  0xa0   : > { %v334_v39 = vpop.permute.xlu2 %333 }
  0xa1   : > { %368 = vst.msk [vmem:[#allocation2 + $0x10] sm:$0xf] %vm363_vm6, %v334_v39 }
  0xa8   : > { %v342_v40 = vpop.permute.xlu2 %341 }
  0xa9   : > { %372 = vst.msk [vmem:[#allocation2 + $0x20] sm:$0x1] %vm365_vm5, %v342_v40 }
  0xad   : > { %v326_v41 = vpop.permute.xlu0 %325 }
  0xae   : > { %362 = vst.msk [vmem:[#allocation2] sm:$0xe] %vm361_vm7, %v326_v41 }
  0xaf   : > { %v330_v42 = vpop.permute.xlu1 %329 }
  0xb0   : > { %366 = vst.msk [vmem:[#allocation2 + $0x8] sm:$0x1] %vm365_vm5, %v330_v42  ;;  %v348_v43 = vpop.permute.xlu2 %347 }
  0xb1   : > { %375 = vst.msk [vmem:[#allocation2 + $0x2c] sm:$0x1] %vm365_vm5, %v348_v43 }
  0xb5   : > { %v328_v44 = vpop.permute.xlu0 %327 }
  0xb6   : > { %364 = vst.msk [vmem:[#allocation2 + $0x4] sm:$0xf] %vm363_vm6, %v328_v44 }
  0xb7   : > { %v332_v45 = vpop.permute.xlu1 %331 }
  0xb8   : > { %367 = vst.msk [vmem:[#allocation2 + $0xc] sm:$0xe] %vm361_vm7, %v332_v45 }
  0xbd   : > { %v338_v46 = vpop.permute.xlu0 %337 }
  0xbe   : > { %370 = vst.msk [vmem:[#allocation2 + $0x18] sm:$0xe] %vm361_vm7, %v338_v46 }
  0xbf   : > { %v340_v47 = vpop.permute.xlu1 %339 }
  0xc0   : > { %371 = vst.msk [vmem:[#allocation2 + $0x1c] sm:$0xf] %vm363_vm6, %v340_v47 }
  0xc5   : > { %v344_v48 = vpop.permute.xlu0 %343 }
  0xc6   : > { %373 = vst.msk [vmem:[#allocation2 + $0x24] sm:$0xe] %vm361_vm7, %v344_v48 }
  0xc7   : > { %v346_v49 = vpop.permute.xlu1 %345 }
  0xc8   : > { %374 = vst.msk [vmem:[#allocation2 + $0x28] sm:$0xf] %vm363_vm6, %v346_v49 }
  0xc9 PF: > { %s8601_s12 = sshll.u32 %s8933_s24, 3  ;;  %v8955_v50 = vmov 1983009808   ;;  %v8956_v52 = vmov 1934713408   ;;  %vm14344_vm8 = vcmask 1047556  }
  0xca   : > { %s377_s16 = sshra.s32 %s8601_s12, 3  ;;  %v390_v51 = vunpack.c.l.s4 %v8955_v50  ;;  %v397_v53 = vunpack.c.l.s4 %v8956_v52  ;;  %s8957_s14 = smov 18   ;;  %vm1573_vm9 = vsmask.f32 3328  ;;  %vm1574_vm10 = vsmask.f32 7440 }
  0xcb   : > { %s8602_s17 = sshll.u32 %s377_s16, 2  ;;  %s8958_s8 = smov 36   ;;  %vm9668_vm11 = vmor %vm1573_vm9, %vm1574_vm10  ;;  %vm688_vm12 = vcmask 146432   ;;  %vm14356_vm13 = vcmask 293888   ;;  %vm710_vm14 = vcmask 441344   ;;  %vm719_vm15 = vcmask 588800  }
  0xcc   : > { %v9178_v54 = vunpack.c.0.s8 %v390_v51  ;;  %v9180_v55 = vunpack.c.0.s8 %v397_v53  ;;  %s9182_s29 = scalar_lea.vmem [#allocation2], %s8602_s17  ;;  %s8959_s30 = smov 54   ;;  %vm728_vm0 = vcmask 736256   ;;  %vm737_vm1 = vcmask 883712  }
  0xcd   : > { %s8960_s11 = smov 72   ;;  %s8961_s7 = smov 90   ;;  %vm14355_vm2 = vcmask 1031168   ;;  %vm14326_vm3 = vcmask 1040384   ;;  %vm4172_vm4 = vsmask.f32 256 }
  0xce   : > { %14394 = vst [vmem:[#allocation15_spill] sm:$0xff] %v9178_v54  ;;  %s8962_s13 = smov 108   ;;  %s8963_s10 = smov 126   ;;  %vm10002_vm5 = vmand %vm14326_vm3, %vm4172_vm4  ;;  %vm14313_vm6 = vcmask 1041408   ;;  %vm4216_vm7 = vsmask.f32 1280 }
  0xcf   : > { %14395 = vst [vmem:[#allocation16_spill] sm:$0xff] %v9180_v55  ;;  %v9185_v56 = vld [vmem:[%s9182_s29 + $0x18] sm:$0xf]  ;;  %v9188_v57 = vld [vmem:[%s9182_s29] sm:$0xf]  ;;  %s8964_s27 = smov 16   ;;  %vm10468_vm10 = vmand %vm14313_vm6, %vm4216_vm7 }
  0xd0   : > { %v9191_v58 = vld [vmem:[%s9182_s29 + $0x24] sm:$0xf]  ;;  %v9195_v59 = vperm.slane %v9185_v56, %v9178_v54  ;;  %v9199_v60 = vperm.slane %v9188_v57, %v9178_v54  ;;  %v9206_v62 = vld [vmem:[%s9182_s29 + $0xc] sm:$0xf]  ;;  %s8965_s16 = smov 34   ;;  %s8966_s17 = smov 127  }
  0xd1   : > { %v9203_v61 = vperm.slane %v9191_v58, %v9178_v54  ;;  %v9210_v63 = vperm.slane %v9206_v62, %v9178_v54  ;;  %vm14345_vm4 = vcmask 1042432   ;;  %vm2805_vm7 = vcmask 1046532  }
  0xd2   : > { %v9214_v0 = vperm.slane %v9195_v59, %v9180_v55  ;;  %v9218_v1 = vperm.slane %v9199_v60, %v9180_v55  ;;  %v393_v42 = vrot.slane %v9199_v60, 4  ;;  %v430_v46 = vrot.slane %v9195_v59, 4 }
  0xd3   : > { %v9222_v2 = vperm.slane %v9203_v61, %v9180_v55  ;;  %v9226_v3 = vperm.slane %v9210_v63, %v9180_v55  ;;  %v412_v45 = vrot.slane %v9210_v63, 4 }
  0xd4   : > { %v506_v4 = vshrl.u32 %v9214_v0, 16  ;;  %v465_v5 = vshrl.u32 %v9218_v1, 16  ;;  %v404_v6 = vrot.slane %v9218_v1, 4  ;;  %v440_v22 = vrot.slane %v9214_v0, 4 }
  0xd5   : > { %v526_v7 = vshrl.u32 %v9222_v2, 16  ;;  %v486_v8 = vshrl.u32 %v9226_v3, 16  ;;  %v422_v9 = vrot.slane %v9226_v3, 4  ;;  %v458_v21 = vrot.slane %v9222_v2, 4 }
  0xd6   : > { %v507_v10 = vpack.i.b16 0, %v506_v4  ;;  %v467_v11 = vpack.i.b16 0, %v465_v5  ;;  %v405_v12 = vsel %vm14344_vm8, 0, %v404_v6  ;;  %v441_v31 = vsel %vm14344_vm8, 0, %v440_v22 }
  0xd7   : > { %v469_v13 = vpack.i.b16 0, %v405_v12  ;;  %v527_v14 = vpack.i.b16 0, %v526_v7  ;;  %v487_v17 = vpack.i.b16 0, %v486_v8  ;;  %v423_v18 = vsel %vm14344_vm8, 0, %v422_v9 }
  0xd8   : > { %v546_v15 = vunpack.c.l.b16 %v507_v10  ;;  %v544_v16 = vunpack.c.l.b16 %v467_v11  ;;  %v489_v20 = vpack.i.b16 0, %v423_v18  ;;  %v470_v28 = vshrl.u32 %v405_v12, 16 }
  0xd9   : > { %v560_v19 = vunpack.c.l.b16 %v469_v13  ;;  %v547_v26 = vunpack.c.l.b16 %v527_v14  ;;  %v545_v27 = vunpack.c.l.b16 %v487_v17  ;;  %v459_v30 = vsel %vm14344_vm8, 0, %v458_v21 }
  0xda   : > { %v550_v23 = vpack.c.b16 %v546_v15, %v546_v15  ;;  %v548_v24 = vpack.c.b16 %v544_v16, %v544_v16  ;;  %v561_v29 = vunpack.c.l.b16 %v489_v20  ;;  %v529_v34 = vpack.i.b16 0, %v459_v30 }
  0xdb   : > { %v564_v25 = vpack.c.b16 %v560_v19, %v560_v19  ;;  %v551_v32 = vpack.c.b16 %v547_v26, %v547_v26  ;;  %v549_v33 = vpack.c.b16 %v545_v27, %v545_v27  ;;  %v509_v35 = vpack.i.b16 0, %v441_v31 }
  0xdc   : > { %556 = vrot.lane.b32.xlu1 %v550_v23, %s8957_s14  ;;  %552 = vrot.lane.b32.xlu0 %v548_v24, %s8957_s14  ;;  %v565_v36 = vpack.c.b16 %v561_v29, %v561_v29  ;;  %v471_v37 = vpack.i.b16 0, %v470_v28  ;;  %v563_v38 = vunpack.c.l.b16 %v529_v34  ;;  %v510_v40 = vshrl.u32 %v441_v31, 16 }
  0xdd   : > { %568 = vrot.lane.b32.xlu2 %v564_v25, %s8958_s8  ;;  %v562_v39 = vunpack.c.l.b16 %v509_v35  ;;  %v490_v41 = vshrl.u32 %v423_v18, 16  ;;  %v530_v44 = vshrl.u32 %v459_v30, 16  ;;  %v413_v53 = vsel %vm14344_vm8, 0, %v412_v45 }
  0xde   : > { %v576_v43 = vunpack.c.l.b16 %v471_v37  ;;  %v567_v47 = vpack.c.b16 %v563_v38, %v563_v38  ;;  %v511_v49 = vpack.i.b16 0, %v510_v40  ;;  %v395_v4 = vsel %vm14344_vm8, 0, %v393_v42 }
  0xdf   : > { %v566_v48 = vpack.c.b16 %v562_v39, %v562_v39  ;;  %v491_v50 = vpack.i.b16 0, %v490_v41  ;;  %v531_v52 = vpack.i.b16 0, %v530_v44  ;;  %v431_v60 = vsel %vm14344_vm8, 0, %v430_v46 }
  0xe0   : > { %v580_v51 = vpack.c.b16 %v576_v43, %v576_v43  ;;  %v578_v5 = vunpack.c.l.b16 %v511_v49  ;;  %v421_v59 = vperm.slane %v413_v53, %v9180_v55  ;;  %v403_v6 = vperm.slane %v395_v4, %v9180_v55 }
  0xe1   : > { %v577_v63 = vunpack.c.l.b16 %v491_v50  ;;  %v579_v7 = vunpack.c.l.b16 %v531_v52  ;;  %v439_v8 = vperm.slane %v431_v60, %v9180_v55  ;;  %v448_v9 = vrot.slane %v9203_v61, 4 }
  0xe2   : > { %v582_v10 = vpack.c.b16 %v578_v5, %v578_v5  ;;  %v493_v12 = vpack.i.b16 0, %v421_v59  ;;  %v473_v13 = vpack.i.b16 0, %v403_v6  ;;  %v474_v19 = vshrl.u32 %v403_v6, 16 }
  0xe3   : > { %v581_v11 = vpack.c.b16 %v577_v63, %v577_v63  ;;  %v583_v14 = vpack.c.b16 %v579_v7, %v579_v7  ;;  %v513_v15 = vpack.i.b16 0, %v439_v8  ;;  %v449_v16 = vsel %vm14344_vm8, 0, %v448_v9 }
  0xe4   : > { %558 = vrot.lane.b32.xlu1 %v551_v32, %s8957_s14  ;;  %554 = vrot.lane.b32.xlu0 %v549_v33, %s8957_s14  ;;  %v593_v17 = vunpack.c.l.b16 %v493_v12  ;;  %v592_v18 = vunpack.c.l.b16 %v473_v13  ;;  %v457_v20 = vperm.slane %v449_v16, %v9180_v55  ;;  %v494_v21 = vshrl.u32 %v421_v59, 16 }
  0xe5   : > { %570 = vrot.lane.b32.xlu2 %v565_v36, %s8958_s8  ;;  %v594_v61 = vunpack.c.l.b16 %v513_v15  ;;  %v475_v24 = vpack.i.b16 0, %v474_v19  ;;  %v406_v28 = vrot.slane %v403_v6, 4  ;;  %v514_v32 = vshrl.u32 %v439_v8, 16  ;;  %v9281_v19 = vld [vmem:[%s9182_s29 + $0x4] sm:$0x3] }
  0xe6   : > { %v597_v22 = vpack.c.b16 %v593_v17, %v593_v17  ;;  %v596_v23 = vpack.c.b16 %v592_v18, %v592_v18  ;;  %v533_v25 = vpack.i.b16 0, %v457_v20  ;;  %v495_v27 = vpack.i.b16 0, %v494_v21 }
  0xe7   : > { %v598_v26 = vpack.c.b16 %v594_v61, %v594_v61  ;;  %v608_v29 = vunpack.c.l.b16 %v475_v24  ;;  %v534_v31 = vshrl.u32 %v457_v20, 16  ;;  %v407_v34 = vsel %vm14344_vm8, 0, %v406_v28 }
  0xe8   : > { %v595_v30 = vunpack.c.l.b16 %v533_v25  ;;  %v609_v33 = vunpack.c.l.b16 %v495_v27  ;;  %v515_v38 = vpack.i.b16 0, %v514_v32  ;;  %v477_v40 = vpack.i.b16 0, %v407_v34 }
  0xe9   : > { %v612_v35 = vpack.c.b16 %v608_v29, %v608_v29  ;;  %v535_v37 = vpack.i.b16 0, %v534_v31  ;;  %v442_v41 = vrot.slane %v439_v8, 4  ;;  %v424_v42 = vrot.slane %v421_v59, 4  ;;  %v9292_v29 = vld [vmem:[%s9182_s29 + $0x28] sm:$0x3] }
  0xea   : > { %v599_v36 = vpack.c.b16 %v595_v30, %v595_v30  ;;  %v613_v39 = vpack.c.b16 %v609_v33, %v609_v33  ;;  %v460_v43 = vrot.slane %v457_v20, 4  ;;  %v610_v45 = vunpack.c.l.b16 %v515_v38  ;;  %v9284_v20 = vld [vmem:[%s9182_s29 + $0x10] sm:$0x3]  ;;  %v9295_v30 = vld [vmem:[%s9182_s29 + $0x1c] sm:$0x3] }
  0xeb   : > { %v611_v44 = vunpack.c.l.b16 %v535_v37  ;;  %v624_v46 = vunpack.c.l.b16 %v477_v40  ;;  %v478_v6 = vshrl.u32 %v407_v34, 16  ;;  %v501_v25 = vpack.i.b16 0, %v9284_v20 }
  0xec   : > { %574 = vrot.lane.b32.xlu1 %v567_v47, %s8958_s8  ;;  %572 = vrot.lane.b32.xlu0 %v566_v48, %s8958_s8  ;;  %v443_v47 = vsel %vm14344_vm8, 0, %v442_v41  ;;  %v425_v48 = vsel %vm14344_vm8, 0, %v424_v42  ;;  %v461_v49 = vsel %vm14344_vm8, 0, %v460_v43  ;;  %v14270_v31 = vshrl.u32 %v9281_v19, 16 }
  0xed   : > { %584 = vrot.lane.b32.xlu2 %v580_v51, %s8959_s30  ;;  %v615_v50 = vpack.c.b16 %v611_v44, %v611_v44  ;;  %v614_v51 = vpack.c.b16 %v610_v45, %v610_v45  ;;  %v517_v52 = vpack.i.b16 0, %v443_v47  ;;  %v497_v53 = vpack.i.b16 0, %v425_v48 }
  0xee   : > { %v628_v4 = vpack.c.b16 %v624_v46, %v624_v46  ;;  %v537_v60 = vpack.i.b16 0, %v461_v49  ;;  %v498_v59 = vshrl.u32 %v425_v48, 16  ;;  %v518_v8 = vshrl.u32 %v443_v47, 16 }
  0xef   : > { %v626_v5 = vunpack.c.l.b16 %v517_v52  ;;  %v625_v63 = vunpack.c.l.b16 %v497_v53  ;;  %v479_v12 = vpack.i.b16 0, %v478_v6  ;;  %v538_v17 = vshrl.u32 %v461_v49, 16 }
  0xf0   : > { %v627_v7 = vunpack.c.l.b16 %v537_v60  ;;  %v657_v28 = vunpack.c.l.b16 %v501_v25  ;;  %v541_v34 = vpack.i.b16 0, %v9292_v29  ;;  %v483_v37 = vpack.i.b16 0, %v14270_v31 }
  0xf1   : > { %v630_v9 = vpack.c.b16 %v626_v5, %v626_v5  ;;  %v640_v16 = vunpack.c.l.b16 %v479_v12  ;;  %v14269_v40 = vshrl.u32 %v9295_v30, 16  ;;  %v14268_v41 = vshrl.u32 %v9284_v20, 16 }
  0xf2   : > { %v631_v13 = vpack.c.b16 %v627_v7, %v627_v7  ;;  %v659_v38 = vunpack.c.l.b16 %v541_v34  ;;  %v672_v42 = vunpack.c.l.b16 %v483_v37  ;;  %v14267_v43 = vshrl.u32 %v9292_v29, 16 }
  0xf3   : > { %v644_v21 = vpack.c.b16 %v640_v16, %v640_v16  ;;  %v523_v46 = vpack.i.b16 0, %v14269_v40  ;;  %v503_v47 = vpack.i.b16 0, %v14268_v41 }
  0xf4   : > { %588 = vrot.lane.b32.xlu1 %v582_v10, %s8959_s30  ;;  %586 = vrot.lane.b32.xlu0 %v581_v11, %s8959_s30  ;;  %v629_v10 = vpack.c.b16 %v625_v63, %v625_v63  ;;  %v499_v11 = vpack.i.b16 0, %v498_v59  ;;  %v663_v44 = vpack.c.b16 %v659_v38, %v659_v38  ;;  %v676_v48 = vpack.c.b16 %v672_v42, %v672_v42 }
  0xf5   : > { %590 = vrot.lane.b32.xlu2 %v583_v14, %s8959_s30  ;;  %v519_v14 = vpack.i.b16 0, %v518_v8  ;;  %v543_v49 = vpack.i.b16 0, %v14267_v43 }
  0xf6   : > { %v641_v15 = vunpack.c.l.b16 %v499_v11 }
  0xf7   : > { %v642_v18 = vunpack.c.l.b16 %v519_v14  ;;  %v675_v52 = vunpack.c.l.b16 %v543_v49 }
  0xf8   : > { %v645_v61 = vpack.c.b16 %v641_v15, %v641_v15 }
  0xf9   : > { %v646_v24 = vpack.c.b16 %v642_v18, %v642_v18  ;;  %v679_v60 = vpack.c.b16 %v675_v52, %v675_v52 }
  0xfc   : > { %602 = vrot.lane.b32.xlu1 %v597_v22, %s8960_s11  ;;  %600 = vrot.lane.b32.xlu0 %v596_v23, %s8960_s11  ;;  %v481_v22 = vpack.i.b16 0, %v9281_v19  ;;  %v539_v23 = vpack.i.b16 0, %v538_v17 }
  0xfd   : > { %604 = vrot.lane.b32.xlu2 %v598_v26, %s8960_s11 }
  0xfe   : > { %v656_v26 = vunpack.c.l.b16 %v481_v22  ;;  %v643_v27 = vunpack.c.l.b16 %v539_v23 }
 0x100   : > { %v660_v32 = vpack.c.b16 %v656_v26, %v656_v26  ;;  %v647_v33 = vpack.c.b16 %v643_v27, %v643_v27 }
 0x104   : > { %616 = vrot.lane.b32.xlu1 %v612_v35, %s8961_s7  ;;  %606 = vrot.lane.b32.xlu0 %v599_v36, %s8960_s11  ;;  %v521_v35 = vpack.i.b16 0, %v9295_v30  ;;  %v661_v36 = vpack.c.b16 %v657_v28, %v657_v28 }
 0x105   : > { %618 = vrot.lane.b32.xlu2 %v613_v39, %s8961_s7 }
 0x106   : > { %v658_v39 = vunpack.c.l.b16 %v521_v35 }
 0x108   : > { %v662_v45 = vpack.c.b16 %v658_v39, %v658_v39 }
 0x10c   : > { %622 = vrot.lane.b32.xlu1 %v615_v50, %s8961_s7  ;;  %620 = vrot.lane.b32.xlu0 %v614_v51, %s8961_s7  ;;  %v674_v50 = vunpack.c.l.b16 %v523_v46  ;;  %v673_v51 = vunpack.c.l.b16 %v503_v47 }
 0x10d   : > { %632 = vrot.lane.b32.xlu2 %v628_v4, %s8962_s13 }
 0x10e   : > { %v678_v53 = vpack.c.b16 %v674_v50, %v674_v50  ;;  %v677_v4 = vpack.c.b16 %v673_v51, %v673_v51 }
 0x114   : > { %636 = vrot.lane.b32.xlu1 %v630_v9, %s8962_s13  ;;  %634 = vrot.lane.b32.xlu0 %v629_v10, %s8962_s13 }
 0x115   : > { %638 = vrot.lane.b32.xlu2 %v631_v13, %s8962_s13 }
 0x11c   : > { %650 = vrot.lane.b32.xlu1 %v645_v61, %s8963_s10  ;;  %648 = vrot.lane.b32.xlu0 %v644_v21, %s8963_s10 }
 0x11d   : > { %652 = vrot.lane.b32.xlu2 %v646_v24, %s8963_s10 }
 0x124   : > { %664 = vrot.lane.b32.xlu1 %v660_v32, %s8964_s27  ;;  %654 = vrot.lane.b32.xlu0 %v647_v33, %s8963_s10 }
 0x125   : > { %666 = vrot.lane.b32.xlu2 %v661_v36, %s8964_s27 }
 0x12c   : > { %670 = vrot.lane.b32.xlu1 %v663_v44, %s8964_s27  ;;  %668 = vrot.lane.b32.xlu0 %v662_v45, %s8964_s27 }
 0x12d   : > { %680 = vrot.lane.b32.xlu2 %v676_v48, %s8965_s16 }
 0x134   : > { %684 = vrot.lane.b32.xlu1 %v678_v53, %s8965_s16  ;;  %682 = vrot.lane.b32.xlu0 %v677_v4, %s8965_s16 }
 0x135   : > { %686 = vrot.lane.b32.xlu2 %v679_v60, %s8965_s16 }
 0x137   : > { %v9320_v5 = vpop.permute.xlu2 %568 }
 0x13c   : > { %791 = vrot.lane.b32.xlu1 %v9281_v19, %s8966_s17  ;;  %789 = vrot.lane.b32.xlu0 %v9188_v57, %s8966_s17 }
 0x13d   : > { %793 = vrot.lane.b32.xlu2 %v9206_v62, %s8966_s17 }
 0x13f   : > { %v9328_v63 = vpop.permute.xlu2 %570 }
 0x144   : > { %797 = vrot.lane.b32.xlu1 %v9185_v56, %s8966_s17  ;;  %795 = vrot.lane.b32.xlu0 %v9284_v20, %s8966_s17 }
 0x145   : > { %799 = vrot.lane.b32.xlu2 %v9295_v30, %s8966_s17 }
 0x147   : > { %v9336_v59 = vpop.permute.xlu2 %584 }
 0x14c   : > { %801 = vrot.lane.b32.xlu0 %v9191_v58, %s8966_s17  ;;  %803 = vrot.lane.b32.xlu1 %v9292_v29, %s8966_s17 }
 0x14e   : > { %v9342_v6 = vpop.permute.xlu1 %556  ;;  %v9344_v7 = vpop.permute.xlu0 %552 }
 0x14f   : > { %v9346_v8 = vpop.permute.xlu2 %590 }
 0x156   : > { %v9348_v9 = vpop.permute.xlu1 %558  ;;  %v9350_v10 = vpop.permute.xlu0 %554 }
 0x157   : > { %v9352_v11 = vpop.permute.xlu2 %604 }
 0x158   : > { %14396 = vst [vmem:[#allocation17_spill] sm:$0xff] %v9352_v11 }
 0x15e   : > { %v9354_v12 = vpop.permute.xlu1 %574  ;;  %v9356_v13 = vpop.permute.xlu0 %572 }
 0x15f   : > { %14397 = vst [vmem:[#allocation18_spill] sm:$0xff] %v9356_v13  ;;  %v9358_v14 = vpop.permute.xlu2 %618 }
 0x166   : > { %v9360_v15 = vpop.permute.xlu1 %588  ;;  %v9362_v16 = vpop.permute.xlu0 %586 }
 0x167   : > { %14398 = vst [vmem:[#allocation19_spill] sm:$0xff] %v9360_v15  ;;  %v9364_v17 = vpop.permute.xlu2 %632 }
 0x16e   : > { %v9366_v18 = vpop.permute.xlu1 %602  ;;  %v9368_v61 = vpop.permute.xlu0 %600 }
 0x16f   : > { %v9370_v21 = vpop.permute.xlu2 %638 }
 0x170   : > { %14399 = vst [vmem:[#allocation20_spill] sm:$0xff] %v9370_v21 }
 0x176   : > { %v9372_v22 = vpop.permute.xlu1 %616  ;;  %v9374_v23 = vpop.permute.xlu0 %606 }
 0x177   : > { %v9376_v24 = vpop.permute.xlu2 %652 }
 0x178   : > { %14400 = vst [vmem:[#allocation21_spill] sm:$0xff] %v9376_v24 }
 0x17e   : > { %v9378_v25 = vpop.permute.xlu1 %622  ;;  %v9380_v26 = vpop.permute.xlu0 %620 }
 0x17f   : > { %14401 = vst [vmem:[#allocation22_spill] sm:$0xff] %v9378_v25  ;;  %v9382_v27 = vpop.permute.xlu2 %666 }
 0x180   : > { %14402 = vst [vmem:[#allocation23_spill] sm:$0xff] %v9380_v26 }
 0x181   : > { %14403 = vst [vmem:[#allocation24_spill] sm:$0xff] %v9382_v27 }
 0x186   : > { %v9384_v28 = vpop.permute.xlu1 %636  ;;  %v9386_v32 = vpop.permute.xlu0 %634 }
 0x187   : > { %14404 = vst [vmem:[#allocation25_spill] sm:$0xff] %v9384_v28  ;;  %v9388_v33 = vpop.permute.xlu2 %680 }
 0x188   : > { %14405 = vst [vmem:[#allocation26_spill] sm:$0xff] %v9386_v32 }
 0x189   : > { %14406 = vst [vmem:[#allocation27_spill] sm:$0xff] %v9388_v33 }
 0x18e   : > { %v9390_v34 = vpop.permute.xlu1 %650  ;;  %v9392_v35 = vpop.permute.xlu0 %648 }
 0x18f   : > { %14407 = vst [vmem:[#allocation28_spill] sm:$0xff] %v9390_v34  ;;  %v9394_v36 = vpop.permute.xlu2 %686 }
 0x190   : > { %14408 = vst [vmem:[#allocation29_spill] sm:$0xff] %v9392_v35 }
 0x191   : > { %14409 = vst [vmem:[#allocation30_spill] sm:$0xff] %v9394_v36 }
 0x196   : > { %v9396_v37 = vpop.permute.xlu1 %664  ;;  %v9398_v38 = vpop.permute.xlu0 %654 }
 0x197   : > { %14410 = vst [vmem:[#allocation31_spill] sm:$0xff] %v9396_v37  ;;  %v794_v39 = vpop.permute.xlu2 %793 }
 0x198   : > { %14411 = vst [vmem:[#allocation32_spill] sm:$0xff] %v9398_v38  ;;  %v828_v42 = vperm.slane %v794_v39, %v9178_v54 }
 0x19a   : > { %v9402_v44 = vperm.slane %v828_v42, %v9180_v55  ;;  %v829_v11 = vrot.slane %v828_v42, 4 }
 0x19c   : > { %v903_v45 = vshrl.u32 %v9402_v44, 16  ;;  %v830_v34 = vsel %vm14344_vm8, 0, %v829_v11 }
 0x19e   : > { %v9405_v46 = vpop.permute.xlu1 %670  ;;  %v9407_v47 = vpop.permute.xlu0 %668  ;;  %v904_v48 = vpack.i.b16 0, %v903_v45 }
 0x19f   : > { %14412 = vst [vmem:[#allocation33_spill] sm:$0xff] %v9405_v46  ;;  %v839_v46 = vrot.slane %v9402_v44, 4 }
 0x1a0   : > { %14413 = vst [vmem:[#allocation34_spill] sm:$0xff] %v9407_v47  ;;  %v962_v49 = vunpack.c.l.b16 %v904_v48 }
 0x1a1   : > { %v840_v27 = vsel %vm14344_vm8, 0, %v839_v46 }
 0x1a2   : > { %v966_v50 = vpack.c.b16 %v962_v49, %v962_v49  ;;  %v906_v37 = vpack.i.b16 0, %v840_v27  ;;  %v907_v42 = vshrl.u32 %v840_v27, 16 }
 0x1a4   : > { %971 = vrot.lane.b32.xlu0 %v966_v50, %s8957_s14  ;;  %v978_v46 = vunpack.c.l.b16 %v906_v37 }
 0x1a6   : > { %v9410_v51 = vpop.permute.xlu1 %684  ;;  %v9412_v52 = vpop.permute.xlu0 %682  ;;  %v982_v15 = vpack.c.b16 %v978_v46, %v978_v46 }
 0x1a7   : > { %14414 = vst [vmem:[#allocation35_spill] sm:$0xff] %v9410_v51 }
 0x1a8   : > { %14415 = vst [vmem:[#allocation36_spill] sm:$0xff] %v9412_v52 }
 0x1ae   : > { %v9414_v53 = vpop.permute.xlu1 %791  ;;  %v790_v4 = vpop.permute.xlu0 %789 }
 0x1af   : > { %v809_v60 = vperm.slane %v790_v4, %v9178_v54 }
 0x1b1   : > { %v9418_v39 = vperm.slane %v809_v60, %v9180_v55 }
 0x1b3   : > { %v883_v43 = vshrl.u32 %v9418_v39, 16  ;;  %v820_v45 = vrot.slane %v9418_v39, 4 }
 0x1b5   : > { %v884_v48 = vpack.i.b16 0, %v883_v43  ;;  %v821_v49 = vsel %vm14344_vm8, 0, %v820_v45 }
 0x1b6   : > { %v798_v50 = vpop.permute.xlu1 %797  ;;  %v9423_v41 = vpop.permute.xlu0 %795  ;;  %v886_v40 = vpack.i.b16 0, %v821_v49 }
 0x1b7   : > { %v847_v31 = vperm.slane %v798_v50, %v9178_v54  ;;  %v961_v52 = vunpack.c.l.b16 %v884_v48 }
 0x1b8   : > { %v977_v51 = vunpack.c.l.b16 %v886_v40 }
 0x1b9   : > { %v9427_v4 = vperm.slane %v847_v31, %v9180_v55  ;;  %v965_v36 = vpack.c.b16 %v961_v52, %v961_v52 }
 0x1ba   : > { %v981_v47 = vpack.c.b16 %v977_v51, %v977_v51 }
 0x1bb   : > { %14416 = vst [vmem:[#allocation37_spill] sm:$0xff] %v9427_v4  ;;  %v923_v33 = vshrl.u32 %v9427_v4, 16  ;;  %969 = vrot.lane.b32.xlu2 %v965_v36, %s8957_s14  ;;  %v858_v50 = vrot.slane %v9427_v4, 4  ;;  %v810_v4 = vrot.slane %v809_v60, 4  ;;  %v908_v60 = vpack.i.b16 0, %v907_v42 }
 0x1bc   : > { %985 = vrot.lane.b32.xlu0 %v981_v47, %s8958_s8 }
 0x1bd   : > { %v924_v43 = vpack.i.b16 0, %v923_v33  ;;  %v859_v33 = vsel %vm14344_vm8, 0, %v858_v50 }
 0x1be   : > { %v802_v45 = vpop.permute.xlu0 %801  ;;  %v927_v26 = vshrl.u32 %v859_v33, 16  ;;  %v926_v13 = vpack.i.b16 0, %v859_v33 }
 0x1bf   : > { %v866_v48 = vperm.slane %v802_v45, %v9178_v54  ;;  %v963_v40 = vunpack.c.l.b16 %v924_v43  ;;  %v887_v43 = vshrl.u32 %v821_v49, 16 }
 0x1c0   : > { %v928_v35 = vpack.i.b16 0, %v927_v26  ;;  %v979_v37 = vunpack.c.l.b16 %v926_v13 }
 0x1c1   : > { %v9437_v52 = vperm.slane %v866_v48, %v9180_v55  ;;  %v967_v51 = vpack.c.b16 %v963_v40, %v963_v40  ;;  %v867_v27 = vrot.slane %v866_v48, 4 }
 0x1c2   : > { %v995_v50 = vunpack.c.l.b16 %v928_v35  ;;  %v983_v26 = vpack.c.b16 %v979_v37, %v979_v37 }
 0x1c3   : > { %14417 = vst [vmem:[#allocation38_spill] sm:$0xff] %v9437_v52  ;;  %973 = vrot.lane.b32.xlu1 %v967_v51, %s8957_s14  ;;  %v943_v36 = vshrl.u32 %v9437_v52, 16  ;;  %v877_v47 = vrot.slane %v9437_v52, 4  ;;  %v888_v51 = vpack.i.b16 0, %v887_v43  ;;  %v868_v46 = vsel %vm14344_vm8, 0, %v867_v27 }
 0x1c4   : > { %v876_v48 = vperm.slane %v868_v46, %v9180_v55 }
 0x1c5   : > { %v944_v24 = vpack.i.b16 0, %v943_v36  ;;  %v878_v45 = vsel %vm14344_vm8, 0, %v877_v47  ;;  %v993_v49 = vunpack.c.l.b16 %v888_v51 }
 0x1c6   : > { %v946_v28 = vpack.i.b16 0, %v878_v45 }
 0x1c7   : > { %v964_v38 = vunpack.c.l.b16 %v944_v24  ;;  %v947_v24 = vshrl.u32 %v878_v45, 16  ;;  %v997_v11 = vpack.c.b16 %v993_v49, %v993_v49 }
 0x1c8   : > { %v980_v21 = vunpack.c.l.b16 %v946_v28  ;;  %v9449_v28 = vperm.slane %v830_v34, %v9180_v55  ;;  %v994_v34 = vunpack.c.l.b16 %v908_v60  ;;  %v950_v60 = vpack.i.b16 0, %v876_v48 }
 0x1c9   : > { %v968_v40 = vpack.c.b16 %v964_v38, %v964_v38  ;;  %v848_v38 = vrot.slane %v847_v31, 4  ;;  %v948_v36 = vpack.i.b16 0, %v947_v24 }
 0x1ca   : > { %v984_v25 = vpack.c.b16 %v980_v21, %v980_v21  ;;  %v811_v21 = vsel %vm14344_vm8, 0, %v810_v4  ;;  %v910_v13 = vpack.i.b16 0, %v9449_v28  ;;  %v998_v45 = vpack.c.b16 %v994_v34, %v994_v34 }
 0x1cb   : > { %975 = vrot.lane.b32.xlu2 %v968_v40, %s8957_s14  ;;  %987 = vrot.lane.b32.xlu1 %v982_v15, %s8958_s8  ;;  %v819_v47 = vperm.slane %v811_v21, %v9180_v55  ;;  %v849_v15 = vsel %vm14344_vm8, 0, %v848_v38  ;;  %v996_v35 = vunpack.c.l.b16 %v948_v36  ;;  %v911_v38 = vshrl.u32 %v9449_v28, 16 }
 0x1cc   : > { %991 = vrot.lane.b32.xlu0 %v984_v25, %s8958_s8  ;;  %v999_v25 = vpack.c.b16 %v995_v50, %v995_v50  ;;  %v857_v31 = vperm.slane %v849_v15, %v9180_v55  ;;  %v1010_v4 = vunpack.c.l.b16 %v910_v13  ;;  %v951_v21 = vshrl.u32 %v876_v48, 16 }
 0x1cd   : > { %v891_v33 = vshrl.u32 %v819_v47, 16  ;;  %v1000_v43 = vpack.c.b16 %v996_v35, %v996_v35  ;;  %v890_v40 = vpack.i.b16 0, %v819_v47  ;;  %v912_v36 = vpack.i.b16 0, %v911_v38 }
 0x1ce   : > { %v930_v51 = vpack.i.b16 0, %v857_v31  ;;  %v1014_v37 = vpack.c.b16 %v1010_v4, %v1010_v4  ;;  %v822_v13 = vrot.slane %v819_v47, 4  ;;  %v860_v27 = vrot.slane %v857_v31, 4 }
 0x1cf   : > { %v892_v49 = vpack.i.b16 0, %v891_v33  ;;  %v1009_v42 = vunpack.c.l.b16 %v890_v40  ;;  %v1012_v34 = vunpack.c.l.b16 %v950_v60  ;;  %v1026_v35 = vunpack.c.l.b16 %v912_v36 }
 0x1d0   : > { %v1011_v24 = vunpack.c.l.b16 %v930_v51  ;;  %v931_v4 = vshrl.u32 %v857_v31, 16  ;;  %v823_v46 = vsel %vm14344_vm8, 0, %v822_v13 }
 0x1d1   : > { %v1025_v50 = vunpack.c.l.b16 %v892_v49  ;;  %v1016_v40 = vpack.c.b16 %v1012_v34, %v1012_v34  ;;  %v1030_v51 = vpack.c.b16 %v1026_v35, %v1026_v35  ;;  %v895_v35 = vshrl.u32 %v823_v46, 16 }
 0x1d2   : > { %v932_v47 = vpack.i.b16 0, %v931_v4 }
 0x1d3   : > { %989 = vrot.lane.b32.xlu2 %v983_v26, %s8958_s8  ;;  %1001 = vrot.lane.b32.xlu1 %v997_v11, %s8959_s30  ;;  %v1013_v26 = vpack.c.b16 %v1009_v42, %v1009_v42  ;;  %v1015_v11 = vpack.c.b16 %v1011_v24, %v1011_v24  ;;  %v1029_v15 = vpack.c.b16 %v1025_v50, %v1025_v50  ;;  %v879_v24 = vrot.slane %v876_v48, 4 }
 0x1d4   : > { %1005 = vrot.lane.b32.xlu0 %v999_v25, %s8959_s30  ;;  %v952_v25 = vpack.i.b16 0, %v951_v21  ;;  %v1027_v38 = vunpack.c.l.b16 %v932_v47  ;;  %v898_v47 = vpack.i.b16 0, %v9414_v53 }
 0x1d6   : > { %v1028_v33 = vunpack.c.l.b16 %v952_v25 }
 0x1d8   : > { %v1032_v49 = vpack.c.b16 %v1028_v33, %v1028_v33 }
 0x1db   : > { %1003 = vrot.lane.b32.xlu2 %v998_v45, %s8959_s30  ;;  %1007 = vrot.lane.b32.xlu1 %v1000_v43, %s8959_s30  ;;  %v861_v45 = vsel %vm14344_vm8, 0, %v860_v27  ;;  %v841_v43 = vrot.slane %v9449_v28, 4  ;;  %v880_v28 = vsel %vm14344_vm8, 0, %v879_v24  ;;  %v804_v24 = vpop.permute.xlu1 %803 }
 0x1dc   : > { %1019 = vrot.lane.b32.xlu0 %v1014_v37, %s8960_s11  ;;  %v894_v37 = vpack.i.b16 0, %v823_v46  ;;  %v934_v42 = vpack.i.b16 0, %v861_v45  ;;  %v954_v36 = vpack.i.b16 0, %v880_v28  ;;  %v935_v34 = vshrl.u32 %v861_v45, 16 }
 0x1dd   : > { %v842_v31 = vsel %vm14344_vm8, 0, %v841_v43  ;;  %v1073_v45 = vunpack.c.l.b16 %v898_v47  ;;  %v958_v46 = vpack.i.b16 0, %v804_v24  ;;  %v959_v47 = vshrl.u32 %v804_v24, 16 }
 0x1de   : > { %v1041_v50 = vunpack.c.l.b16 %v894_v37  ;;  %v1043_v21 = vunpack.c.l.b16 %v934_v42  ;;  %v1044_v13 = vunpack.c.l.b16 %v954_v36 }
 0x1df   : > { %v1076_v36 = vunpack.c.l.b16 %v958_v46 }
 0x1e0   : > { %v1045_v60 = vpack.c.b16 %v1041_v50, %v1041_v50  ;;  %v1047_v25 = vpack.c.b16 %v1043_v21, %v1043_v21  ;;  %v1048_v33 = vpack.c.b16 %v1044_v13, %v1044_v13 }
 0x1e3   : > { %1017 = vrot.lane.b32.xlu2 %v1013_v26, %s8960_s11  ;;  %1021 = vrot.lane.b32.xlu1 %v1015_v11, %s8960_s11  ;;  %v915_v26 = vshrl.u32 %v842_v31, 16  ;;  %v1031_v11 = vpack.c.b16 %v1027_v38, %v1027_v38  ;;  %v918_v38 = vpack.i.b16 0, %v9423_v41 }
 0x1e4   : > { %1033 = vrot.lane.b32.xlu0 %v1029_v15, %s8961_s7  ;;  %v914_v15 = vpack.i.b16 0, %v842_v31  ;;  %v955_v31 = vshrl.u32 %v880_v28, 16 }
 0x1e5   : > { %v916_v48 = vpack.i.b16 0, %v915_v26  ;;  %v1074_v28 = vunpack.c.l.b16 %v918_v38 }
 0x1e6   : > { %v1042_v27 = vunpack.c.l.b16 %v914_v15  ;;  %v956_v26 = vpack.i.b16 0, %v955_v31  ;;  %v960_v31 = vpack.i.b16 0, %v959_v47 }
 0x1e7   : > { %v1058_v4 = vunpack.c.l.b16 %v916_v48 }
 0x1e8   : > { %v1046_v43 = vpack.c.b16 %v1042_v27, %v1042_v27  ;;  %v1060_v48 = vunpack.c.l.b16 %v956_v26  ;;  %v1092_v46 = vunpack.c.l.b16 %v960_v31 }
 0x1e9   : > { %v1062_v37 = vpack.c.b16 %v1058_v4, %v1058_v4  ;;  %v1078_v4 = vpack.c.b16 %v1074_v28, %v1074_v28 }
 0x1eb   : > { %1023 = vrot.lane.b32.xlu2 %v1016_v40, %s8960_s11  ;;  %1035 = vrot.lane.b32.xlu1 %v1030_v51, %s8961_s7  ;;  %v936_v40 = vpack.i.b16 0, %v935_v34  ;;  %v896_v51 = vpack.i.b16 0, %v895_v35  ;;  %v1080_v34 = vpack.c.b16 %v1076_v36, %v1076_v36 }
 0x1ec   : > { %1039 = vrot.lane.b32.xlu0 %v1032_v49, %s8961_s7 }
 0x1ed   : > { %v1059_v49 = vunpack.c.l.b16 %v936_v40  ;;  %v1057_v42 = vunpack.c.l.b16 %v896_v51  ;;  %v919_v51 = vshrl.u32 %v9423_v41, 16 }
 0x1ef   : > { %v1063_v50 = vpack.c.b16 %v1059_v49, %v1059_v49  ;;  %v1061_v21 = vpack.c.b16 %v1057_v42, %v1057_v42  ;;  %v920_v42 = vpack.i.b16 0, %v919_v51 }
 0x1f1   : > { %v1090_v38 = vunpack.c.l.b16 %v920_v42 }
 0x1f3   : > { %1037 = vrot.lane.b32.xlu2 %v1031_v11, %s8961_s7  ;;  %1049 = vrot.lane.b32.xlu1 %v1045_v60, %s8962_s13  ;;  %v800_v11 = vpop.permute.xlu2 %799  ;;  %v1077_v60 = vpack.c.b16 %v1073_v45, %v1073_v45 }
 0x1f4   : > { %1053 = vrot.lane.b32.xlu0 %v1047_v25, %s8962_s13  ;;  %v939_v15 = vshrl.u32 %v800_v11, 16  ;;  %v899_v25 = vshrl.u32 %v9414_v53, 16  ;;  %v938_v13 = vpack.i.b16 0, %v800_v11 }
 0x1f6   : > { %v940_v27 = vpack.i.b16 0, %v939_v15  ;;  %v900_v35 = vpack.i.b16 0, %v899_v25 }
 0x1f8   : > { %v1091_v40 = vunpack.c.l.b16 %v940_v27  ;;  %v1089_v53 = vunpack.c.l.b16 %v900_v35 }
 0x1fa   : > { %v1095_v49 = vpack.c.b16 %v1091_v40, %v1091_v40  ;;  %v1093_v45 = vpack.c.b16 %v1089_v53, %v1089_v53 }
 0x1fb   : > { %1055 = vrot.lane.b32.xlu1 %v1048_v33, %s8962_s13  ;;  %1051 = vrot.lane.b32.xlu2 %v1046_v43, %s8962_s13  ;;  %v1064_v33 = vpack.c.b16 %v1060_v48, %v1060_v48  ;;  %v1075_v43 = vunpack.c.l.b16 %v938_v13 }
 0x1fc   : > { %1067 = vrot.lane.b32.xlu0 %v1062_v37, %s8963_s10 }
 0x1fd   : > { %v1079_v37 = vpack.c.b16 %v1075_v43, %v1075_v43 }
 0x203   : > { %1069 = vrot.lane.b32.xlu1 %v1063_v50, %s8963_s10  ;;  %1065 = vrot.lane.b32.xlu2 %v1061_v21, %s8963_s10  ;;  %v1096_v50 = vpack.c.b16 %v1092_v46, %v1092_v46  ;;  %v1094_v21 = vpack.c.b16 %v1090_v38, %v1090_v38 }
 0x204   : > { %1081 = vrot.lane.b32.xlu0 %v1077_v60, %s8964_s27 }
 0x20b   : > { %1083 = vrot.lane.b32.xlu1 %v1078_v4, %s8964_s27  ;;  %1071 = vrot.lane.b32.xlu2 %v1064_v33, %s8963_s10 }
 0x20c   : > { %1087 = vrot.lane.b32.xlu0 %v1080_v34, %s8964_s27 }
 0x213   : > { %1097 = vrot.lane.b32.xlu1 %v1093_v45, %s8965_s16  ;;  %1085 = vrot.lane.b32.xlu2 %v1079_v37, %s8964_s27 }
 0x214   : > { %1101 = vrot.lane.b32.xlu0 %v1095_v49, %s8965_s16 }
 0x215   : > { %v9499_v41 = vpop.permute.xlu2 %969 }
 0x21b   : > { %1103 = vrot.lane.b32.xlu1 %v1096_v50, %s8965_s16  ;;  %1099 = vrot.lane.b32.xlu2 %v1094_v21, %s8965_s16 }
 0x21c   : > { %1183 = vrot.lane.b32.xlu0 %v9281_v19, %s8963_s10 }
 0x223   : > { %1185 = vrot.lane.b32.xlu1 %v9206_v62, %s8963_s10  ;;  %1181 = vrot.lane.b32.xlu2 %v9188_v57, %s8963_s10  ;;  %v9517_v62 = vpop.permute.xlu0 %971 }
 0x224   : > { %1189 = vrot.lane.b32.xlu0 %v9185_v56, %s8963_s10 }
 0x225   : > { %v9507_v24 = vpop.permute.xlu2 %975 }
 0x226   : > { %14418 = vst [vmem:[#allocation39_spill] sm:$0xff] %v9507_v24 }
 0x22b   : > { %1187 = vrot.lane.b32.xlu2 %v9284_v20, %s8963_s10  ;;  %1191 = vrot.lane.b32.xlu1 %v9295_v30, %s8963_s10 }
 0x22c   : > { %1195 = vrot.lane.b32.xlu0 %v9292_v29, %s8963_s10 }
 0x22d   : > { %v9515_v26 = vpop.permute.xlu2 %989 }
 0x22e   : > { %14419 = vst [vmem:[#allocation40_spill] sm:$0xff] %v9515_v26  ;;  %v9525_v11 = vpop.permute.xlu0 %985 }
 0x22f   : > { %14421 = vst [vmem:[#allocation42_spill] sm:$0xff] %v9525_v11 }
 0x233   : > { %1193 = vrot.lane.b32.xlu2 %v9191_v58, %s8963_s10 }
 0x235   : > { %v9521_v57 = vpop.permute.xlu1 %973  ;;  %v9523_v56 = vpop.permute.xlu2 %1003 }
 0x236   : > { %14420 = vst [vmem:[#allocation41_spill] sm:$0xff] %v9521_v57 }
 0x23d   : > { %v9527_v60 = vpop.permute.xlu1 %987  ;;  %v9529_v36 = vpop.permute.xlu2 %1017 }
 0x23e   : > { %14422 = vst [vmem:[#allocation43_spill] sm:$0xff] %v9529_v36  ;;  %v9531_v15 = vpop.permute.xlu0 %991 }
 0x23f   : > { %14423 = vst [vmem:[#allocation44_spill] sm:$0xff] %v9531_v15 }
 0x245   : > { %v9533_v25 = vpop.permute.xlu1 %1001  ;;  %v9535_v28 = vpop.permute.xlu2 %1023 }
 0x246   : > { %14424 = vst [vmem:[#allocation45_spill] sm:$0xff] %v9533_v25  ;;  %v9537_v48 = vpop.permute.xlu0 %1005 }
 0x247   : > { %14425 = vst [vmem:[#allocation46_spill] sm:$0xff] %v9535_v28 }
 0x248   : > { %14426 = vst [vmem:[#allocation47_spill] sm:$0xff] %v9537_v48 }
 0x24d   : > { %v9539_v13 = vpop.permute.xlu1 %1007  ;;  %v9541_v58 = vpop.permute.xlu2 %1037 }
 0x24e   : > { %14427 = vst [vmem:[#allocation48_spill] sm:$0xff] %v9539_v13  ;;  %v9543_v27 = vpop.permute.xlu0 %1019 }
 0x24f   : > { %14428 = vst [vmem:[#allocation49_spill] sm:$0xff] %v9541_v58 }
 0x250   : > { %14429 = vst [vmem:[#allocation50_spill] sm:$0xff] %v9543_v27 }
 0x255   : > { %v9545_v34 = vpop.permute.xlu1 %1021  ;;  %v9547_v35 = vpop.permute.xlu2 %1051 }
 0x256   : > { %14430 = vst [vmem:[#allocation51_spill] sm:$0xff] %v9545_v34  ;;  %v9549_v4 = vpop.permute.xlu0 %1033 }
 0x257   : > { %14431 = vst [vmem:[#allocation52_spill] sm:$0xff] %v9547_v35 }
 0x258   : > { %14432 = vst [vmem:[#allocation53_spill] sm:$0xff] %v9549_v4 }
 0x25d   : > { %v9551_v33 = vpop.permute.xlu1 %1035  ;;  %v9553_v43 = vpop.permute.xlu2 %1065 }
 0x25e   : > { %14433 = vst [vmem:[#allocation54_spill] sm:$0xff] %v9551_v33  ;;  %v9555_v40 = vpop.permute.xlu0 %1039 }
 0x25f   : > { %14434 = vst [vmem:[#allocation55_spill] sm:$0xff] %v9553_v43 }
 0x260   : > { %14435 = vst [vmem:[#allocation56_spill] sm:$0xff] %v9555_v40 }
 0x265   : > { %v9557_v51 = vpop.permute.xlu1 %1049  ;;  %v9559_v47 = vpop.permute.xlu2 %1071 }
 0x266   : > { %14436 = vst [vmem:[#allocation57_spill] sm:$0xff] %v9557_v51  ;;  %v9561_v53 = vpop.permute.xlu0 %1053 }
 0x267   : > { %14437 = vst [vmem:[#allocation58_spill] sm:$0xff] %v9559_v47 }
 0x268   : > { %14438 = vst [vmem:[#allocation59_spill] sm:$0xff] %v9561_v53 }
 0x26d   : > { %v9563_v37 = vpop.permute.xlu1 %1055  ;;  %v9565_v49 = vpop.permute.xlu2 %1085 }
 0x26e   : > { %14439 = vst [vmem:[#allocation60_spill] sm:$0xff] %v9563_v37  ;;  %v9567_v42 = vpop.permute.xlu0 %1067 }
 0x26f   : > { %14440 = vst [vmem:[#allocation61_spill] sm:$0xff] %v9565_v49 }
 0x270   : > { %14441 = vst [vmem:[#allocation62_spill] sm:$0xff] %v9567_v42 }
 0x275   : > { %v9569_v31 = vpop.permute.xlu1 %1069  ;;  %v9571_v45 = vpop.permute.xlu2 %1099 }
 0x276   : > { %14442 = vst [vmem:[#allocation63_spill] sm:$0xff] %v9569_v31  ;;  %v9573_v46 = vpop.permute.xlu0 %1081 }
 0x277   : > { %14443 = vst [vmem:[#allocation64_spill] sm:$0xff] %v9571_v45 }
 0x278   : > { %14444 = vst [vmem:[#allocation65_spill] sm:$0xff] %v9573_v46 }
 0x27d   : > { %v9575_v38 = vpop.permute.xlu1 %1083  ;;  %v1182_v50 = vpop.permute.xlu2 %1181 }
 0x27e   : > { %14445 = vst [vmem:[#allocation66_spill] sm:$0xff] %v9575_v38  ;;  %v1201_v21 = vperm.slane %v1182_v50, %v9178_v54  ;;  %v9578_v58 = vpop.permute.xlu0 %1087 }
 0x27f   : > { %14446 = vst [vmem:[#allocation67_spill] sm:$0xff] %v9578_v58 }
 0x280   : > { %v9581_v53 = vperm.slane %v1201_v21, %v9180_v55 }
 0x282   : > { %14447 = vst [vmem:[#allocation68_spill] sm:$0xff] %v9581_v53  ;;  %v1275_v49 = vshrl.u32 %v9581_v53, 16  ;;  %v1212_v28 = vrot.slane %v9581_v53, 4 }
 0x284   : > { %v1276_v47 = vpack.i.b16 0, %v1275_v49  ;;  %v1213_v13 = vsel %vm14344_vm8, 0, %v1212_v28 }
 0x285   : > { %v9584_v34 = vpop.permute.xlu1 %1097  ;;  %v9586_v31 = vpop.permute.xlu2 %1187  ;;  %v1278_v24 = vpack.i.b16 0, %v1213_v13 }
 0x286   : > { %14448 = vst [vmem:[#allocation69_spill] sm:$0xff] %v9584_v34  ;;  %v9588_v45 = vpop.permute.xlu0 %1101  ;;  %v1353_v46 = vunpack.c.l.b16 %v1276_v47 }
 0x287   : > { %14449 = vst [vmem:[#allocation70_spill] sm:$0xff] %v9588_v45 }
 0x288   : > { %v1357_v48 = vpack.c.b16 %v1353_v46, %v1353_v46 }
 0x28a   : > { %1361 = vrot.lane.b32.xlu1 %v1357_v48, %s8957_s14 }
 0x28d   : > { %v9591_v38 = vpop.permute.xlu1 %1103  ;;  %v1194_v50 = vpop.permute.xlu2 %1193 }
 0x28e   : > { %14450 = vst [vmem:[#allocation71_spill] sm:$0xff] %v9591_v38  ;;  %v1258_v58 = vperm.slane %v1194_v50, %v9178_v54  ;;  %v9594_v37 = vpop.permute.xlu0 %1183 }
 0x290   : > { %v9597_v40 = vperm.slane %v1258_v58, %v9180_v55 }
 0x292   : > { %14451 = vst [vmem:[#allocation72_spill] sm:$0xff] %v9597_v40  ;;  %v1335_v49 = vshrl.u32 %v9597_v40, 16 }
 0x294   : > { %v1336_v34 = vpack.i.b16 0, %v1335_v49 }
 0x295   : > { %v1186_v26 = vpop.permute.xlu1 %1185 }
 0x296   : > { %v9601_v45 = vperm.slane %v1186_v26, %v9178_v54  ;;  %v1190_v47 = vpop.permute.xlu0 %1189  ;;  %v1356_v46 = vunpack.c.l.b16 %v1336_v34 }
 0x297   : > { %v1239_v48 = vperm.slane %v1190_v47, %v9178_v54 }
 0x298   : > { %v9606_v38 = vperm.slane %v9601_v45, %v9180_v55  ;;  %v1360_v50 = vpack.c.b16 %v1356_v46, %v1356_v46 }
 0x299   : > { %v9609_v43 = vperm.slane %v1239_v48, %v9180_v55 }
 0x29a   : > { %1367 = vrot.lane.b32.xlu1 %v1360_v50, %s8957_s14  ;;  %v1295_v49 = vshrl.u32 %v9606_v38, 16  ;;  %v1231_v26 = vrot.slane %v9606_v38, 4  ;;  %v1202_v50 = vrot.slane %v1201_v21, 4 }
 0x29b   : > { %14452 = vst [vmem:[#allocation73_spill] sm:$0xff] %v9609_v43  ;;  %v1315_v34 = vshrl.u32 %v9609_v43, 16  ;;  %v1250_v47 = vrot.slane %v9609_v43, 4 }
 0x29c   : > { %v1296_v57 = vpack.i.b16 0, %v1295_v49  ;;  %v1232_v51 = vsel %vm14344_vm8, 0, %v1231_v26  ;;  %v1269_v49 = vrot.slane %v9597_v40, 4 }
 0x29d   : > { %v1316_v4 = vpack.i.b16 0, %v1315_v34  ;;  %v1251_v46 = vsel %vm14344_vm8, 0, %v1250_v47  ;;  %v1299_v36 = vshrl.u32 %v1232_v51, 16  ;;  %v1298_v15 = vpack.i.b16 0, %v1232_v51 }
 0x29e   : > { %v1354_v53 = vunpack.c.l.b16 %v1296_v57  ;;  %v1318_v42 = vpack.i.b16 0, %v1251_v46  ;;  %v1203_v34 = vsel %vm14344_vm8, 0, %v1202_v50  ;;  %v1369_v57 = vunpack.c.l.b16 %v1278_v24 }
 0x29f   : > { %v1355_v35 = vunpack.c.l.b16 %v1316_v4  ;;  %v1300_v11 = vpack.i.b16 0, %v1299_v36  ;;  %v1370_v28 = vunpack.c.l.b16 %v1298_v15  ;;  %v1270_v51 = vsel %vm14344_vm8, 0, %v1269_v49 }
 0x2a0   : > { %v1358_v32 = vpack.c.b16 %v1354_v53, %v1354_v53  ;;  %v1371_v25 = vunpack.c.l.b16 %v1318_v42  ;;  %v1279_v53 = vshrl.u32 %v1213_v13, 16  ;;  %v9627_v36 = vperm.slane %v1203_v34, %v9180_v55 }
 0x2a1   : > { %v1359_v33 = vpack.c.b16 %v1355_v35, %v1355_v35  ;;  %v1386_v4 = vunpack.c.l.b16 %v1300_v11  ;;  %v1259_v35 = vrot.slane %v1258_v58, 4  ;;  %v1374_v42 = vpack.c.b16 %v1370_v28, %v1370_v28 }
 0x2a2   : > { %1363 = vrot.lane.b32.xlu2 %v1358_v32, %s8957_s14  ;;  %v1375_v26 = vpack.c.b16 %v1371_v25, %v1371_v25  ;;  %v1373_v21 = vpack.c.b16 %v1369_v57, %v1369_v57  ;;  %v1338_v25 = vpack.i.b16 0, %v1270_v51  ;;  %v1280_v47 = vpack.i.b16 0, %v1279_v53 }
 0x2a3   : > { %1365 = vrot.lane.b32.xlu0 %v1359_v33, %s8957_s14  ;;  %v1390_v32 = vpack.c.b16 %v1386_v4, %v1386_v4  ;;  %v1282_v15 = vpack.i.b16 0, %v9627_v36  ;;  %v1260_v33 = vsel %vm14344_vm8, 0, %v1259_v35  ;;  %v1240_v24 = vrot.slane %v1239_v48, 4 }
 0x2a4   : > { %1381 = vrot.lane.b32.xlu1 %v1375_v26, %s8958_s8  ;;  %v1372_v11 = vunpack.c.l.b16 %v1338_v25  ;;  %v1319_v13 = vshrl.u32 %v1251_v46, 16  ;;  %v1221_v58 = vrot.slane %v9601_v45, 4  ;;  %v1385_v50 = vunpack.c.l.b16 %v1280_v47 }
 0x2a5   : > { %v1339_v49 = vshrl.u32 %v1270_v51, 16  ;;  %v1268_v26 = vperm.slane %v1260_v33, %v9180_v55  ;;  %v1401_v34 = vunpack.c.l.b16 %v1282_v15  ;;  %v1241_v28 = vsel %vm14344_vm8, 0, %v1240_v24 }
 0x2a6   : > { %v1376_v57 = vpack.c.b16 %v1372_v11, %v1372_v11  ;;  %v1320_v4 = vpack.i.b16 0, %v1319_v13  ;;  %v1222_v53 = vsel %vm14344_vm8, 0, %v1221_v58  ;;  %v1389_v48 = vpack.c.b16 %v1385_v50, %v1385_v50 }
 0x2a7   : > { %v1340_v35 = vpack.i.b16 0, %v1339_v49  ;;  %v1405_v46 = vpack.c.b16 %v1401_v34, %v1401_v34  ;;  %v1230_v45 = vperm.slane %v1222_v53, %v9180_v55  ;;  %v1283_v34 = vshrl.u32 %v9627_v36, 16 }
 0x2a8   : > { %v1387_v51 = vunpack.c.l.b16 %v1320_v4 }
 0x2a9   : > { %v1302_v33 = vpack.i.b16 0, %v1230_v45  ;;  %v1233_v50 = vrot.slane %v1230_v45, 4 }
 0x2aa   : > { %1377 = vrot.lane.b32.xlu2 %v1373_v21, %s8958_s8  ;;  %v1342_v21 = vpack.i.b16 0, %v1268_v26  ;;  %v1391_v15 = vpack.c.b16 %v1387_v51, %v1387_v51 }
 0x2ab   : > { %1379 = vrot.lane.b32.xlu0 %v1374_v42, %s8958_s8  ;;  %v1249_v42 = vperm.slane %v1241_v28, %v9180_v55  ;;  %v1402_v49 = vunpack.c.l.b16 %v1302_v33  ;;  %v1234_v53 = vsel %vm14344_vm8, 0, %v1233_v50 }
 0x2ac   : > { %1395 = vrot.lane.b32.xlu1 %v1390_v32, %s8959_s30  ;;  %v1388_v32 = vunpack.c.l.b16 %v1340_v35  ;;  %v1404_v25 = vunpack.c.l.b16 %v1342_v21 }
 0x2ad   : > { %v1323_v47 = vshrl.u32 %v1249_v42, 16  ;;  %v1322_v11 = vpack.i.b16 0, %v1249_v42  ;;  %v1406_v35 = vpack.c.b16 %v1402_v49, %v1402_v49 }
 0x2ae   : > { %v1392_v24 = vpack.c.b16 %v1388_v32, %v1388_v32  ;;  %v1408_v13 = vpack.c.b16 %v1404_v25, %v1404_v25  ;;  %v1306_v25 = vpack.i.b16 0, %v1234_v53 }
 0x2af   : > { %v1324_v58 = vpack.i.b16 0, %v1323_v47  ;;  %v1403_v28 = vunpack.c.l.b16 %v1322_v11 }
 0x2b1   : > { %v1419_v4 = vunpack.c.l.b16 %v1324_v58  ;;  %v1407_v21 = vpack.c.b16 %v1403_v28, %v1403_v28 }
 0x2b2   : > { %1383 = vrot.lane.b32.xlu2 %v1376_v57, %s8958_s8  ;;  %v1303_v57 = vshrl.u32 %v1230_v45, 16 }
 0x2b3   : > { %1393 = vrot.lane.b32.xlu0 %v1389_v48, %s8959_s30  ;;  %v1214_v48 = vrot.slane %v9627_v36, 4  ;;  %v1423_v32 = vpack.c.b16 %v1419_v4, %v1419_v4  ;;  %v1271_v36 = vrot.slane %v1268_v26, 4 }
 0x2b4   : > { %1409 = vrot.lane.b32.xlu1 %v1405_v46, %s8960_s11  ;;  %v1284_v46 = vpack.i.b16 0, %v1283_v34  ;;  %v1304_v51 = vpack.i.b16 0, %v1303_v57  ;;  %v1252_v34 = vrot.slane %v1249_v42, 4 }
 0x2b5   : > { %v1215_v47 = vsel %vm14344_vm8, 0, %v1214_v48  ;;  %v1272_v4 = vsel %vm14344_vm8, 0, %v1271_v36  ;;  %v1307_v36 = vshrl.u32 %v1234_v53, 16  ;;  %v14453_v53 = vmov 0 }
 0x2b6   : > { %v1417_v45 = vunpack.c.l.b16 %v1284_v46  ;;  %v1418_v33 = vunpack.c.l.b16 %v1304_v51  ;;  %v1287_v11 = vshrl.u32 %v1215_v47, 16  ;;  %v1286_v49 = vpack.i.b16 0, %v1215_v47 }
 0x2b7   : > { %v1585_v51 = vshll.u32 %v9281_v19, 16  ;;  %v1346_v47 = vpack.i.b16 0, %v1272_v4  ;;  %v14454_v53 = vsel %vm9668_vm11, 4294967295, %v14453_v53 }
 0x2b8   : > { %v1422_v50 = vpack.c.b16 %v1418_v33, %v1418_v33  ;;  %v1288_v57 = vpack.i.b16 0, %v1287_v11  ;;  %14455 = vst [vmem:[#allocation74_spill] sm:$0xff] %v14454_v53 }
 0x2ba   : > { %1397 = vrot.lane.b32.xlu2 %v1391_v15, %s8959_s30  ;;  %v1343_v15 = vshrl.u32 %v1268_v26, 16  ;;  %v1253_v26 = vsel %vm14344_vm8, 0, %v1252_v34  ;;  %v1449_v46 = vunpack.c.l.b16 %v1288_v57  ;;  %v9663_v34 = vrot.slane %v1585_v51, 5  ;;  %v9665_v57 = vpop.permute.xlu1 %1191 }
 0x2bb   : > { %1399 = vrot.lane.b32.xlu0 %v1392_v24, %s8959_s30  ;;  %v1434_v24 = vunpack.c.l.b16 %v1306_v25 }
 0x2bc   : > { %1415 = vrot.lane.b32.xlu1 %v1408_v13, %s8960_s11  ;;  %v1421_v13 = vpack.c.b16 %v1417_v45, %v1417_v45  ;;  %v1344_v58 = vpack.i.b16 0, %v1343_v15  ;;  %v8783_v45 = vld [vmem:[%s9182_s29] sm:$0xf] }
 0x2bd   : > { %v1438_v28 = vpack.c.b16 %v1434_v24, %v1434_v24  ;;  %v1577_v15 = vshrl.u32 %v8783_v45, 16  ;;  %v1580_v33 = vshll.u32 %v8783_v45, 16  ;;  %v1453_v24 = vpack.c.b16 %v1449_v46, %v1449_v46 }
 0x2be   : > { %v1420_v48 = vunpack.c.l.b16 %v1344_v58 }
 0x2bf   : > { %v1582_v58 = vrot.slane %v1580_v33, 5 }
 0x2c0   : > { %v1424_v42 = vpack.c.b16 %v1420_v48, %v1420_v48 }
 0x2c2   : > { %1411 = vrot.lane.b32.xlu2 %v1406_v35, %s8960_s11  ;;  %v1433_v35 = vunpack.c.l.b16 %v1286_v49  ;;  %v1327_v49 = vshrl.u32 %v1253_v26, 16 }
 0x2c3   : > { %1413 = vrot.lane.b32.xlu0 %v1407_v21, %s8960_s11  ;;  %v1347_v21 = vshrl.u32 %v1272_v4, 16 }
 0x2c4   : > { %1429 = vrot.lane.b32.xlu1 %v1423_v32, %s8961_s7  ;;  %v1326_v32 = vpack.i.b16 0, %v1253_v26  ;;  %v1437_v25 = vpack.c.b16 %v1433_v35, %v1433_v35  ;;  %v1308_v35 = vpack.i.b16 0, %v1307_v36  ;;  %v1328_v26 = vpack.i.b16 0, %v1327_v49 }
 0x2c5   : > { %v1348_v11 = vpack.i.b16 0, %v1347_v21  ;;  %v1636_v21 = vshll.u32 %v9292_v29, 16 }
 0x2c6   : > { %v1451_v49 = vunpack.c.l.b16 %v1328_v26 }
 0x2c7   : > { %v1452_v48 = vunpack.c.l.b16 %v1348_v11 }
 0x2c8   : > { %v1455_v40 = vpack.c.b16 %v1451_v49, %v1451_v49 }
 0x2c9   : > { %v1456_v33 = vpack.c.b16 %v1452_v48, %v1452_v48 }
 0x2ca   : > { %1425 = vrot.lane.b32.xlu2 %v1421_v13, %s8961_s7  ;;  %v1579_v13 = vrot.slane %v1577_v15, 4 }
 0x2cb   : > { %1427 = vrot.lane.b32.xlu0 %v1422_v50, %s8961_s7  ;;  %v1435_v50 = vunpack.c.l.b16 %v1326_v32  ;;  %v1330_v32 = vpack.i.b16 0, %v9665_v57 }
 0x2cc   : > { %1443 = vrot.lane.b32.xlu1 %v1438_v28, %s8962_s13  ;;  %v1436_v28 = vunpack.c.l.b16 %v1346_v47  ;;  %v1583_v4 = vor.u32 %v1582_v58, %v1579_v13  ;;  %v8784_v47 = vld [vmem:[%s9182_s29 + $0x24] sm:$0xf]  ;;  %v9682_v13 = vrot.slane %v1636_v21, 5  ;;  %v1311_v21 = vshrl.u32 %v9586_v31, 16 }
 0x2cd   : > { %v1628_v45 = vshrl.u32 %v8784_v47, 16  ;;  %v1631_v15 = vshll.u32 %v8784_v47, 16  ;;  %v1467_v58 = vunpack.c.l.b16 %v1330_v32 }
 0x2ce   : > { %v1584_v46 = vrot.slane %v1583_v4, 4  ;;  %v1440_v51 = vpack.c.b16 %v1436_v28, %v1436_v28  ;;  %v8785_v4 = vld [vmem:[%s9182_s29 + $0xc] sm:$0xf] }
 0x2cf   : > { %v1630_v11 = vrot.slane %v1628_v45, 4  ;;  %v1633_v36 = vrot.slane %v1631_v15, 5  ;;  %v1594_v48 = vshrl.u32 %v8785_v4, 16  ;;  %v1290_v45 = vpack.i.b16 0, %v9594_v37 }
 0x2d1   : > { %v1634_v28 = vor.u32 %v1633_v36, %v1630_v11  ;;  %v8788_v11 = vld [vmem:[%s9182_s29 + $0x18] sm:$0xf]  ;;  %v1465_v49 = vunpack.c.l.b16 %v1290_v45 }
 0x2d2   : > { %1431 = vrot.lane.b32.xlu2 %v1424_v42, %s8961_s7  ;;  %v1439_v42 = vpack.c.b16 %v1435_v50, %v1435_v50  ;;  %v1611_v36 = vshrl.u32 %v8788_v11, 16 }
 0x2d3   : > { %1441 = vrot.lane.b32.xlu0 %v1437_v25, %s8962_s13  ;;  %v9677_v25 = vsel %vm9668_vm11, %v1584_v46, %v9663_v34  ;;  %v1597_v46 = vshll.u32 %v8785_v4, 16  ;;  %v1635_v32 = vrot.slane %v1634_v28, 4  ;;  %v1614_v4 = vshll.u32 %v8788_v11, 16  ;;  %v1196_v11 = vpop.permute.xlu0 %1195 }
 0x2d4   : > { %1457 = vrot.lane.b32.xlu1 %v1453_v24, %s8963_s10  ;;  %14456 = vst [vmem:[#allocation75_spill] sm:$0xff] %v9677_v25  ;;  %v1450_v24 = vunpack.c.l.b16 %v1308_v35  ;;  %v9687_v50 = vperm.slane %v9677_v25, %v9178_v54  ;;  %v8787_v35 = vld [vmem:[%s9182_s29 + $0x10] sm:$0x3]  ;;  %v1471_v25 = vpack.c.b16 %v1467_v58, %v1467_v58  ;;  %v1312_v28 = vpack.i.b16 0, %v1311_v21 }
 0x2d5   : > { %v1602_v47 = vshll.u32 %v8787_v35, 16  ;;  %v1599_v43 = vrot.slane %v1597_v46, 5  ;;  %v9703_v35 = vsel %vm9668_vm11, %v1635_v32, %v9682_v13  ;;  %v1613_v58 = vrot.slane %v1611_v36, 4 }
 0x2d6   : > { %v1454_v15 = vpack.c.b16 %v1450_v24, %v1450_v24  ;;  %v9696_v26 = vperm.slane %v9687_v50, %v9180_v55  ;;  %14458 = vst [vmem:[#allocation77_spill] sm:$0xff] %v9703_v35  ;;  %v1469_v45 = vpack.c.b16 %v1465_v49, %v1465_v49  ;;  %v1351_v49 = vshrl.u32 %v1196_v11, 16 }
 0x2d7   : > { %v9708_v27 = vrot.slane %v1602_v47, 5  ;;  %v1482_v47 = vunpack.c.l.b16 %v1312_v28 }
 0x2d8   : > { %14457 = vst [vmem:[#allocation76_spill] sm:$0xff] %v9696_v26  ;;  %v1722_v32 = vshrl.u32 %v9696_v26, 16 }
 0x2da   : > { %1445 = vrot.lane.b32.xlu2 %v1439_v42, %s8962_s13  ;;  %v8786_v42 = vld [vmem:[%s9182_s29 + $0x1c] sm:$0x3] }
 0x2db   : > { %1447 = vrot.lane.b32.xlu0 %v1440_v51, %s8962_s13  ;;  %v1619_v51 = vshll.u32 %v8786_v42, 16  ;;  %v1310_v42 = vpack.i.b16 0, %v9586_v31 }
 0x2dc   : > { %1463 = vrot.lane.b32.xlu1 %v1456_v33, %s8963_s10  ;;  %v1596_v33 = vrot.slane %v1594_v48, 4  ;;  %v1616_v48 = vrot.slane %v1614_v4, 5 }
 0x2dd   : > { %v9706_v46 = vrot.slane %v1619_v51, 5  ;;  %v1291_v51 = vshrl.u32 %v9594_v37, 16 }
 0x2de   : > { %v1600_v24 = vor.u32 %v1599_v43, %v1596_v33  ;;  %v9715_v43 = vperm.slane %v9703_v35, %v9178_v54  ;;  %v1617_v21 = vor.u32 %v1616_v48, %v1613_v58  ;;  %v1350_v33 = vpack.i.b16 0, %v1196_v11 }
 0x2df   : > { %v1292_v37 = vpack.i.b16 0, %v1291_v51  ;;  %v1486_v48 = vpack.c.b16 %v1482_v47, %v1482_v47  ;;  %v1352_v11 = vpack.i.b16 0, %v1351_v49 }
 0x2e0   : > { %v1601_v31 = vrot.slane %v1600_v24, 4  ;;  %v1618_v36 = vrot.slane %v1617_v21, 4  ;;  %v9725_v4 = vperm.slane %v9715_v43, %v9180_v55  ;;  %v1468_v58 = vunpack.c.l.b16 %v1350_v33 }
 0x2e1   : > { %v1481_v51 = vunpack.c.l.b16 %v1292_v37  ;;  %v1484_v37 = vunpack.c.l.b16 %v1352_v11 }
 0x2e2   : > { %1459 = vrot.lane.b32.xlu2 %v1454_v15, %s8963_s10  ;;  %v1466_v15 = vunpack.c.l.b16 %v1310_v42  ;;  %14460 = vst [vmem:[#allocation79_spill] sm:$0xff] %v9725_v4  ;;  %v9730_v42 = vsel %vm9668_vm11, %v1618_v36, %v9706_v46  ;;  %v1472_v33 = vpack.c.b16 %v1468_v58, %v1468_v58 }
 0x2e3   : > { %1461 = vrot.lane.b32.xlu0 %v1455_v40, %s8963_s10  ;;  %v9721_v40 = vsel %vm9668_vm11, %v1601_v31, %v9708_v27  ;;  %14461 = vst [vmem:[#allocation80_spill] sm:$0xff] %v9730_v42  ;;  %v9734_v28 = vperm.slane %v9730_v42, %v9178_v54 }
 0x2e4   : > { %1477 = vrot.lane.b32.xlu1 %v1471_v25, %s8964_s27  ;;  %14459 = vst [vmem:[#allocation78_spill] sm:$0xff] %v9721_v40  ;;  %v1723_v25 = vpack.i.b16 0, %v1722_v32  ;;  %v1470_v24 = vpack.c.b16 %v1466_v15, %v1466_v15  ;;  %v9739_v31 = vperm.slane %v9721_v40, %v9178_v54  ;;  %v1331_v32 = vshrl.u32 %v9665_v57, 16 }
 0x2e5   : > { %v1782_v15 = vshrl.u32 %v9725_v4, 16  ;;  %v9747_v36 = vperm.slane %v9734_v28, %v9180_v55  ;;  %v1485_v57 = vpack.c.b16 %v1481_v51, %v1481_v51 }
 0x2e6   : > { %v1800_v21 = vunpack.c.l.b16 %v1723_v25  ;;  %v9751_v47 = vperm.slane %v9739_v31, %v9180_v55 }
 0x2e7   : > { %14462 = vst [vmem:[#allocation81_spill] sm:$0xff] %v9747_v36  ;;  %v1783_v53 = vpack.i.b16 0, %v1782_v15  ;;  %v1762_v58 = vshrl.u32 %v9747_v36, 16  ;;  %v1488_v15 = vpack.c.b16 %v1484_v37, %v1484_v37 }
 0x2e8   : > { %14463 = vst [vmem:[#allocation82_spill] sm:$0xff] %v9751_v47  ;;  %v1742_v25 = vshrl.u32 %v9751_v47, 16 }
 0x2e9   : > { %v1803_v42 = vunpack.c.l.b16 %v1783_v53  ;;  %v1763_v51 = vpack.i.b16 0, %v1762_v58 }
 0x2ea   : > { %1473 = vrot.lane.b32.xlu2 %v1469_v45, %s8964_s27  ;;  %v1332_v45 = vpack.i.b16 0, %v1331_v32  ;;  %v1678_v32 = vrot.slane %v9751_v47, 4 }
 0x2eb   : > { %1475 = vrot.lane.b32.xlu0 %v1470_v24, %s8964_s27  ;;  %v1804_v24 = vpack.c.b16 %v1800_v21, %v1800_v21  ;;  %v1743_v21 = vpack.i.b16 0, %v1742_v25  ;;  %v1807_v40 = vpack.c.b16 %v1803_v42, %v1803_v42  ;;  %v1802_v53 = vunpack.c.l.b16 %v1763_v51 }
 0x2ec   : > { %1491 = vrot.lane.b32.xlu1 %v1486_v48, %s8965_s16  ;;  %v1697_v48 = vrot.slane %v9747_v36, 4  ;;  %v1483_v54 = vunpack.c.l.b16 %v1332_v45  ;;  %v1679_v11 = vsel %vm14344_vm8, 0, %v1678_v32 }
 0x2ed   : > { %v1746_v25 = vshrl.u32 %v1679_v11, 16  ;;  %v1806_v58 = vpack.c.b16 %v1802_v53, %v1802_v53  ;;  %v1745_v32 = vpack.i.b16 0, %v1679_v11  ;;  %v1706_v53 = vrot.slane %v9715_v43, 4 }
 0x2ee   : > { %v1698_v49 = vsel %vm14344_vm8, 0, %v1697_v48  ;;  %v1487_v35 = vpack.c.b16 %v1483_v54, %v1483_v54  ;;  %v1649_v54 = vrot.slane %v9687_v50, 4 }
 0x2ef   : > { %v1765_v52 = vpack.i.b16 0, %v1698_v49  ;;  %v1747_v47 = vpack.i.b16 0, %v1746_v25 }
 0x2f1   : > { %v1818_v48 = vunpack.c.l.b16 %v1765_v52  ;;  %v1833_v11 = vunpack.c.l.b16 %v1747_v47 }
 0x2f2   : > { %1479 = vrot.lane.b32.xlu2 %v1472_v33, %s8964_s27  ;;  %v1659_v33 = vrot.slane %v9696_v26, 4 }
 0x2f3   : > { %1489 = vrot.lane.b32.xlu0 %v1485_v57, %s8965_s16  ;;  %v1801_v57 = vunpack.c.l.b16 %v1743_v21  ;;  %v1822_v21 = vpack.c.b16 %v1818_v48, %v1818_v48 }
 0x2f4   : > { %1808 = vrot.lane.b32.xlu1 %v1804_v24, %s8957_s14  ;;  %v1660_v45 = vsel %vm14344_vm8, 0, %v1659_v33 }
 0x2f5   : > { %v1805_v42 = vpack.c.b16 %v1801_v57, %v1801_v57  ;;  %v1725_v37 = vpack.i.b16 0, %v1660_v45  ;;  %v1726_v33 = vshrl.u32 %v1660_v45, 16  ;;  %v1707_v45 = vsel %vm14344_vm8, 0, %v1706_v53 }
 0x2f7   : > { %v1816_v51 = vunpack.c.l.b16 %v1725_v37  ;;  %v1727_v37 = vpack.i.b16 0, %v1726_v33 }
 0x2f9   : > { %v1820_v25 = vpack.c.b16 %v1816_v51, %v1816_v51  ;;  %v1832_v43 = vunpack.c.l.b16 %v1727_v37  ;;  %v1668_v51 = vrot.slane %v9739_v31, 4 }
 0x2fa   : > { %1493 = vrot.lane.b32.xlu2 %v1487_v35, %s8965_s16  ;;  %v1716_v35 = vrot.slane %v9725_v4, 4 }
 0x2fb   : > { %1495 = vrot.lane.b32.xlu0 %v1488_v15, %s8965_s16  ;;  %v1650_v15 = vsel %vm14344_vm8, 0, %v1649_v54 }
 0x2fc   : > { %1814 = vrot.lane.b32.xlu1 %v1807_v40, %s8957_s14  ;;  %v9767_v24 = vpop.permute.xlu2 %1363  ;;  %v1817_v40 = vunpack.c.l.b16 %v1745_v32  ;;  %v1717_v52 = vsel %vm14344_vm8, 0, %v1716_v35  ;;  %v9779_v57 = vperm.slane %v1650_v15, %v9180_v55  ;;  %v9782_v48 = vpop.permute.xlu1 %1361  ;;  %v1687_v35 = vrot.slane %v9734_v28, 4 }
 0x2fd   : > { %v1785_v54 = vpack.i.b16 0, %v1717_v52  ;;  %v1786_v15 = vshrl.u32 %v1717_v52, 16  ;;  %v1669_v52 = vsel %vm14344_vm8, 0, %v1668_v51 }
 0x2fe   : > { %v1729_v32 = vpack.i.b16 0, %v9779_v57  ;;  %v1688_v28 = vsel %vm14344_vm8, 0, %v1687_v35 }
 0x2ff   : > { %v1819_v47 = vunpack.c.l.b16 %v1785_v54  ;;  %v1836_v54 = vpack.c.b16 %v1832_v43, %v1832_v43 }
 0x300   : > { %v1848_v33 = vunpack.c.l.b16 %v1729_v32 }
 0x302   : > { %1810 = vrot.lane.b32.xlu2 %v1805_v42, %s8957_s14  ;;  %v1821_v42 = vpack.c.b16 %v1817_v40, %v1817_v40  ;;  %v1852_v37 = vpack.c.b16 %v1848_v33, %v1848_v33 }
 0x303   : > { %1812 = vrot.lane.b32.xlu0 %v1806_v58, %s8957_s14  ;;  %v1837_v58 = vpack.c.b16 %v1833_v11, %v1833_v11  ;;  %v9794_v11 = vperm.slane %v1707_v45, %v9180_v55  ;;  %v1677_v45 = vperm.slane %v1669_v52, %v9180_v55 }
 0x304   : > { %1828 = vrot.lane.b32.xlu1 %v1822_v21, %s8958_s8  ;;  %v9776_v50 = vpop.permute.xlu2 %1377  ;;  %v1766_v21 = vshrl.u32 %v1698_v49, 16 }
 0x305   : > { %v1789_v31 = vpack.i.b16 0, %v9794_v11  ;;  %v1750_v36 = vshrl.u32 %v1677_v45, 16 }
 0x306   : > { %v1767_v49 = vpack.i.b16 0, %v1766_v21 }
 0x307   : > { %v1851_v21 = vunpack.c.l.b16 %v1789_v31 }
 0x308   : > { %v1834_v32 = vunpack.c.l.b16 %v1767_v49 }
 0x309   : > { %v1855_v52 = vpack.c.b16 %v1851_v21, %v1851_v21 }
 0x30a   : > { %1824 = vrot.lane.b32.xlu2 %v1820_v25, %s8958_s8  ;;  %v1823_v25 = vpack.c.b16 %v1819_v47, %v1819_v47  ;;  %v1838_v33 = vpack.c.b16 %v1834_v32, %v1834_v32 }
 0x30b   : > { %1826 = vrot.lane.b32.xlu0 %v1821_v42, %s8958_s8  ;;  %v1787_v42 = vpack.i.b16 0, %v1786_v15 }
 0x30c   : > { %1842 = vrot.lane.b32.xlu1 %v1837_v58, %s8959_s30  ;;  %v9791_v40 = vpop.permute.xlu2 %1383  ;;  %v9797_v53 = vpop.permute.xlu1 %1367  ;;  %v9802_v58 = vperm.slane %v1688_v28, %v9180_v55  ;;  %v1749_v28 = vpack.i.b16 0, %v1677_v45 }
 0x30d   : > { %14464 = vst [vmem:[#allocation83_spill] sm:$0xff] %v9791_v40  ;;  %v1835_v35 = vunpack.c.l.b16 %v1787_v42 }
 0x30e   : > { %14465 = vst [vmem:[#allocation84_spill] sm:$0xff] %v9797_v53  ;;  %v1770_v43 = vshrl.u32 %v9802_v58, 16  ;;  %v1769_v49 = vpack.i.b16 0, %v9802_v58  ;;  %v1849_v42 = vunpack.c.l.b16 %v1749_v28 }
 0x310   : > { %v1771_v4 = vpack.i.b16 0, %v1770_v43  ;;  %v1850_v31 = vunpack.c.l.b16 %v1769_v49  ;;  %v1661_v43 = vrot.slane %v9779_v57, 4  ;;  %v1853_v28 = vpack.c.b16 %v1849_v42, %v1849_v42 }
 0x312   : > { %1830 = vrot.lane.b32.xlu2 %v1823_v25, %s8958_s8  ;;  %v1839_v25 = vpack.c.b16 %v1835_v35, %v1835_v35  ;;  %v1866_v32 = vunpack.c.l.b16 %v1771_v4  ;;  %v1662_v42 = vsel %vm14344_vm8, 0, %v1661_v43 }
 0x313   : > { %1840 = vrot.lane.b32.xlu0 %v1836_v54, %s8959_s30  ;;  %v1680_v54 = vrot.slane %v1677_v45, 4  ;;  %v14469_v45 = vshrl.u32 %v9281_v19, 16  ;;  %v1790_v19 = vshrl.u32 %v9794_v11, 16 }
 0x314   : > { %1856 = vrot.lane.b32.xlu1 %v1852_v37, %s8960_s11  ;;  %v9808_v47 = vpop.permute.xlu2 %1397  ;;  %v1730_v37 = vshrl.u32 %v9779_v57, 16  ;;  %v1870_v4 = vpack.c.b16 %v1866_v32, %v1866_v32  ;;  %v14472_v57 = vshrl.u32 %v9292_v29, 16  ;;  %v1734_v32 = vshrl.u32 %v1662_v42, 16 }
 0x315   : > { %14466 = vst [vmem:[#allocation85_spill] sm:$0xff] %v9808_v47  ;;  %v9811_v15 = vpop.permute.xlu0 %1365  ;;  %v9825_v21 = vsel %vm14344_vm8, 0, %v1680_v54  ;;  %v1854_v47 = vpack.c.b16 %v1850_v31, %v1850_v31  ;;  %v1590_v49 = vrot.slane %v14469_v45, 4  ;;  %v14471_v54 = vshrl.u32 %v9284_v20, 16 }
 0x316   : > { %14467 = vst [vmem:[#allocation86_spill] sm:$0xff] %v9811_v15  ;;  %v9813_v51 = vpop.permute.xlu1 %1381  ;;  %v1731_v55 = vpack.i.b16 0, %v1730_v37  ;;  %v1753_v15 = vpack.i.b16 0, %v9825_v21  ;;  %v1641_v53 = vrot.slane %v14472_v57, 4 }
 0x317   : > { %14468 = vst [vmem:[#allocation87_spill] sm:$0xff] %v9813_v51  ;;  %v1607_v40 = vrot.slane %v14471_v54, 4  ;;  %v1591_v37 = vor.u32 %v1590_v49, %v9663_v34  ;;  %v485_v34 = vpack.i.b16 0, %v9226_v3 }
 0x318   : > { %v1881_v29 = vunpack.c.l.b16 %v1753_v15  ;;  %v525_v15 = vpack.i.b16 0, %v9222_v2 }
 0x319   : > { %v1608_v43 = vor.u32 %v1607_v40, %v9708_v27  ;;  %v1699_v27 = vrot.slane %v9802_v58, 4  ;;  %v1735_v40 = vpack.i.b16 0, %v1734_v32  ;;  %v694_v2 = vsel %vm688_vm12, %v485_v34, %v9350_v10 }
 0x31a   : > { %1844 = vrot.lane.b32.xlu2 %v1838_v33, %s8959_s30 }
 0x31b   : > { %1846 = vrot.lane.b32.xlu0 %v1839_v25, %s8959_s30  ;;  %v1751_v25 = vpack.i.b16 0, %v1750_v36  ;;  %v1864_v36 = vunpack.c.l.b16 %v1731_v55  ;;  %v464_v55 = vpack.i.b16 0, %v9218_v1  ;;  %v1885_v1 = vpack.c.b16 %v1881_v29, %v1881_v29 }
 0x31c   : > { %1862 = vrot.lane.b32.xlu1 %v1855_v52, %s8960_s11  ;;  %v9820_v26 = vpop.permute.xlu2 %1411  ;;  %v14470_v52 = vshrl.u32 %v9295_v30, 16  ;;  %v9867_v54 = vrot.slane %v1608_v43, 4  ;;  %v902_v29 = vpack.i.b16 0, %v9402_v44 }
 0x31d   : > { %v9822_v35 = vpop.permute.xlu0 %1379  ;;  %v1865_v30 = vunpack.c.l.b16 %v1751_v25  ;;  %v1791_v25 = vpack.i.b16 0, %v1790_v19  ;;  %v691_v3 = vsel %vm688_vm12, %v464_v55, %v9344_v7  ;;  %v1896_v19 = vunpack.c.l.b16 %v1735_v40  ;;  %v14473_v40 = vld [vmem:[#allocation38_spill] sm:$0xff] }
 0x31e   : > { %v9828_v33 = vpop.permute.xlu1 %1395  ;;  %v1624_v51 = vrot.slane %v14470_v52, 4  ;;  %v1733_v52 = vpack.i.b16 0, %v1662_v42  ;;  %v1700_v42 = vsel %vm14344_vm8, 0, %v1699_v27 }
 0x31f   : > { %v1869_v49 = vpack.c.b16 %v1865_v30, %v1865_v30  ;;  %v1867_v58 = vunpack.c.l.b16 %v1791_v25 }
 0x320   : > { %v1625_v31 = vor.u32 %v1624_v51, %v9706_v46  ;;  %v1868_v51 = vpack.c.b16 %v1864_v36, %v1864_v36  ;;  %v1880_v7 = vunpack.c.l.b16 %v1733_v52  ;;  %v703_v36 = vsel %vm14356_vm13, %v691_v3, %v9320_v5 }
 0x321   : > { %v1871_v43 = vpack.c.b16 %v1867_v58, %v1867_v58  ;;  %v712_v55 = vsel %vm710_vm14, %v703_v36, %v9336_v59 }
 0x322   : > { %1858 = vrot.lane.b32.xlu2 %v1853_v28, %s8960_s11  ;;  %v1642_v28 = vor.u32 %v1641_v53, %v9682_v13  ;;  %v9859_v13 = vrot.slane %v1591_v37, 4  ;;  %v505_v53 = vpack.i.b16 0, %v9214_v0  ;;  %v700_v0 = vsel %vm688_vm12, %v525_v15, %v9348_v9 }
 0x323   : > { %1860 = vrot.lane.b32.xlu0 %v1854_v47, %s8960_s11  ;;  %v1718_v47 = vrot.slane %v9794_v11, 4  ;;  %v705_v9 = vsel %vm14356_vm13, %v694_v2, %v9328_v63  ;;  %v709_v5 = vsel %vm14356_vm13, %v700_v0, %v9354_v12  ;;  %v1884_v63 = vpack.c.b16 %v1880_v7, %v1880_v7  ;;  %v14476_v7 = vld [vmem:[#allocation42_spill] sm:$0xff] }
 0x324   : > { %1876 = vrot.lane.b32.xlu1 %v1870_v4, %s8961_s7  ;;  %v9846_v20 = vpop.permute.xlu2 %1425  ;;  %v9865_v4 = vrot.slane %v1625_v31, 4  ;;  %v9872_v57 = vrot.slane %v1642_v28, 4  ;;  %v9885_v37 = vsel %vm688_vm12, %v505_v53, %v9342_v6  ;;  %v1773_v28 = vpack.i.b16 0, %v1700_v42  ;;  %v14474_v53 = vld [vmem:[#allocation50_spill] sm:$0xff] }
 0x325   : > { %v9851_v45 = vpop.permute.xlu0 %1393  ;;  %v1719_v11 = vsel %vm14344_vm8, 0, %v1718_v47  ;;  %v714_v6 = vsel %vm710_vm14, %v705_v9, %v9362_v16  ;;  %v1110_v12 = vsel %vm688_vm12, %v902_v29, %v9517_v62  ;;  %v721_v25 = vsel %vm719_vm15, %v712_v55, %v9368_v61  ;;  %v14480_v55 = vld [vmem:[#allocation37_spill] sm:$0xff] }
 0x326   : > { %v9855_v46 = vpop.permute.xlu1 %1409  ;;  %v1794_v30 = vshrl.u32 %v1719_v11, 16  ;;  %v1793_v47 = vpack.i.b16 0, %v1719_v11  ;;  %v723_v34 = vsel %vm719_vm15, %v714_v6, %v9366_v18  ;;  %v718_v16 = vsel %vm710_vm14, %v709_v5, %v9346_v8  ;;  %v14478_v5 = vld [vmem:[#allocation45_spill] sm:$0xff] }
 0x327   : > { %v1120_v59 = vsel %vm14356_vm13, %v1110_v12, %v9527_v60  ;;  %v730_v15 = vsel %vm728_vm0, %v721_v25, %v9372_v22  ;;  %v1754_v18 = vshrl.u32 %v9825_v21, 16  ;;  %v1882_v62 = vunpack.c.l.b16 %v1773_v28  ;;  %v14479_v28 = vld [vmem:[#allocation26_spill] sm:$0xff] }
 0x328   : > { %v1795_v44 = vpack.i.b16 0, %v1794_v30  ;;  %v882_v61 = vpack.i.b16 0, %v9418_v39  ;;  %v1774_v8 = vshrl.u32 %v1700_v42, 16  ;;  %v1883_v52 = vunpack.c.l.b16 %v1793_v47  ;;  %v14477_v30 = vld [vmem:[#allocation39_spill] sm:$0xff]  ;;  %v14481_v47 = vld [vmem:[#allocation44_spill] sm:$0xff] }
 0x329   : > { %v9920_v60 = vsel %vm719_vm15, %v718_v16, %v9374_v23  ;;  %v1128_v22 = vsel %vm710_vm14, %v1120_v59, %v9523_v56  ;;  %v1294_v21 = vpack.i.b16 0, %v9606_v38  ;;  %v9930_v39 = vsel %vm737_vm1, %v730_v15, %v9364_v17  ;;  %v14475_v38 = vld [vmem:[#allocation54_spill] sm:$0xff]  ;;  %v14484_v59 = vld [vmem:[#allocation43_spill] sm:$0xff] }
 0x32a   : > { %1872 = vrot.lane.b32.xlu2 %v1868_v51, %s8961_s7  ;;  %v1900_v51 = vpack.c.b16 %v1896_v19, %v1896_v19  ;;  %v942_v23 = vpack.i.b16 0, %v14473_v40  ;;  %v1136_v3 = vsel %vm719_vm15, %v1128_v22, %v14474_v53  ;;  %v1755_v58 = vpack.i.b16 0, %v1754_v18  ;;  %v14485_v18 = vld [vmem:[#allocation68_spill] sm:$0xff] }
 0x32b   : > { %1874 = vrot.lane.b32.xlu0 %v1869_v49, %s8961_s7  ;;  %v732_v49 = vsel %vm728_vm0, %v723_v34, %v9358_v14  ;;  %v1899_v14 = vunpack.c.l.b16 %v1795_v44  ;;  %v1144_v11 = vsel %vm728_vm0, %v1136_v3, %v14475_v38  ;;  %v1502_v2 = vsel %vm688_vm12, %v1294_v21, %v9767_v24 }
 0x32c   : > { %1890 = vrot.lane.b32.xlu1 %v1885_v1, %s8962_s13  ;;  %v9881_v10 = vpop.permute.xlu2 %1431  ;;  %v1107_v1 = vsel %vm688_vm12, %v882_v61, %v9499_v41  ;;  %v1886_v17 = vpack.c.b16 %v1882_v62, %v1882_v62  ;;  %v1512_v42 = vsel %vm14356_vm13, %v1502_v2, %v9822_v35  ;;  %v1775_v36 = vpack.i.b16 0, %v1774_v8  ;;  %v14482_v35 = vld [vmem:[#allocation52_spill] sm:$0xff] }
 0x32d   : > { %v9889_v31 = vpop.permute.xlu0 %1399  ;;  %v1118_v41 = vsel %vm14356_vm13, %v1107_v1, %v14476_v7  ;;  %v1887_v19 = vpack.c.b16 %v1883_v52, %v1883_v52  ;;  %v1116_v9 = vsel %vm688_vm12, %v942_v23, %v14477_v30  ;;  %v1777_v24 = vpack.i.b16 0, %v9865_v4  ;;  %v14486_v61 = vld [vmem:[#allocation48_spill] sm:$0xff]  ;;  %v14487_v52 = vld [vmem:[#allocation53_spill] sm:$0xff] }
 0x32e   : > { %v9894_v32 = vpop.permute.xlu1 %1415  ;;  %v1126_v29 = vsel %vm710_vm14, %v1118_v41, %v14478_v5  ;;  %v741_v6 = vsel %vm737_vm1, %v732_v49, %v14479_v28  ;;  %v1124_v34 = vsel %vm14356_vm13, %v1116_v9, %v14481_v47  ;;  %v1152_v12 = vsel %vm737_vm1, %v1144_v11, %v14482_v35  ;;  %v14489_v1 = vld [vmem:[#allocation57_spill] sm:$0xff]  ;;  %v14496_v28 = vld [vmem:[#allocation72_spill] sm:$0xff]  ;;  %v14497_v47 = vld [vmem:[#allocation55_spill] sm:$0xff] }
 0x32f   : > { %v1520_v25 = vsel %vm710_vm14, %v1512_v42, %v9828_v33  ;;  %v1897_v16 = vunpack.c.l.b16 %v1755_v58  ;;  %v1134_v15 = vsel %vm719_vm15, %v1126_v29, %v14484_v59  ;;  %v1274_v62 = vpack.i.b16 0, %v14485_v18  ;;  %v14491_v5 = vld [vmem:[#allocation41_spill] sm:$0xff] }
 0x330   : > { %v1898_v49 = vunpack.c.l.b16 %v1775_v36  ;;  %v1132_v8 = vsel %vm710_vm14, %v1124_v34, %v14486_v61  ;;  %v1142_v22 = vsel %vm728_vm0, %v1134_v15, %v14487_v52  ;;  %v1914_v21 = vunpack.c.l.b16 %v1777_v24  ;;  %v14500_v18 = vld [vmem:[#allocation29_spill] sm:$0xff]  ;;  %v14502_v61 = vld [vmem:[#allocation56_spill] sm:$0xff] }
 0x331   : > { %v1150_v40 = vsel %vm737_vm1, %v1142_v22, %v14489_v1  ;;  %v1499_v53 = vsel %vm688_vm12, %v1274_v62, %v9782_v48  ;;  %v1528_v38 = vsel %vm719_vm15, %v1520_v25, %v9820_v26  ;;  %v1737_v7 = vpack.i.b16 0, %v9859_v13 }
 0x332   : > { %1878 = vrot.lane.b32.xlu2 %v1871_v43, %s8961_s7  ;;  %v1903_v43 = vpack.c.b16 %v1899_v14, %v1899_v14  ;;  %v1758_v14 = vshrl.u32 %v9867_v54, 16  ;;  %v1510_v11 = vsel %vm14356_vm13, %v1499_v53, %v9776_v50  ;;  %v1902_v36 = vpack.c.b16 %v1898_v49, %v1898_v49  ;;  %v14501_v49 = vld [vmem:[#allocation40_spill] sm:$0xff] }
 0x333   : > { %1888 = vrot.lane.b32.xlu0 %v1884_v63, %s8962_s13  ;;  %v922_v63 = vpack.i.b16 0, %v14480_v55  ;;  %v1518_v41 = vsel %vm710_vm14, %v1510_v11, %v9851_v45  ;;  %v1757_v48 = vpack.i.b16 0, %v9867_v54  ;;  %v1918_v30 = vpack.c.b16 %v1914_v21, %v1914_v21 }
 0x334   : > { %1904 = vrot.lane.b32.xlu1 %v1900_v51, %s8963_s10  ;;  %v9926_v27 = vpop.permute.xlu2 %1445  ;;  %v14483_v51 = vld [vmem:[#allocation62_spill] sm:$0xff]  ;;  %v1759_v9 = vpack.i.b16 0, %v1758_v14  ;;  %v14493_v45 = vmov 0  ;;  %v1334_v55 = vpack.i.b16 0, %v14496_v28  ;;  %v1158_v34 = vsel %vm14355_vm2, %v1150_v40, %v14497_v47  ;;  %v14504_v14 = vld [vmem:[#allocation60_spill] sm:$0xff]  ;;  %v14505_v40 = vld [vmem:[#allocation73_spill] sm:$0xff] }
 0x335   : > { %v9937_v56 = vpop.permute.xlu0 %1413  ;;  %v1160_v44 = vsel %vm14355_vm2, %v1152_v12, %v14483_v51  ;;  %v1113_v29 = vsel %vm688_vm12, %v922_v63, %v14491_v5  ;;  %v14494_v45 = vsel %vm10002_vm5, 4294967295, %v14493_v45  ;;  %v1526_v63 = vsel %vm719_vm15, %v1518_v41, %v9855_v46  ;;  %v14510_v5 = vld [vmem:[#allocation22_spill] sm:$0xff] }
 0x336   : > { %v9943_v0 = vpop.permute.xlu1 %1429  ;;  %v3991_v23 = vshll.u32 %v1160_v44, 16  ;;  %14495 = vst [vmem:[#allocation50_spill] sm:$0xff] %v14494_v45  ;;  %v1912_v12 = vunpack.c.l.b16 %v1737_v7  ;;  %v14498_v44 = vld [vmem:[#allocation84_spill] sm:$0xff]  ;;  %v1913_v59 = vunpack.c.l.b16 %v1757_v48  ;;  %v1738_v15 = vshrl.u32 %v9859_v13, 16  ;;  %v14508_v48 = vld [vmem:[#allocation47_spill] sm:$0xff]  ;;  %v14512_v28 = vld [vmem:[#allocation58_spill] sm:$0xff] }
 0x337   : > { %v1508_v25 = vsel %vm688_vm12, %v1334_v55, %v14498_v44  ;;  %v748_v62 = vsel %vm14355_vm2, %v9930_v39, %v14500_v18  ;;  %v1122_v46 = vsel %vm14356_vm13, %v1113_v29, %v14501_v49  ;;  %v1929_v22 = vunpack.c.l.b16 %v1759_v9  ;;  %v14515_v44 = vld [vmem:[#allocation87_spill] sm:$0xff] }
 0x338   : > { %v3987_v21 = vshll.u32 %v1158_v34, 16  ;;  %v1534_v39 = vsel %vm728_vm0, %v1526_v63, %v9846_v20  ;;  %v1130_v20 = vsel %vm710_vm14, %v1122_v46, %v14508_v48  ;;  %v736_v29 = vsel %vm728_vm0, %v9920_v60, %v14510_v5  ;;  %v14514_v63 = vld [vmem:[#allocation18_spill] sm:$0xff]  ;;  %v14518_v46 = vld [vmem:[#allocation20_spill] sm:$0xff] }
 0x339   : > { %v1933_v9 = vpack.c.b16 %v1929_v22, %v1929_v22  ;;  %v1778_v60 = vshrl.u32 %v9865_v4, 16 }
 0x33a   : > { %1892 = vrot.lane.b32.xlu2 %v1886_v17, %s8962_s13  ;;  %v1901_v17 = vpack.c.b16 %v1897_v16, %v1897_v16 }
 0x33b   : > { %1894 = vrot.lane.b32.xlu0 %v1887_v19, %s8962_s13  ;;  %v14490_v19 = vld [vmem:[#allocation28_spill] sm:$0xff] }
 0x33c   : > { %1910 = vrot.lane.b32.xlu1 %v1903_v43, %s8963_s10  ;;  %v9975_v33 = vpop.permute.xlu2 %1459  ;;  %v751_v26 = vsel %vm14355_vm2, %v741_v6, %v14490_v19  ;;  %v14492_v43 = vld [vmem:[#allocation46_spill] sm:$0xff] }
 0x33d   : > { %14488 = vst [vmem:[#allocation38_spill] sm:$0xff] %v9975_v33  ;;  %v1428_v3 = vpop.permute.xlu0 %1427  ;;  %v1140_v24 = vsel %vm719_vm15, %v1132_v8, %v14492_v43  ;;  %v4176_v35 = vsel %vm10002_vm5, %v751_v26, %v3991_v23  ;;  %v1314_v23 = vpack.i.b16 0, %v14505_v40  ;;  %v14509_v26 = vld [vmem:[#allocation86_spill] sm:$0xff]  ;;  %v14511_v43 = vld [vmem:[#allocation51_spill] sm:$0xff] }
 0x33e   : > { %v1536_v2 = vsel %vm728_vm0, %v1528_v38, %v1428_v3  ;;  %v1444_v58 = vpop.permute.xlu1 %1443  ;;  %v1148_v8 = vsel %vm728_vm0, %v1140_v24, %v14502_v61  ;;  %v14506_v3 = vld [vmem:[#allocation83_spill] sm:$0xff]  ;;  %v4174_v24 = vsel %vm10002_vm5, %v748_v62, %v3987_v21  ;;  %v745_v61 = vsel %vm737_vm1, %v736_v29, %v14518_v46 }
 0x33f   : > { %v1544_v42 = vsel %vm737_vm1, %v1536_v2, %v1444_v58  ;;  %v1156_v1 = vsel %vm737_vm1, %v1148_v8, %v14504_v14  ;;  %v1516_v38 = vsel %vm14356_vm13, %v1508_v25, %v14506_v3  ;;  %v1916_v58 = vpack.c.b16 %v1912_v12, %v1912_v12  ;;  %v14519_v8 = vld [vmem:[#allocation49_spill] sm:$0xff]  ;;  %v14527_v29 = vld [vmem:[#allocation23_spill] sm:$0xff] }
 0x340   : > { %v1552_v50 = vsel %vm14355_vm2, %v1544_v42, %v9975_v33  ;;  %v1524_v7 = vsel %vm710_vm14, %v1516_v38, %v9889_v31  ;;  %v1917_v42 = vpack.c.b16 %v1913_v59, %v1913_v59  ;;  %v1138_v31 = vsel %vm719_vm15, %v1130_v20, %v14511_v43  ;;  %v14524_v20 = vld [vmem:[#allocation63_spill] sm:$0xff] }
 0x341   : > { %v4021_v6 = vrot.slane %v1552_v50, 7  ;;  %v1505_v50 = vsel %vm688_vm12, %v1314_v23, %v14509_v26  ;;  %v1164_v55 = vsel %vm14355_vm2, %v1156_v1, %v14512_v28  ;;  %v707_v12 = vsel %vm14356_vm13, %v9885_v37, %v14514_v63  ;;  %v14520_v1 = vld [vmem:[#allocation85_spill] sm:$0xff] }
 0x342   : > { %1906 = vrot.lane.b32.xlu2 %v1901_v17, %s8963_s10  ;;  %v1797_v17 = vpack.i.b16 0, %v9872_v57  ;;  %v1514_v25 = vsel %vm14356_vm13, %v1505_v50, %v14515_v44  ;;  %v1146_v37 = vsel %vm728_vm0, %v1138_v31, %v14519_v8  ;;  %v3999_v22 = vshll.u32 %v1164_v55, 16  ;;  %v14525_v50 = vld [vmem:[#allocation17_spill] sm:$0xff] }
 0x343   : > { %v10017_v16 = vsel %vm14326_vm3, %v4176_v35, %v4021_v6  ;;  %1908 = vrot.lane.b32.xlu0 %v1902_v36, %s8963_s10  ;;  %v1739_v36 = vpack.i.b16 0, %v1738_v15  ;;  %v1532_v6 = vsel %vm719_vm15, %v1524_v7, %v9894_v32  ;;  %v1798_v32 = vshrl.u32 %v9872_v57, 16  ;;  %v14516_v15 = vld [vmem:[#allocation19_spill] sm:$0xff]  ;;  %v14522_v7 = vld [vmem:[#allocation32_spill] sm:$0xff] }
 0x344   : > { %14499 = vst [vmem:[#allocation54_spill] sm:$0xff] %v10017_v16  ;;  %1924 = vrot.lane.b32.xlu1 %v1918_v30, %s8964_s27  ;;  %v10029_v52 = vpop.permute.xlu2 %1473  ;;  %v1915_v35 = vunpack.c.l.b16 %v1797_v17  ;;  %v716_v62 = vsel %vm710_vm14, %v707_v12, %v14516_v15  ;;  %v1540_v14 = vsel %vm728_vm0, %v1532_v6, %v9881_v10  ;;  %v1522_v40 = vsel %vm710_vm14, %v1514_v25, %v14520_v1 }
 0x345   : > { %14503 = vst [vmem:[#allocation42_spill] sm:$0xff] %v10029_v52  ;;  %v1442_v53 = vpop.permute.xlu0 %1441  ;;  %v1928_v59 = vunpack.c.l.b16 %v1739_v36  ;;  %v1779_v3 = vpack.i.b16 0, %v1778_v60  ;;  %v1530_v38 = vsel %vm719_vm15, %v1522_v40, %v9937_v56  ;;  %v1799_v17 = vpack.i.b16 0, %v1798_v32 }
 0x346   : > { %v1542_v11 = vsel %vm737_vm1, %v1534_v39, %v1442_v53  ;;  %v10039_v2 = vpop.permute.xlu1 %1457  ;;  %v1919_v39 = vpack.c.b16 %v1915_v35, %v1915_v35  ;;  %v757_v10 = vsel %vm14355_vm2, %v745_v61, %v14522_v7  ;;  %v725_v56 = vsel %vm719_vm15, %v716_v62, %v14525_v50  ;;  %v14529_v35 = vld [vmem:[#allocation75_spill] sm:$0xff] }
 0x347   : > { %14507 = vst [vmem:[#allocation39_spill] sm:$0xff] %v10039_v2  ;;  %v1550_v41 = vsel %vm14355_vm2, %v1542_v11, %v10039_v2  ;;  %v4180_v48 = vsel %vm10002_vm5, %v757_v10, %v3999_v22  ;;  %v1930_v5 = vunpack.c.l.b16 %v1779_v3  ;;  %v734_v43 = vsel %vm728_vm0, %v725_v56, %v14527_v29  ;;  %v14537_v22 = vld [vmem:[#allocation78_spill] sm:$0xff] }
 0x348   : > { %v4019_v30 = vrot.slane %v1550_v41, 7  ;;  %v14523_v41 = vld [vmem:[#allocation59_spill] sm:$0xff]  ;;  %v1931_v31 = vunpack.c.l.b16 %v1799_v17 }
 0x349   : > { %v1934_v25 = vpack.c.b16 %v1930_v5, %v1930_v5 }
 0x34a   : > { %v10062_v34 = vsel %vm14326_vm3, %v4174_v24, %v4019_v30  ;;  %1920 = vrot.lane.b32.xlu2 %v1916_v58, %s8964_s27  ;;  %v1932_v58 = vpack.c.b16 %v1928_v59, %v1928_v59  ;;  %v1538_v30 = vsel %vm728_vm0, %v1530_v38, %v9943_v0  ;;  %v14528_v24 = vld [vmem:[#allocation25_spill] sm:$0xff]  ;;  %v1935_v62 = vpack.c.b16 %v1931_v31, %v1931_v31 }
 0x34b   : > { %14513 = vst [vmem:[#allocation45_spill] sm:$0xff] %v10062_v34  ;;  %1922 = vrot.lane.b32.xlu0 %v1917_v42, %s8964_s27  ;;  %v1154_v42 = vsel %vm737_vm1, %v1146_v37, %v14523_v41  ;;  %v743_v55 = vsel %vm737_vm1, %v734_v43, %v14528_v24  ;;  %v1546_v60 = vsel %vm737_vm1, %v1538_v30, %v9926_v27  ;;  %v14533_v59 = vld [vmem:[#allocation21_spill] sm:$0xff] }
 0x34c   : > { %1938 = vrot.lane.b32.xlu1 %v1933_v9, %s8965_s16  ;;  %v10076_v49 = vpop.permute.xlu2 %1479  ;;  %v1162_v26 = vsel %vm14355_vm2, %v1154_v42, %v14524_v20  ;;  %v754_v32 = vsel %vm14355_vm2, %v743_v55, %v14533_v59 }
 0x34d   : > { %14517 = vst [vmem:[#allocation26_spill] sm:$0xff] %v10076_v49  ;;  %v1448_v21 = vpop.permute.xlu0 %1447  ;;  %v3995_v6 = vshll.u32 %v1162_v26, 16 }
 0x34e   : > { %v1548_v23 = vsel %vm737_vm1, %v1540_v14, %v1448_v21  ;;  %v10087_v53 = vpop.permute.xlu1 %1463  ;;  %v14538_v21 = vld [vmem:[#allocation77_spill] sm:$0xff] }
 0x34f   : > { %14521 = vst [vmem:[#allocation37_spill] sm:$0xff] %v10087_v53  ;;  %v1556_v11 = vsel %vm14355_vm2, %v1548_v23, %v10087_v53  ;;  %v4178_v46 = vsel %vm10002_vm5, %v754_v32, %v3995_v6  ;;  %v14540_v23 = vld [vmem:[#allocation80_spill] sm:$0xff] }
 0x350   : > { %v4025_v36 = vrot.slane %v1556_v11, 7 }
 0x352   : > { %v10106_v9 = vsel %vm14326_vm3, %v4180_v48, %v4025_v36  ;;  %1926 = vrot.lane.b32.xlu2 %v1919_v39, %s8964_s27 }
 0x353   : > { %14526 = vst [vmem:[#allocation44_spill] sm:$0xff] %v10106_v9  ;;  %1936 = vrot.lane.b32.xlu0 %v1932_v58, %s8965_s16 }
 0x354   : > { %2020 = vrot.lane.b32.xlu1 %v14529_v35, %s8966_s17  ;;  %v10116_v0 = vpop.permute.xlu2 %1493 }
 0x355   : > { %14530 = vst [vmem:[#allocation52_spill] sm:$0xff] %v10116_v0  ;;  %v10120_v63 = vpop.permute.xlu0 %1461  ;;  %v14554_v0 = vld [vmem:[#allocation15_spill] sm:$0xff] }
 0x356   : > { %14531 = vst [vmem:[#allocation43_spill] sm:$0xff] %v10120_v63  ;;  %v1554_v12 = vsel %vm14355_vm2, %v1546_v60, %v10120_v63  ;;  %v10124_v44 = vpop.permute.xlu1 %1477  ;;  %v14556_v63 = vld [vmem:[#allocation16_spill] sm:$0xff] }
 0x357   : > { %14532 = vst [vmem:[#allocation68_spill] sm:$0xff] %v10124_v44  ;;  %v4023_v15 = vrot.slane %v1554_v12, 7 }
 0x359   : > { %v10131_v61 = vsel %vm14326_vm3, %v4178_v46, %v4023_v15 }
 0x35a   : > { %14534 = vst [vmem:[#allocation48_spill] sm:$0xff] %v10131_v61  ;;  %1940 = vrot.lane.b32.xlu2 %v1934_v25, %s8965_s16 }
 0x35b   : > { %1942 = vrot.lane.b32.xlu0 %v1935_v62, %s8965_s16 }
 0x35c   : > { %2026 = vrot.lane.b32.xlu1 %v9867_v54, %s8966_s17  ;;  %v10137_v27 = vpop.permute.xlu2 %1810 }
 0x35d   : > { %v10139_v8 = vpop.permute.xlu0 %1475 }
 0x35e   : > { %14535 = vst [vmem:[#allocation53_spill] sm:$0xff] %v10139_v8  ;;  %v10141_v37 = vpop.permute.xlu1 %1491 }
 0x35f   : > { %14536 = vst [vmem:[#allocation57_spill] sm:$0xff] %v10141_v37 }
 0x362   : > { %2022 = vrot.lane.b32.xlu2 %v9859_v13, %s8966_s17 }
 0x363   : > { %2024 = vrot.lane.b32.xlu0 %v14537_v22, %s8966_s17 }
 0x364   : > { %2032 = vrot.lane.b32.xlu1 %v14538_v21, %s8966_s17  ;;  %v10149_v14 = vpop.permute.xlu2 %1824 }
 0x365   : > { %v10151_v1 = vpop.permute.xlu0 %1489 }
 0x366   : > { %14539 = vst [vmem:[#allocation41_spill] sm:$0xff] %v10151_v1  ;;  %v10153_v40 = vpop.permute.xlu1 %1808 }
 0x36a   : > { %2028 = vrot.lane.b32.xlu2 %v14540_v23, %s8966_s17 }
 0x36b   : > { %2030 = vrot.lane.b32.xlu0 %v9865_v4, %s8966_s17 }
 0x36c   : > { %v10159_v39 = vpop.permute.xlu2 %1830 }
 0x36d   : > { %v10161_v3 = vpop.permute.xlu0 %1495 }
 0x36e   : > { %14541 = vst [vmem:[#allocation46_spill] sm:$0xff] %v10161_v3  ;;  %v10163_v38 = vpop.permute.xlu1 %1814 }
 0x372   : > { %2034 = vrot.lane.b32.xlu2 %v9872_v57, %s8966_s17 }
 0x374   : > { %v10167_v11 = vpop.permute.xlu2 %1844 }
 0x375   : > { %v10169_v58 = vpop.permute.xlu0 %1812 }
 0x376   : > { %v10171_v17 = vpop.permute.xlu1 %1828 }
 0x37c   : > { %v10173_v10 = vpop.permute.xlu2 %1858 }
 0x37d   : > { %v10175_v41 = vpop.permute.xlu0 %1826 }
 0x37e   : > { %v10177_v42 = vpop.permute.xlu1 %1842 }
 0x384   : > { %v10179_v36 = vpop.permute.xlu2 %1872 }
 0x385   : > { %v10181_v48 = vpop.permute.xlu0 %1840 }
 0x386   : > { %v10183_v26 = vpop.permute.xlu1 %1856 }
 0x38c   : > { %v10185_v50 = vpop.permute.xlu2 %1878 }
 0x38d   : > { %14542 = vst [vmem:[#allocation72_spill] sm:$0xff] %v10185_v50  ;;  %v10187_v56 = vpop.permute.xlu0 %1846 }
 0x38e   : > { %v10189_v30 = vpop.permute.xlu1 %1862 }
 0x394   : > { %v10191_v5 = vpop.permute.xlu2 %1892 }
 0x395   : > { %v10193_v29 = vpop.permute.xlu0 %1860 }
 0x396   : > { %v10195_v43 = vpop.permute.xlu1 %1876 }
 0x39c   : > { %v10197_v31 = vpop.permute.xlu2 %1906 }
 0x39d   : > { %14543 = vst [vmem:[#allocation84_spill] sm:$0xff] %v10197_v31  ;;  %v10199_v24 = vpop.permute.xlu0 %1874 }
 0x39e   : > { %v10201_v55 = vpop.permute.xlu1 %1890 }
 0x3a4   : > { %v10203_v6 = vpop.permute.xlu2 %1920 }
 0x3a5   : > { %14544 = vst [vmem:[#allocation40_spill] sm:$0xff] %v10203_v6  ;;  %v10205_v60 = vpop.permute.xlu0 %1888 }
 0x3a6   : > { %v10207_v12 = vpop.permute.xlu1 %1904 }
 0x3a7   : > { %14545 = vst [vmem:[#allocation56_spill] sm:$0xff] %v10207_v12 }
 0x3ac   : > { %v10209_v25 = vpop.permute.xlu2 %1926 }
 0x3ad   : > { %14546 = vst [vmem:[#allocation60_spill] sm:$0xff] %v10209_v25  ;;  %v10211_v32 = vpop.permute.xlu0 %1894 }
 0x3ae   : > { %14547 = vst [vmem:[#allocation73_spill] sm:$0xff] %v10211_v32  ;;  %v10213_v15 = vpop.permute.xlu1 %1910 }
 0x3af   : > { %14548 = vst [vmem:[#allocation83_spill] sm:$0xff] %v10213_v15 }
 0x3b4   : > { %v10215_v62 = vpop.permute.xlu2 %1940 }
 0x3b5   : > { %14549 = vst [vmem:[#allocation47_spill] sm:$0xff] %v10215_v62  ;;  %v10217_v46 = vpop.permute.xlu0 %1908 }
 0x3b6   : > { %14550 = vst [vmem:[#allocation86_spill] sm:$0xff] %v10217_v46  ;;  %v10219_v3 = vpop.permute.xlu1 %1924 }
 0x3b7   : > { %14551 = vst [vmem:[#allocation22_spill] sm:$0xff] %v10219_v3 }
 0x3bc   : > { %v10221_v53 = vpop.permute.xlu2 %2022 }
 0x3bd   : > { %v10223_v49 = vpop.permute.xlu0 %1922 }
 0x3be   : > { %14552 = vst [vmem:[#allocation51_spill] sm:$0xff] %v10223_v49  ;;  %v10225_v6 = vpop.permute.xlu1 %1938 }
 0x3bf   : > { %14553 = vst [vmem:[#allocation18_spill] sm:$0xff] %v10225_v6 }
 0x3c4   : > { %v2029_v45 = vpop.permute.xlu2 %2028 }
 0x3c5   : > { %v10228_v1 = vperm.slane %v2029_v45, %v14554_v0  ;;  %v10230_v25 = vpop.permute.xlu0 %1936 }
 0x3c6   : > { %14555 = vst [vmem:[#allocation87_spill] sm:$0xff] %v10230_v25  ;;  %v2021_v37 = vpop.permute.xlu1 %2020 }
 0x3c7   : > { %v10234_v62 = vperm.slane %v10228_v1, %v14556_v63  ;;  %v2040_v44 = vperm.slane %v2021_v37, %v14554_v0 }
 0x3c9   : > { %v2154_v3 = vshrl.u32 %v10234_v62, 16  ;;  %v10239_v2 = vperm.slane %v2040_v44, %v14556_v63 }
 0x3cb   : > { %v2155_v49 = vpack.i.b16 0, %v2154_v3  ;;  %v2114_v6 = vshrl.u32 %v10239_v2, 16  ;;  %v2051_v8 = vrot.slane %v10239_v2, 4 }
 0x3cd   : > { %v10242_v52 = vpop.permute.xlu0 %1942  ;;  %v2194_v45 = vunpack.c.l.b16 %v2155_v49  ;;  %v2115_v25 = vpack.i.b16 0, %v2114_v6  ;;  %v2089_v49 = vrot.slane %v10234_v62, 4 }
 0x3ce   : > { %14557 = vst [vmem:[#allocation19_spill] sm:$0xff] %v10242_v52  ;;  %v10244_v20 = vpop.permute.xlu1 %2026 }
 0x3cf   : > { %v2198_v59 = vpack.c.b16 %v2194_v45, %v2194_v45  ;;  %v2192_v7 = vunpack.c.l.b16 %v2115_v25  ;;  %v2052_v25 = vsel %vm14344_vm8, 0, %v2051_v8  ;;  %v2090_v52 = vsel %vm14344_vm8, 0, %v2089_v49 }
 0x3d0   : > { %v2118_v51 = vshrl.u32 %v2052_v25, 16  ;;  %v2157_v34 = vpack.i.b16 0, %v2090_v52  ;;  %v2117_v31 = vpack.i.b16 0, %v2052_v25 }
 0x3d1   : > { %2204 = vrot.lane.b32.xlu2 %v2198_v59, %s8957_s14  ;;  %v2196_v33 = vpack.c.b16 %v2192_v7, %v2192_v7 }
 0x3d2   : > { %v2210_v49 = vunpack.c.l.b16 %v2157_v34 }
 0x3d3   : > { %2200 = vrot.lane.b32.xlu0 %v2196_v33, %s8957_s14 }
 0x3d4   : > { %v2214_v25 = vpack.c.b16 %v2210_v49, %v2210_v49 }
 0x3d5   : > { %v2025_v37 = vpop.permute.xlu0 %2024 }
 0x3d6   : > { %v2059_v3 = vperm.slane %v2025_v37, %v14554_v0  ;;  %v2033_v28 = vpop.permute.xlu1 %2032 }
 0x3d7   : > { %v10251_v19 = vperm.slane %v2033_v28, %v14554_v0 }
 0x3d8   : > { %v10255_v6 = vperm.slane %v2059_v3, %v14556_v63  ;;  %v2060_v50 = vrot.slane %v2059_v3, 4 }
 0x3d9   : > { %v10259_v59 = vperm.slane %v10251_v19, %v14556_v63 }
 0x3da   : > { %14558 = vst [vmem:[#allocation20_spill] sm:$0xff] %v10255_v6  ;;  %v2070_v33 = vrot.slane %v10255_v6, 4  ;;  %v2134_v7 = vshrl.u32 %v10255_v6, 16  ;;  %v2119_v6 = vpack.i.b16 0, %v2118_v51 }
 0x3db   : > { %14559 = vst [vmem:[#allocation49_spill] sm:$0xff] %v10259_v59  ;;  %v2174_v45 = vshrl.u32 %v10259_v59, 16  ;;  %v2108_v9 = vrot.slane %v10259_v59, 4 }
 0x3dc   : > { %v2135_v37 = vpack.i.b16 0, %v2134_v7  ;;  %v2071_v28 = vsel %vm14344_vm8, 0, %v2070_v33  ;;  %v2208_v7 = vunpack.c.l.b16 %v2117_v31 }
 0x3dd   : > { %v2175_v47 = vpack.i.b16 0, %v2174_v45  ;;  %v2137_v18 = vpack.i.b16 0, %v2071_v28  ;;  %v2109_v33 = vsel %vm14344_vm8, 0, %v2108_v9  ;;  %v2041_v45 = vrot.slane %v2040_v44, 4 }
 0x3de   : > { %v2193_v16 = vunpack.c.l.b16 %v2135_v37  ;;  %v2224_v37 = vunpack.c.l.b16 %v2119_v6 }
 0x3df   : > { %v2195_v0 = vunpack.c.l.b16 %v2175_v47  ;;  %v2209_v61 = vunpack.c.l.b16 %v2137_v18  ;;  %v2178_v47 = vshrl.u32 %v2109_v33, 16  ;;  %v2138_v18 = vshrl.u32 %v2071_v28, 16 }
 0x3e0   : > { %v2197_v15 = vpack.c.b16 %v2193_v16, %v2193_v16  ;;  %v2079_v16 = vrot.slane %v10228_v1, 4  ;;  %v2042_v51 = vsel %vm14344_vm8, 0, %v2041_v45  ;;  %v2158_v1 = vshrl.u32 %v2090_v52, 16 }
 0x3e1   : > { %v2199_v32 = vpack.c.b16 %v2195_v0, %v2195_v0  ;;  %v2213_v8 = vpack.c.b16 %v2209_v61, %v2209_v61  ;;  %v2212_v0 = vpack.c.b16 %v2208_v7, %v2208_v7  ;;  %v2177_v61 = vpack.i.b16 0, %v2109_v33 }
 0x3e2   : > { %2202 = vrot.lane.b32.xlu1 %v2197_v15, %s8957_s14  ;;  %v2228_v15 = vpack.c.b16 %v2224_v37, %v2224_v37  ;;  %v2179_v59 = vpack.i.b16 0, %v2178_v47  ;;  %v2139_v9 = vpack.i.b16 0, %v2138_v18  ;;  %v2050_v34 = vperm.slane %v2042_v51, %v14556_v63 }
 0x3e3   : > { %2206 = vrot.lane.b32.xlu0 %v2199_v32, %s8957_s14  ;;  %2218 = vrot.lane.b32.xlu2 %v2213_v8, %s8958_s8  ;;  %v2080_v32 = vsel %vm14344_vm8, 0, %v2079_v16  ;;  %v2211_v44 = vunpack.c.l.b16 %v2177_v61  ;;  %v2061_v8 = vsel %vm14344_vm8, 0, %v2060_v50  ;;  %v2098_v33 = vrot.slane %v10251_v19, 4 }
 0x3e4   : > { %v10280_v31 = vperm.slane %v2080_v32, %v14556_v63  ;;  %v2227_v6 = vunpack.c.l.b16 %v2179_v59  ;;  %v2225_v28 = vunpack.c.l.b16 %v2139_v9  ;;  %v2159_v49 = vpack.i.b16 0, %v2158_v1 }
 0x3e5   : > { %v2215_v3 = vpack.c.b16 %v2211_v44, %v2211_v44  ;;  %v2121_v7 = vpack.i.b16 0, %v2050_v34  ;;  %v2069_v45 = vperm.slane %v2061_v8, %v14556_v63  ;;  %v2099_v52 = vsel %vm14344_vm8, 0, %v2098_v33 }
 0x3e6   : > { %v2231_v37 = vpack.c.b16 %v2227_v6, %v2227_v6  ;;  %v2229_v47 = vpack.c.b16 %v2225_v28, %v2225_v28  ;;  %v2161_v18 = vpack.i.b16 0, %v10280_v31  ;;  %v2226_v50 = vunpack.c.l.b16 %v2159_v49 }
 0x3e7   : > { %v2107_v19 = vperm.slane %v2099_v52, %v14556_v63  ;;  %v2240_v59 = vunpack.c.l.b16 %v2121_v7  ;;  %v2141_v61 = vpack.i.b16 0, %v2069_v45  ;;  %v2053_v44 = vrot.slane %v2050_v34, 4 }
 0x3e8   : > { %v2242_v16 = vunpack.c.l.b16 %v2161_v18  ;;  %v2122_v6 = vshrl.u32 %v2050_v34, 16  ;;  %v2162_v33 = vshrl.u32 %v10280_v31, 16 }
 0x3e9   : > { %v2244_v51 = vpack.c.b16 %v2240_v59, %v2240_v59  ;;  %v2181_v9 = vpack.i.b16 0, %v2107_v19  ;;  %v2241_v1 = vunpack.c.l.b16 %v2141_v61  ;;  %v2110_v59 = vrot.slane %v2107_v19, 4 }
 0x3ea   : > { %2216 = vrot.lane.b32.xlu1 %v2212_v0, %s8958_s8  ;;  %v2230_v0 = vpack.c.b16 %v2226_v50, %v2226_v50  ;;  %v2123_v7 = vpack.i.b16 0, %v2122_v6  ;;  %v2163_v18 = vpack.i.b16 0, %v2162_v33  ;;  %v2072_v50 = vrot.slane %v2069_v45, 4 }
 0x3eb   : > { %2232 = vrot.lane.b32.xlu2 %v2228_v15, %s8959_s30  ;;  %2220 = vrot.lane.b32.xlu0 %v2214_v25, %s8958_s8  ;;  %v2142_v25 = vshrl.u32 %v2069_v45, 16  ;;  %v2246_v15 = vpack.c.b16 %v2242_v16, %v2242_v16  ;;  %v2243_v28 = vunpack.c.l.b16 %v2181_v9  ;;  %v2245_v49 = vpack.c.b16 %v2241_v1, %v2241_v1 }
 0x3ec   : > { %v2256_v34 = vunpack.c.l.b16 %v2123_v7  ;;  %v2182_v16 = vshrl.u32 %v2107_v19, 16  ;;  %v2091_v61 = vrot.slane %v10280_v31, 4 }
 0x3ed   : > { %v2143_v32 = vpack.i.b16 0, %v2142_v25  ;;  %v2258_v25 = vunpack.c.l.b16 %v2163_v18 }
 0x3ee   : > { %v2260_v9 = vpack.c.b16 %v2256_v34, %v2256_v34 }
 0x3ef   : > { %v2257_v8 = vunpack.c.l.b16 %v2143_v32  ;;  %v2183_v32 = vpack.i.b16 0, %v2182_v16  ;;  %v2262_v45 = vpack.c.b16 %v2258_v25, %v2258_v25 }
 0x3f1   : > { %v2259_v19 = vunpack.c.l.b16 %v2183_v32 }
 0x3f2   : > { %2222 = vrot.lane.b32.xlu1 %v2215_v3, %s8958_s8  ;;  %v2054_v3 = vsel %vm14344_vm8, 0, %v2053_v44 }
 0x3f3   : > { %2238 = vrot.lane.b32.xlu2 %v2231_v37, %s8959_s30  ;;  %2234 = vrot.lane.b32.xlu0 %v2229_v47, %s8959_s30  ;;  %v2247_v37 = vpack.c.b16 %v2243_v28, %v2243_v28  ;;  %v2261_v47 = vpack.c.b16 %v2257_v8, %v2257_v8  ;;  %v2125_v52 = vpack.i.b16 0, %v2054_v3  ;;  %v2092_v28 = vsel %vm14344_vm8, 0, %v2091_v61 }
 0x3f4   : > { %v2126_v33 = vshrl.u32 %v2054_v3, 16  ;;  %v2263_v7 = vpack.c.b16 %v2259_v19, %v2259_v19 }
 0x3fa   : > { %2236 = vrot.lane.b32.xlu1 %v2230_v0, %s8959_s30  ;;  %v2272_v0 = vunpack.c.l.b16 %v2125_v52  ;;  %v2127_v52 = vpack.i.b16 0, %v2126_v33 }
 0x3fb   : > { %2248 = vrot.lane.b32.xlu0 %v2244_v51, %s8960_s11  ;;  %2252 = vrot.lane.b32.xlu2 %v2246_v15, %s8960_s11  ;;  %v2073_v51 = vsel %vm14344_vm8, 0, %v2072_v50  ;;  %v2111_v15 = vsel %vm14344_vm8, 0, %v2110_v59 }
 0x3fc   : > { %v2276_v44 = vpack.c.b16 %v2272_v0, %v2272_v0  ;;  %v2145_v1 = vpack.i.b16 0, %v2073_v51  ;;  %v2185_v6 = vpack.i.b16 0, %v2111_v15  ;;  %v2146_v34 = vshrl.u32 %v2073_v51, 16 }
 0x3fd   : > { %v2288_v16 = vunpack.c.l.b16 %v2127_v52  ;;  %v2186_v0 = vshrl.u32 %v2111_v15, 16  ;;  %v2130_v51 = vshrl.u32 %v10221_v53, 16 }
 0x3fe   : > { %v2273_v31 = vunpack.c.l.b16 %v2145_v1  ;;  %v2275_v8 = vunpack.c.l.b16 %v2185_v6  ;;  %v2147_v3 = vpack.i.b16 0, %v2146_v34  ;;  %v2031_v6 = vpop.permute.xlu0 %2030 }
 0x3ff   : > { %v2292_v32 = vpack.c.b16 %v2288_v16, %v2288_v16  ;;  %v2169_v15 = vpack.i.b16 0, %v2031_v6  ;;  %v2131_v33 = vpack.i.b16 0, %v2130_v51 }
 0x400   : > { %v2279_v18 = vpack.c.b16 %v2275_v8, %v2275_v8  ;;  %v2289_v1 = vunpack.c.l.b16 %v2147_v3 }
 0x402   : > { %2250 = vrot.lane.b32.xlu1 %v2245_v49, %s8960_s11  ;;  %v2166_v49 = vshrl.u32 %v2092_v28, 16  ;;  %v2293_v8 = vpack.c.b16 %v2289_v1, %v2289_v1 }
 0x403   : > { %2254 = vrot.lane.b32.xlu0 %v2247_v37, %s8960_s11  ;;  %2266 = vrot.lane.b32.xlu2 %v2261_v47, %s8961_s7  ;;  %v2165_v37 = vpack.i.b16 0, %v2092_v28  ;;  %v2277_v47 = vpack.c.b16 %v2273_v31, %v2273_v31  ;;  %v2129_v31 = vpack.i.b16 0, %v10221_v53 }
 0x404   : > { %v2167_v50 = vpack.i.b16 0, %v2166_v49 }
 0x405   : > { %v2274_v59 = vunpack.c.l.b16 %v2165_v37  ;;  %v2035_v37 = vpop.permute.xlu2 %2034  ;;  %v2304_v52 = vunpack.c.l.b16 %v2129_v31 }
 0x406   : > { %v2290_v25 = vunpack.c.l.b16 %v2167_v50  ;;  %v2320_v50 = vunpack.c.l.b16 %v2131_v33  ;;  %v2189_v34 = vpack.i.b16 0, %v2035_v37 }
 0x407   : > { %v2278_v61 = vpack.c.b16 %v2274_v59, %v2274_v59  ;;  %v2150_v59 = vshrl.u32 %v10244_v20, 16 }
 0x408   : > { %v2307_v3 = vunpack.c.l.b16 %v2189_v34 }
 0x40a   : > { %2264 = vrot.lane.b32.xlu1 %v2260_v9, %s8961_s7  ;;  %v2149_v9 = vpack.i.b16 0, %v10244_v20 }
 0x40b   : > { %2268 = vrot.lane.b32.xlu0 %v2262_v45, %s8961_s7  ;;  %2280 = vrot.lane.b32.xlu2 %v2276_v44, %s8962_s13  ;;  %v2294_v45 = vpack.c.b16 %v2290_v25, %v2290_v25  ;;  %v2187_v44 = vpack.i.b16 0, %v2186_v0  ;;  %v2308_v25 = vpack.c.b16 %v2304_v52, %v2304_v52  ;;  %v2324_v0 = vpack.c.b16 %v2320_v50, %v2320_v50  ;;  %v14561_v50 = vld [vmem:[#allocation81_spill] sm:$0xff] }
 0x40c   : > { %v2305_v28 = vunpack.c.l.b16 %v2149_v9 }
 0x40d   : > { %v2291_v19 = vunpack.c.l.b16 %v2187_v44  ;;  %v2311_v44 = vpack.c.b16 %v2307_v3, %v2307_v3 }
 0x40e   : > { %v2309_v49 = vpack.c.b16 %v2305_v28, %v2305_v28 }
 0x412   : > { %2270 = vrot.lane.b32.xlu1 %v2263_v7, %s8961_s7  ;;  %v2295_v7 = vpack.c.b16 %v2291_v19, %v2291_v19 }
 0x413   : > { %2282 = vrot.lane.b32.xlu0 %v2277_v47, %s8962_s13  ;;  %2286 = vrot.lane.b32.xlu2 %v2279_v18, %s8962_s13  ;;  %v2190_v47 = vshrl.u32 %v2035_v37, 16  ;;  %v2306_v18 = vunpack.c.l.b16 %v2169_v15 }
 0x415   : > { %v2191_v16 = vpack.i.b16 0, %v2190_v47  ;;  %v2310_v53 = vpack.c.b16 %v2306_v18, %v2306_v18 }
 0x417   : > { %v2323_v9 = vunpack.c.l.b16 %v2191_v16 }
 0x419   : > { %v2327_v1 = vpack.c.b16 %v2323_v9, %v2323_v9 }
 0x41a   : > { %2284 = vrot.lane.b32.xlu1 %v2278_v61, %s8962_s13  ;;  %v2151_v61 = vpack.i.b16 0, %v2150_v59  ;;  %v1761_v59 = vpack.i.b16 0, %v14561_v50 }
 0x41b   : > { %2296 = vrot.lane.b32.xlu0 %v2292_v32, %s8963_s10  ;;  %2300 = vrot.lane.b32.xlu2 %v2294_v45, %s8963_s10  ;;  %v2170_v32 = vshrl.u32 %v2031_v6, 16 }
 0x41c   : > { %v2321_v45 = vunpack.c.l.b16 %v2151_v61  ;;  %v14563_v61 = vld [vmem:[#allocation82_spill] sm:$0xff] }
 0x41d   : > { %v2171_v51 = vpack.i.b16 0, %v2170_v32  ;;  %v1741_v3 = vpack.i.b16 0, %v14563_v61 }
 0x41e   : > { %v2325_v20 = vpack.c.b16 %v2321_v45, %v2321_v45 }
 0x41f   : > { %v2322_v28 = vunpack.c.l.b16 %v2171_v51  ;;  %v1949_v51 = vsel %vm688_vm12, %v1741_v3, %v10137_v27  ;;  %v14567_v3 = vld [vmem:[#allocation72_spill] sm:$0xff] }
 0x421   : > { %v2326_v15 = vpack.c.b16 %v2322_v28, %v2322_v28 }
 0x422   : > { %2298 = vrot.lane.b32.xlu1 %v2293_v8, %s8963_s10 }
 0x423   : > { %2302 = vrot.lane.b32.xlu0 %v2295_v7, %s8963_s10  ;;  %2314 = vrot.lane.b32.xlu2 %v2309_v49, %s8964_s27 }
 0x42a   : > { %2312 = vrot.lane.b32.xlu1 %v2308_v25, %s8964_s27 }
 0x42b   : > { %2316 = vrot.lane.b32.xlu0 %v2310_v53, %s8964_s27  ;;  %2328 = vrot.lane.b32.xlu2 %v2324_v0, %s8965_s16  ;;  %v10325_v19 = vpop.permute.xlu2 %2204  ;;  %v1952_v0 = vsel %vm688_vm12, %v1761_v59, %v10169_v58  ;;  %v1959_v58 = vsel %vm14356_vm13, %v1949_v51, %v10175_v41 }
 0x42c   : > { %v1961_v32 = vsel %vm14356_vm13, %v1952_v0, %v10171_v17  ;;  %v1967_v27 = vsel %vm710_vm14, %v1959_v58, %v10177_v42 }
 0x42d   : > { %v1975_v42 = vsel %vm719_vm15, %v1967_v27, %v10173_v10  ;;  %v14572_v27 = vld [vmem:[#allocation83_spill] sm:$0xff] }
 0x432   : > { %2318 = vrot.lane.b32.xlu1 %v2311_v44, %s8964_s27  ;;  %v14564_v44 = vld [vmem:[#allocation79_spill] sm:$0xff] }
 0x433   : > { %2330 = vrot.lane.b32.xlu0 %v2325_v20, %s8965_s16  ;;  %2334 = vrot.lane.b32.xlu2 %v2327_v1, %s8965_s16  ;;  %v1781_v1 = vpack.i.b16 0, %v14564_v44  ;;  %v14570_v44 = vld [vmem:[#allocation49_spill] sm:$0xff] }
 0x43a   : > { %2332 = vrot.lane.b32.xlu1 %v2326_v15, %s8965_s16  ;;  %v1955_v15 = vsel %vm688_vm12, %v1781_v1, %v10163_v38 }
 0x43b   : > { %2412 = vrot.lane.b32.xlu0 %v14529_v35, %s8963_s10  ;;  %2416 = vrot.lane.b32.xlu2 %v14537_v22, %s8963_s10 }
 0x43d   : > { %v10332_v6 = vpop.permute.xlu2 %2218 }
 0x442   : > { %2414 = vrot.lane.b32.xlu1 %v9859_v13, %s8963_s10 }
 0x443   : > { %2418 = vrot.lane.b32.xlu0 %v9867_v54, %s8963_s10  ;;  %2422 = vrot.lane.b32.xlu2 %v9865_v4, %s8963_s10 }
 0x445   : > { %v10340_v31 = vpop.permute.xlu2 %2232  ;;  %v2201_v35 = vpop.permute.xlu0 %2200 }
 0x44a   : > { %2420 = vrot.lane.b32.xlu1 %v14540_v23, %s8963_s10 }
 0x44b   : > { %2424 = vrot.lane.b32.xlu0 %v14538_v21, %s8963_s10 }
 0x44d   : > { %v10346_v22 = vpop.permute.xlu2 %2238 }
 0x452   : > { %2426 = vrot.lane.b32.xlu1 %v9872_v57, %s8963_s10  ;;  %v14560_v57 = vld [vmem:[#allocation76_spill] sm:$0xff] }
 0x453   : > { %v1721_v52 = vpack.i.b16 0, %v14560_v57  ;;  %v1963_v57 = vsel %vm14356_vm13, %v1955_v15, %v10159_v39 }
 0x454   : > { %v10350_v13 = vpop.permute.xlu1 %2202  ;;  %v1971_v38 = vsel %vm710_vm14, %v1963_v57, %v10187_v56 }
 0x455   : > { %v10352_v54 = vpop.permute.xlu0 %2206  ;;  %v10354_v8 = vpop.permute.xlu2 %2252  ;;  %v1946_v25 = vsel %vm688_vm12, %v1721_v52, %v10153_v40  ;;  %v2153_v52 = vpack.i.b16 0, %v10234_v62 }
 0x456   : > { %v1957_v9 = vsel %vm14356_vm13, %v1946_v25, %v10149_v14  ;;  %v1969_v14 = vsel %vm710_vm14, %v1961_v32, %v10167_v11 }
 0x457   : > { %v1965_v45 = vsel %vm710_vm14, %v1957_v9, %v10181_v48  ;;  %v1977_v48 = vsel %vm719_vm15, %v1969_v14, %v10193_v29  ;;  %v2113_v29 = vpack.i.b16 0, %v10239_v2  ;;  %v1983_v2 = vsel %vm728_vm0, %v1975_v42, %v10199_v24 }
 0x458   : > { %v1973_v20 = vsel %vm719_vm15, %v1965_v45, %v10183_v26  ;;  %v1985_v26 = vsel %vm728_vm0, %v1977_v48, %v10195_v43  ;;  %v2344_v62 = vsel %vm688_vm12, %v2153_v52, %v10325_v19  ;;  %v1991_v24 = vsel %vm737_vm1, %v1983_v2, %v10201_v55  ;;  %v14569_v45 = vld [vmem:[#allocation73_spill] sm:$0xff] }
 0x459   : > { %v1981_v41 = vsel %vm728_vm0, %v1973_v20, %v10179_v36  ;;  %v1993_v36 = vsel %vm737_vm1, %v1985_v26, %v10191_v5  ;;  %v1979_v5 = vsel %vm719_vm15, %v1971_v38, %v10189_v30  ;;  %v14568_v30 = vld [vmem:[#allocation20_spill] sm:$0xff]  ;;  %v2173_v55 = vpack.i.b16 0, %v14570_v44 }
 0x45a   : > { %v1989_v11 = vsel %vm737_vm1, %v1981_v41, %v10205_v60  ;;  %v2338_v60 = vsel %vm688_vm12, %v2113_v29, %v2201_v35  ;;  %v2001_v39 = vsel %vm14355_vm2, %v1993_v36, %v10217_v46  ;;  %v1987_v9 = vsel %vm728_vm0, %v1979_v5, %v14567_v3  ;;  %v14578_v29 = vld [vmem:[#allocation45_spill] sm:$0xff] }
 0x45b   : > { %v1997_v43 = vsel %vm14355_vm2, %v1989_v11, %v10207_v12  ;;  %v4039_v0 = vshll.u32 %v2001_v39, 16  ;;  %v2133_v32 = vpack.i.b16 0, %v14568_v30  ;;  %v14585_v30 = vld [vmem:[#allocation54_spill] sm:$0xff] }
 0x45c   : > { %v2217_v4 = vpop.permute.xlu1 %2216  ;;  %v4027_v25 = vshll.u32 %v1997_v43, 16 }
 0x45d   : > { %v2221_v33 = vpop.permute.xlu0 %2220  ;;  %v10356_v49 = vpop.permute.xlu2 %2266  ;;  %v2349_v56 = vsel %vm14356_vm13, %v2338_v60, %v2217_v4  ;;  %v2341_v58 = vsel %vm688_vm12, %v2133_v32, %v10350_v13  ;;  %v4041_v14 = vrot.slane %v4039_v0, 7  ;;  %v14579_v60 = vld [vmem:[#allocation48_spill] sm:$0xff] }
 0x45e   : > { %v2353_v35 = vsel %vm14356_vm13, %v2344_v62, %v2221_v33  ;;  %v2357_v4 = vsel %vm710_vm14, %v2349_v56, %v10340_v31  ;;  %v1995_v33 = vsel %vm737_vm1, %v1987_v9, %v14569_v45  ;;  %v4029_v31 = vrot.slane %v4027_v25, 7  ;;  %v14584_v9 = vld [vmem:[#allocation15_spill] sm:$0xff] }
 0x45f   : > { %v2351_v57 = vsel %vm14356_vm13, %v2341_v58, %v10332_v6  ;;  %v4222_v6 = vsel %vm10468_vm10, %v14579_v60, %v4041_v14 }
 0x460   : > { %v4218_v38 = vsel %vm10468_vm10, %v14578_v29, %v4029_v31 }
 0x464   : > { %v10358_v23 = vpop.permute.xlu1 %2222 }
 0x465   : > { %v10360_v7 = vpop.permute.xlu0 %2234  ;;  %v10362_v21 = vpop.permute.xlu2 %2280 }
 0x466   : > { %v2359_v42 = vsel %vm710_vm14, %v2351_v57, %v10360_v7 }
 0x46c   : > { %v2237_v37 = vpop.permute.xlu1 %2236 }
 0x46d   : > { %v2249_v47 = vpop.permute.xlu0 %2248  ;;  %v10364_v18 = vpop.permute.xlu2 %2286  ;;  %v2361_v61 = vsel %vm710_vm14, %v2353_v35, %v2237_v37  ;;  %v14571_v37 = vld [vmem:[#allocation84_spill] sm:$0xff] }
 0x46e   : > { %v2365_v19 = vsel %vm719_vm15, %v2357_v4, %v2249_v47  ;;  %v1999_v51 = vsel %vm14355_vm2, %v1991_v24, %v14571_v37  ;;  %v2369_v20 = vsel %vm719_vm15, %v2361_v61, %v10354_v8  ;;  %v2347_v47 = vsel %vm688_vm12, %v2173_v55, %v10352_v54 }
 0x46f   : > { %v2355_v41 = vsel %vm14356_vm13, %v2347_v47, %v10358_v23  ;;  %v14575_v54 = vmov 0 }
 0x470   : > { %v14576_v54 = vsel %vm10468_vm10, 4294967295, %v14575_v54  ;;  %v2363_v39 = vsel %vm710_vm14, %v2355_v41, %v10346_v22 }
 0x471   : > { %14577 = vst [vmem:[#allocation75_spill] sm:$0xff] %v14576_v54 }
 0x474   : > { %v10368_v34 = vpop.permute.xlu1 %2250 }
 0x475   : > { %v10370_v16 = vpop.permute.xlu0 %2254  ;;  %v10372_v53 = vpop.permute.xlu2 %2300  ;;  %v2367_v2 = vsel %vm719_vm15, %v2359_v42, %v10368_v34 }
 0x476   : > { %14562 = vst [vmem:[#allocation85_spill] sm:$0xff] %v10372_v53  ;;  %v2371_v56 = vsel %vm719_vm15, %v2363_v39, %v10370_v16  ;;  %v2375_v35 = vsel %vm728_vm0, %v2367_v2, %v10356_v49 }
 0x47c   : > { %v2265_v40 = vpop.permute.xlu1 %2264 }
 0x47d   : > { %v2269_v28 = vpop.permute.xlu0 %2268  ;;  %v10394_v17 = vpop.permute.xlu2 %2314  ;;  %v2373_v1 = vsel %vm728_vm0, %v2365_v19, %v2265_v40  ;;  %v2003_v40 = vsel %vm14355_vm2, %v1995_v33, %v14572_v27  ;;  %v14586_v19 = vld [vmem:[#allocation44_spill] sm:$0xff] }
 0x47e   : > { %14565 = vst [vmem:[#allocation59_spill] sm:$0xff] %v10394_v17  ;;  %v2377_v48 = vsel %vm728_vm0, %v2369_v20, %v2269_v28  ;;  %v2381_v26 = vsel %vm737_vm1, %v2373_v1, %v10362_v21  ;;  %v4033_v28 = vshll.u32 %v1999_v51, 16  ;;  %v4045_v52 = vshll.u32 %v2003_v40, 16 }
 0x480   : > { %v4035_v25 = vrot.slane %v4033_v28, 7  ;;  %v4047_v24 = vrot.slane %v4045_v52, 7 }
 0x484   : > { %v2271_v50 = vpop.permute.xlu1 %2270 }
 0x485   : > { %v2283_v10 = vpop.permute.xlu0 %2282  ;;  %v10426_v59 = vpop.permute.xlu2 %2328  ;;  %v2379_v62 = vsel %vm728_vm0, %v2371_v56, %v2271_v50 }
 0x486   : > { %14566 = vst [vmem:[#allocation17_spill] sm:$0xff] %v10426_v59  ;;  %v2383_v34 = vsel %vm737_vm1, %v2375_v35, %v2283_v10  ;;  %v2387_v22 = vsel %vm737_vm1, %v2379_v62, %v10364_v18  ;;  %v4220_v10 = vsel %vm10468_vm10, %v14585_v30, %v4035_v25  ;;  %v4224_v18 = vsel %vm10468_vm10, %v14586_v19, %v4047_v24 }
 0x48c   : > { %v2285_v15 = vpop.permute.xlu1 %2284 }
 0x48d   : > { %v2385_v13 = vsel %vm737_vm1, %v2377_v48, %v2285_v15  ;;  %v10462_v11 = vpop.permute.xlu0 %2296  ;;  %v10464_v8 = vpop.permute.xlu2 %2334 }
 0x48e   : > { %14573 = vst [vmem:[#allocation23_spill] sm:$0xff] %v10462_v11  ;;  %v2393_v23 = vsel %vm14355_vm2, %v2385_v13, %v10372_v53  ;;  %v2389_v21 = vsel %vm14355_vm2, %v2381_v26, %v10462_v11 }
 0x48f   : > { %14574 = vst [vmem:[#allocation25_spill] sm:$0xff] %v10464_v8  ;;  %v4071_v36 = vrot.slane %v2393_v23, 6  ;;  %v4067_v43 = vrot.slane %v2389_v21, 6 }
 0x491   : > { %v10493_v5 = vsel %vm14313_vm6, %v4222_v6, %v4071_v36  ;;  %v10496_v7 = vsel %vm14313_vm6, %v4218_v38, %v4067_v43 }
 0x492   : > { %14580 = vst [vmem:[#allocation78_spill] sm:$0xff] %v10493_v5 }
 0x493   : > { %14581 = vst [vmem:[#allocation77_spill] sm:$0xff] %v10496_v7 }
 0x494   : > { %v10502_v0 = vpop.permute.xlu1 %2298 }
 0x495   : > { %14582 = vst [vmem:[#allocation80_spill] sm:$0xff] %v10502_v0  ;;  %v2391_v16 = vsel %vm14355_vm2, %v2383_v34, %v10502_v0  ;;  %v10508_v61 = vpop.permute.xlu0 %2302  ;;  %v2417_v4 = vpop.permute.xlu2 %2416 }
 0x496   : > { %14583 = vst [vmem:[#allocation76_spill] sm:$0xff] %v10508_v61  ;;  %v4069_v3 = vrot.slane %v2391_v16, 6  ;;  %v2395_v50 = vsel %vm14355_vm2, %v2387_v22, %v10508_v61  ;;  %v10513_v49 = vperm.slane %v2417_v4, %v14584_v9 }
 0x497   : > { %v4073_v32 = vrot.slane %v2395_v50, 6 }
 0x498   : > { %v10522_v45 = vsel %vm14313_vm6, %v4220_v10, %v4069_v3  ;;  %v10526_v33 = vperm.slane %v10513_v49, %v14556_v63  ;;  %v2452_v19 = vrot.slane %v10513_v49, 4 }
 0x499   : > { %v10529_v44 = vsel %vm14313_vm6, %v4224_v18, %v4073_v32  ;;  %vm10620_vm6 = vmor %vm14345_vm4, %vm2805_vm7  ;;  %vm4259_vm7 = vsmask.f32 2304 }
 0x49a   : > { %14587 = vst [vmem:[#allocation81_spill] sm:$0xff] %v10529_v44  ;;  %v2526_v55 = vshrl.u32 %v10526_v33, 16  ;;  %v2462_v56 = vrot.slane %v10526_v33, 4  ;;  %vm10894_vm3 = vmand %vm14345_vm4, %vm4259_vm7  ;;  %vm14346_vm7 = vcmask 1043456  }
 0x49c   : > { %v10532_v1 = vpop.permute.xlu1 %2312  ;;  %v2527_v51 = vpack.i.b16 0, %v2526_v55  ;;  %v2463_v50 = vsel %vm14344_vm8, 0, %v2462_v56 }
 0x49d   : > { %14588 = vst [vmem:[#allocation82_spill] sm:$0xff] %v10532_v1  ;;  %v10534_v31 = vpop.permute.xlu0 %2316 }
 0x49e   : > { %14589 = vst [vmem:[#allocation79_spill] sm:$0xff] %v10534_v31  ;;  %v2585_v58 = vunpack.c.l.b16 %v2527_v51 }
 0x4a0   : > { %v2589_v20 = vpack.c.b16 %v2585_v58, %v2585_v58  ;;  %v2529_v58 = vpack.i.b16 0, %v2463_v50 }
 0x4a2   : > { %2594 = vrot.lane.b32.xlu0 %v2589_v20, %s8957_s14 }
 0x4a4   : > { %v10537_v14 = vpop.permute.xlu1 %2318 }
 0x4a5   : > { %14590 = vst [vmem:[#allocation72_spill] sm:$0xff] %v10537_v14  ;;  %v10539_v47 = vpop.permute.xlu0 %2330 }
 0x4a6   : > { %14591 = vst [vmem:[#allocation20_spill] sm:$0xff] %v10539_v47 }
 0x4ac   : > { %v10541_v48 = vpop.permute.xlu1 %2332 }
 0x4ad   : > { %14592 = vst [vmem:[#allocation73_spill] sm:$0xff] %v10541_v48  ;;  %v2413_v15 = vpop.permute.xlu0 %2412 }
 0x4ae   : > { %v2432_v40 = vperm.slane %v2413_v15, %v14584_v9 }
 0x4b0   : > { %v10545_v41 = vperm.slane %v2432_v40, %v14556_v63 }
 0x4b2   : > { %v2443_v26 = vrot.slane %v10545_v41, 4  ;;  %v2506_v13 = vshrl.u32 %v10545_v41, 16 }
 0x4b4   : > { %v10549_v28 = vpop.permute.xlu1 %2414  ;;  %v2507_v57 = vpack.i.b16 0, %v2506_v13  ;;  %v2444_v23 = vsel %vm14344_vm8, 0, %v2443_v26 }
 0x4b5   : > { %v10552_v21 = vpop.permute.xlu0 %2418  ;;  %v2509_v29 = vpack.i.b16 0, %v2444_v23 }
 0x4b6   : > { %v2584_v38 = vunpack.c.l.b16 %v2507_v57  ;;  %v2453_v57 = vsel %vm14344_vm8, 0, %v2452_v19 }
 0x4b7   : > { %v2600_v42 = vunpack.c.l.b16 %v2509_v29  ;;  %v2433_v29 = vrot.slane %v2432_v40, 4 }
 0x4b8   : > { %v2588_v36 = vpack.c.b16 %v2584_v38, %v2584_v38  ;;  %v2601_v38 = vunpack.c.l.b16 %v2529_v58 }
 0x4b9   : > { %v2604_v43 = vpack.c.b16 %v2600_v42, %v2600_v42  ;;  %v2510_v42 = vshrl.u32 %v2444_v23, 16 }
 0x4ba   : > { %2592 = vrot.lane.b32.xlu2 %v2588_v36, %s8957_s14  ;;  %v2530_v36 = vshrl.u32 %v2463_v50, 16  ;;  %v2605_v56 = vpack.c.b16 %v2601_v38, %v2601_v38 }
 0x4bb   : > { %2608 = vrot.lane.b32.xlu0 %v2604_v43, %s8958_s8  ;;  %v10578_v43 = vperm.slane %v2453_v57, %v14556_v63 }
 0x4bc   : > { %v2421_v52 = vpop.permute.xlu1 %2420 }
 0x4bd   : > { %v2470_v60 = vperm.slane %v2421_v52, %v14584_v9  ;;  %v2425_v6 = vpop.permute.xlu0 %2424 }
 0x4be   : > { %v2489_v2 = vperm.slane %v2425_v6, %v14584_v9  ;;  %v2434_v6 = vsel %vm14344_vm8, 0, %v2433_v29 }
 0x4bf   : > { %v10559_v39 = vperm.slane %v2470_v60, %v14556_v63  ;;  %v2442_v40 = vperm.slane %v2434_v6, %v14556_v63  ;;  %v2471_v50 = vrot.slane %v2470_v60, 4 }
 0x4c0   : > { %v10563_v62 = vperm.slane %v2489_v2, %v14556_v63  ;;  %v2490_v23 = vrot.slane %v2489_v2, 4 }
 0x4c1   : > { %v2481_v25 = vrot.slane %v10559_v39, 4  ;;  %v2546_v35 = vshrl.u32 %v10559_v39, 16 }
 0x4c2   : > { %v2500_v24 = vrot.slane %v10563_v62, 4  ;;  %v2566_v34 = vshrl.u32 %v10563_v62, 16  ;;  %v2491_v19 = vsel %vm14344_vm8, 0, %v2490_v23  ;;  %v2464_v23 = vrot.slane %v10578_v43, 4 }
 0x4c3   : > { %v2547_v22 = vpack.i.b16 0, %v2546_v35  ;;  %v2482_v16 = vsel %vm14344_vm8, 0, %v2481_v25  ;;  %v2511_v25 = vpack.i.b16 0, %v2510_v42  ;;  %v2499_v2 = vperm.slane %v2491_v19, %v14556_v63 }
 0x4c4   : > { %v2567_v4 = vpack.i.b16 0, %v2566_v34  ;;  %v2501_v3 = vsel %vm14344_vm8, 0, %v2500_v24  ;;  %v2550_v32 = vshrl.u32 %v2482_v16, 16  ;;  %v2549_v15 = vpack.i.b16 0, %v2482_v16 }
 0x4c5   : > { %v2586_v30 = vunpack.c.l.b16 %v2547_v22  ;;  %v2569_v10 = vpack.i.b16 0, %v2501_v3  ;;  %v2531_v24 = vpack.i.b16 0, %v2530_v36  ;;  %v2533_v22 = vpack.i.b16 0, %v10578_v43 }
 0x4c6   : > { %v2587_v18 = vunpack.c.l.b16 %v2567_v4  ;;  %v2551_v13 = vpack.i.b16 0, %v2550_v32  ;;  %v2602_v49 = vunpack.c.l.b16 %v2549_v15  ;;  %v2616_v16 = vunpack.c.l.b16 %v2511_v25 }
 0x4c7   : > { %v2590_v55 = vpack.c.b16 %v2586_v30, %v2586_v30  ;;  %v2603_v51 = vunpack.c.l.b16 %v2569_v10  ;;  %v2570_v4 = vshrl.u32 %v2501_v3, 16  ;;  %v2617_v30 = vunpack.c.l.b16 %v2531_v24 }
 0x4c8   : > { %v2591_v20 = vpack.c.b16 %v2587_v18, %v2587_v18  ;;  %v2618_v52 = vunpack.c.l.b16 %v2551_v13  ;;  %v2606_v35 = vpack.c.b16 %v2602_v49, %v2602_v49  ;;  %v2633_v10 = vunpack.c.l.b16 %v2533_v22 }
 0x4c9   : > { %2596 = vrot.lane.b32.xlu1 %v2590_v55, %s8957_s14  ;;  %v2607_v26 = vpack.c.b16 %v2603_v51, %v2603_v51  ;;  %v2514_v32 = vshrl.u32 %v2442_v40, 16  ;;  %v2620_v18 = vpack.c.b16 %v2616_v16, %v2616_v16  ;;  %v2571_v55 = vpack.i.b16 0, %v2570_v4 }
 0x4ca   : > { %2598 = vrot.lane.b32.xlu2 %v2591_v20, %s8957_s14  ;;  %v2622_v34 = vpack.c.b16 %v2618_v52, %v2618_v52  ;;  %v2472_v51 = vsel %vm14344_vm8, 0, %v2471_v50  ;;  %v2621_v58 = vpack.c.b16 %v2617_v30, %v2617_v30  ;;  %v2513_v20 = vpack.i.b16 0, %v2442_v40 }
 0x4cb   : > { %2614 = vrot.lane.b32.xlu0 %v2607_v26, %s8958_s8  ;;  %v2637_v15 = vpack.c.b16 %v2633_v10, %v2633_v10  ;;  %v2515_v26 = vpack.i.b16 0, %v2514_v32  ;;  %v2480_v60 = vperm.slane %v2472_v51, %v14556_v63  ;;  %v2619_v3 = vunpack.c.l.b16 %v2571_v55 }
 0x4cc   : > { %v2632_v13 = vunpack.c.l.b16 %v2513_v20  ;;  %v2574_v29 = vshrl.u32 %v2499_v2, 16  ;;  %v2573_v36 = vpack.i.b16 0, %v2499_v2  ;;  %v2445_v30 = vrot.slane %v2442_v40, 4 }
 0x4cd   : > { %v2648_v57 = vunpack.c.l.b16 %v2515_v26  ;;  %v2623_v38 = vpack.c.b16 %v2619_v3, %v2619_v3  ;;  %v2553_v42 = vpack.i.b16 0, %v2480_v60  ;;  %v2465_v55 = vsel %vm14344_vm8, 0, %v2464_v23 }
 0x4ce   : > { %v2636_v49 = vpack.c.b16 %v2632_v13, %v2632_v13  ;;  %v2575_v6 = vpack.i.b16 0, %v2574_v29  ;;  %v2635_v24 = vunpack.c.l.b16 %v2573_v36  ;;  %v2537_v13 = vpack.i.b16 0, %v2465_v55 }
 0x4cf   : > { %v2652_v52 = vpack.c.b16 %v2648_v57, %v2648_v57  ;;  %v2634_v25 = vunpack.c.l.b16 %v2553_v42 }
 0x4d0   : > { %v2651_v22 = vunpack.c.l.b16 %v2575_v6  ;;  %v2639_v10 = vpack.c.b16 %v2635_v24, %v2635_v24  ;;  %v2665_v42 = vunpack.c.l.b16 %v2537_v13  ;;  %v10634_v13 = vld [vmem:[%s9182_s29 + $0x4] sm:$0x3] }
 0x4d1   : > { %2610 = vrot.lane.b32.xlu1 %v2605_v56, %s8958_s8  ;;  %v2483_v56 = vrot.slane %v2480_v60, 4  ;;  %v2638_v4 = vpack.c.b16 %v2634_v25, %v2634_v25 }
 0x4d2   : > { %2612 = vrot.lane.b32.xlu2 %v2606_v35, %s8958_s8  ;;  %v2534_v35 = vshrl.u32 %v10578_v43, 16  ;;  %v2655_v19 = vpack.c.b16 %v2651_v22, %v2651_v22  ;;  %v2446_v43 = vsel %vm14344_vm8, 0, %v2445_v30  ;;  %v8789_v30 = vld [vmem:[%s9182_s29 + $0xc] sm:$0xf] }
 0x4d3   : > { %2628 = vrot.lane.b32.xlu0 %v2622_v34, %s8959_s30  ;;  %v2554_v34 = vshrl.u32 %v2480_v60, 16  ;;  %v2484_v16 = vsel %vm14344_vm8, 0, %v2483_v56  ;;  %v2517_v40 = vpack.i.b16 0, %v2446_v43  ;;  %v2502_v60 = vrot.slane %v2499_v2, 4 }
 0x4d4   : > { %v2535_v50 = vpack.i.b16 0, %v2534_v35  ;;  %v2518_v36 = vshrl.u32 %v2446_v43, 16  ;;  %v2669_v2 = vpack.c.b16 %v2665_v42, %v2665_v42  ;;  %v2521_v35 = vpack.i.b16 0, %v10549_v28 }
 0x4d5   : > { %v2555_v32 = vpack.i.b16 0, %v2554_v34  ;;  %v2558_v22 = vshrl.u32 %v2484_v16, 16 }
 0x4d6   : > { %v2649_v51 = vunpack.c.l.b16 %v2535_v50  ;;  %v2519_v25 = vpack.i.b16 0, %v2518_v36 }
 0x4d8   : > { %v2653_v26 = vpack.c.b16 %v2649_v51, %v2649_v51  ;;  %v2680_v23 = vunpack.c.l.b16 %v2519_v25 }
 0x4d9   : > { %2624 = vrot.lane.b32.xlu1 %v2620_v18, %s8959_s30  ;;  %v2557_v18 = vpack.i.b16 0, %v2484_v16 }
 0x4da   : > { %2626 = vrot.lane.b32.xlu2 %v2621_v58, %s8959_s30  ;;  %v2650_v58 = vunpack.c.l.b16 %v2555_v32  ;;  %v10616_v32 = vld [vmem:[%s9182_s29 + $0x10] sm:$0x3]  ;;  %v2684_v43 = vpack.c.b16 %v2680_v23, %v2680_v23  ;;  %v8793_v23 = vld [vmem:[%s9182_s29 + $0x24] sm:$0xf] }
 0x4db   : > { %2642 = vrot.lane.b32.xlu0 %v2637_v15, %s8960_s11  ;;  %v2666_v20 = vunpack.c.l.b16 %v2557_v18  ;;  %v2538_v15 = vshrl.u32 %v2465_v55, 16  ;;  %v2696_v18 = vunpack.c.l.b16 %v2521_v35  ;;  %v14593_v55 = vmov 0 }
 0x4dc   : > { %v2654_v3 = vpack.c.b16 %v2650_v58, %v2650_v58  ;;  %v14594_v55 = vsel %vm10620_vm6, 4294967295, %v14593_v55  ;;  %v2559_v58 = vpack.i.b16 0, %v2558_v22 }
 0x4dd   : > { %v2670_v57 = vpack.c.b16 %v2666_v20, %v2666_v20  ;;  %v2539_v29 = vpack.i.b16 0, %v2538_v15  ;;  %14595 = vst [vmem:[#allocation49_spill] sm:$0xff] %v14594_v55  ;;  %v2423_v15 = vpop.permute.xlu2 %2422 }
 0x4de   : > { %v2562_v42 = vshrl.u32 %v2423_v15, 16 }
 0x4e0   : > { %v2563_v35 = vpack.i.b16 0, %v2562_v42 }
 0x4e1   : > { %2630 = vrot.lane.b32.xlu1 %v2623_v38, %s8959_s30  ;;  %v2664_v38 = vunpack.c.l.b16 %v2517_v40  ;;  %v2700_v40 = vpack.c.b16 %v2696_v18, %v2696_v18 }
 0x4e2   : > { %2640 = vrot.lane.b32.xlu2 %v2636_v49, %s8960_s11  ;;  %v2503_v49 = vsel %vm14344_vm8, 0, %v2502_v60  ;;  %v8791_v60 = vld [vmem:[%s9182_s29] sm:$0xf] }
 0x4e3   : > { %2656 = vrot.lane.b32.xlu0 %v2652_v52, %s8961_s7  ;;  %v2681_v52 = vunpack.c.l.b16 %v2539_v29  ;;  %v2668_v6 = vpack.c.b16 %v2664_v38, %v2664_v38  ;;  %v2577_v56 = vpack.i.b16 0, %v2503_v49  ;;  %v2578_v50 = vshrl.u32 %v2503_v49, 16 }
 0x4e4   : > { %v2682_v38 = vunpack.c.l.b16 %v2559_v58  ;;  %v10667_v58 = vld [vmem:[%s9182_s29 + $0x1c] sm:$0x3] }
 0x4e5   : > { %v2685_v24 = vpack.c.b16 %v2681_v52, %v2681_v52  ;;  %v2667_v34 = vunpack.c.l.b16 %v2577_v56  ;;  %v2579_v20 = vpack.i.b16 0, %v2578_v50  ;;  %v2561_v56 = vpack.i.b16 0, %v2423_v15 }
 0x4e6   : > { %v2686_v25 = vpack.c.b16 %v2682_v38, %v2682_v38  ;;  %v8606_v50 = vrot.slane %v8793_v23, 9 }
 0x4e7   : > { %v2671_v51 = vpack.c.b16 %v2667_v34, %v2667_v34  ;;  %v2683_v36 = vunpack.c.l.b16 %v2579_v20  ;;  %v2698_v18 = vunpack.c.l.b16 %v2561_v56  ;;  %v2522_v20 = vshrl.u32 %v10549_v28, 16 }
 0x4e9   : > { %2644 = vrot.lane.b32.xlu1 %v2638_v4, %s8960_s11  ;;  %v10612_v4 = vpop.permute.xlu1 %2426  ;;  %v2687_v34 = vpack.c.b16 %v2683_v36, %v2683_v36  ;;  %v2702_v42 = vpack.c.b16 %v2698_v18, %v2698_v18  ;;  %v2523_v36 = vpack.i.b16 0, %v2522_v20 }
 0x4ea   : > { %2646 = vrot.lane.b32.xlu2 %v2639_v10, %s8960_s11  ;;  %v8604_v10 = vrot.slane %v8789_v30, 9  ;;  %v2581_v16 = vpack.i.b16 0, %v10612_v4  ;;  %v10661_v30 = vld [vmem:[%s9182_s29 + $0x28] sm:$0x3]  ;;  %v2582_v18 = vshrl.u32 %v10612_v4, 16 }
 0x4eb   : > { %2662 = vrot.lane.b32.xlu0 %v2655_v19, %s8961_s7  ;;  %v14314_v19 = vrot.slane %v10616_v32, 5 }
 0x4ec   : > { %v2699_v29 = vunpack.c.l.b16 %v2581_v16 }
 0x4f1   : > { %2658 = vrot.lane.b32.xlu1 %v2653_v26, %s8961_s7  ;;  %v10629_v26 = vsel %vm10620_vm6, %v8604_v10, %v14314_v19  ;;  %v14316_v10 = vrot.slane %v10661_v30, 5 }
 0x4f2   : > { %2660 = vrot.lane.b32.xlu2 %v2654_v3, %s8961_s7  ;;  %v8603_v3 = vrot.slane %v8791_v60, 9  ;;  %v10641_v49 = vperm.slane %v10629_v26, %v14584_v9 }
 0x4f3   : > { %2676 = vrot.lane.b32.xlu0 %v2670_v57, %s8962_s13  ;;  %v14317_v57 = vrot.slane %v10634_v13, 5  ;;  %v10682_v38 = vsel %vm10620_vm6, %v8606_v50, %v14316_v10  ;;  %v2712_v50 = vunpack.c.l.b16 %v2523_v36 }
 0x4f5   : > { %v10647_v52 = vsel %vm10620_vm6, %v8603_v3, %v14317_v57  ;;  %v2542_v3 = vshrl.u32 %v10552_v21, 16 }
 0x4f6   : > { %v10656_v22 = vperm.slane %v10647_v52, %v14584_v9 }
 0x4f9   : > { %2672 = vrot.lane.b32.xlu1 %v2668_v6, %s8962_s13  ;;  %v2541_v6 = vpack.i.b16 0, %v10552_v21 }
 0x4fa   : > { %2674 = vrot.lane.b32.xlu2 %v2669_v2, %s8962_s13  ;;  %v2703_v2 = vpack.c.b16 %v2699_v29, %v2699_v29  ;;  %v10676_v29 = vperm.slane %v10656_v22, %v14556_v63 }
 0x4fb   : > { %2690 = vrot.lane.b32.xlu0 %v2685_v24, %s8963_s10  ;;  %v10652_v24 = vperm.slane %v10641_v49, %v14556_v63  ;;  %v2697_v15 = vunpack.c.l.b16 %v2541_v6 }
 0x4fc   : > { %v2905_v23 = vshrl.u32 %v10676_v29, 16 }
 0x4fd   : > { %v2925_v60 = vshrl.u32 %v10652_v24, 16  ;;  %v2701_v6 = vpack.c.b16 %v2697_v15, %v2697_v15  ;;  %v2861_v10 = vrot.slane %v10652_v24, 4 }
 0x4ff   : > { %v2926_v56 = vpack.i.b16 0, %v2925_v60  ;;  %v2906_v60 = vpack.i.b16 0, %v2905_v23 }
 0x501   : > { %2678 = vrot.lane.b32.xlu1 %v2671_v51, %s8962_s13  ;;  %v8795_v51 = vld [vmem:[%s9182_s29 + $0x18] sm:$0xf]  ;;  %s8973_s29 = smov 38  }
 0x502   : > { %2688 = vrot.lane.b32.xlu2 %v2684_v43, %s8963_s10  ;;  %v8605_v16 = vrot.slane %v8795_v51, 9  ;;  %v14315_v43 = vrot.slane %v10667_v58, 5  ;;  %v2984_v51 = vunpack.c.l.b16 %v2926_v56 }
 0x503   : > { %2704 = vrot.lane.b32.xlu0 %v2700_v40, %s8964_s27  ;;  %v2714_v40 = vunpack.c.l.b16 %v2563_v35  ;;  %v10693_v35 = vperm.slane %v10682_v38, %v14584_v9 }
 0x504   : > { %v10688_v28 = vsel %vm10620_vm6, %v8605_v16, %v14315_v43  ;;  %v2988_v36 = vpack.c.b16 %v2984_v51, %v2984_v51 }
 0x505   : > { %v2718_v21 = vpack.c.b16 %v2714_v40, %v2714_v40  ;;  %v10707_v15 = vperm.slane %v10693_v35, %v14556_v63 }
 0x509   : > { %2692 = vrot.lane.b32.xlu1 %v2686_v25, %s8963_s10  ;;  %v2842_v25 = vrot.slane %v10676_v29, 4 }
 0x50a   : > { %2694 = vrot.lane.b32.xlu2 %v2687_v34, %s8963_s10  ;;  %v10698_v34 = vperm.slane %v10688_v28, %v14584_v9 }
 0x50b   : > { %2710 = vrot.lane.b32.xlu0 %v2703_v2, %s8964_s27  ;;  %v2543_v2 = vpack.i.b16 0, %v2542_v3  ;;  %v2843_v20 = vsel %vm14344_vm8, 0, %v2842_v25  ;;  %v2716_v3 = vpack.c.b16 %v2712_v50, %v2712_v50  ;;  %v2965_v25 = vshrl.u32 %v10707_v15, 16 }
 0x50c   : > { %v10711_v40 = vperm.slane %v10698_v34, %v14556_v63 }
 0x50d   : > { %v2713_v16 = vunpack.c.l.b16 %v2543_v2  ;;  %v2983_v2 = vunpack.c.l.b16 %v2906_v60 }
 0x50e   : > { %v2945_v56 = vshrl.u32 %v10711_v40, 16  ;;  %v2880_v51 = vrot.slane %v10711_v40, 4 }
 0x50f   : > { %v2717_v4 = vpack.c.b16 %v2713_v16, %v2713_v16  ;;  %v2987_v43 = vpack.c.b16 %v2983_v2, %v2983_v2 }
 0x510   : > { %v2946_v16 = vpack.i.b16 0, %v2945_v56  ;;  %v2881_v55 = vsel %vm14344_vm8, 0, %v2880_v51 }
 0x511   : > { %2706 = vrot.lane.b32.xlu1 %v2701_v6, %s8964_s27  ;;  %v2908_v6 = vpack.i.b16 0, %v2843_v20  ;;  %v2949_v56 = vshrl.u32 %v2881_v55, 16  ;;  %v2948_v51 = vpack.i.b16 0, %v2881_v55 }
 0x512   : > { %2708 = vrot.lane.b32.xlu2 %v2702_v42, %s8964_s27  ;;  %v2583_v42 = vpack.i.b16 0, %v2582_v18 }
 0x513   : > { %2724 = vrot.lane.b32.xlu0 %v2718_v21, %s8965_s16  ;;  %v2899_v21 = vrot.slane %v10707_v15, 4  ;;  %v2999_v23 = vunpack.c.l.b16 %v2908_v6  ;;  %v2862_v6 = vsel %vm14344_vm8, 0, %v2861_v10 }
 0x514   : > { %v2715_v19 = vunpack.c.l.b16 %v2583_v42  ;;  %v10719_v50 = vpop.permute.xlu2 %2592  ;;  %v2985_v42 = vunpack.c.l.b16 %v2946_v16 }
 0x515   : > { %v2900_v18 = vsel %vm14344_vm8, 0, %v2899_v21 }
 0x516   : > { %v2719_v57 = vpack.c.b16 %v2715_v19, %v2715_v19  ;;  %v2968_v60 = vpack.i.b16 0, %v2900_v18  ;;  %v2851_v19 = vrot.slane %v10641_v49, 4 }
 0x518   : > { %v3002_v21 = vunpack.c.l.b16 %v2968_v60  ;;  %v2852_v16 = vsel %vm14344_vm8, 0, %v2851_v19  ;;  %v2929_v60 = vshrl.u32 %v2862_v6, 16 }
 0x519   : > { %2720 = vrot.lane.b32.xlu1 %v2716_v3, %s8965_s16  ;;  %v2966_v3 = vpack.i.b16 0, %v2965_v25  ;;  %v2989_v25 = vpack.c.b16 %v2985_v42, %v2985_v42  ;;  %v10738_v42 = vperm.slane %v2852_v16, %v14556_v63  ;;  %v2870_v16 = vrot.slane %v10698_v34, 4 }
 0x51a   : > { %2722 = vrot.lane.b32.xlu2 %v2717_v4, %s8965_s16  ;;  %v3003_v4 = vpack.c.b16 %v2999_v23, %v2999_v23  ;;  %v2928_v23 = vpack.i.b16 0, %v2862_v6  ;;  %v3006_v53 = vpack.c.b16 %v3002_v21, %v3002_v21  ;;  %v10743_v21 = vpop.permute.xlu0 %2594 }
 0x51b   : > { %2993 = vrot.lane.b32.xlu0 %v2988_v36, %s8957_s14  ;;  %v2986_v36 = vunpack.c.l.b16 %v2966_v3  ;;  %v2909_v3 = vshrl.u32 %v2843_v20, 16  ;;  %v2930_v20 = vpack.i.b16 0, %v2929_v60 }
 0x51c   : > { %v3000_v10 = vunpack.c.l.b16 %v2928_v23 }
 0x51d   : > { %v2990_v48 = vpack.c.b16 %v2986_v36, %v2986_v36 }
 0x521   : > { %2726 = vrot.lane.b32.xlu1 %v2719_v57, %s8965_s16  ;;  %v2950_v57 = vpack.i.b16 0, %v2949_v56  ;;  %v2910_v56 = vpack.i.b16 0, %v2909_v3 }
 0x522   : > { %2991 = vrot.lane.b32.xlu2 %v2987_v43, %s8957_s14  ;;  %v2832_v43 = vrot.slane %v10656_v22, 4  ;;  %v3004_v22 = vpack.c.b16 %v3000_v10, %v3000_v10 }
 0x523   : > { %3007 = vrot.lane.b32.xlu0 %v3003_v4, %s8958_s8  ;;  %v3001_v4 = vunpack.c.l.b16 %v2948_v51  ;;  %v3017_v49 = vunpack.c.l.b16 %v2950_v57  ;;  %v3015_v23 = vunpack.c.l.b16 %v2910_v56  ;;  %v2969_v51 = vshrl.u32 %v2900_v18, 16 }
 0x524   : > { %v10729_v2 = vpop.permute.xlu2 %2598  ;;  %v2833_v36 = vsel %vm14344_vm8, 0, %v2832_v43  ;;  %v3016_v57 = vunpack.c.l.b16 %v2930_v20 }
 0x525   : > { %v3005_v19 = vpack.c.b16 %v3001_v4, %v3001_v4  ;;  %v10747_v6 = vperm.slane %v2833_v36, %v14556_v63 }
 0x526   : > { %v3020_v36 = vpack.c.b16 %v3016_v57, %v3016_v57 }
 0x527   : > { %v2913_v10 = vshrl.u32 %v10747_v6, 16  ;;  %v2912_v18 = vpack.i.b16 0, %v10747_v6 }
 0x529   : > { %2995 = vrot.lane.b32.xlu1 %v2989_v25, %s8957_s14  ;;  %v3021_v25 = vpack.c.b16 %v3017_v49, %v3017_v49  ;;  %v2970_v49 = vpack.i.b16 0, %v2969_v51  ;;  %v2914_v34 = vpack.i.b16 0, %v2913_v10 }
 0x52a   : > { %2997 = vrot.lane.b32.xlu2 %v2990_v48, %s8957_s14  ;;  %v2932_v48 = vpack.i.b16 0, %v10738_v42 }
 0x52b   : > { %3013 = vrot.lane.b32.xlu0 %v3006_v53, %s8958_s8  ;;  %v2889_v53 = vrot.slane %v10693_v35, 4  ;;  %v3019_v35 = vpack.c.b16 %v3015_v23, %v3015_v23  ;;  %v3018_v20 = vunpack.c.l.b16 %v2970_v49  ;;  %v3047_v23 = vunpack.c.l.b16 %v2914_v34 }
 0x52c   : > { %v10740_v55 = vpop.permute.xlu2 %2612  ;;  %v3032_v43 = vunpack.c.l.b16 %v2932_v48  ;;  %v3031_v48 = vunpack.c.l.b16 %v2912_v18 }
 0x52d   : > { %v2890_v4 = vsel %vm14344_vm8, 0, %v2889_v53  ;;  %v10758_v60 = vpop.permute.xlu0 %2608  ;;  %v3051_v49 = vpack.c.b16 %v3047_v23, %v3047_v23 }
 0x52e   : > { %v3036_v56 = vpack.c.b16 %v3032_v43, %v3032_v43  ;;  %v3022_v43 = vpack.c.b16 %v3018_v20, %v3018_v20 }
 0x531   : > { %3009 = vrot.lane.b32.xlu1 %v3004_v22, %s8958_s8  ;;  %v2871_v22 = vsel %vm14344_vm8, 0, %v2870_v16 }
 0x532   : > { %3011 = vrot.lane.b32.xlu2 %v3005_v19, %s8958_s8  ;;  %v10763_v19 = vperm.slane %v2890_v4, %v14556_v63  ;;  %v3035_v4 = vpack.c.b16 %v3031_v48, %v3031_v48 }
 0x533   : > { %3027 = vrot.lane.b32.xlu0 %v3021_v25, %s8959_s30  ;;  %v2879_v25 = vperm.slane %v2871_v22, %v14556_v63 }
 0x534   : > { %v10755_v3 = vpop.permute.xlu2 %2626  ;;  %v2973_v51 = vshrl.u32 %v10763_v19, 16 }
 0x535   : > { %v2952_v10 = vpack.i.b16 0, %v2879_v25  ;;  %v2953_v31 = vshrl.u32 %v2879_v25, 16 }
 0x536   : > { %v2974_v22 = vpack.i.b16 0, %v2973_v51  ;;  %v2863_v51 = vrot.slane %v10738_v42, 4 }
 0x537   : > { %v3033_v18 = vunpack.c.l.b16 %v2952_v10  ;;  %v2954_v61 = vpack.i.b16 0, %v2953_v31 }
 0x538   : > { %v3050_v20 = vunpack.c.l.b16 %v2974_v22  ;;  %v2864_v14 = vsel %vm14344_vm8, 0, %v2863_v51 }
 0x539   : > { %3023 = vrot.lane.b32.xlu1 %v3019_v35, %s8959_s30  ;;  %v2972_v35 = vpack.i.b16 0, %v10763_v19  ;;  %v3049_v22 = vunpack.c.l.b16 %v2954_v61  ;;  %v2937_v31 = vshrl.u32 %v2864_v14, 16 }
 0x53a   : > { %3025 = vrot.lane.b32.xlu2 %v3020_v36, %s8959_s30  ;;  %v2882_v36 = vrot.slane %v2879_v25, 4  ;;  %v3054_v25 = vpack.c.b16 %v3050_v20, %v3050_v20 }
 0x53b   : > { %v10768_v53 = vpop.permute.xlu1 %2596  ;;  %3041 = vrot.lane.b32.xlu0 %v3036_v56, %s8960_s11  ;;  %v2933_v56 = vshrl.u32 %v10738_v42, 16  ;;  %v3034_v34 = vunpack.c.l.b16 %v2972_v35  ;;  %v3053_v51 = vpack.c.b16 %v3049_v22, %v3049_v22  ;;  %v2938_v61 = vpack.i.b16 0, %v2937_v31 }
 0x53c   : > { %v10772_v57 = vpop.permute.xlu2 %2640  ;;  %v2883_v23 = vsel %vm14344_vm8, 0, %v2882_v36 }
 0x53d   : > { %v10774_v16 = vpop.permute.xlu0 %2614  ;;  %v2934_v10 = vpack.i.b16 0, %v2933_v56  ;;  %v3038_v47 = vpack.c.b16 %v3034_v34, %v3034_v34  ;;  %v2956_v35 = vpack.i.b16 0, %v2883_v23 }
 0x541   : > { %3029 = vrot.lane.b32.xlu1 %v3022_v43, %s8959_s30  ;;  %v3037_v43 = vpack.c.b16 %v3033_v18, %v3033_v18  ;;  %v3065_v18 = vunpack.c.l.b16 %v2956_v35 }
 0x542   : > { %3039 = vrot.lane.b32.xlu2 %v3035_v4, %s8960_s11  ;;  %v2844_v4 = vrot.slane %v10747_v6, 4 }
 0x543   : > { %v10780_v8 = vpop.permute.xlu1 %2610  ;;  %3055 = vrot.lane.b32.xlu0 %v3051_v49, %s8961_s7  ;;  %v3048_v49 = vunpack.c.l.b16 %v2934_v10  ;;  %v2901_v10 = vrot.slane %v10763_v19, 4 }
 0x544   : > { %v10783_v48 = vpop.permute.xlu2 %2646  ;;  %v2845_v42 = vsel %vm14344_vm8, 0, %v2844_v4 }
 0x545   : > { %v10787_v54 = vpop.permute.xlu0 %2628  ;;  %v3052_v34 = vpack.c.b16 %v3048_v49, %v3048_v49  ;;  %v2916_v20 = vpack.i.b16 0, %v2845_v42  ;;  %v2902_v35 = vsel %vm14344_vm8, 0, %v2901_v10  ;;  %v2917_v0 = vshrl.u32 %v2845_v42, 16 }
 0x546   : > { %v3080_v49 = vunpack.c.l.b16 %v2938_v61  ;;  %v2977_v61 = vshrl.u32 %v2902_v35, 16 }
 0x547   : > { %v3063_v4 = vunpack.c.l.b16 %v2916_v20 }
 0x548   : > { %v2978_v11 = vpack.i.b16 0, %v2977_v61 }
 0x549   : > { %3043 = vrot.lane.b32.xlu1 %v3037_v43, %s8960_s11  ;;  %v2936_v43 = vpack.i.b16 0, %v2864_v14  ;;  %v14596_v14 = vrot.slane %v10634_v13, 5  ;;  %v3067_v31 = vpack.c.b16 %v3063_v4, %v3063_v4  ;;  %v14597_v4 = vrot.slane %v10661_v30, 5 }
 0x54a   : > { %3045 = vrot.lane.b32.xlu2 %v3038_v47, %s8960_s11  ;;  %v3069_v47 = vpack.c.b16 %v3065_v18, %v3065_v18 }
 0x54b   : > { %v10794_v36 = vpop.permute.xlu1 %2624  ;;  %3061 = vrot.lane.b32.xlu0 %v3054_v25, %s8961_s7  ;;  %v3064_v25 = vunpack.c.l.b16 %v2936_v43  ;;  %v10810_v22 = vrot.slane %v14596_v14, 4  ;;  %v3084_v43 = vpack.c.b16 %v3080_v49, %v3080_v49 }
 0x54c   : > { %v10797_v56 = vpop.permute.xlu2 %2660 }
 0x54d   : > { %v10799_v6 = vpop.permute.xlu0 %2642  ;;  %v3068_v20 = vpack.c.b16 %v3064_v25, %v3064_v25  ;;  %v2920_v42 = vpack.i.b16 0, %v10810_v22  ;;  %v10824_v25 = vrot.slane %v14597_v4, 4  ;;  %v2525_v4 = vpack.i.b16 0, %v10526_v33 }
 0x54f   : > { %v3095_v59 = vunpack.c.l.b16 %v2920_v42  ;;  %v2733_v61 = vsel %vm688_vm12, %v2525_v4, %v10743_v21 }
 0x550   : > { %v2743_v33 = vsel %vm14356_vm13, %v2733_v61, %v10780_v8  ;;  %v2565_v8 = vpack.i.b16 0, %v10563_v62 }
 0x551   : > { %3057 = vrot.lane.b32.xlu1 %v3052_v34, %s8961_s7  ;;  %v2976_v34 = vpack.i.b16 0, %v2902_v35  ;;  %v2980_v35 = vpack.i.b16 0, %v10824_v25 }
 0x552   : > { %3059 = vrot.lane.b32.xlu2 %v3053_v51, %s8961_s7  ;;  %v2918_v51 = vpack.i.b16 0, %v2917_v0  ;;  %v2739_v62 = vsel %vm688_vm12, %v2565_v8, %v10729_v2 }
 0x553   : > { %v10805_v17 = vpop.permute.xlu1 %2630  ;;  %3075 = vrot.lane.b32.xlu0 %v3069_v47, %s8962_s13  ;;  %v3066_v10 = vunpack.c.l.b16 %v2976_v34  ;;  %v2957_v47 = vshrl.u32 %v2883_v23, 16 }
 0x554   : > { %v10812_v19 = vpop.permute.xlu2 %2674  ;;  %v3079_v13 = vunpack.c.l.b16 %v2918_v51  ;;  %v14599_v51 = vrot.slane %v10667_v58, 5  ;;  %v3098_v58 = vunpack.c.l.b16 %v2980_v35 }
 0x555   : > { %v10814_v18 = vpop.permute.xlu0 %2656  ;;  %v2958_v34 = vpack.i.b16 0, %v2957_v47 }
 0x556   : > { %v3083_v23 = vpack.c.b16 %v3079_v13, %v3079_v13  ;;  %v10833_v1 = vrot.slane %v14599_v51, 4  ;;  %v3102_v51 = vpack.c.b16 %v3098_v58, %v3098_v58 }
 0x557   : > { %v3081_v30 = vunpack.c.l.b16 %v2958_v34 }
 0x558   : > { %v2961_v13 = vshrl.u32 %v10833_v1, 16  ;;  %v2960_v35 = vpack.i.b16 0, %v10833_v1 }
 0x559   : > { %3071 = vrot.lane.b32.xlu1 %v3067_v31, %s8962_s13  ;;  %v3070_v31 = vpack.c.b16 %v3066_v10, %v3066_v10  ;;  %v3082_v10 = vunpack.c.l.b16 %v2978_v11 }
 0x55a   : > { %3073 = vrot.lane.b32.xlu2 %v3068_v20, %s8962_s13  ;;  %v3099_v20 = vpack.c.b16 %v3095_v59, %v3095_v59  ;;  %v2505_v59 = vpack.i.b16 0, %v10545_v41  ;;  %v3085_v41 = vpack.c.b16 %v3081_v30, %v3081_v30 }
 0x55b   : > { %v10819_v14 = vpop.permute.xlu1 %2644  ;;  %3089 = vrot.lane.b32.xlu0 %v3084_v43, %s8963_s10  ;;  %v14600_v43 = vrot.slane %v10616_v32, 5 }
 0x55c   : > { %v10826_v0 = vpop.permute.xlu2 %2688  ;;  %v2730_v32 = vsel %vm688_vm12, %v2505_v59, %v10719_v50  ;;  %v2751_v50 = vsel %vm710_vm14, %v2743_v33, %v10755_v3  ;;  %v3097_v59 = vunpack.c.l.b16 %v2960_v35 }
 0x55d   : > { %14598 = vst [vmem:[#allocation45_spill] sm:$0xff] %v10826_v0  ;;  %v10828_v49 = vpop.permute.xlu0 %2662  ;;  %v10838_v42 = vrot.slane %v14600_v43, 4  ;;  %v2962_v43 = vpack.i.b16 0, %v2961_v13  ;;  %v2759_v30 = vsel %vm719_vm15, %v2751_v50, %v10799_v6 }
 0x55f   : > { %v2940_v34 = vpack.i.b16 0, %v10838_v42  ;;  %v2941_v3 = vshrl.u32 %v10838_v42, 16  ;;  %v3113_v13 = vunpack.c.l.b16 %v2962_v43  ;;  %v2545_v43 = vpack.i.b16 0, %v10559_v39 }
 0x561   : > { %3077 = vrot.lane.b32.xlu1 %v3070_v31, %s8962_s13  ;;  %v3096_v4 = vunpack.c.l.b16 %v2940_v34 }
 0x562   : > { %3087 = vrot.lane.b32.xlu2 %v3083_v23, %s8963_s10  ;;  %v2741_v23 = vsel %vm14356_vm13, %v2730_v32, %v10758_v60  ;;  %v2921_v60 = vshrl.u32 %v10810_v22, 16 }
 0x563   : > { %v2659_v47 = vpop.permute.xlu1 %2658  ;;  %3103 = vrot.lane.b32.xlu0 %v3099_v20, %s8964_s27  ;;  %v3086_v20 = vpack.c.b16 %v3082_v10, %v3082_v10  ;;  %v2749_v21 = vsel %vm710_vm14, %v2741_v23, %v10794_v36 }
 0x564   : > { %v10847_v31 = vpop.permute.xlu2 %2694  ;;  %v2757_v10 = vsel %vm719_vm15, %v2749_v21, %v10772_v57  ;;  %v2767_v36 = vsel %vm728_vm0, %v2759_v30, %v2659_v47  ;;  %v2747_v57 = vsel %vm14356_vm13, %v2739_v62, %v10774_v16  ;;  %v3101_v16 = vpack.c.b16 %v3097_v59, %v3097_v59 }
 0x565   : > { %14601 = vst [vmem:[#allocation48_spill] sm:$0xff] %v10847_v31  ;;  %v10853_v11 = vpop.permute.xlu0 %2676  ;;  %v2765_v6 = vsel %vm728_vm0, %v2757_v10, %v10814_v18  ;;  %v2775_v32 = vsel %vm737_vm1, %v2767_v36, %v10812_v19  ;;  %v3100_v18 = vpack.c.b16 %v3096_v4, %v3096_v4  ;;  %v2755_v35 = vsel %vm710_vm14, %v2747_v57, %v10805_v17 }
 0x566   : > { %v14604_v21 = vmov 0  ;;  %v2981_v4 = vshrl.u32 %v10824_v25, 16  ;;  %v2736_v17 = vsel %vm688_vm12, %v2545_v43, %v10768_v53 }
 0x567   : > { %v14605_v21 = vsel %vm10894_vm3, 4294967295, %v14604_v21  ;;  %v2745_v62 = vsel %vm14356_vm13, %v2736_v17, %v10740_v55 }
 0x568   : > { %14606 = vst [vmem:[#allocation88_spill] sm:$0xff] %v14605_v21  ;;  %v2753_v57 = vsel %vm710_vm14, %v2745_v62, %v10787_v54 }
 0x569   : > { %3091 = vrot.lane.b32.xlu1 %v3085_v41, %s8963_s10  ;;  %v2922_v41 = vpack.i.b16 0, %v2921_v60  ;;  %v2763_v60 = vsel %vm719_vm15, %v2755_v35, %v10783_v48 }
 0x56a   : > { %3093 = vrot.lane.b32.xlu2 %v3086_v20, %s8963_s10  ;;  %v2942_v20 = vpack.i.b16 0, %v2941_v3  ;;  %v2771_v36 = vsel %vm728_vm0, %v2763_v60, %v10828_v49 }
 0x56b   : > { %v2673_v58 = vpop.permute.xlu1 %2672  ;;  %3109 = vrot.lane.b32.xlu0 %v3102_v51, %s8964_s27  ;;  %v3117_v51 = vpack.c.b16 %v3113_v13, %v3113_v13  ;;  %v3111_v30 = vunpack.c.l.b16 %v2922_v41  ;;  %v2982_v13 = vpack.i.b16 0, %v2981_v4 }
 0x56c   : > { %v2773_v47 = vsel %vm737_vm1, %v2765_v6, %v2673_v58  ;;  %v10881_v61 = vpop.permute.xlu2 %2708  ;;  %v3112_v10 = vunpack.c.l.b16 %v2942_v20 }
 0x56d   : > { %14602 = vst [vmem:[#allocation54_spill] sm:$0xff] %v10881_v61  ;;  %v2781_v2 = vsel %vm14355_vm2, %v2773_v47, %v10826_v0  ;;  %v10887_v33 = vpop.permute.xlu0 %2690  ;;  %v3115_v49 = vpack.c.b16 %v3111_v30, %v3111_v30  ;;  %v3114_v55 = vunpack.c.l.b16 %v2982_v13 }
 0x56e   : > { %14603 = vst [vmem:[#allocation44_spill] sm:$0xff] %v10887_v33  ;;  %v4075_v34 = vshll.u32 %v2781_v2, 16  ;;  %v2783_v23 = vsel %vm14355_vm2, %v2775_v32, %v10887_v33  ;;  %v3116_v32 = vpack.c.b16 %v3112_v10, %v3112_v10  ;;  %v2761_v2 = vsel %vm719_vm15, %v2753_v57, %v10819_v14 }
 0x56f   : > { %v4081_v19 = vshll.u32 %v2783_v23, 16  ;;  %v2769_v41 = vsel %vm728_vm0, %v2761_v2, %v10797_v56  ;;  %v3118_v35 = vpack.c.b16 %v3114_v55, %v3114_v55 }
 0x570   : > { %v10899_v50 = vrot.slane %v4075_v34, 6  ;;  %v2777_v54 = vsel %vm737_vm1, %v2769_v41, %v10853_v11 }
 0x571   : > { %v10901_v8 = vrot.slane %v4081_v19, 6  ;;  %3105 = vrot.lane.b32.xlu1 %v3100_v18, %s8964_s27 }
 0x572   : > { %14607 = vst [vmem:[#allocation89_spill] sm:$0xff] %v10899_v50  ;;  %3107 = vrot.lane.b32.xlu2 %v3101_v16, %s8964_s27 }
 0x573   : > { %14608 = vst [vmem:[#allocation90_spill] sm:$0xff] %v10901_v8  ;;  %v2679_v53 = vpop.permute.xlu1 %2678  ;;  %3123 = vrot.lane.b32.xlu0 %v3117_v51, %s8965_s16 }
 0x574   : > { %v2779_v48 = vsel %vm737_vm1, %v2771_v36, %v2679_v53  ;;  %v10922_v3 = vpop.permute.xlu2 %2722 }
 0x575   : > { %14609 = vst [vmem:[#allocation91_spill] sm:$0xff] %v10922_v3  ;;  %v2787_v6 = vsel %vm14355_vm2, %v2779_v48, %v10847_v31  ;;  %v10928_v58 = vpop.permute.xlu0 %2704 }
 0x576   : > { %14610 = vst [vmem:[#allocation92_spill] sm:$0xff] %v10928_v58  ;;  %v4093_v47 = vshll.u32 %v2787_v6, 16 }
 0x578   : > { %v10934_v18 = vrot.slane %v4093_v47, 6 }
 0x579   : > { %3119 = vrot.lane.b32.xlu1 %v3115_v49, %s8965_s16 }
 0x57a   : > { %14611 = vst [vmem:[#allocation93_spill] sm:$0xff] %v10934_v18  ;;  %3121 = vrot.lane.b32.xlu2 %v3116_v32, %s8965_s16 }
 0x57b   : > { %v10946_v23 = vpop.permute.xlu1 %2692  ;;  %3205 = vrot.lane.b32.xlu0 %v10810_v22, %s8966_s17 }
 0x57c   : > { %14612 = vst [vmem:[#allocation94_spill] sm:$0xff] %v10946_v23  ;;  %v2785_v14 = vsel %vm14355_vm2, %v2777_v54, %v10946_v23  ;;  %v10952_v16 = vpop.permute.xlu2 %2991 }
 0x57d   : > { %v4087_v56 = vshll.u32 %v2785_v14, 16  ;;  %v10954_v20 = vpop.permute.xlu0 %2710 }
 0x57e   : > { %14613 = vst [vmem:[#allocation95_spill] sm:$0xff] %v10954_v20 }
 0x57f   : > { %v10956_v19 = vrot.slane %v4087_v56, 6 }
 0x581   : > { %14614 = vst [vmem:[#allocation96_spill] sm:$0xff] %v10956_v19  ;;  %3125 = vrot.lane.b32.xlu1 %v3118_v35, %s8965_s16 }
 0x582   : > { %3203 = vrot.lane.b32.xlu2 %v10647_v52, %s8966_s17 }
 0x583   : > { %v10965_v51 = vpop.permute.xlu1 %2706  ;;  %3211 = vrot.lane.b32.xlu0 %v10688_v28, %s8966_s17 }
 0x584   : > { %14615 = vst [vmem:[#allocation97_spill] sm:$0xff] %v10965_v51  ;;  %v10969_v43 = vpop.permute.xlu2 %2997 }
 0x585   : > { %v10971_v30 = vpop.permute.xlu0 %2724 }
 0x586   : > { %14616 = vst [vmem:[#allocation98_spill] sm:$0xff] %v10971_v30 }
 0x589   : > { %3207 = vrot.lane.b32.xlu1 %v10629_v26, %s8966_s17 }
 0x58a   : > { %3209 = vrot.lane.b32.xlu2 %v10838_v42, %s8966_s17 }
 0x58b   : > { %v10977_v4 = vpop.permute.xlu1 %2720  ;;  %3217 = vrot.lane.b32.xlu0 %v10824_v25, %s8966_s17 }
 0x58c   : > { %14617 = vst [vmem:[#allocation99_spill] sm:$0xff] %v10977_v4  ;;  %v10981_v17 = vpop.permute.xlu2 %3011 }
 0x58d   : > { %14618 = vst [vmem:[#allocation100_spill] sm:$0xff] %v10981_v17  ;;  %v10983_v60 = vpop.permute.xlu0 %2993 }
 0x591   : > { %3213 = vrot.lane.b32.xlu1 %v10833_v1, %s8966_s17 }
 0x592   : > { %3215 = vrot.lane.b32.xlu2 %v10682_v38, %s8966_s17 }
 0x593   : > { %v10989_v10 = vpop.permute.xlu1 %2726 }
 0x594   : > { %14619 = vst [vmem:[#allocation101_spill] sm:$0xff] %v10989_v10  ;;  %v10991_v36 = vpop.permute.xlu2 %3025 }
 0x595   : > { %v10993_v53 = vpop.permute.xlu0 %3007 }
 0x59b   : > { %v10995_v48 = vpop.permute.xlu1 %2995 }
 0x59c   : > { %v10997_v62 = vpop.permute.xlu2 %3039 }
 0x59d   : > { %v10999_v6 = vpop.permute.xlu0 %3013 }
 0x5a3   : > { %v11001_v49 = vpop.permute.xlu1 %3009 }
 0x5a4   : > { %v11003_v13 = vpop.permute.xlu2 %3045 }
 0x5a5   : > { %v11005_v57 = vpop.permute.xlu0 %3027 }
 0x5a6   : > { %14620 = vst [vmem:[#allocation102_spill] sm:$0xff] %v11005_v57 }
 0x5ab   : > { %v11007_v47 = vpop.permute.xlu1 %3023 }
 0x5ac   : > { %v11009_v32 = vpop.permute.xlu2 %3059 }
 0x5ad   : > { %14621 = vst [vmem:[#allocation103_spill] sm:$0xff] %v11009_v32  ;;  %v11011_v2 = vpop.permute.xlu0 %3041 }
 0x5b3   : > { %v11013_v55 = vpop.permute.xlu1 %3029 }
 0x5b4   : > { %v11015_v41 = vpop.permute.xlu2 %3073 }
 0x5b5   : > { %v11017_v54 = vpop.permute.xlu0 %3055 }
 0x5bb   : > { %v11019_v14 = vpop.permute.xlu1 %3043 }
 0x5bc   : > { %14622 = vst [vmem:[#allocation104_spill] sm:$0xff] %v11019_v14  ;;  %v11021_v56 = vpop.permute.xlu2 %3087 }
 0x5bd   : > { %v11023_v35 = vpop.permute.xlu0 %3061 }
 0x5c3   : > { %v11025_v11 = vpop.permute.xlu1 %3057 }
 0x5c4   : > { %v11027_v34 = vpop.permute.xlu2 %3093 }
 0x5c5   : > { %14623 = vst [vmem:[#allocation105_spill] sm:$0xff] %v11027_v34  ;;  %v11029_v39 = vpop.permute.xlu0 %3075 }
 0x5c6   : > { %14624 = vst [vmem:[#allocation106_spill] sm:$0xff] %v11029_v39 }
 0x5cb   : > { %v11031_v59 = vpop.permute.xlu1 %3071 }
 0x5cc   : > { %v11033_v30 = vpop.permute.xlu2 %3107 }
 0x5cd   : > { %14625 = vst [vmem:[#allocation107_spill] sm:$0xff] %v11033_v30  ;;  %v11035_v23 = vpop.permute.xlu0 %3089 }
 0x5ce   : > { %14626 = vst [vmem:[#allocation108_spill] sm:$0xff] %v11035_v23 }
 0x5d3   : > { %v11037_v61 = vpop.permute.xlu1 %3077 }
 0x5d4   : > { %14627 = vst [vmem:[#allocation109_spill] sm:$0xff] %v11037_v61  ;;  %v11039_v10 = vpop.permute.xlu2 %3121 }
 0x5d5   : > { %14628 = vst [vmem:[#allocation110_spill] sm:$0xff] %v11039_v10  ;;  %v11041_v31 = vpop.permute.xlu0 %3103 }
 0x5d6   : > { %14629 = vst [vmem:[#allocation111_spill] sm:$0xff] %v11041_v31 }
 0x5db   : > { %v11043_v20 = vpop.permute.xlu1 %3091 }
 0x5dc   : > { %14630 = vst [vmem:[#allocation112_spill] sm:$0xff] %v11043_v20  ;;  %v3204_v3 = vpop.permute.xlu2 %3203 }
 0x5dd   : > { %v3223_v33 = vperm.slane %v3204_v3, %v14584_v9  ;;  %v11046_v51 = vpop.permute.xlu0 %3109 }
 0x5de   : > { %14631 = vst [vmem:[#allocation113_spill] sm:$0xff] %v11046_v51 }
 0x5df   : > { %v11049_v4 = vperm.slane %v3223_v33, %v14556_v63 }
 0x5e1   : > { %v3297_v30 = vshrl.u32 %v11049_v4, 16 }
 0x5e3   : > { %v11052_v0 = vpop.permute.xlu1 %3105  ;;  %v3298_v58 = vpack.i.b16 0, %v3297_v30 }
 0x5e4   : > { %14632 = vst [vmem:[#allocation114_spill] sm:$0xff] %v11052_v0  ;;  %v11054_v27 = vpop.permute.xlu2 %3209 }
 0x5e5   : > { %v11056_v10 = vpop.permute.xlu0 %3123  ;;  %v3375_v31 = vunpack.c.l.b16 %v3298_v58 }
 0x5e6   : > { %14633 = vst [vmem:[#allocation115_spill] sm:$0xff] %v11056_v10 }
 0x5e7   : > { %v3379_v46 = vpack.c.b16 %v3375_v31, %v3375_v31 }
 0x5e9   : > { %3383 = vrot.lane.b32.xlu1 %v3379_v46, %s8957_s14 }
 0x5eb   : > { %v11059_v12 = vpop.permute.xlu1 %3119 }
 0x5ec   : > { %14634 = vst [vmem:[#allocation116_spill] sm:$0xff] %v11059_v12  ;;  %v3216_v3 = vpop.permute.xlu2 %3215 }
 0x5ed   : > { %v3280_v51 = vperm.slane %v3216_v3, %v14584_v9  ;;  %v11062_v37 = vpop.permute.xlu0 %3205 }
 0x5ef   : > { %v11065_v19 = vperm.slane %v3280_v51, %v14556_v63 }
 0x5f1   : > { %v3357_v30 = vshrl.u32 %v11065_v19, 16 }
 0x5f3   : > { %v11068_v0 = vpop.permute.xlu1 %3125  ;;  %v3358_v5 = vpack.i.b16 0, %v3357_v30 }
 0x5f4   : > { %14635 = vst [vmem:[#allocation117_spill] sm:$0xff] %v11068_v0 }
 0x5f5   : > { %v3212_v10 = vpop.permute.xlu0 %3211  ;;  %v3378_v58 = vunpack.c.l.b16 %v3358_v5  ;;  %v3234_v5 = vrot.slane %v11049_v4, 4 }
 0x5f6   : > { %v3261_v31 = vperm.slane %v3212_v10, %v14584_v9 }
 0x5f7   : > { %v3382_v46 = vpack.c.b16 %v3378_v58, %v3378_v58  ;;  %v3224_v58 = vrot.slane %v3223_v33, 4 }
 0x5f8   : > { %v11072_v12 = vperm.slane %v3261_v31, %v14556_v63  ;;  %v3262_v8 = vrot.slane %v3261_v31, 4 }
 0x5f9   : > { %3389 = vrot.lane.b32.xlu1 %v3382_v46, %s8957_s14 }
 0x5fa   : > { %14636 = vst [vmem:[#allocation118_spill] sm:$0xff] %v11072_v12  ;;  %v3272_v3 = vrot.slane %v11072_v12, 4  ;;  %v3337_v20 = vshrl.u32 %v11072_v12, 16  ;;  %v3281_v12 = vrot.slane %v3280_v51, 4 }
 0x5fb   : > { %v3208_v18 = vpop.permute.xlu1 %3207 }
 0x5fc   : > { %v3242_v44 = vperm.slane %v3208_v18, %v14584_v9  ;;  %v3338_v39 = vpack.i.b16 0, %v3337_v20  ;;  %v11079_v30 = vsel %vm14344_vm8, 0, %v3272_v3  ;;  %v3235_v20 = vsel %vm14344_vm8, 0, %v3234_v5 }
 0x5fd   : > { %v3340_v10 = vpack.i.b16 0, %v11079_v30  ;;  %v3225_v3 = vsel %vm14344_vm8, 0, %v3224_v58  ;;  %v3301_v7 = vshrl.u32 %v3235_v20, 16  ;;  %v3300_v61 = vpack.i.b16 0, %v3235_v20 }
 0x5fe   : > { %v11084_v0 = vperm.slane %v3242_v44, %v14556_v63  ;;  %v3377_v46 = vunpack.c.l.b16 %v3338_v39  ;;  %v11094_v17 = vperm.slane %v3225_v3, %v14556_v63  ;;  %v3282_v3 = vsel %vm14344_vm8, 0, %v3281_v12 }
 0x5ff   : > { %v3393_v32 = vunpack.c.l.b16 %v3340_v10 }
 0x600   : > { %v3253_v14 = vrot.slane %v11084_v0, 4  ;;  %v3317_v57 = vshrl.u32 %v11084_v0, 16  ;;  %v3381_v34 = vpack.c.b16 %v3377_v46, %v3377_v46 }
 0x601   : > { %v3397_v18 = vpack.c.b16 %v3393_v32, %v3393_v32  ;;  %v3291_v32 = vrot.slane %v11065_v19, 4 }
 0x602   : > { %3387 = vrot.lane.b32.xlu0 %v3381_v34, %s8957_s14  ;;  %v3318_v9 = vpack.i.b16 0, %v3317_v57  ;;  %v3254_v33 = vsel %vm14344_vm8, 0, %v3253_v14  ;;  %v3302_v14 = vpack.i.b16 0, %v3301_v7  ;;  %v3263_v7 = vsel %vm14344_vm8, 0, %v3262_v8 }
 0x603   : > { %3403 = vrot.lane.b32.xlu1 %v3397_v18, %s8958_s8  ;;  %v3320_v50 = vpack.i.b16 0, %v3254_v33  ;;  %v3321_v39 = vshrl.u32 %v3254_v33, 16  ;;  %v3304_v33 = vpack.i.b16 0, %v11094_v17 }
 0x604   : > { %v3376_v10 = vunpack.c.l.b16 %v3318_v9  ;;  %v3292_v9 = vsel %vm14344_vm8, 0, %v3291_v32  ;;  %v3407_v51 = vunpack.c.l.b16 %v3302_v14  ;;  %v11109_v32 = vperm.slane %v3263_v7, %v14556_v63 }
 0x605   : > { %v3392_v46 = vunpack.c.l.b16 %v3320_v50  ;;  %v3322_v5 = vpack.i.b16 0, %v3321_v39  ;;  %v3391_v50 = vunpack.c.l.b16 %v3300_v61  ;;  %v3361_v20 = vshrl.u32 %v3292_v9, 16 }
 0x606   : > { %v3380_v58 = vpack.c.b16 %v3376_v10, %v3376_v10  ;;  %v11104_v39 = vperm.slane %v3282_v3, %v14556_v63  ;;  %v3423_v10 = vunpack.c.l.b16 %v3304_v33  ;;  %v3411_v12 = vpack.c.b16 %v3407_v51, %v3407_v51 }
 0x607   : > { %v3396_v34 = vpack.c.b16 %v3392_v46, %v3392_v46  ;;  %v3408_v57 = vunpack.c.l.b16 %v3322_v5  ;;  %v3395_v46 = vpack.c.b16 %v3391_v50, %v3391_v50  ;;  %v3360_v5 = vpack.i.b16 0, %v3292_v9 }
 0x608   : > { %3385 = vrot.lane.b32.xlu2 %v3380_v58, %s8957_s14  ;;  %v3243_v58 = vrot.slane %v3242_v44, 4  ;;  %v3362_v31 = vpack.i.b16 0, %v3361_v20  ;;  %v3427_v61 = vpack.c.b16 %v3423_v10, %v3423_v10  ;;  %v3341_v14 = vshrl.u32 %v11079_v30, 16 }
 0x609   : > { %v3412_v18 = vpack.c.b16 %v3408_v57, %v3408_v57  ;;  %v3394_v57 = vunpack.c.l.b16 %v3360_v5  ;;  %v3345_v33 = vshrl.u32 %v11109_v32, 16  ;;  %v3344_v20 = vpack.i.b16 0, %v11109_v32 }
 0x60a   : > { %3401 = vrot.lane.b32.xlu0 %v3396_v34, %s8958_s8  ;;  %v3364_v34 = vpack.i.b16 0, %v11104_v39  ;;  %v3244_v8 = vsel %vm14344_vm8, 0, %v3243_v58  ;;  %v3410_v44 = vunpack.c.l.b16 %v3362_v31  ;;  %v3342_v50 = vpack.i.b16 0, %v3341_v14 }
 0x60b   : > { %3417 = vrot.lane.b32.xlu1 %v3412_v18, %s8959_s30  ;;  %v3252_v9 = vperm.slane %v3244_v8, %v14556_v63  ;;  %v3398_v3 = vpack.c.b16 %v3394_v57, %v3394_v57  ;;  %v3346_v7 = vpack.i.b16 0, %v3345_v33  ;;  %v3425_v5 = vunpack.c.l.b16 %v3344_v20 }
 0x60c   : > { %v3426_v18 = vunpack.c.l.b16 %v3364_v34  ;;  %v3414_v51 = vpack.c.b16 %v3410_v44, %v3410_v44  ;;  %v3236_v31 = vrot.slane %v11094_v17, 4 }
 0x60d   : > { %v3255_v30 = vrot.slane %v3252_v9, 4  ;;  %v3325_v58 = vshrl.u32 %v3252_v9, 16  ;;  %v3324_v34 = vpack.i.b16 0, %v3252_v9  ;;  %v3429_v14 = vpack.c.b16 %v3425_v5, %v3425_v5 }
 0x60e   : > { %v3430_v10 = vpack.c.b16 %v3426_v18, %v3426_v18 }
 0x60f   : > { %v3256_v57 = vsel %vm14344_vm8, 0, %v3255_v30  ;;  %v3326_v8 = vpack.i.b16 0, %v3325_v58  ;;  %v3424_v33 = vunpack.c.l.b16 %v3324_v34 }
 0x610   : > { %3399 = vrot.lane.b32.xlu2 %v3395_v46, %s8958_s8  ;;  %v3409_v46 = vunpack.c.l.b16 %v3342_v50  ;;  %v3328_v18 = vpack.i.b16 0, %v3256_v57  ;;  %v3237_v50 = vsel %vm14344_vm8, 0, %v3236_v31  ;;  %v3365_v31 = vshrl.u32 %v11104_v39, 16 }
 0x611   : > { %v3309_v9 = vshrl.u32 %v3237_v50, 16  ;;  %v3308_v5 = vpack.i.b16 0, %v3237_v50 }
 0x612   : > { %3415 = vrot.lane.b32.xlu0 %v3411_v12, %s8959_s30  ;;  %v3441_v12 = vunpack.c.l.b16 %v3346_v7  ;;  %v3456_v20 = vunpack.c.l.b16 %v3328_v18  ;;  %v3428_v7 = vpack.c.b16 %v3424_v33, %v3424_v33  ;;  %v3366_v33 = vpack.i.b16 0, %v3365_v31 }
 0x613   : > { %3431 = vrot.lane.b32.xlu1 %v3427_v61, %s8960_s11  ;;  %v3413_v61 = vpack.c.b16 %v3409_v46, %v3409_v46  ;;  %v3455_v34 = vunpack.c.l.b16 %v3308_v5 }
 0x614   : > { %v3445_v44 = vpack.c.b16 %v3441_v12, %v3441_v12  ;;  %v3460_v58 = vpack.c.b16 %v3456_v20, %v3456_v20  ;;  %v3310_v12 = vpack.i.b16 0, %v3309_v9 }
 0x618   : > { %3405 = vrot.lane.b32.xlu2 %v3398_v3, %s8958_s8  ;;  %v3305_v3 = vshrl.u32 %v11094_v17, 16 }
 0x61a   : > { %3421 = vrot.lane.b32.xlu0 %v3414_v51, %s8959_s30  ;;  %v3440_v51 = vunpack.c.l.b16 %v3326_v8  ;;  %v3306_v30 = vpack.i.b16 0, %v3305_v3  ;;  %v3471_v8 = vunpack.c.l.b16 %v3310_v12  ;;  %v3459_v3 = vpack.c.b16 %v3455_v34, %v3455_v34 }
 0x61b   : > { %3437 = vrot.lane.b32.xlu1 %v3430_v10, %s8960_s11  ;;  %v3293_v10 = vrot.slane %v11104_v39, 4  ;;  %v3442_v39 = vunpack.c.l.b16 %v3366_v33  ;;  %v3329_v34 = vshrl.u32 %v3256_v57, 16 }
 0x61c   : > { %v3444_v46 = vpack.c.b16 %v3440_v51, %v3440_v51  ;;  %v3439_v17 = vunpack.c.l.b16 %v3306_v30  ;;  %v3475_v51 = vpack.c.b16 %v3471_v8, %v3471_v8 }
 0x61d   : > { %v3330_v33 = vpack.i.b16 0, %v3329_v34 }
 0x61e   : > { %v3443_v18 = vpack.c.b16 %v3439_v17, %v3439_v17 }
 0x620   : > { %3419 = vrot.lane.b32.xlu2 %v3413_v61, %s8959_s30  ;;  %v3294_v61 = vsel %vm14344_vm8, 0, %v3293_v10 }
 0x621   : > { %v3368_v50 = vpack.i.b16 0, %v3294_v61 }
 0x622   : > { %3435 = vrot.lane.b32.xlu0 %v3429_v14, %s8960_s11  ;;  %v3274_v14 = vrot.slane %v11109_v32, 4 }
 0x623   : > { %3451 = vrot.lane.b32.xlu1 %v3445_v44, %s8961_s7  ;;  %v3369_v44 = vshrl.u32 %v3294_v61, 16  ;;  %v3458_v10 = vunpack.c.l.b16 %v3368_v50  ;;  %v3332_v50 = vpack.i.b16 0, %v11054_v27 }
 0x624   : > { %v3275_v9 = vsel %vm14344_vm8, 0, %v3274_v14  ;;  %vm11254_vm8 = vmand %vm14346_vm7, %vm1573_vm9  ;;  %vm14669_vm9 = vcmask 1047556  }
 0x625   : > { %v3370_v20 = vpack.i.b16 0, %v3369_v44  ;;  %v3349_v32 = vshrl.u32 %v3275_v9, 16  ;;  %v3348_v5 = vpack.i.b16 0, %v3275_v9  ;;  %v3462_v12 = vpack.c.b16 %v3458_v10, %v3458_v10 }
 0x626   : > { %v3333_v44 = vshrl.u32 %v11054_v27, 16  ;;  %v3472_v9 = vunpack.c.l.b16 %v3330_v33  ;;  %v3488_v57 = vunpack.c.l.b16 %v3332_v50 }
 0x627   : > { %v3474_v30 = vunpack.c.l.b16 %v3370_v20  ;;  %v3350_v17 = vpack.i.b16 0, %v3349_v32  ;;  %v3457_v61 = vunpack.c.l.b16 %v3348_v5  ;;  %v3312_v32 = vpack.i.b16 0, %v11062_v37 }
 0x628   : > { %3433 = vrot.lane.b32.xlu2 %v3428_v7, %s8960_s11  ;;  %v3214_v7 = vpop.permute.xlu1 %3213  ;;  %v3334_v20 = vpack.i.b16 0, %v3333_v44  ;;  %v3492_v5 = vpack.c.b16 %v3488_v57, %v3488_v57 }
 0x629   : > { %v3478_v31 = vpack.c.b16 %v3474_v30, %v3474_v30  ;;  %v3473_v8 = vunpack.c.l.b16 %v3350_v17  ;;  %v3476_v30 = vpack.c.b16 %v3472_v9, %v3472_v9  ;;  %v3353_v44 = vshrl.u32 %v3214_v7, 16 }
 0x62a   : > { %3449 = vrot.lane.b32.xlu0 %v3444_v46, %s8961_s7  ;;  %v3446_v46 = vpack.c.b16 %v3442_v39, %v3442_v39  ;;  %v3313_v39 = vshrl.u32 %v11062_v37, 16  ;;  %v3504_v10 = vunpack.c.l.b16 %v3334_v20 }
 0x62b   : > { %3465 = vrot.lane.b32.xlu1 %v3460_v58, %s8962_s13  ;;  %v3352_v58 = vpack.i.b16 0, %v3214_v7 }
 0x62c   : > { %v3508_v27 = vpack.c.b16 %v3504_v10, %v3504_v10 }
 0x62d   : > { %v3489_v14 = vunpack.c.l.b16 %v3352_v58  ;;  %v3314_v58 = vpack.i.b16 0, %v3313_v39 }
 0x630   : > { %3447 = vrot.lane.b32.xlu2 %v3443_v18, %s8961_s7  ;;  %v3461_v18 = vpack.c.b16 %v3457_v61, %v3457_v61 }
 0x632   : > { %3463 = vrot.lane.b32.xlu0 %v3459_v3, %s8962_s13  ;;  %v3493_v3 = vpack.c.b16 %v3489_v14, %v3489_v14 }
 0x633   : > { %3479 = vrot.lane.b32.xlu1 %v3475_v51, %s8963_s10  ;;  %v3477_v51 = vpack.c.b16 %v3473_v8, %v3473_v8 }
 0x638   : > { %3453 = vrot.lane.b32.xlu2 %v3446_v46, %s8961_s7  ;;  %v3218_v46 = vpop.permute.xlu0 %3217 }
 0x639   : > { %v3373_v17 = vshrl.u32 %v3218_v46, 16  ;;  %v3372_v61 = vpack.i.b16 0, %v3218_v46 }
 0x63a   : > { %3469 = vrot.lane.b32.xlu0 %v3462_v12, %s8962_s13  ;;  %v3487_v12 = vunpack.c.l.b16 %v3312_v32 }
 0x63b   : > { %3485 = vrot.lane.b32.xlu1 %v3478_v31, %s8963_s10  ;;  %v3503_v31 = vunpack.c.l.b16 %v3314_v58  ;;  %v3374_v14 = vpack.i.b16 0, %v3373_v17  ;;  %v3490_v37 = vunpack.c.l.b16 %v3372_v61  ;;  %v2924_v58 = vpack.i.b16 0, %v10652_v24 }
 0x63c   : > { %v3491_v34 = vpack.c.b16 %v3487_v12, %v3487_v12 }
 0x63d   : > { %v3507_v8 = vpack.c.b16 %v3503_v31, %v3503_v31  ;;  %v3494_v33 = vpack.c.b16 %v3490_v37, %v3490_v37  ;;  %v3132_v31 = vsel %vm688_vm12, %v2924_v58, %v10983_v60 }
 0x63e   : > { %v3142_v61 = vsel %vm14356_vm13, %v3132_v31, %v11001_v49 }
 0x640   : > { %3467 = vrot.lane.b32.xlu2 %v3461_v18, %s8962_s13  ;;  %v3506_v18 = vunpack.c.l.b16 %v3374_v14 }
 0x642   : > { %3483 = vrot.lane.b32.xlu0 %v3477_v51, %s8963_s10  ;;  %v3510_v50 = vpack.c.b16 %v3506_v18, %v3506_v18 }
 0x643   : > { %3499 = vrot.lane.b32.xlu1 %v3493_v3, %s8964_s27  ;;  %v3354_v3 = vpack.i.b16 0, %v3353_v44 }
 0x645   : > { %v3505_v51 = vunpack.c.l.b16 %v3354_v3 }
 0x647   : > { %v3509_v20 = vpack.c.b16 %v3505_v51, %v3505_v51 }
 0x648   : > { %3481 = vrot.lane.b32.xlu2 %v3476_v30, %s8963_s10 }
 0x64a   : > { %3497 = vrot.lane.b32.xlu0 %v3492_v5, %s8964_s27 }
 0x64b   : > { %3513 = vrot.lane.b32.xlu1 %v3508_v27, %s8965_s16 }
 0x650   : > { %3495 = vrot.lane.b32.xlu2 %v3491_v34, %s8964_s27  ;;  %v3316_v34 = vpack.i.b16 0, %v11084_v0 }
 0x652   : > { %3511 = vrot.lane.b32.xlu0 %v3507_v8, %s8965_s16 }
 0x653   : > { %3595 = vrot.lane.b32.xlu1 %v10647_v52, %s8963_s10 }
 0x658   : > { %3501 = vrot.lane.b32.xlu2 %v3494_v33, %s8964_s27 }
 0x65a   : > { %3517 = vrot.lane.b32.xlu0 %v3510_v50, %s8965_s16 }
 0x65b   : > { %3601 = vrot.lane.b32.xlu1 %v10838_v42, %s8963_s10  ;;  %v3384_v52 = vpop.permute.xlu1 %3383 }
 0x660   : > { %3515 = vrot.lane.b32.xlu2 %v3509_v20, %s8965_s16 }
 0x662   : > { %3599 = vrot.lane.b32.xlu0 %v10629_v26, %s8963_s10  ;;  %v3386_v7 = vpop.permute.xlu2 %3385 }
 0x663   : > { %3607 = vrot.lane.b32.xlu1 %v10682_v38, %s8963_s10  ;;  %v3524_v24 = vsel %vm688_vm12, %v3316_v34, %v3386_v7 }
 0x668   : > { %3597 = vrot.lane.b32.xlu2 %v10810_v22, %s8963_s10 }
 0x66a   : > { %v3400_v9 = vpop.permute.xlu2 %3399  ;;  %3605 = vrot.lane.b32.xlu0 %v10833_v1, %s8963_s10 }
 0x66b   : > { %v11170_v57 = vpop.permute.xlu1 %3389 }
 0x670   : > { %3603 = vrot.lane.b32.xlu2 %v10688_v28, %s8963_s10 }
 0x672   : > { %v11174_v42 = vpop.permute.xlu2 %3405 }
 0x674   : > { %v11176_v26 = vpop.permute.xlu0 %3387 }
 0x675   : > { %v11178_v39 = vpop.permute.xlu1 %3403 }
 0x678   : > { %3609 = vrot.lane.b32.xlu2 %v10824_v25, %s8963_s10  ;;  %v2904_v25 = vpack.i.b16 0, %v10676_v29  ;;  %v3150_v29 = vsel %vm710_vm14, %v3142_v61, %v10991_v36 }
 0x679   : > { %v3158_v0 = vsel %vm719_vm15, %v3150_v29, %v11011_v2 }
 0x67a   : > { %v11182_v38 = vpop.permute.xlu2 %3419  ;;  %v3129_v14 = vsel %vm688_vm12, %v2904_v25, %v10952_v16  ;;  %v2964_v16 = vpack.i.b16 0, %v10707_v15  ;;  %v3166_v49 = vsel %vm728_vm0, %v3158_v0, %v11025_v11 }
 0x67b   : > { %v3140_v8 = vsel %vm14356_vm13, %v3129_v14, %v10993_v53  ;;  %v3296_v53 = vpack.i.b16 0, %v11049_v4  ;;  %v3174_v15 = vsel %vm737_vm1, %v3166_v49, %v11015_v41 }
 0x67c   : > { %v3402_v22 = vpop.permute.xlu0 %3401  ;;  %v3148_v60 = vsel %vm710_vm14, %v3140_v8, %v11007_v47  ;;  %v3138_v51 = vsel %vm688_vm12, %v2964_v16, %v10969_v43  ;;  %v3182_v20 = vsel %vm14355_vm2, %v3174_v15, %v11035_v23  ;;  %v14643_v16 = vld [vmem:[#allocation118_spill] sm:$0xff] }
 0x67d   : > { %v3418_v10 = vpop.permute.xlu1 %3417  ;;  %v3534_v37 = vsel %vm14356_vm13, %v3524_v24, %v3402_v22  ;;  %v3156_v3 = vsel %vm719_vm15, %v3148_v60, %v10997_v62  ;;  %v3521_v50 = vsel %vm688_vm12, %v3296_v53, %v3384_v52  ;;  %v3146_v41 = vsel %vm14356_vm13, %v3138_v51, %v10999_v6  ;;  %v14644_v53 = vld [vmem:[#allocation100_spill] sm:$0xff] }
 0x67e   : > { %v3542_v36 = vsel %vm710_vm14, %v3534_v37, %v3418_v10  ;;  %v3164_v2 = vsel %vm728_vm0, %v3156_v3, %v11017_v54  ;;  %v3532_v11 = vsel %vm14356_vm13, %v3521_v50, %v3400_v9  ;;  %v2944_v54 = vpack.i.b16 0, %v10711_v40  ;;  %v14642_v37 = vld [vmem:[#allocation109_spill] sm:$0xff] }
 0x67f   : > { %v3172_v62 = vsel %vm737_vm1, %v3164_v2, %v11031_v59  ;;  %v3154_v52 = vsel %vm710_vm14, %v3146_v41, %v11013_v55  ;;  %v4117_v22 = vrot.slane %v3182_v20, 5  ;;  %v14637_v55 = vmov 0  ;;  %v14648_v50 = vld [vmem:[#allocation105_spill] sm:$0xff] }
 0x680   : > { %v3180_v59 = vsel %vm14355_vm2, %v3172_v62, %v11021_v56  ;;  %v14638_v55 = vsel %vm11254_vm8, 4294967295, %v14637_v55  ;;  %v3135_v25 = vsel %vm688_vm12, %v2944_v54, %v10995_v48  ;;  %v14640_v48 = vld [vmem:[#allocation90_spill] sm:$0xff] }
 0x681   : > { %14639 = vst [vmem:[#allocation119_spill] sm:$0xff] %v14638_v55 }
 0x682   : > { %v3434_v32 = vpop.permute.xlu2 %3433 }
 0x683   : > { %v3550_v47 = vsel %vm719_vm15, %v3542_v36, %v3434_v32  ;;  %v3356_v32 = vpack.i.b16 0, %v11065_v19  ;;  %v4115_v19 = vrot.slane %v3180_v59, 5  ;;  %v14646_v36 = vld [vmem:[#allocation89_spill] sm:$0xff] }
 0x684   : > { %v3416_v1 = vpop.permute.xlu0 %3415 }
 0x685   : > { %v3432_v30 = vpop.permute.xlu1 %3431  ;;  %v3540_v7 = vsel %vm710_vm14, %v3532_v11, %v3416_v1 }
 0x686   : > { %v3548_v10 = vsel %vm719_vm15, %v3540_v7, %v3432_v30  ;;  %v3162_v30 = vsel %vm719_vm15, %v3154_v52, %v11003_v13  ;;  %v14641_v13 = vsel %vm10894_vm3, %v10522_v45, %v14640_v48  ;;  %v3336_v45 = vpack.i.b16 0, %v14643_v16  ;;  %v14650_v7 = vld [vmem:[#allocation104_spill] sm:$0xff] }
 0x687   : > { %v3170_v24 = vsel %vm728_vm0, %v3162_v30, %v11023_v35  ;;  %v11279_v8 = vsel %vm14345_vm4, %v14641_v13, %v4117_v22  ;;  %v14684_v35 = vld [vmem:[#allocation64_spill] sm:$0xff] }
 0x688   : > { %v3178_v60 = vsel %vm737_vm1, %v3170_v24, %v14642_v37  ;;  %v3527_v2 = vsel %vm688_vm12, %v3336_v45, %v11176_v26 }
 0x689   : > { %v3536_v52 = vsel %vm14356_vm13, %v3527_v2, %v11178_v39  ;;  %v14655_v39 = vld [vmem:[#allocation81_spill] sm:$0xff] }
 0x68a   : > { %v3448_v46 = vpop.permute.xlu2 %3447  ;;  %v3544_v59 = vsel %vm710_vm14, %v3536_v52, %v11182_v38  ;;  %v14658_v38 = vld [vmem:[#allocation112_spill] sm:$0xff] }
 0x68b   : > { %v3556_v6 = vsel %vm728_vm0, %v3548_v10, %v3448_v46  ;;  %v3530_v46 = vsel %vm688_vm12, %v3356_v32, %v11170_v57  ;;  %v14653_v32 = vld [vmem:[#allocation106_spill] sm:$0xff] }
 0x68c   : > { %v11184_v5 = vpop.permute.xlu0 %3421  ;;  %v3538_v29 = vsel %vm14356_vm13, %v3530_v46, %v11174_v42  ;;  %v14645_v42 = vld [vmem:[#allocation77_spill] sm:$0xff] }
 0x68d   : > { %v11186_v28 = vpop.permute.xlu1 %3437  ;;  %v3546_v0 = vsel %vm710_vm14, %v3538_v29, %v11184_v5 }
 0x68e   : > { %v3554_v15 = vsel %vm719_vm15, %v3546_v0, %v11186_v28 }
 0x692   : > { %v11189_v27 = vpop.permute.xlu2 %3453 }
 0x693   : > { %v3562_v62 = vsel %vm728_vm0, %v3554_v15, %v11189_v27  ;;  %v14652_v27 = vld [vmem:[#allocation103_spill] sm:$0xff] }
 0x694   : > { %v11191_v12 = vpop.permute.xlu0 %3435 }
 0x695   : > { %v11194_v17 = vpop.permute.xlu1 %3451 }
 0x69a   : > { %v11209_v44 = vpop.permute.xlu2 %3467 }
 0x69c   : > { %v3450_v18 = vpop.permute.xlu0 %3449 }
 0x69d   : > { %v3466_v33 = vpop.permute.xlu1 %3465  ;;  %v3558_v4 = vsel %vm728_vm0, %v3550_v47, %v3450_v18  ;;  %v3144_v18 = vsel %vm14356_vm13, %v3135_v25, %v14644_v53  ;;  %v3186_v47 = vsel %vm14355_vm2, %v3178_v60, %v14648_v50  ;;  %v14663_v60 = vld [vmem:[#allocation96_spill] sm:$0xff] }
 0x69e   : > { %v3566_v9 = vsel %vm737_vm1, %v3558_v4, %v3466_v33  ;;  %v14647_v33 = vsel %vm10894_vm3, %v14645_v42, %v14646_v36  ;;  %v14649_v4 = vld [vmem:[#allocation102_spill] sm:$0xff]  ;;  %v4121_v28 = vrot.slane %v3186_v47, 5  ;;  %v14667_v47 = vld [vmem:[#allocation15_spill] sm:$0xff]  ;;  %v14694_v50 = vld [vmem:[#allocation32_spill] sm:$0xff] }
 0x69f   : > { %v11302_v3 = vsel %vm14345_vm4, %v14647_v33, %v4115_v19  ;;  %v3152_v51 = vsel %vm710_vm14, %v3144_v18, %v14649_v4 }
 0x6a0   : > { %v3160_v54 = vsel %vm719_vm15, %v3152_v51, %v14650_v7 }
 0x6a1   : > { %v3168_v10 = vsel %vm728_vm0, %v3160_v54, %v14652_v27 }
 0x6a2   : > { %v11243_v43 = vpop.permute.xlu2 %3481 }
 0x6a3   : > { %v3574_v40 = vsel %vm14355_vm2, %v3566_v9, %v11243_v43 }
 0x6a4   : > { %v4129_v1 = vshll.u32 %v3574_v40, 16  ;;  %v3464_v58 = vpop.permute.xlu0 %3463  ;;  %v3552_v40 = vsel %vm719_vm15, %v3544_v59, %v11191_v12 }
 0x6a5   : > { %v3564_v31 = vsel %vm737_vm1, %v3556_v6, %v3464_v58  ;;  %v11263_v61 = vpop.permute.xlu1 %3479  ;;  %v3176_v6 = vsel %vm737_vm1, %v3168_v10, %v14653_v32  ;;  %v14656_v58 = vld [vmem:[#allocation93_spill] sm:$0xff]  ;;  %v3560_v12 = vsel %vm728_vm0, %v3552_v40, %v11194_v17  ;;  %v14662_v17 = vld [vmem:[#allocation78_spill] sm:$0xff] }
 0x6a6   : > { %v11267_v34 = vrot.slane %v4129_v1, 5  ;;  %v3572_v14 = vsel %vm14355_vm2, %v3564_v31, %v11263_v61  ;;  %v14657_v25 = vsel %vm10894_vm3, %v14655_v39, %v14656_v58  ;;  %v3184_v31 = vsel %vm14355_vm2, %v3176_v6, %v14658_v38  ;;  %v14688_v38 = vld [vmem:[#allocation58_spill] sm:$0xff] }
 0x6a7   : > { %v4123_v57 = vshll.u32 %v3572_v14, 16  ;;  %v11345_v30 = vsel %vm14345_vm4, %v14657_v25, %v4121_v28  ;;  %v3568_v14 = vsel %vm737_vm1, %v3560_v12, %v11209_v44  ;;  %v4119_v48 = vrot.slane %v3184_v31, 5 }
 0x6a8   : > { %v14664_v0 = vsel %vm10894_vm3, %v14662_v17, %v14663_v60 }
 0x6a9   : > { %v11292_v49 = vrot.slane %v4123_v57, 5  ;;  %v11373_v16 = vsel %vm14345_vm4, %v14664_v0, %v4119_v48  ;;  %vm14670_vm4 = vmmov %vm14669_vm9 }
 0x6aa   : > { %v11304_v5 = vpop.permute.xlu2 %3495  ;;  %vm14671_vm7 = vmmov %vm14670_vm4 }
 0x6ac   : > { %v3470_v20 = vpop.permute.xlu0 %3469 }
 0x6ad   : > { %v3570_v26 = vsel %vm737_vm1, %v3562_v62, %v3470_v20  ;;  %v11323_v41 = vpop.permute.xlu1 %3485 }
 0x6ae   : > { %14651 = vst [vmem:[#allocation90_spill] sm:$0xff] %v11323_v41  ;;  %v3578_v9 = vsel %vm14355_vm2, %v3570_v26, %v11323_v41  ;;  %v14695_v41 = vld [vmem:[#allocation34_spill] sm:$0xff] }
 0x6af   : > { %v4141_v22 = vshll.u32 %v3578_v9, 16 }
 0x6b1   : > { %v11337_v1 = vrot.slane %v4141_v22, 5 }
 0x6b2   : > { %v11349_v19 = vpop.permute.xlu2 %3501 }
 0x6b3   : > { %14654 = vst [vmem:[#allocation109_spill] sm:$0xff] %v11337_v1  ;;  %v14706_v1 = vld [vmem:[#allocation70_spill] sm:$0xff] }
 0x6b4   : > { %14659 = vst [vmem:[#allocation118_spill] sm:$0xff] %v11349_v19  ;;  %v11359_v24 = vpop.permute.xlu0 %3483  ;;  %v14697_v19 = vld [vmem:[#allocation71_spill] sm:$0xff] }
 0x6b5   : > { %14660 = vst [vmem:[#allocation100_spill] sm:$0xff] %v11359_v24  ;;  %v3576_v13 = vsel %vm14355_vm2, %v3568_v14, %v11359_v24  ;;  %v11363_v29 = vpop.permute.xlu1 %3499  ;;  %v14689_v24 = vld [vmem:[#allocation69_spill] sm:$0xff] }
 0x6b6   : > { %14661 = vst [vmem:[#allocation77_spill] sm:$0xff] %v11363_v29  ;;  %v4135_v57 = vshll.u32 %v3576_v13, 16  ;;  %v14691_v29 = vld [vmem:[#allocation38_spill] sm:$0xff] }
 0x6b8   : > { %v11365_v37 = vrot.slane %v4135_v57, 5 }
 0x6ba   : > { %v11379_v45 = vpop.permute.xlu2 %3515 }
 0x6bb   : > { %14665 = vst [vmem:[#allocation89_spill] sm:$0xff] %v11379_v45 }
 0x6bc   : > { %v11381_v53 = vpop.permute.xlu0 %3497 }
 0x6bd   : > { %v11383_v18 = vpop.permute.xlu1 %3513 }
 0x6be   : > { %14666 = vst [vmem:[#allocation102_spill] sm:$0xff] %v11383_v18 }
 0x6c2   : > { %v11385_v42 = vpop.permute.xlu2 %3597 }
 0x6c4   : > { %v11387_v36 = vpop.permute.xlu0 %3511 }
 0x6c5   : > { %v3596_v33 = vpop.permute.xlu1 %3595 }
 0x6c6   : > { %v3615_v2 = vperm.slane %v3596_v33, %v14667_v47 }
 0x6c8   : > { %v11391_v15 = vperm.slane %v3615_v2, %v14556_v63 }
 0x6ca   : > { %v3689_v4 = vshrl.u32 %v11391_v15, 16  ;;  %v3604_v51 = vpop.permute.xlu2 %3603  ;;  %v3626_v10 = vrot.slane %v11391_v15, 4 }
 0x6cb   : > { %v3653_v62 = vperm.slane %v3604_v51, %v14667_v47 }
 0x6cc   : > { %v11395_v20 = vpop.permute.xlu0 %3517  ;;  %v3690_v7 = vpack.i.b16 0, %v3689_v4  ;;  %v3627_v48 = vsel %vm14669_vm9, 0, %v3626_v10  ;;  %vm14672_vm9 = vmmov %vm14670_vm4 }
 0x6cd   : > { %14668 = vst [vmem:[#allocation104_spill] sm:$0xff] %v11395_v20  ;;  %v11398_v54 = vperm.slane %v3653_v62, %v14556_v63  ;;  %v11400_v26 = vpop.permute.xlu1 %3601  ;;  %v3693_v4 = vshrl.u32 %v3627_v48, 16 }
 0x6ce   : > { %v3767_v28 = vunpack.c.l.b16 %v3690_v7 }
 0x6cf   : > { %v3729_v52 = vshrl.u32 %v11398_v54, 16  ;;  %v3664_v58 = vrot.slane %v11398_v54, 4 }
 0x6d0   : > { %v3771_v9 = vpack.c.b16 %v3767_v28, %v3767_v28 }
 0x6d1   : > { %v3730_v59 = vpack.i.b16 0, %v3729_v52  ;;  %v3665_v60 = vsel %vm14671_vm7, 0, %v3664_v58  ;;  %vm14673_vm7 = vmmov %vm14670_vm4 }
 0x6d2   : > { %3775 = vrot.lane.b32.xlu0 %v3771_v9, %s8957_s14  ;;  %v3732_v9 = vpack.i.b16 0, %v3665_v60 }
 0x6d3   : > { %v3769_v22 = vunpack.c.l.b16 %v3730_v59 }
 0x6d4   : > { %v3600_v27 = vpop.permute.xlu0 %3599  ;;  %v3785_v58 = vunpack.c.l.b16 %v3732_v9 }
 0x6d5   : > { %v3634_v40 = vperm.slane %v3600_v27, %v14667_v47  ;;  %v3608_v32 = vpop.permute.xlu1 %3607  ;;  %v3773_v6 = vpack.c.b16 %v3769_v22, %v3769_v22  ;;  %v3692_v22 = vpack.i.b16 0, %v3627_v48 }
 0x6d6   : > { %v11407_v39 = vperm.slane %v3608_v32, %v14667_v47  ;;  %v3694_v32 = vpack.i.b16 0, %v3693_v4  ;;  %v14686_v47 = vld [vmem:[#allocation28_spill] sm:$0xff] }
 0x6d7   : > { %v11411_v25 = vperm.slane %v3634_v40, %v14556_v63  ;;  %3779 = vrot.lane.b32.xlu2 %v3773_v6, %s8957_s14 }
 0x6d8   : > { %v11416_v31 = vperm.slane %v11407_v39, %v14556_v63 }
 0x6d9   : > { %v3645_v12 = vrot.slane %v11411_v25, 4  ;;  %v3709_v14 = vshrl.u32 %v11411_v25, 16 }
 0x6da   : > { %v3749_v13 = vshrl.u32 %v11416_v31, 16  ;;  %v3683_v51 = vrot.slane %v11416_v31, 4 }
 0x6db   : > { %v3710_v57 = vpack.i.b16 0, %v3709_v14  ;;  %v3646_v17 = vsel %vm14670_vm4, 0, %v3645_v12  ;;  %v3783_v12 = vunpack.c.l.b16 %v3692_v22  ;;  %v3616_v14 = vrot.slane %v3615_v2, 4 }
 0x6dc   : > { %v3750_v0 = vpack.i.b16 0, %v3749_v13  ;;  %v3712_v33 = vpack.i.b16 0, %v3646_v17  ;;  %v3684_v6 = vsel %vm14672_vm9, 0, %v3683_v51  ;;  %v3799_v13 = vunpack.c.l.b16 %v3694_v32  ;;  %vm14674_vm9 = vmmov %vm14670_vm4 }
 0x6dd   : > { %v3768_v7 = vunpack.c.l.b16 %v3710_v57  ;;  %v3753_v57 = vshrl.u32 %v3684_v6, 16  ;;  %v3787_v48 = vpack.c.b16 %v3783_v12, %v3783_v12  ;;  %v3617_v4 = vsel %vm14670_vm4, 0, %v3616_v14 }
 0x6de   : > { %v3770_v28 = vunpack.c.l.b16 %v3750_v0  ;;  %v3784_v52 = vunpack.c.l.b16 %v3712_v33  ;;  %v3713_v0 = vshrl.u32 %v3646_v17, 16  ;;  %v3654_v33 = vrot.slane %v3653_v62, 4 }
 0x6df   : > { %v3772_v59 = vpack.c.b16 %v3768_v7, %v3768_v7  ;;  %v3789_v7 = vpack.c.b16 %v3785_v58, %v3785_v58  ;;  %v3625_v2 = vperm.slane %v3617_v4, %v14556_v63  ;;  %v3733_v17 = vshrl.u32 %v3665_v60, 16 }
 0x6e0   : > { %v3774_v27 = vpack.c.b16 %v3770_v28, %v3770_v28  ;;  %v3788_v10 = vpack.c.b16 %v3784_v52, %v3784_v52  ;;  %v3752_v28 = vpack.i.b16 0, %v3684_v6  ;;  %v3803_v52 = vpack.c.b16 %v3799_v13, %v3799_v13 }
 0x6e1   : > { %3777 = vrot.lane.b32.xlu1 %v3772_v59, %s8957_s14  ;;  %v3754_v59 = vpack.i.b16 0, %v3753_v57  ;;  %v3714_v46 = vpack.i.b16 0, %v3713_v0  ;;  %v3655_v51 = vsel %vm14673_vm7, 0, %v3654_v33  ;;  %v3673_v6 = vrot.slane %v11407_v39, 4  ;;  %vm14675_vm7 = vmmov %vm14670_vm4 }
 0x6e2   : > { %3781 = vrot.lane.b32.xlu0 %v3774_v27, %s8957_s14  ;;  %3793 = vrot.lane.b32.xlu2 %v3788_v10, %s8958_s8  ;;  %v3635_v27 = vrot.slane %v3634_v40, 4  ;;  %v3786_v62 = vunpack.c.l.b16 %v3752_v28  ;;  %v11436_v9 = vperm.slane %v3655_v51, %v14556_v63  ;;  %v3734_v58 = vpack.i.b16 0, %v3733_v17  ;;  %s8974_s14 = smov 74  }
 0x6e3   : > { %v3802_v22 = vunpack.c.l.b16 %v3754_v59  ;;  %v3800_v10 = vunpack.c.l.b16 %v3714_v46  ;;  %v3696_v12 = vpack.i.b16 0, %v3625_v2  ;;  %v3674_v60 = vsel %vm14670_vm4, 0, %v3673_v6 }
 0x6e4   : > { %v3636_v32 = vsel %vm14674_vm9, 0, %v3635_v27  ;;  %v3790_v40 = vpack.c.b16 %v3786_v62, %v3786_v62  ;;  %v3736_v0 = vpack.i.b16 0, %v11436_v9  ;;  %v3801_v46 = vunpack.c.l.b16 %v3734_v58  ;;  %vm14676_vm9 = vmmov %vm14670_vm4 }
 0x6e5   : > { %v3644_v14 = vperm.slane %v3636_v32, %v14556_v63  ;;  %v3806_v13 = vpack.c.b16 %v3802_v22, %v3802_v22  ;;  %v3804_v57 = vpack.c.b16 %v3800_v10, %v3800_v10  ;;  %v3682_v39 = vperm.slane %v3674_v60, %v14556_v63  ;;  %v14685_v63 = vld [vmem:[#allocation24_spill] sm:$0xff] }
 0x6e6   : > { %v3815_v33 = vunpack.c.l.b16 %v3696_v12  ;;  %v3805_v28 = vpack.c.b16 %v3801_v46, %v3801_v46  ;;  %v3628_v62 = vrot.slane %v3625_v2, 4  ;;  %v3697_v22 = vshrl.u32 %v3625_v2, 16 }
 0x6e7   : > { %v3716_v4 = vpack.i.b16 0, %v3644_v14  ;;  %v3756_v51 = vpack.i.b16 0, %v3682_v39  ;;  %v3737_v6 = vshrl.u32 %v11436_v9, 16  ;;  %v3647_v46 = vrot.slane %v3644_v14, 4 }
 0x6e8   : > { %v3698_v12 = vpack.i.b16 0, %v3697_v22 }
 0x6e9   : > { %3791 = vrot.lane.b32.xlu1 %v3787_v48, %s8958_s8  ;;  %v3717_v48 = vshrl.u32 %v3644_v14, 16  ;;  %v3816_v17 = vunpack.c.l.b16 %v3716_v4  ;;  %v3818_v10 = vunpack.c.l.b16 %v3756_v51  ;;  %v3666_v4 = vrot.slane %v11436_v9, 4 }
 0x6ea   : > { %3807 = vrot.lane.b32.xlu2 %v3803_v52, %s8959_s30  ;;  %3795 = vrot.lane.b32.xlu0 %v3789_v7, %s8958_s8  ;;  %v3817_v7 = vunpack.c.l.b16 %v3736_v0  ;;  %v3819_v52 = vpack.c.b16 %v3815_v33, %v3815_v33  ;;  %v3738_v0 = vpack.i.b16 0, %v3737_v6  ;;  %v3685_v33 = vrot.slane %v3682_v39, 4 }
 0x6eb   : > { %v3718_v27 = vpack.i.b16 0, %v3717_v48  ;;  %v3820_v58 = vpack.c.b16 %v3816_v17, %v3816_v17  ;;  %v3831_v2 = vunpack.c.l.b16 %v3698_v12 }
 0x6ec   : > { %v3821_v59 = vpack.c.b16 %v3817_v7, %v3817_v7  ;;  %v3757_v7 = vshrl.u32 %v3682_v39, 16  ;;  %v3833_v48 = vunpack.c.l.b16 %v3738_v0 }
 0x6ed   : > { %v3832_v32 = vunpack.c.l.b16 %v3718_v27  ;;  %v3835_v51 = vpack.c.b16 %v3831_v2, %v3831_v2 }
 0x6ee   : > { %v3758_v27 = vpack.i.b16 0, %v3757_v7  ;;  %v3837_v14 = vpack.c.b16 %v3833_v48, %v3833_v48 }
 0x6f0   : > { %v3834_v39 = vunpack.c.l.b16 %v3758_v27 }
 0x6f1   : > { %3797 = vrot.lane.b32.xlu1 %v3790_v40, %s8958_s8  ;;  %v3629_v40 = vsel %vm14675_vm7, 0, %v3628_v62  ;;  %vm14677_vm7 = vmmov %vm14670_vm4  ;;  %s8975_s8 = smov 112  }
 0x6f2   : > { %3813 = vrot.lane.b32.xlu2 %v3806_v13, %s8959_s30  ;;  %3809 = vrot.lane.b32.xlu0 %v3804_v57, %s8959_s30  ;;  %v3822_v13 = vpack.c.b16 %v3818_v10, %v3818_v10  ;;  %v3836_v57 = vpack.c.b16 %v3832_v32, %v3832_v32  ;;  %v3700_v60 = vpack.i.b16 0, %v3629_v40  ;;  %v3667_v10 = vsel %vm14677_vm7, 0, %v3666_v4 }
 0x6f3   : > { %v3701_v6 = vshrl.u32 %v3629_v40, 16  ;;  %v3838_v12 = vpack.c.b16 %v3834_v39, %v3834_v39  ;;  %vm14716_vm7 = vcmask 1040384  }
 0x6f4   : > { %vm14717_vm2 = vmmov %vm14716_vm7 }
 0x6f9   : > { %3811 = vrot.lane.b32.xlu1 %v3805_v28, %s8959_s30  ;;  %v3847_v28 = vunpack.c.l.b16 %v3700_v60  ;;  %v3702_v60 = vpack.i.b16 0, %v3701_v6  ;;  %s8976_s30 = smov 20  }
 0x6fa   : > { %3823 = vrot.lane.b32.xlu0 %v3819_v52, %s8960_s11  ;;  %3827 = vrot.lane.b32.xlu2 %v3821_v59, %s8960_s11  ;;  %v3648_v52 = vsel %vm14676_vm9, 0, %v3647_v46  ;;  %v3686_v59 = vsel %vm14670_vm4, 0, %v3685_v33  ;;  %vm14357_vm9 = vcmask 130048   ;;  %vm768_vm4 = vcmask 277504  }
 0x6fb   : > { %v3851_v62 = vpack.c.b16 %v3847_v28, %v3847_v28  ;;  %v3720_v17 = vpack.i.b16 0, %v3648_v52  ;;  %v3760_v22 = vpack.i.b16 0, %v3686_v59  ;;  %v3721_v2 = vshrl.u32 %v3648_v52, 16 }
 0x6fc   : > { %v3863_v7 = vunpack.c.l.b16 %v3702_v60  ;;  %v3761_v28 = vshrl.u32 %v3686_v59, 16  ;;  %v3705_v52 = vshrl.u32 %v11385_v42, 16 }
 0x6fd   : > { %v3848_v9 = vunpack.c.l.b16 %v3720_v17  ;;  %v3850_v32 = vunpack.c.l.b16 %v3760_v22  ;;  %v3722_v40 = vpack.i.b16 0, %v3721_v2  ;;  %v3606_v22 = vpop.permute.xlu0 %3605 }
 0x6fe   : > { %v3867_v27 = vpack.c.b16 %v3863_v7, %v3863_v7  ;;  %v3744_v59 = vpack.i.b16 0, %v3606_v22  ;;  %v3706_v6 = vpack.i.b16 0, %v3705_v52 }
 0x6ff   : > { %v3854_v0 = vpack.c.b16 %v3850_v32, %v3850_v32  ;;  %v3864_v17 = vunpack.c.l.b16 %v3722_v40 }
 0x701   : > { %3825 = vrot.lane.b32.xlu1 %v3820_v58, %s8960_s11  ;;  %v3741_v58 = vshrl.u32 %v3667_v10, 16  ;;  %v3868_v32 = vpack.c.b16 %v3864_v17, %v3864_v17 }
 0x702   : > { %3829 = vrot.lane.b32.xlu0 %v3822_v13, %s8960_s11  ;;  %3841 = vrot.lane.b32.xlu2 %v3836_v57, %s8961_s7  ;;  %v3740_v13 = vpack.i.b16 0, %v3667_v10  ;;  %v3852_v57 = vpack.c.b16 %v3848_v9, %v3848_v9  ;;  %v3704_v9 = vpack.i.b16 0, %v11385_v42  ;;  %s8969_s11 = smov 56  }
 0x703   : > { %v3742_v46 = vpack.i.b16 0, %v3741_v58 }
 0x704   : > { %v3849_v33 = vunpack.c.l.b16 %v3740_v13  ;;  %v3610_v13 = vpop.permute.xlu2 %3609  ;;  %v3879_v60 = vunpack.c.l.b16 %v3704_v9 }
 0x705   : > { %v3865_v48 = vunpack.c.l.b16 %v3742_v46  ;;  %v3895_v46 = vunpack.c.l.b16 %v3706_v6  ;;  %v3764_v2 = vpack.i.b16 0, %v3610_v13 }
 0x706   : > { %v3853_v4 = vpack.c.b16 %v3849_v33, %v3849_v33  ;;  %v3725_v33 = vshrl.u32 %v11400_v26, 16 }
 0x707   : > { %v3882_v40 = vunpack.c.l.b16 %v3764_v2 }
 0x709   : > { %3839 = vrot.lane.b32.xlu1 %v3835_v51, %s8961_s7  ;;  %v3724_v51 = vpack.i.b16 0, %v11400_v26 }
 0x70a   : > { %3843 = vrot.lane.b32.xlu0 %v3837_v14, %s8961_s7  ;;  %3855 = vrot.lane.b32.xlu2 %v3851_v62, %s8962_s13  ;;  %v3869_v14 = vpack.c.b16 %v3865_v48, %v3865_v48  ;;  %v3762_v62 = vpack.i.b16 0, %v3761_v28  ;;  %v3883_v48 = vpack.c.b16 %v3879_v60, %v3879_v60  ;;  %v3899_v28 = vpack.c.b16 %v3895_v46, %v3895_v46 }
 0x70b   : > { %v3880_v10 = vunpack.c.l.b16 %v3724_v51 }
 0x70c   : > { %v3866_v39 = vunpack.c.l.b16 %v3762_v62  ;;  %v3886_v62 = vpack.c.b16 %v3882_v40, %v3882_v40  ;;  %v14679_v40 = vld [vmem:[#allocation62_spill] sm:$0xff] }
 0x70d   : > { %v3884_v58 = vpack.c.b16 %v3880_v10, %v3880_v10 }
 0x711   : > { %3845 = vrot.lane.b32.xlu1 %v3838_v12, %s8961_s7  ;;  %v3870_v12 = vpack.c.b16 %v3866_v39, %v3866_v39  ;;  %s8970_s7 = smov 92  }
 0x712   : > { %3857 = vrot.lane.b32.xlu0 %v3852_v57, %s8962_s13  ;;  %3861 = vrot.lane.b32.xlu2 %v3854_v0, %s8962_s13  ;;  %v3881_v57 = vunpack.c.l.b16 %v3744_v59  ;;  %v3765_v0 = vshrl.u32 %v3610_v13, 16 }
 0x714   : > { %v3885_v7 = vpack.c.b16 %v3881_v57, %v3881_v57  ;;  %v3766_v42 = vpack.i.b16 0, %v3765_v0 }
 0x716   : > { %v3898_v51 = vunpack.c.l.b16 %v3766_v42 }
 0x718   : > { %v3902_v17 = vpack.c.b16 %v3898_v51, %v3898_v51 }
 0x719   : > { %3859 = vrot.lane.b32.xlu1 %v3853_v4, %s8962_s13  ;;  %v3726_v4 = vpack.i.b16 0, %v3725_v33  ;;  %s8971_s13 = smov 110  }
 0x71a   : > { %3871 = vrot.lane.b32.xlu0 %v3867_v27, %s8963_s10  ;;  %3875 = vrot.lane.b32.xlu2 %v3869_v14, %s8963_s10  ;;  %v3745_v27 = vshrl.u32 %v3606_v22, 16 }
 0x71b   : > { %v3896_v14 = vunpack.c.l.b16 %v3726_v4  ;;  %v14678_v4 = vld [vmem:[#allocation66_spill] sm:$0xff] }
 0x71c   : > { %v3746_v52 = vpack.i.b16 0, %v3745_v27  ;;  %v1168_v51 = vsel %vm14357_vm9, %v14679_v40, %v14678_v4  ;;  %v763_v4 = vsel %vm14357_vm9, %v14686_v47, %v14685_v63  ;;  %v14687_v40 = vld [vmem:[#allocation67_spill] sm:$0xff]  ;;  %v14696_v63 = vld [vmem:[#allocation21_spill] sm:$0xff] }
 0x71d   : > { %v3900_v26 = vpack.c.b16 %v3896_v14, %v3896_v14  ;;  %v1176_v11 = vsel %vm768_vm4, %v1168_v51, %v14684_v35  ;;  %v1172_v45 = vsel %vm14357_vm9, %v14688_v38, %v14687_v40  ;;  %v14693_v51 = vld [vmem:[#allocation33_spill] sm:$0xff]  ;;  %v765_v47 = vsel %vm14357_vm9, %v14696_v63, %v14695_v41 }
 0x71e   : > { %v3897_v10 = vunpack.c.l.b16 %v3746_v52  ;;  %v767_v20 = vsel %vm14357_vm9, %v14694_v50, %v14693_v51  ;;  %v1180_v38 = vsel %vm768_vm4, %v1172_v45, %v14697_v19  ;;  %v14698_v40 = vld [vmem:[#allocation61_spill] sm:$0xff]  ;;  %v3993_v21 = vshll.u32 %v1176_v11, 16  ;;  %v14702_v50 = vld [vmem:[#allocation68_spill] sm:$0xff]  ;;  %v14703_v51 = vld [vmem:[#allocation43_spill] sm:$0xff] }
 0x71f   : > { %v1562_v18 = vsel %vm14357_vm9, %v14703_v51, %v14702_v50  ;;  %v14704_v41 = vld [vmem:[#allocation57_spill] sm:$0xff]  ;;  %v14708_v50 = vld [vmem:[#allocation35_spill] sm:$0xff] }
 0x720   : > { %v3901_v39 = vpack.c.b16 %v3897_v10, %v3897_v10  ;;  %v14683_v10 = vld [vmem:[#allocation55_spill] sm:$0xff]  ;;  %v14705_v19 = vld [vmem:[#allocation41_spill] sm:$0xff]  ;;  %v11562_v51 = vsel %vm768_vm4, %v765_v47, %v14708_v50 }
 0x721   : > { %3873 = vrot.lane.b32.xlu1 %v3868_v32, %s8963_s10 }
 0x722   : > { %3877 = vrot.lane.b32.xlu0 %v3870_v12, %s8963_s10  ;;  %3889 = vrot.lane.b32.xlu2 %v3884_v58, %s8964_s27 }
 0x729   : > { %3887 = vrot.lane.b32.xlu1 %v3883_v48, %s8964_s27 }
 0x72a   : > { %3891 = vrot.lane.b32.xlu0 %v3885_v7, %s8964_s27  ;;  %3903 = vrot.lane.b32.xlu2 %v3899_v28, %s8965_s16 }
 0x731   : > { %3893 = vrot.lane.b32.xlu1 %v3886_v62, %s8964_s27  ;;  %v3780_v59 = vpop.permute.xlu2 %3779  ;;  %v14680_v62 = vld [vmem:[#allocation31_spill] sm:$0xff] }
 0x732   : > { %3905 = vrot.lane.b32.xlu0 %v3900_v26, %s8965_s16  ;;  %3909 = vrot.lane.b32.xlu2 %v3902_v17, %s8965_s16  ;;  %v14681_v17 = vld [vmem:[#allocation29_spill] sm:$0xff] }
 0x733   : > { %v761_v52 = vsel %vm14357_vm9, %v14681_v17, %v14680_v62  ;;  %v14682_v26 = vld [vmem:[#allocation65_spill] sm:$0xff] }
 0x734   : > { %v14690_v17 = vld [vmem:[#allocation53_spill] sm:$0xff] }
 0x739   : > { %3907 = vrot.lane.b32.xlu1 %v3901_v39, %s8965_s16  ;;  %v1166_v39 = vsel %vm14357_vm9, %v14683_v10, %v14682_v26  ;;  %v1560_v26 = vsel %vm14357_vm9, %v14691_v29, %v14690_v17  ;;  %v14692_v10 = vld [vmem:[#allocation27_spill] sm:$0xff]  ;;  %v14700_v29 = vld [vmem:[#allocation42_spill] sm:$0xff]  ;;  %s8972_s16 = smov 2  }
 0x73a   : > { %v1174_v62 = vsel %vm768_vm4, %v1166_v39, %v14689_v24  ;;  %v770_v35 = vsel %vm768_vm4, %v761_v52, %v14692_v10  ;;  %v14699_v24 = vld [vmem:[#allocation63_spill] sm:$0xff]  ;;  %v3688_v10 = vpack.i.b16 0, %v11391_v15  ;;  %v1568_v63 = vsel %vm768_vm4, %v1560_v26, %v14704_v41  ;;  %v14709_v26 = vld [vmem:[#allocation36_spill] sm:$0xff] }
 0x73b   : > { %v1170_v39 = vsel %vm14357_vm9, %v14699_v24, %v14698_v40  ;;  %v14701_v17 = vld [vmem:[#allocation39_spill] sm:$0xff]  ;;  %v3989_v23 = vshll.u32 %v1174_v62, 16  ;;  %v4001_v40 = vshll.u32 %v1180_v38, 16  ;;  %v3728_v24 = vpack.i.b16 0, %v11398_v54  ;;  %v14710_v38 = vld [vmem:[#allocation52_spill] sm:$0xff] }
 0x73c   : > { %v11482_v9 = vpop.permute.xlu2 %3793  ;;  %v1558_v52 = vsel %vm14357_vm9, %v14701_v17, %v14700_v29  ;;  %v11554_v11 = vsel %vm768_vm4, %v1170_v39, %v14706_v1  ;;  %v14707_v29 = vld [vmem:[#allocation30_spill] sm:$0xff]  ;;  %v11571_v54 = vsel %vm768_vm4, %v1562_v18, %v14710_v38  ;;  %v14719_v38 = vld [vmem:[#allocation40_spill] sm:$0xff] }
 0x73d   : > { %v1566_v45 = vsel %vm768_vm4, %v1558_v52, %v14705_v19  ;;  %v779_v17 = vsel %vm768_vm4, %v767_v20, %v14707_v29  ;;  %v773_v52 = vsel %vm768_vm4, %v763_v4, %v14709_v26  ;;  %v4175_v19 = vsel %vm10002_vm5, %v770_v35, %v3989_v23  ;;  %v14712_v18 = vld [vmem:[#allocation26_spill] sm:$0xff]  ;;  %v14713_v29 = vld [vmem:[#allocation37_spill] sm:$0xff]  ;;  %v14714_v35 = vld [vmem:[#allocation51_spill] sm:$0xff] }
 0x73e   : > { %v4020_v39 = vrot.slane %v1566_v45, 7  ;;  %v3997_v47 = vshll.u32 %v11554_v11, 16  ;;  %v4177_v4 = vsel %vm10002_vm5, %v773_v52, %v3993_v21  ;;  %v4024_v23 = vrot.slane %v11571_v54, 7  ;;  %v14718_v52 = vld [vmem:[#allocation46_spill] sm:$0xff] }
 0x740   : > { %v11601_v26 = vsel %vm14717_vm2, %v4175_v19, %v4020_v39  ;;  %v14721_v39 = vld [vmem:[#allocation22_spill] sm:$0xff] }
 0x741   : > { %v14722_v19 = vld [vmem:[#allocation86_spill] sm:$0xff] }
 0x744   : > { %v3776_v32 = vpop.permute.xlu0 %3775  ;;  %v3808_v22 = vpop.permute.xlu2 %3807 }
 0x745   : > { %v3913_v15 = vsel %vm688_vm12, %v3688_v10, %v3776_v32  ;;  %v4022_v32 = vrot.slane %v1568_v63, 7  ;;  %v3919_v10 = vsel %vm688_vm12, %v3728_v24, %v3780_v59  ;;  %v1564_v63 = vsel %vm14357_vm9, %v14713_v29, %v14712_v18  ;;  %v14715_v24 = vld [vmem:[#allocation84_spill] sm:$0xff] }
 0x746   : > { %v2007_v21 = vsel %vm14357_vm9, %v14715_v24, %v14714_v35  ;;  %v14725_v24 = vld [vmem:[#allocation60_spill] sm:$0xff] }
 0x74c   : > { %v11488_v12 = vpop.permute.xlu2 %3813 }
 0x753   : > { %v11484_v6 = vpop.permute.xlu1 %3777 }
 0x754   : > { %v11486_v58 = vpop.permute.xlu0 %3781  ;;  %v11490_v0 = vpop.permute.xlu2 %3827 }
 0x75b   : > { %v3792_v13 = vpop.permute.xlu1 %3791 }
 0x75c   : > { %v3796_v57 = vpop.permute.xlu0 %3795  ;;  %v11496_v33 = vpop.permute.xlu2 %3841  ;;  %v3924_v41 = vsel %vm14356_vm13, %v3913_v15, %v3792_v13  ;;  %v11582_v15 = vsel %vm10002_vm5, %v779_v17, %v4001_v40  ;;  %v11598_v17 = vsel %vm14716_vm7, %v4177_v4, %v4022_v32  ;;  %v14723_v4 = vld [vmem:[#allocation18_spill] sm:$0xff]  ;;  %vm14733_vm7 = vcmask 1043456  }
 0x75d   : > { %v3928_v13 = vsel %vm14356_vm13, %v3919_v10, %v3796_v57  ;;  %v3932_v45 = vsel %vm710_vm14, %v3924_v41, %v3808_v22  ;;  %v3708_v57 = vpack.i.b16 0, %v11411_v25  ;;  %v3748_v22 = vpack.i.b16 0, %v11416_v31  ;;  %v14720_v25 = vld [vmem:[#allocation56_spill] sm:$0xff] }
 0x75e   : > { %v11607_v41 = vsel %vm768_vm4, %v1564_v63, %v14718_v52  ;;  %v2009_v31 = vsel %vm14357_vm9, %v14722_v19, %v14721_v39  ;;  %v14724_v63 = vld [vmem:[#allocation87_spill] sm:$0xff] }
 0x75f   : > { %v3916_v10 = vsel %vm688_vm12, %v3708_v57, %v11484_v6  ;;  %v14729_v52 = vld [vmem:[#allocation47_spill] sm:$0xff] }
 0x763   : > { %v11492_v60 = vpop.permute.xlu1 %3797 }
 0x764   : > { %v11494_v46 = vpop.permute.xlu0 %3809  ;;  %v11500_v48 = vpop.permute.xlu2 %3855 }
 0x76b   : > { %v3812_v2 = vpop.permute.xlu1 %3811 }
 0x76c   : > { %v3824_v7 = vpop.permute.xlu0 %3823  ;;  %v11515_v44 = vpop.permute.xlu2 %3861  ;;  %v3936_v59 = vsel %vm710_vm14, %v3928_v13, %v3812_v2  ;;  %v3922_v13 = vsel %vm688_vm12, %v3748_v22, %v11486_v58  ;;  %vm14727_vm12 = vcmask 1031168  }
 0x76d   : > { %v3940_v50 = vsel %vm719_vm15, %v3932_v45, %v3824_v7  ;;  %v2005_v7 = vsel %vm14357_vm9, %v14720_v25, %v14719_v38  ;;  %v3944_v32 = vsel %vm719_vm15, %v3936_v59, %v11490_v0  ;;  %v3930_v6 = vsel %vm14356_vm13, %v3922_v13, %v11492_v60  ;;  %vm14728_vm2 = vmmov %vm14727_vm12  ;;  %v14737_v13 = vld [vmem:[#allocation92_spill] sm:$0xff] }
 0x76e   : > { %v2013_v45 = vsel %vm768_vm4, %v2005_v7, %v14724_v63  ;;  %v2017_v38 = vsel %vm768_vm4, %v2009_v31, %v14729_v52  ;;  %v14745_v52 = vld [vmem:[#allocation72_spill] sm:$0xff] }
 0x76f   : > { %v4030_v25 = vshll.u32 %v2013_v45, 16  ;;  %v14739_v45 = vld [vmem:[#allocation99_spill] sm:$0xff] }
 0x773   : > { %v11498_v42 = vpop.permute.xlu1 %3825 }
 0x774   : > { %v11502_v28 = vpop.permute.xlu0 %3829  ;;  %v11595_v40 = vpop.permute.xlu2 %3875 }
 0x77b   : > { %v3840_v27 = vpop.permute.xlu1 %3839 }
 0x77c   : > { %v3844_v14 = vpop.permute.xlu0 %3843  ;;  %v3948_v2 = vsel %vm728_vm0, %v3940_v50, %v3840_v27  ;;  %v2015_v27 = vsel %vm768_vm4, %v2007_v21, %v14723_v4  ;;  %v14726_v21 = vld [vmem:[#allocation83_spill] sm:$0xff]  ;;  %v4026_v4 = vrot.slane %v11607_v41, 7  ;;  %v4032_v41 = vrot.slane %v4030_v25, 7 }
 0x77d   : > { %v3952_v18 = vsel %vm728_vm0, %v3944_v32, %v3844_v14  ;;  %v3956_v0 = vsel %vm737_vm1, %v3948_v2, %v11500_v48  ;;  %v2011_v58 = vsel %vm14357_vm9, %v14726_v21, %v14725_v24  ;;  %v3926_v14 = vsel %vm14356_vm13, %v3916_v10, %v11482_v9  ;;  %v14730_v10 = vld [vmem:[#allocation82_spill] sm:$0xff]  ;;  %v14731_v32 = vld [vmem:[#allocation23_spill] sm:$0xff] }
 0x77e   : > { %v4036_v50 = vshll.u32 %v2015_v27, 16  ;;  %v3934_v48 = vsel %vm710_vm14, %v3926_v14, %v11494_v46  ;;  %v3938_v9 = vsel %vm710_vm14, %v3930_v6, %v11488_v12  ;;  %v2397_v39 = vsel %vm14357_vm9, %v14731_v32, %v14730_v10  ;;  %vm14735_vm14 = vmmov %vm14733_vm7  ;;  %v14736_v27 = vld [vmem:[#allocation19_spill] sm:$0xff]  ;;  %v14749_v10 = vld [vmem:[#allocation44_spill] sm:$0xff] }
 0x77f   : > { %v3942_v7 = vsel %vm719_vm15, %v3934_v48, %v11498_v42  ;;  %v3946_v19 = vsel %vm719_vm15, %v3938_v9, %v11502_v28  ;;  %v14732_v46 = vsel %vm11254_vm8, %v11373_v16, %v11365_v37  ;;  %v14734_v12 = vsel %vm11254_vm8, %v11302_v3, %v11292_v49  ;;  %v11680_v49 = vpop.permute.xlu2 %3889  ;;  %vm14741_vm15 = vmmov %vm14728_vm2  ;;  %v14743_v48 = vld [vmem:[#allocation80_spill] sm:$0xff]  ;;  %v14748_v9 = vld [vmem:[#allocation97_spill] sm:$0xff] }
 0x780   : > { %v2019_v28 = vsel %vm768_vm4, %v2011_v58, %v14736_v27  ;;  %v4038_v63 = vrot.slane %v4036_v50, 7  ;;  %v3950_v3 = vsel %vm728_vm0, %v3942_v7, %v11496_v33  ;;  %v3580_v24 = vsel %vm14357_vm9, %v11263_v61, %v11304_v5  ;;  %v14742_v50 = vld [vmem:[#allocation59_spill] sm:$0xff] }
 0x781   : > { %v4048_v58 = vshll.u32 %v2019_v28, 16  ;;  %v3588_v14 = vsel %vm768_vm4, %v3580_v24, %v11387_v36  ;;  %v2399_v61 = vsel %vm14357_vm9, %v14743_v48, %v14742_v50  ;;  %v14746_v36 = vld [vmem:[#allocation76_spill] sm:$0xff]  ;;  %v2791_v32 = vsel %vm14357_vm9, %v14749_v10, %v14748_v9  ;;  %v14771_v9 = vld [vmem:[#allocation90_spill] sm:$0xff] }
 0x782   : > { %v14754_v28 = vld [vmem:[#allocation20_spill] sm:$0xff] }
 0x783   : > { %v3846_v62 = vpop.permute.xlu1 %3845  ;;  %v14764_v50 = vld [vmem:[#allocation48_spill] sm:$0xff] }
 0x784   : > { %v11567_v1 = vpop.permute.xlu0 %3857  ;;  %v3954_v16 = vsel %vm728_vm0, %v3946_v19, %v3846_v62  ;;  %vm14744_vm0 = vmmov %vm14728_vm2 }
 0x785   : > { %v3958_v62 = vsel %vm737_vm1, %v3950_v3, %v11567_v1  ;;  %v3962_v33 = vsel %vm737_vm1, %v3954_v16, %v11515_v44  ;;  %v14747_v44 = vld [vmem:[#allocation111_spill] sm:$0xff] }
 0x786   : > { %v3188_v25 = vsel %vm14357_vm9, %v11021_v56, %v14747_v44 }
 0x78b   : > { %v3860_v29 = vpop.permute.xlu1 %3859 }
 0x78c   : > { %v3960_v59 = vsel %vm737_vm1, %v3952_v18, %v3860_v29  ;;  %v11631_v35 = vpop.permute.xlu0 %3871  ;;  %v14738_v18 = vld [vmem:[#allocation45_spill] sm:$0xff]  ;;  %v4042_v29 = vshll.u32 %v2017_v38, 16  ;;  %v2403_v38 = vsel %vm14357_vm9, %v14746_v36, %v14745_v52  ;;  %vm14752_vm1 = vmmov %vm14733_vm7 }
 0x78d   : > { %v3968_v57 = vsel %vm14727_vm12, %v3960_v59, %v11595_v40  ;;  %v3964_v60 = vsel %vm14728_vm2, %v3956_v0, %v11631_v35  ;;  %v2789_v37 = vsel %vm14357_vm9, %v14738_v18, %v14737_v13  ;;  %v14740_v0 = vld [vmem:[#allocation17_spill] sm:$0xff]  ;;  %vm14753_vm12 = vcmask 1040384   ;;  %vm14757_vm2 = vmmov %vm14752_vm1 }
 0x78e   : > { %v4167_v22 = vrot.slane %v3968_v57, 4  ;;  %v4163_v2 = vrot.slane %v3964_v60, 4  ;;  %v2797_v6 = vsel %vm768_vm4, %v2789_v37, %v14739_v45  ;;  %v2405_v59 = vsel %vm768_vm4, %v2397_v39, %v14740_v0  ;;  %v14750_v39 = vld [vmem:[#allocation116_spill] sm:$0xff]  ;;  %v14755_v37 = vld [vmem:[#allocation109_spill] sm:$0xff] }
 0x78f   : > { %v4078_v5 = vshll.u32 %v2797_v6, 16  ;;  %v3196_v19 = vsel %vm768_vm4, %v3188_v25, %v14750_v39  ;;  %v11727_v56 = vsel %vm14753_vm12, %v11582_v15, %v4026_v4  ;;  %v2407_v13 = vsel %vm768_vm4, %v2399_v61, %v14754_v28  ;;  %v14759_v45 = vld [vmem:[#allocation25_spill] sm:$0xff]  ;;  %v3904_v61 = vpop.permute.xlu2 %3903  ;;  %v14774_v28 = vld [vmem:[#allocation104_spill] sm:$0xff] }
 0x790   : > { %v11661_v31 = vsel %vm14733_vm7, %v14732_v46, %v4167_v22  ;;  %v11669_v42 = vsel %vm14735_vm14, %v14734_v12, %v4163_v2  ;;  %v4068_v2 = vrot.slane %v2405_v59, 6  ;;  %v4126_v46 = vshll.u32 %v3588_v14, 16  ;;  %v14768_v36 = vld [vmem:[#allocation101_spill] sm:$0xff] }
 0x791   : > { %v14751_v12 = vsel %vm11254_vm8, %v11279_v8, %v11267_v34  ;;  %v3582_v18 = vsel %vm14357_vm9, %v11243_v43, %v11381_v53  ;;  %v14756_v16 = vsel %vm11254_vm8, %v11345_v30, %v14755_v37  ;;  %v11742_v8 = vrot.slane %v4042_v29, 7  ;;  %v14760_v30 = vld [vmem:[#allocation91_spill] sm:$0xff] }
 0x792   : > { %v4221_v4 = vsel %vm10468_vm10, %v11598_v17, %v4038_v63  ;;  %v11749_v6 = vsel %vm768_vm4, %v2403_v38, %v14759_v45  ;;  %v4080_v3 = vrot.slane %v4078_v5, 6  ;;  %v4219_v43 = vsel %vm10468_vm10, %v11601_v26, %v4032_v41  ;;  %v14765_v41 = vld [vmem:[#allocation114_spill] sm:$0xff]  ;;  %v14775_v45 = vld [vmem:[#allocation113_spill] sm:$0xff] }
 0x793   : > { %v11691_v21 = vpop.permute.xlu1 %3873  ;;  %v11754_v53 = vrot.slane %v4048_v58, 7  ;;  %v2799_v0 = vsel %vm768_vm4, %v2791_v32, %v14760_v30  ;;  %v4116_v29 = vrot.slane %v3196_v19, 5  ;;  %vm14761_vm7 = vcmask 1041408   ;;  %v14766_v58 = vld [vmem:[#allocation108_spill] sm:$0xff]  ;;  %v14773_v19 = vld [vmem:[#allocation110_spill] sm:$0xff]  ;;  %v14777_v30 = vld [vmem:[#allocation117_spill] sm:$0xff] }
 0x794   : > { %v3966_v57 = vsel %vm14741_vm15, %v3958_v62, %v11691_v21  ;;  %v11699_v60 = vpop.permute.xlu0 %3877  ;;  %v4233_v59 = vsel %vm14761_vm7, %v4219_v43, %v4068_v2  ;;  %v4070_v24 = vrot.slane %v2407_v13, 6  ;;  %v14762_v62 = vld [vmem:[#allocation102_spill] sm:$0xff]  ;;  %v4128_v63 = vrot.slane %v4126_v46, 5  ;;  %vm14772_vm15 = vmmov %vm14761_vm7 }
 0x795   : > { %v4165_v1 = vrot.slane %v3966_v57, 4  ;;  %v3970_v22 = vsel %vm14744_vm0, %v3962_v33, %v11699_v60  ;;  %v3590_v17 = vsel %vm768_vm4, %v3582_v18, %v14762_v62  ;;  %v4074_v33 = vrot.slane %v11749_v6, 6  ;;  %v14763_v57 = vld [vmem:[#allocation95_spill] sm:$0xff]  ;;  %v14776_v6 = vld [vmem:[#allocation105_spill] sm:$0xff] }
 0x796   : > { %v4169_v7 = vrot.slane %v3970_v22, 4  ;;  %v2795_v26 = vsel %vm14357_vm9, %v14764_v50, %v14763_v57  ;;  %v3190_v48 = vsel %vm14357_vm9, %v14766_v58, %v14765_v41  ;;  %v4084_v22 = vshll.u32 %v2799_v0, 16 }
 0x797   : > { %v11723_v27 = vsel %vm14752_vm1, %v14751_v12, %v4165_v1  ;;  %v4262_v52 = vsel %vm10894_vm3, %v4233_v59, %v4080_v3  ;;  %v2803_v38 = vsel %vm768_vm4, %v2795_v26, %v14768_v36  ;;  %vm14769_vm14 = vcmask 1042432  }
 0x798   : > { %v11740_v34 = vsel %vm14757_vm2, %v14756_v16, %v4169_v7  ;;  %v4276_v25 = vsel %vm14769_vm14, %v4262_v52, %v4116_v29  ;;  %v14770_v7 = vld [vmem:[#allocation118_spill] sm:$0xff]  ;;  %v4132_v32 = vshll.u32 %v3590_v17, 16  ;;  %v3198_v46 = vsel %vm768_vm4, %v3190_v48, %v14773_v19  ;;  %v3910_v52 = vpop.permute.xlu2 %3909 }
 0x799   : > { %v3586_v10 = vsel %vm14357_vm9, %v14771_v9, %v14770_v7  ;;  %v4305_v12 = vsel %vm11254_vm8, %v4276_v25, %v4128_v63  ;;  %vm4348_vm0 = vcmask 1041409   ;;  %vm4352_vm1 = vcmask 1042434   ;;  %v14779_v48 = vld [vmem:[#allocation54_spill] sm:$0xff] }
 0x79a   : > { %v3594_v13 = vsel %vm768_vm4, %v3586_v10, %v14774_v28  ;;  %vm4356_vm12 = vcmask 1043459   ;;  %v4086_v37 = vrot.slane %v4084_v22, 6  ;;  %v4096_v16 = vshll.u32 %v2803_v38, 16  ;;  %v14781_v9 = vld [vmem:[#allocation98_spill] sm:$0xff] }
 0x79b   : > { %v3888_v14 = vpop.permute.xlu1 %3887  ;;  %v4118_v43 = vrot.slane %v3198_v46, 5  ;;  %v4134_v29 = vrot.slane %v4132_v32, 5  ;;  %v4144_v59 = vshll.u32 %v3594_v13, 16  ;;  %vm14778_vm7 = vcmask 1040384   ;;  %v14784_v13 = vld [vmem:[#allocation73_spill] sm:$0xff] }
 0x79c   : > { %v3972_v5 = vsel %vm14357_vm9, %v11631_v35, %v3888_v14  ;;  %v11770_v1 = vpop.permute.xlu0 %3891  ;;  %v4241_v35 = vsel %vm14772_vm15, %v4221_v4, %v4070_v24  ;;  %v3194_v4 = vsel %vm14357_vm9, %v14776_v6, %v14775_v45  ;;  %v3974_v57 = vsel %vm14357_vm9, %v11691_v21, %v11680_v49 }
 0x79d   : > { %v3980_v44 = vsel %vm768_vm4, %v3972_v5, %v3904_v61  ;;  %v3202_v0 = vsel %vm768_vm4, %v3194_v4, %v14777_v30  ;;  %v14780_v61 = vld [vmem:[#allocation94_spill] sm:$0xff]  ;;  %v4264_v22 = vsel %vm10894_vm3, %v4241_v35, %v4086_v37  ;;  %v4225_v7 = vsel %vm10468_vm10, %v11727_v56, %v11754_v53  ;;  %v14783_v35 = vld [vmem:[#allocation85_spill] sm:$0xff]  ;;  %v14788_v30 = vld [vmem:[#allocation107_spill] sm:$0xff] }
 0x79e   : > { %v4164_v39 = vrot.slane %v3980_v44, 4  ;;  %v2793_v5 = vsel %vm14357_vm9, %v14780_v61, %v14779_v48  ;;  %v4098_v44 = vrot.slane %v4096_v16, 6  ;;  %v4284_v49 = vsel %vm14769_vm14, %v4264_v22, %v4118_v43  ;;  %v14785_v53 = vld [vmem:[#allocation77_spill] sm:$0xff] }
 0x79f   : > { %v2801_v10 = vsel %vm768_vm4, %v2793_v5, %v14781_v9  ;;  %v4122_v32 = vrot.slane %v3202_v0, 5  ;;  %v4257_v46 = vsel %vm14772_vm15, %v4225_v7, %v4074_v33  ;;  %v14787_v43 = vld [vmem:[#allocation89_spill] sm:$0xff]  ;;  %v14789_v0 = vld [vmem:[#allocation112_spill] sm:$0xff]  ;;  %vm14791_vm15 = vmmov %vm14757_vm2 }
 0x7a0   : > { %v4318_v18 = vsel %vm14757_vm2, %v4305_v12, %v4164_v39  ;;  %v14782_v39 = vld [vmem:[#allocation79_spill] sm:$0xff]  ;;  %v4146_v12 = vrot.slane %v4144_v59, 5  ;;  %v4090_v6 = vshll.u32 %v2801_v10, 16  ;;  %v4268_v4 = vsel %vm10894_vm3, %v4257_v46, %v4098_v44 }
 0x7a1   : > { %v4341_v3 = vrot.slane %v4318_v18, 7  ;;  %v2401_v19 = vsel %vm14357_vm9, %v14783_v35, %v14782_v39  ;;  %v14786_v18 = vld [vmem:[#allocation100_spill] sm:$0xff]  ;;  %v4300_v59 = vsel %vm14769_vm14, %v4268_v4, %v4122_v32 }
 0x7a2   : > { %v2409_v56 = vsel %vm768_vm4, %v2401_v19, %v14784_v13  ;;  %v3584_v37 = vsel %vm14357_vm9, %v14786_v18, %v14785_v53  ;;  %v4092_v5 = vrot.slane %v4090_v6, 6 }
 0x7a3   : > { %v4346_v24 = vsel %vm14778_vm7, %v11669_v42, %v4341_v3  ;;  %v4349_v62 = vsel %vm4348_vm0, %v11669_v42, %v4341_v3  ;;  %v4353_v17 = vsel %vm4352_vm1, %v11669_v42, %v4341_v3  ;;  %v4357_v63 = vsel %vm4356_vm12, %v11669_v42, %v4341_v3  ;;  %v3894_v14 = vpop.permute.xlu1 %3893 }
 0x7a4   : > { %v4351_v50 = vrot.slane %v4349_v62, 1  ;;  %v4355_v26 = vrot.slane %v4353_v17, 2  ;;  %v4359_v41 = vrot.slane %v4357_v63, 3  ;;  %4465 = vst [vmem:[#allocation1] ss:$9 sm:$0xff] %v4346_v24  ;;  %v3906_v58 = vpop.permute.xlu0 %3905  ;;  %v3978_v36 = vsel %vm14357_vm9, %v11699_v60, %v3894_v14  ;;  %v14790_v14 = vld [vmem:[#allocation115_spill] sm:$0xff] }
 0x7a5   : > { %v3982_v38 = vsel %vm768_vm4, %v3974_v57, %v3906_v58  ;;  %v3986_v21 = vsel %vm768_vm4, %v3978_v36, %v3910_v52  ;;  %v4307_v60 = vsel %vm11254_vm8, %v4284_v49, %v4134_v29  ;;  %v3592_v33 = vsel %vm768_vm4, %v3584_v37, %v14787_v43 }
 0x7a6   : > { %4468 = vst [vmem:[#allocation1 + $0x1] ss:$9 sm:$0xff] %v4351_v50  ;;  %v4166_v25 = vrot.slane %v3982_v38, 4  ;;  %v4170_v16 = vrot.slane %v3986_v21, 4  ;;  %vm4360_vm7 = vcmask 1044484   ;;  %v3192_v29 = vsel %vm14357_vm9, %v14789_v0, %v14788_v30 }
 0x7a7   : > { %4471 = vst [vmem:[#allocation1 + $0x2] ss:$9 sm:$0xff] %v4355_v26  ;;  %v4179_v17 = vsel %vm10002_vm5, %v11562_v51, %v3997_v47  ;;  %v4072_v63 = vrot.slane %v2409_v56, 6  ;;  %v3200_v57 = vsel %vm768_vm4, %v3192_v29, %v14790_v14  ;;  %v4311_v50 = vsel %vm11254_vm8, %v4300_v59, %v4146_v12 }
 0x7a8   : > { %4474 = vst [vmem:[#allocation1 + $0x3] ss:$9 sm:$0xff] %v4359_v41  ;;  %v4324_v28 = vsel %vm14757_vm2, %v4307_v60, %v4166_v25  ;;  %v4138_v26 = vshll.u32 %v3592_v33, 16  ;;  %v4361_v41 = vsel %vm4360_vm7, %v11669_v42, %v4341_v3  ;;  %v4336_v58 = vsel %vm14791_vm15, %v4311_v50, %v4170_v16 }
 0x7a9   : > { %v4342_v45 = vrot.slane %v4324_v28, 7  ;;  %vm14792_vm2 = vcmask 1040384   ;;  %v4120_v22 = vrot.slane %v3200_v57, 5  ;;  %v4363_v3 = vrot.slane %v4361_v41, 4 }
 0x7aa   : > { %vm14793_vm14 = vmmov %vm14792_vm2  ;;  %v11867_v52 = vrot.slane %v4336_v58, 7  ;;  %vm14794_vm15 = vcmask 1041408   ;;  %v3976_v49 = vsel %vm14357_vm9, %v11595_v40, %v11770_v1  ;;  %v8967_v41 = vmov 0  }
 0x7ab   : > { %v4367_v24 = vsel %vm4348_vm0, %v11723_v27, %v4342_v45  ;;  %v4370_v62 = vsel %vm4352_vm1, %v11723_v27, %v4342_v45  ;;  %v4365_v11 = vsel %vm14792_vm2, %v11723_v27, %v4342_v45  ;;  %v4205_v51 = vsel %vm14793_vm14, %v4179_v17, %v4024_v23  ;;  %v3908_v44 = vpop.permute.xlu1 %3907  ;;  %8775 = vset.pattern.permute.xlu0 %v8967_v41 }
 0x7ac   : > { %v4369_v47 = vrot.slane %v4367_v24, 1  ;;  %v4372_v48 = vrot.slane %v4370_v62, 2  ;;  %v4223_v61 = vsel %vm10468_vm10, %v4205_v51, %v11742_v8  ;;  %v4373_v42 = vsel %vm4356_vm12, %v11723_v27, %v4342_v45 }
 0x7ad   : > { %v4419_v36 = vunpack.i.h.s16 %v4365_v11  ;;  %v4249_v54 = vsel %vm14794_vm15, %v4223_v61, %v4072_v63  ;;  %v4140_v23 = vrot.slane %v4138_v26, 5  ;;  %v4375_v21 = vrot.slane %v4373_v42, 3  ;;  %v4550_v26 = vld [vmem:[%s14259_s2] sm:$0xf] }
 0x7ae   : > { %v4421_v38 = vunpack.i.h.s16 %v4369_v47  ;;  %v4423_v8 = vunpack.i.h.s16 %v4372_v48  ;;  %v8607_v25 = vpack.i.b16 %v4365_v11, %v4363_v3  ;;  %v4266_v9 = vsel %vm10894_vm3, %v4249_v54, %v4092_v5  ;;  %4553 = vperm.xlu0 %8775, %v4550_v26  }
 0x7af   : > { %v8608_v7 = vpack.i.b16 %v4369_v47, %v4419_v36  ;;  %v3984_v32 = vsel %vm768_vm4, %v3976_v49, %v3908_v44  ;;  %vm14795_vm2 = vcmask 1042432   ;;  %v4397_v39 = vsel %vm4348_vm0, %v11740_v34, %v11867_v52 }
 0x7b0   : > { %v8609_v10 = vpack.i.b16 %v4372_v48, %v4421_v38  ;;  %v4292_v60 = vsel %vm14795_vm2, %v4266_v9, %v4120_v22  ;;  %v8610_v35 = vpack.i.b16 %v4375_v21, %v4423_v8  ;;  %4477 = vst [vmem:[#allocation1 + $0x4] ss:$9 sm:$0xff] %v8607_v25  ;;  %v4168_v19 = vrot.slane %v3984_v32, 4 }
 0x7b1   : > { %v4309_v40 = vsel %vm11254_vm8, %v4292_v60, %v4140_v23  ;;  %4480 = vst [vmem:[#allocation1 + $0x5] ss:$9 sm:$0xff] %v8608_v7  ;;  %vm14796_vm14 = vcmask 1043456   ;;  %vm14797_vm15 = vcmask 1040384   ;;  %v4399_v12 = vrot.slane %v4397_v39, 1 }
 0x7b2   : > { %4483 = vst [vmem:[#allocation1 + $0x6] ss:$9 sm:$0xff] %v8609_v10  ;;  %v4330_v1 = vsel %vm14796_vm14, %v4309_v40, %v4168_v19  ;;  %v4395_v46 = vsel %vm14797_vm15, %v11740_v34, %v11867_v52  ;;  %v4376_v13 = vsel %vm4360_vm7, %v11723_v27, %v4342_v45  ;;  %v4425_v56 = vunpack.i.h.s16 %v4375_v21  ;;  %vm14798_vm4 = vmmov %vm14797_vm15 }
 0x7b3   : > { %4486 = vst [vmem:[#allocation1 + $0x7] ss:$9 sm:$0xff] %v8610_v35  ;;  %v4343_v28 = vrot.slane %v4330_v1, 7  ;;  %v4400_v53 = vsel %vm4352_vm1, %v11740_v34, %v11867_v52  ;;  %v4437_v18 = vunpack.i.h.s16 %v4395_v46  ;;  %v4439_v16 = vunpack.i.h.s16 %v4399_v12 }
 0x7b4   : > { %v4378_v6 = vrot.slane %v4376_v13, 4  ;;  %v4402_v43 = vrot.slane %v4400_v53, 2  ;;  %v4403_v14 = vsel %vm4356_vm12, %v11740_v34, %v11867_v52  ;;  %v14361_v58 = vmov 1  }
 0x7b5   : > { %v4391_v37 = vsel %vm4360_vm7, %v11661_v31, %v4343_v28  ;;  %v8613_v0 = vpack.i.b16 %v4399_v12, %v4437_v18  ;;  %v4382_v27 = vsel %vm4348_vm0, %v11661_v31, %v4343_v28  ;;  %v4385_v24 = vsel %vm4352_vm1, %v11661_v31, %v4343_v28  ;;  %8776 = vset.pattern.permute.xlu1 %v14361_v58 }
 0x7b6   : > { %v4393_v4 = vrot.slane %v4391_v37, 4  ;;  %v8611_v33 = vpack.i.b16 %v4378_v6, %v4425_v56  ;;  %v8614_v45 = vpack.i.b16 %v4402_v43, %v4439_v16  ;;  %v4388_v62 = vsel %vm4356_vm12, %v11661_v31, %v4343_v28  ;;  %4559 = vperm.xlu1 %8776, %v4550_v26  }
 0x7b7   : > { %v4380_v17 = vsel %vm14798_vm4, %v11661_v31, %v4343_v28  ;;  %v4384_v63 = vrot.slane %v4382_v27, 1  ;;  %v4387_v57 = vrot.slane %v4385_v24, 2  ;;  %v4390_v50 = vrot.slane %v4388_v62, 3 }
 0x7b8   : > { %v8612_v30 = vpack.i.b16 %v4395_v46, %v4393_v4  ;;  %v4405_v31 = vrot.slane %v4403_v14, 3  ;;  %v4406_v11 = vsel %vm4360_vm7, %v11740_v34, %v11867_v52  ;;  %v4441_v51 = vunpack.i.h.s16 %v4402_v43  ;;  %v4445_v34 = vld [vmem:[%s14258_s1] sm:$0x3] }
 0x7b9   : > { %v4408_v48 = vrot.slane %v4406_v11, 4  ;;  %vm14799_vm0 = vcmask 1041408   ;;  %v4566_v19 = vlaneseq }
 0x7ba   : > { %v4487_v29 = vld [vmem:[#allocation1] sm:$0xff]  ;;  %v4488_v59 = vld [vmem:[#allocation1 + $0x9] sm:$0xff]  ;;  %v4443_v47 = vunpack.i.h.s16 %v4405_v31  ;;  %v8615_v61 = vpack.i.b16 %v4405_v31, %v4441_v51  ;;  %vm14800_vm1 = vmmov %vm14799_vm0 }
 0x7bb   : > { %4490 = vst [vmem:[#allocation1] ss:$9 sm:$0xff] %v8611_v33  ;;  %v4567_v40 = vshrl.u32 %v4566_v19, 7  ;;  %v4570_v1 = vand.u32 127, %v4566_v19 }
 0x7bc   : > { %4502 = vst [vmem:[#allocation1 + $0x6] ss:$9 sm:$0xff] %v8613_v0  ;;  %v8616_v5 = vpack.i.b16 %v4408_v48, %v4443_v47  ;;  %v14808_v47 = vld [vmem:[#allocation16_spill] sm:$0xff] }
 0x7bd   : > { %4504 = vst [vmem:[#allocation1 + $0x7] ss:$9 sm:$0xff] %v8614_v45  ;;  %v4568_v28 = vadd.s32 8, %v4567_v40  ;;  %vm4581_vm12 = vcmp.ge.s32.totalorder %v4570_v1, 1  ;;  %vm14358_vm7 = vcmp.le.s32.totalorder %v4570_v1, 16 }
 0x7be   : > { %4492 = vst [vmem:[#allocation1 + $0x1] ss:$9 sm:$0xff] %v4380_v17 }
 0x7bf   : > { %4494 = vst [vmem:[#allocation1 + $0x2] ss:$9 sm:$0xff] %v4384_v63 }
 0x7c0   : > { %4496 = vst [vmem:[#allocation1 + $0x3] ss:$9 sm:$0xff] %v4387_v57 }
 0x7c1   : > { %4498 = vst [vmem:[#allocation1 + $0x4] ss:$9 sm:$0xff] %v4390_v50 }
 0x7c2   : > { %4500 = vst [vmem:[#allocation1 + $0x5] ss:$9 sm:$0xff] %v8612_v30  ;;  %v14805_v30 = vld [vmem:[#allocation15_spill] sm:$0xff] }
 0x7c9   : > { %v4505_v22 = vld [vmem:[#allocation1] sm:$0xff]  ;;  %v4506_v42 = vld [vmem:[#allocation1 + $0x9] sm:$0xff] }
 0x7ca   : > { %4508 = vst [vmem:[#allocation1] ss:$9 sm:$0xff] %v8615_v61 }
 0x7cb   : > { %4510 = vst [vmem:[#allocation1 + $0x1] ss:$9 sm:$0xff] %v8616_v5 }
 0x7d2   : > { %v4511_v3 = vld [vmem:[#allocation1] sm:$0xff]  ;;  %v4512_v36 = vld [vmem:[#allocation1 + $0x9] sm:$0xff] }
 0x7d3   : > { %v4520_v38 = vsel %vm14799_vm0, %v4511_v3, 0  ;;  %v4522_v44 = vsel %vm14800_vm1, %v4512_v36, 0  ;;  %vm14803_vm1 = vcmask 1047556  }
 0x7d4   : > { %4529 = vmatpush.bf16.msra.mxu0 %v4520_v38  ;;  %4542 = vmatpush.bf16.msra.mxu1 %v4522_v44  ;;  %vm14809_vm9 = vmmov %vm14803_vm1 }
 0x7d8   : > { %4530 = vmatpush.bf16.msra.mxu0 %v4505_v22  ;;  %4543 = vmatpush.bf16.msra.mxu1 %v4506_v42 }
 0x7dc   : > { %4531 = vmatpush.bf16.msra.mxu0 %v4487_v29  ;;  %4544 = vmatpush.bf16.msra.mxu1 %v4488_v59 }
 0x7df   : > { %8617 = vmatmul.msk.bf16.vlgmr.msra.gmra.mxu0 %vm14356_vm13, %v4445_v34  ;;  %8618 = vmatmul.msk.bf16.vlgmr.msra.gmra.mxu1 %vm14356_vm13, %v4445_v34  ;;  %vm14804_vm13 = vmmov %vm14803_vm1 }
 0x820   : > { %v4554_v52 = vpop.permute.xlu0 %4553 }
 0x828   : > { %v4560_v54 = vpop.permute.xlu1 %4559 }
 0x85c   : > { %v4533_v23 = vpop.f32.mrf.mxu0  ;;  %v4546_v49 = vpop.f32.mrf.mxu1 }
 0x85d   : > { %v4556_v21 = vmul.f32 %v4554_v52, %v4533_v23  ;;  %v4557_v8 = vmul.f32 %v4554_v52, %v4546_v49 }
 0x85f   : > { %v4562_v25 = vadd.f32 %v4560_v54, %v4556_v21  ;;  %v4563_v7 = vadd.f32 %v4560_v54, %v4557_v8 }
 0x861   : > { %v4564_v9 = vmax.f32 %v4562_v25, 0.0  ;;  %v4565_v60 = vmax.f32 %v4563_v7, 0.0 }
 0x863   : > { %4597 = vrot.lane.b32.xlu0 %v4564_v9, %s8969_s11  ;;  %4591 = vrot.lane.b32.xlu1 %v4564_v9, %s8970_s7  ;;  %v8777_v39 = vpack.i.bf16 %v4565_v60, %v4564_v9  ;;  %s8977_s11 = smov 94   ;;  %s8619_s7 = sadd.s32 4294967295, %s8601_s12 }
 0x864   : > { %4588 = vrot.lane.b32.xlu2 %v4564_v9, %s8971_s13  ;;  %v4535_v10 = vpop.f32.mrf.mxu0  ;;  %v4548_v32 = vpop.f32.mrf.mxu1  ;;  %v4572_v46 = vstv %s8619_s7  ;;  %s8978_s12 = smov 32   ;;  %s8979_s13 = smov 48  }
 0x865   : > { %v4574_v13 = vadd.s32 %v4572_v46, %v4568_v28  ;;  %v4573_v62 = vadd.s32 %v4572_v46, %v4567_v40 }
 0x867   : > { %vm4576_vm2 = vcmp.ge.s32.totalorder %v4574_v13, 0  ;;  %vm4578_vm14 = vcmp.lt.s32.totalorder %v4574_v13, 16 }
 0x868   : > { %vm4580_vm15 = vmand %vm4576_vm2, %vm4578_vm14  ;;  %vm4611_vm14 = vcmask 15360  }
 0x869   : > { %vm4583_vm4 = vmand %vm4580_vm15, %vm4581_vm12 }
 0x86a   : > { %vm11923_vm0 = vmand %vm4583_vm4, %vm14358_vm7  ;;  %vm4577_vm4 = vcmp.lt.s32.totalorder %v4573_v62, 16 }
 0x86b   : > { %8778 = vrot.lane.b32.xlu0 %v8777_v39, %s8972_s16  ;;  %4600 = vrot.lane.b32.xlu1 %v4564_v9, %s8973_s29  ;;  %vm14806_vm2 = vmmov %vm14803_vm1  ;;  %s8980_s16 = smov 64   ;;  %s8981_s29 = smov 80  }
 0x86c   : > { %4594 = vrot.lane.b32.xlu2 %v4564_v9, %s8974_s14  ;;  %vm14807_vm15 = vmmov %vm14803_vm1  ;;  %s8982_s14 = smov 96  }
 0x86d   : > { %vm14810_vm7 = vmmov %vm14803_vm1 }
 0x873   : > { %4614 = vrot.lane.b32.xlu1 %v4565_v60, %s8975_s8 }
 0x874   : > { %4603 = vrot.lane.b32.xlu2 %v4564_v9, %s8976_s30  ;;  %s8636_s30 = sshll.u32 %s8937_s25, 1 }
 0x87c   : > { %4616 = vrot.lane.b32.xlu2 %v4565_v60, %s8977_s11  ;;  %s8498_s11 = sadd.s32 %s8933_s24, %s8636_s30  ;;  %s8488_s24 = scalar_lea.sflag [#allocation5], %s256_s6 }
 0x87d   : > { %s8637_s7 = sshll.u32 %s8498_s11, 2 }
 0x8be   : > { %v4589_v35 = vpop.permute.xlu2 %4588 }
 0x8c6   : > { %v4595_v12 = vpop.permute.xlu2 %4594 }
 0x8c7   : > { %v4625_v56 = vrot.slane %v4595_v12, 4 }
 0x8c9   : > { %v4626_v4 = vsel %vm14803_vm1, %v4625_v56, %v4589_v35 }
 0x8ca   : > { %v4630_v0 = vperm.slane %v4626_v4, %v14805_v30 }
 0x8cc   : > { %v4643_v17 = vrot.slane %v4630_v0, 4 }
 0x8ce   : > { %v4604_v6 = vpop.permute.xlu2 %4603 }
 0x8cf   : > { %v4631_v43 = vrot.slane %v4604_v6, 4 }
 0x8d5   : > { %v4598_v53 = vpop.permute.xlu0 %4597  ;;  %v4592_v18 = vpop.permute.xlu1 %4591 }
 0x8d6   : > { %v4618_v16 = vrot.slane %v4592_v18, 4  ;;  %v4632_v29 = vsel %vm14806_vm2, %v4631_v43, %v4598_v53 }
 0x8d7   : > { %v4636_v63 = vperm.slane %v4632_v29, %v14805_v30 }
 0x8d8   : > { %v4620_v33 = vsel %vm14804_vm13, %v4618_v16, %v4564_v9  ;;  %vm4575_vm13 = vcmp.ge.s32.totalorder %v4573_v62, 0 }
 0x8d9   : > { %v4624_v27 = vperm.slane %v4620_v33, %v14805_v30  ;;  %v4657_v11 = vrot.slane %v4636_v63, 4  ;;  %vm4579_vm2 = vmand %vm4575_vm13, %vm4577_vm4 }
 0x8da   : > { %vm14813_vm13 = vmmov %vm14810_vm7 }
 0x8db   : > { %v4644_v50 = vsel %vm14807_vm15, %v4643_v17, %v4624_v27  ;;  %v4645_v26 = vrot.slane %v4624_v27, 4  ;;  %vm14811_vm15 = vmmov %vm14803_vm1 }
 0x8dc   : > { %v4650_v48 = vperm.slane %v4644_v50, %v14808_v47  ;;  %vm14817_vm4 = vmmov %vm14810_vm7 }
 0x8dd   : > { %v8779_v59 = vpop.permute.xlu0 %8778  ;;  %v4601_v41 = vpop.permute.xlu1 %4600  ;;  %v4646_v61 = vsel %vm14809_vm9, %v4630_v0, %v4645_v26  ;;  %vm14814_vm9 = vmmov %vm14810_vm7 }
 0x8de   : > { %v8781_v45 = vunpack.i.h.bf16 %v8779_v59  ;;  %v8780_v24 = vunpack.i.l.bf16 %v8779_v59  ;;  %v4654_v36 = vperm.slane %v4646_v61, %v14808_v47  ;;  %v4669_v38 = vrot.slane %v4650_v48, 4 }
 0x8e0   : > { %v4612_v14 = vsel %vm4611_vm14, %v8780_v24, %v8781_v45  ;;  %vm4582_vm14 = vmand %vm4579_vm2, %vm4581_vm12  ;;  %v4673_v25 = vrot.slane %v4654_v36, 4 }
 0x8e1   : > { %v4637_v57 = vrot.slane %v4612_v14, 4  ;;  %vm14815_vm12 = vmmov %vm14810_vm7  ;;  %v4617_v14 = vpop.permute.xlu2 %4616 }
 0x8e2   : > { %vm14818_vm2 = vmmov %vm14817_vm4 }
 0x8e3   : > { %v4638_v31 = vsel %vm14803_vm1, %v4637_v57, %v4601_v41  ;;  %vm14812_vm1 = vcmp.le.s32.totalorder %v4570_v1, 16 }
 0x8e4   : > { %v4642_v51 = vperm.slane %v4638_v31, %v14805_v30  ;;  %vm4585_vm8 = vmand %vm4582_vm14, %vm14812_vm1 }
 0x8e5   : > { %vm14819_vm14 = vmmov %vm14818_vm2 }
 0x8e6   : > { %v4655_v5 = vrot.slane %v4642_v51, 4  ;;  %v4658_v22 = vsel %vm14810_vm7, %v4642_v51, %v4657_v11  ;;  %vm14821_vm1 = vmmov %vm14818_vm2 }
 0x8e7   : > { %v4666_v42 = vperm.slane %v4658_v22, %v14808_v47 }
 0x8e8   : > { %v4656_v3 = vsel %vm14811_vm15, %v4655_v5, %v4636_v63  ;;  %vm14820_vm15 = vmmov %vm14818_vm2 }
 0x8e9   : > { %v4662_v44 = vperm.slane %v4656_v3, %v14808_v47  ;;  %v4671_v34 = vrot.slane %v4666_v42, 4  ;;  %v4674_v10 = vsel %vm14815_vm12, %v4666_v42, %v4673_v25  ;;  %v12017_v42 = vperm.slane %v4617_v14, %v14805_v30  ;;  %vm14825_vm12 = vmmov %vm14821_vm1 }
 0x8ea   : > { %v4711_v19 = vsel %vm4585_vm8, %v4674_v10, 0.0 }
 0x8eb   : > { %v4667_v52 = vrot.slane %v4662_v44, 4  ;;  %v4670_v54 = vsel %vm14813_vm13, %v4662_v44, %v4669_v38  ;;  %v4672_v23 = vsel %vm14814_vm9, %v4671_v34, %v4654_v36  ;;  %v11963_v12 = vpack.c.bf16 %v4711_v19, %v4711_v19  ;;  %vm14822_vm13 = vmmov %vm14821_vm1 }
 0x8ec   : > { %v4709_v49 = vsel %vm4585_vm8, %v4672_v23, 0.0  ;;  %v4707_v9 = vsel %vm4585_vm8, %v4670_v54, 0.0  ;;  %v4685_v25 = vrot.slane %v12017_v42, 4  ;;  %vm14823_vm9 = vmmov %vm14821_vm1 }
 0x8ed   : > { %v4668_v21 = vsel %vm14810_vm7, %v4667_v52, %v4650_v48  ;;  %v11948_v8 = vpack.c.bf16 %v4709_v49, %v4709_v49  ;;  %v11954_v39 = vpack.c.bf16 %v4707_v9, %v4707_v9  ;;  %v14362_v0 = vshrl.u32 %v11963_v12, 16  ;;  %v4615_v48 = vpop.permute.xlu1 %4614 }
 0x8ee   : > { %v4705_v7 = vsel %vm4585_vm8, %v4668_v21, 0.0  ;;  %v4734_v26 = vpack.i.b16 0, %v11963_v12  ;;  %vm14816_vm8 = vmmov %vm14810_vm7  ;;  %v12027_v34 = vperm.slane %v4615_v48, %v14805_v30 }
 0x8ef   : > { %v14363_v32 = vshrl.u32 %v11948_v8, 16  ;;  %v11952_v60 = vpack.c.bf16 %v4705_v7, %v4705_v7  ;;  %v14364_v1 = vshrl.u32 %v11954_v39, 16  ;;  %v4726_v13 = vpack.i.b16 0, %v11954_v39  ;;  %vm14824_vm7 = vmmov %vm14821_vm1 }
 0x8f0   : > { %v4736_v24 = vpack.i.b16 0, %v14362_v0  ;;  %v12022_v36 = vperm.slane %v4734_v26, %v14805_v30  ;;  %v4730_v44 = vpack.i.b16 0, %v11948_v8 }
 0x8f1   : > { %v4732_v35 = vpack.i.b16 0, %v14363_v32  ;;  %v4723_v46 = vshrl.u32 %v11952_v60, 16  ;;  %v4728_v56 = vpack.i.b16 0, %v14364_v1  ;;  %v11979_v6 = vperm.slane %v4726_v13, %v14805_v30 }
 0x8f2   : > { %v4722_v4 = vpack.i.b16 0, %v11952_v60  ;;  %v12009_v50 = vperm.slane %v4736_v24, %v14805_v30  ;;  %v12032_v23 = vperm.slane %v12022_v36, %v14808_v47  ;;  %v4817_v21 = vperm.slane %v4730_v44, %v14805_v30 }
 0x8f3   : > { %v11959_v40 = vperm.slane %v4732_v35, %v14805_v30  ;;  %v4724_v18 = vpack.i.b16 0, %v4723_v46  ;;  %v11976_v16 = vperm.slane %v4728_v56, %v14805_v30  ;;  %v11992_v59 = vperm.slane %v11979_v6, %v14808_v47 }
 0x8f4   : > { %v11995_v27 = vperm.slane %v4722_v4, %v14805_v30  ;;  %v4880_v22 = vperm.slane %v12009_v50, %v14808_v47  ;;  %v4866_v7 = vrot.slane %v12032_v23, 4  ;;  %v12039_v10 = vperm.slane %v4817_v21, %v14808_v47 }
 0x8f5   : > { %v11967_v28 = vperm.slane %v11959_v40, %v14808_v47  ;;  %v11983_v33 = vperm.slane %v4724_v18, %v14805_v30  ;;  %v11988_v29 = vperm.slane %v11976_v16, %v14808_v47  ;;  %v4790_v17 = vrot.slane %v11992_v59, 4 }
 0x8f6   : > { %v12006_v63 = vperm.slane %v11995_v27, %v14808_v47  ;;  %v4896_v49 = vunpack.c.l.b16 %v4880_v22  ;;  %v4686_v35 = vsel %vm14819_vm14, %v4685_v25, %v12027_v34  ;;  %v4885_v13 = vrot.slane %v4880_v22, 4  ;;  %vm14830_vm14 = vmmov %vm14821_vm1 }
 0x8f7   : > { %v4895_v53 = vunpack.c.l.b16 %v11967_v28  ;;  %v4766_v45 = vperm.slane %v11983_v33, %v14808_v47  ;;  %v4894_v62 = vunpack.c.l.b16 %v11988_v29  ;;  %v4791_v31 = vsel %vm14816_vm8, 0, %v4790_v17  ;;  %vm14826_vm8 = vmmov %vm14821_vm1 }
 0x8f8   : > { %v4752_v11 = vrot.slane %v12006_v63, 4  ;;  %v4914_v5 = vunpack.c.l.b16 %v4791_v31  ;;  %v4900_v56 = vpack.c.b16 %v4896_v49, %v4896_v49  ;;  %v4828_v18 = vrot.slane %v12039_v10, 4 }
 0x8f9   : > { %v4899_v43 = vpack.c.b16 %v4895_v53, %v4895_v53  ;;  %v4893_v57 = vunpack.c.l.b16 %v4766_v45  ;;  %v4898_v41 = vpack.c.b16 %v4894_v62, %v4894_v62  ;;  %v4771_v51 = vrot.slane %v4766_v45, 4 }
 0x8fa   : > { %v4753_v3 = vsel %vm14817_vm4, 0, %v4752_v11  ;;  %v4918_v38 = vpack.c.b16 %v4914_v5, %v4914_v5  ;;  %v4867_v53 = vsel %vm14820_vm15, 0, %v4866_v7  ;;  %v12047_v4 = vperm.slane %v4686_v35, %v14808_v47  ;;  %vm14827_vm4 = vmmov %vm14821_vm1 }
 0x8fb   : > { %4905 = vrot.lane.b32.xlu2 %v4899_v43, %s8964_s27  ;;  %v4897_v61 = vpack.c.b16 %v4893_v57, %v4893_v57  ;;  %4903 = vrot.lane.b32.xlu1 %v4898_v41, %s8964_s27  ;;  %v4913_v52 = vunpack.c.l.b16 %v4753_v3  ;;  %v4772_v54 = vsel %vm14818_vm2, 0, %v4771_v51  ;;  %v4829_v45 = vsel %vm14821_vm1, 0, %v4828_v18  ;;  %vm14828_vm2 = vmmov %vm14821_vm1 }
 0x8fc   : > { %v4933_v9 = vunpack.c.l.b16 %v4772_v54  ;;  %v5857_v24 = vshll.u32 %v11952_v60, 16  ;;  %v4916_v62 = vunpack.c.l.b16 %v4867_v53  ;;  %v4886_v17 = vsel %vm14822_vm13, 0, %v4885_v13  ;;  %vm14831_vm15 = vmmov %vm14821_vm1 }
 0x8fd   : > { %4901 = vrot.lane.b32.xlu0 %v4897_v61, %s8964_s27  ;;  %v4917_v19 = vpack.c.b16 %v4913_v52, %v4913_v52  ;;  %v4818_v14 = vrot.slane %v4817_v21, 4  ;;  %v4915_v57 = vunpack.c.l.b16 %v4829_v45  ;;  %v4847_v26 = vrot.slane %v11967_v28, 4  ;;  %vm14832_vm13 = vmmov %vm14821_vm1 }
 0x8fe   : > { %v4937_v43 = vpack.c.b16 %v4933_v9, %v4933_v9  ;;  %v4809_v41 = vrot.slane %v11988_v29, 4  ;;  %v4706_v31 = vsel %vm11923_vm0, %v12047_v4, 0.0  ;;  %v4936_v11 = vunpack.c.l.b16 %v4886_v17 }
 0x8ff   : > { %v5856_v51 = vrot.slane %v4723_v46, 4  ;;  %v5859_v48 = vrot.slane %v5857_v24, 5  ;;  %v4920_v61 = vpack.c.b16 %v4916_v62, %v4916_v62  ;;  %v4819_v5 = vsel %vm14823_vm9, 0, %v4818_v14  ;;  %vm14833_vm9 = vmmov %vm14821_vm1 }
 0x900   : > { %v4919_v22 = vpack.c.b16 %v4915_v57, %v4915_v57  ;;  %v4848_v3 = vsel %vm14824_vm7, 0, %v4847_v26  ;;  %v12064_v28 = vpack.c.bf16 %v4706_v31, %v4706_v31  ;;  %v4810_v29 = vsel %vm14825_vm12, 0, %v4809_v41  ;;  %vm14834_vm7 = vmmov %vm14821_vm1 }
 0x901   : > { %v4742_v44 = vrot.slane %v11995_v27, 4  ;;  %v4940_v46 = vpack.c.b16 %v4936_v11, %v4936_v11  ;;  %v12071_v52 = vperm.slane %v4819_v5, %v14808_v47  ;;  %v5860_v54 = vor.u32 %v5859_v48, %v5856_v51  ;;  %vm14835_vm12 = vmmov %vm14821_vm1 }
 0x902   : > { %v4935_v49 = vunpack.c.l.b16 %v4848_v3  ;;  %v4799_v21 = vrot.slane %v11976_v16, 4  ;;  %v5863_v7 = vshll.u32 %v12064_v28, 16  ;;  %v4761_v18 = vrot.slane %v11983_v33, 4 }
 0x903   : > { %4923 = vrot.lane.b32.xlu2 %v4918_v38, %s8978_s12  ;;  %4921 = vrot.lane.b32.xlu1 %v4917_v19, %s8978_s12  ;;  %v4780_v38 = vrot.slane %v11979_v6, 4  ;;  %v4934_v6 = vunpack.c.l.b16 %v4810_v29  ;;  %v4743_v9 = vsel %vm14827_vm4, 0, %v4742_v44  ;;  %v4955_v27 = vunpack.c.l.b16 %v12071_v52  ;;  %vm14837_vm4 = vmmov %vm14821_vm1 }
 0x904   : > { %v5861_v35 = vrot.slane %v5860_v54, 4  ;;  %v4939_v19 = vpack.c.b16 %v4935_v49, %v4935_v49  ;;  %v4751_v16 = vperm.slane %v4743_v9, %v14808_v47  ;;  %v4856_v45 = vrot.slane %v12022_v36, 4 }
 0x905   : > { %4907 = vrot.lane.b32.xlu0 %v4900_v56, %s8964_s27  ;;  %v4781_v25 = vsel %vm14826_vm8, 0, %v4780_v38  ;;  %v4800_v56 = vsel %vm14828_vm2, 0, %v4799_v21  ;;  %v4938_v53 = vpack.c.b16 %v4934_v6, %v4934_v6  ;;  %v4959_v24 = vpack.c.b16 %v4955_v27, %v4955_v27  ;;  %vm14836_vm8 = vmmov %vm14821_vm1 }
 0x906   : > { %v4789_v13 = vperm.slane %v4781_v25, %v14808_v47  ;;  %v4808_v62 = vperm.slane %v4800_v56, %v14808_v47  ;;  %v4953_v26 = vunpack.c.l.b16 %v4751_v16  ;;  %v4762_v33 = vsel %vm14830_vm14, 0, %v4761_v18  ;;  %vm14838_vm2 = vmmov %vm14821_vm1 }
 0x907   : > { %v4857_v41 = vsel %vm14831_vm15, 0, %v4856_v45  ;;  %v4770_v11 = vperm.slane %v4762_v33, %v14808_v47  ;;  %v4754_v51 = vrot.slane %v4751_v16, 4  ;;  %v4875_v5 = vrot.slane %v12009_v50, 4  ;;  %vm14839_vm14 = vmmov %vm14821_vm1 }
 0x908   : > { %v4954_v17 = vunpack.c.l.b16 %v4789_v13  ;;  %v4974_v31 = vunpack.c.l.b16 %v4808_v62  ;;  %v4957_v48 = vpack.c.b16 %v4953_v26, %v4953_v26  ;;  %v4792_v56 = vrot.slane %v4789_v13, 4  ;;  %vm14840_vm15 = vmmov %vm14821_vm1 }
 0x909   : > { %v4973_v38 = vunpack.c.l.b16 %v4770_v11  ;;  %v4755_v29 = vsel %vm14821_vm1, 0, %v4754_v51  ;;  %v4811_v13 = vrot.slane %v4808_v62, 4 }
 0x90a   : > { %v4958_v36 = vpack.c.b16 %v4954_v17, %v4954_v17  ;;  %v4978_v3 = vpack.c.b16 %v4974_v31, %v4974_v31  ;;  %v4993_v49 = vunpack.c.l.b16 %v4755_v29 }
 0x90b   : > { %4941 = vrot.lane.b32.xlu2 %v4937_v43, %s8979_s13  ;;  %4927 = vrot.lane.b32.xlu1 %v4920_v61, %s8978_s12  ;;  %v5865_v43 = vrot.slane %v5863_v7, 5  ;;  %v4865_v61 = vperm.slane %v4857_v41, %v14808_v47  ;;  %v4977_v50 = vpack.c.b16 %v4973_v38, %v4973_v38  ;;  %v4773_v41 = vrot.slane %v4770_v11, 4 }
 0x90c   : > { %v4997_v7 = vpack.c.b16 %v4993_v49, %v4993_v49 }
 0x90d   : > { %4925 = vrot.lane.b32.xlu0 %v4919_v22, %s8978_s12  ;;  %v12089_v57 = vsel %vm9668_vm11, %v5861_v35, %v5865_v43  ;;  %v4837_v22 = vrot.slane %v11959_v40, 4  ;;  %v4956_v44 = vunpack.c.l.b16 %v4865_v61  ;;  %v4868_v6 = vrot.slane %v4865_v61, 4 }
 0x90e   : > { %v4774_v61 = vsel %vm14839_vm14, 0, %v4773_v41  ;;  %vm14864_vm14 = vmmov %vm14821_vm1 }
 0x90f   : > { %v4838_v54 = vsel %vm14833_vm9, 0, %v4837_v22  ;;  %v4960_v40 = vpack.c.b16 %v4956_v44, %v4956_v44  ;;  %v4869_v27 = vsel %vm14834_vm7, 0, %v4868_v6  ;;  %vm14858_vm9 = vmmov %vm14821_vm1 }
 0x910   : > { %v4846_v25 = vperm.slane %v4838_v54, %v14808_v47  ;;  %vm14859_vm7 = vmmov %vm14821_vm1 }
 0x912   : > { %v4975_v35 = vunpack.c.l.b16 %v4846_v25  ;;  %v4849_v18 = vrot.slane %v4846_v25, 4 }
 0x913   : > { %4947 = vrot.lane.b32.xlu2 %v4940_v46, %s8979_s13  ;;  %4945 = vrot.lane.b32.xlu1 %v4939_v19, %s8979_s13  ;;  %v4876_v46 = vsel %vm14832_vm13, 0, %v4875_v5  ;;  %v4830_v19 = vrot.slane %v12071_v52, 4  ;;  %vm14857_vm13 = vmmov %vm14821_vm1 }
 0x914   : > { %v4884_v21 = vperm.slane %v4876_v46, %v14808_v47  ;;  %v4979_v43 = vpack.c.b16 %v4975_v35, %v4975_v35  ;;  %v4850_v33 = vsel %vm14837_vm4, 0, %v4849_v18  ;;  %vm14862_vm4 = vmmov %vm14821_vm1 }
 0x915   : > { %4943 = vrot.lane.b32.xlu0 %v4938_v53, %s8979_s13  ;;  %v4996_v53 = vunpack.c.l.b16 %v4869_v27  ;;  %v4831_v45 = vsel %vm14835_vm12, 0, %v4830_v19  ;;  %v5015_v31 = vunpack.c.l.b16 %v4850_v33  ;;  %vm14860_vm12 = vmmov %vm14821_vm1 }
 0x916   : > { %v4976_v9 = vunpack.c.l.b16 %v4884_v21  ;;  %v4995_v26 = vunpack.c.l.b16 %v4831_v45  ;;  %v4887_v38 = vrot.slane %v4884_v21, 4 }
 0x917   : > { %v5000_v17 = vpack.c.b16 %v4996_v53, %v4996_v53  ;;  %v5019_v5 = vpack.c.b16 %v5015_v31, %v5015_v31 }
 0x918   : > { %v4980_v16 = vpack.c.b16 %v4976_v9, %v4976_v9  ;;  %v4888_v11 = vsel %vm14840_vm15, 0, %v4887_v38  ;;  %vm14865_vm15 = vmmov %vm14821_vm1 }
 0x919   : > { %v5016_v44 = vunpack.c.l.b16 %v4888_v11 }
 0x91b   : > { %4965 = vrot.lane.b32.xlu2 %v4959_v24, %s8980_s16  ;;  %4963 = vrot.lane.b32.xlu1 %v4958_v36, %s8980_s16  ;;  %v4793_v24 = vsel %vm14836_vm8, 0, %v4792_v56  ;;  %v4999_v36 = vpack.c.b16 %v4995_v26, %v4995_v26  ;;  %v5020_v46 = vpack.c.b16 %v5016_v44, %v5016_v44  ;;  %vm14861_vm8 = vmmov %vm14821_vm1 }
 0x91c   : > { %v4994_v52 = vunpack.c.l.b16 %v4793_v24 }
 0x91d   : > { %4961 = vrot.lane.b32.xlu0 %v4957_v48, %s8980_s16  ;;  %v4812_v48 = vsel %vm14838_vm2, 0, %v4811_v13  ;;  %vm14863_vm2 = vmmov %vm14821_vm1 }
 0x91e   : > { %v4998_v51 = vpack.c.b16 %v4994_v52, %v4994_v52  ;;  %v5014_v22 = vunpack.c.l.b16 %v4812_v48 }
 0x920   : > { %v5018_v29 = vpack.c.b16 %v5014_v22, %v5014_v22 }
 0x923   : > { %4983 = vrot.lane.b32.xlu2 %v4978_v3, %s8981_s29  ;;  %4981 = vrot.lane.b32.xlu1 %v4977_v50, %s8981_s29  ;;  %v5013_v3 = vunpack.c.l.b16 %v4774_v61 }
 0x925   : > { %4967 = vrot.lane.b32.xlu0 %v4960_v40, %s8980_s16  ;;  %v5017_v62 = vpack.c.b16 %v5013_v3, %v5013_v3 }
 0x92b   : > { %5001 = vrot.lane.b32.xlu2 %v4997_v7, %s8982_s14  ;;  %4987 = vrot.lane.b32.xlu1 %v4980_v16, %s8981_s29 }
 0x92d   : > { %4985 = vrot.lane.b32.xlu0 %v4979_v43, %s8981_s29 }
 0x933   : > { %5007 = vrot.lane.b32.xlu2 %v5000_v17, %s8982_s14  ;;  %5005 = vrot.lane.b32.xlu1 %v4999_v36, %s8982_s14 }
 0x935   : > { %5003 = vrot.lane.b32.xlu0 %v4998_v51, %s8982_s14 }
 0x93b   : > { %5025 = vrot.lane.b32.xlu2 %v5019_v5, %s8975_s8  ;;  %5023 = vrot.lane.b32.xlu1 %v5018_v29, %s8975_s8 }
 0x93d   : > { %5021 = vrot.lane.b32.xlu0 %v5017_v62, %s8975_s8 }
 0x943   : > { %5105 = vrot.lane.b32.xlu2 %v11954_v39, %s8966_s17  ;;  %5103 = vrot.lane.b32.xlu1 %v11952_v60, %s8966_s17 }
 0x945   : > { %5027 = vrot.lane.b32.xlu0 %v5020_v46, %s8975_s8 }
 0x94b   : > { %5109 = vrot.lane.b32.xlu1 %v11963_v12, %s8966_s17 }
 0x94d   : > { %5107 = vrot.lane.b32.xlu0 %v11948_v8, %s8966_s17 }
 0x955   : > { %v12134_v54 = vpop.permute.xlu2 %4905 }
 0x95d   : > { %v12136_v49 = vpop.permute.xlu2 %4923 }
 0x965   : > { %v12138_v50 = vpop.permute.xlu2 %4941 }
 0x96d   : > { %v12140_v21 = vpop.permute.xlu2 %4947  ;;  %v12142_v6 = vpop.permute.xlu1 %4903 }
 0x96e   : > { %14841 = vst [vmem:[#allocation103_spill] sm:$0xff] %v12140_v21 }
 0x96f   : > { %v12144_v40 = vpop.permute.xlu0 %4901 }
 0x975   : > { %v12146_v25 = vpop.permute.xlu2 %4965  ;;  %v12148_v7 = vpop.permute.xlu1 %4921 }
 0x977   : > { %v12150_v9 = vpop.permute.xlu0 %4907 }
 0x97d   : > { %v12152_v27 = vpop.permute.xlu2 %4983  ;;  %v12154_v35 = vpop.permute.xlu1 %4927 }
 0x97e   : > { %14842 = vst [vmem:[#allocation106_spill] sm:$0xff] %v12152_v27 }
 0x97f   : > { %v12156_v19 = vpop.permute.xlu0 %4925 }
 0x985   : > { %v12158_v56 = vpop.permute.xlu2 %5001  ;;  %v12160_v53 = vpop.permute.xlu1 %4945 }
 0x986   : > { %14843 = vst [vmem:[#allocation81_spill] sm:$0xff] %v12158_v56 }
 0x987   : > { %v12162_v16 = vpop.permute.xlu0 %4943 }
 0x98d   : > { %v12164_v18 = vpop.permute.xlu2 %5007  ;;  %v12166_v43 = vpop.permute.xlu1 %4963 }
 0x98e   : > { %14844 = vst [vmem:[#allocation93_spill] sm:$0xff] %v12164_v18 }
 0x98f   : > { %v12168_v45 = vpop.permute.xlu0 %4961 }
 0x995   : > { %v12170_v24 = vpop.permute.xlu2 %5025  ;;  %v12172_v17 = vpop.permute.xlu1 %4981 }
 0x996   : > { %14845 = vst [vmem:[#allocation78_spill] sm:$0xff] %v12170_v24 }
 0x997   : > { %v12174_v26 = vpop.permute.xlu0 %4967 }
 0x998   : > { %14846 = vst [vmem:[#allocation96_spill] sm:$0xff] %v12174_v26 }
 0x99d   : > { %v5106_v33 = vpop.permute.xlu2 %5105  ;;  %v12176_v41 = vpop.permute.xlu1 %4987 }
 0x99e   : > { %v5117_v52 = vshrl.u32 %v5106_v33, 16  ;;  %14847 = vst [vmem:[#allocation66_spill] sm:$0xff] %v12176_v41 }
 0x99f   : > { %v12181_v36 = vpop.permute.xlu0 %4985 }
 0x9a0   : > { %v5118_v13 = vpack.i.b16 0, %v5117_v52 }
 0x9a2   : > { %v12179_v31 = vperm.slane %v5118_v13, %v14805_v30  ;;  %v5116_v13 = vpack.i.b16 0, %v5106_v33 }
 0x9a4   : > { %v12185_v51 = vperm.slane %v12179_v31, %v14808_v47  ;;  %v5169_v32 = vperm.slane %v5116_v13, %v14805_v30 }
 0x9a5   : > { %v12188_v5 = vpop.permute.xlu1 %5005 }
 0x9a6   : > { %v5284_v48 = vunpack.c.l.b16 %v12185_v51  ;;  %14848 = vst [vmem:[#allocation62_spill] sm:$0xff] %v12188_v5  ;;  %v12221_v13 = vperm.slane %v5169_v32, %v14808_v47  ;;  %v5170_v56 = vrot.slane %v5169_v32, 4 }
 0x9a7   : > { %v12191_v22 = vpop.permute.xlu0 %5003 }
 0x9a8   : > { %v5288_v61 = vpack.c.b16 %v5284_v48, %v5284_v48  ;;  %14849 = vst [vmem:[#allocation31_spill] sm:$0xff] %v12191_v22 }
 0x9a9   : > { %14854 = vst [vmem:[#allocation24_spill] sm:$0xff] %v12221_v13 }
 0x9aa   : > { %5293 = vrot.lane.b32.xlu0 %v5288_v61, %s8964_s27 }
 0x9ad   : > { %v12193_v3 = vpop.permute.xlu1 %5023 }
 0x9ae   : > { %14850 = vst [vmem:[#allocation29_spill] sm:$0xff] %v12193_v3 }
 0x9af   : > { %v12195_v38 = vpop.permute.xlu0 %5021 }
 0x9b0   : > { %14851 = vst [vmem:[#allocation65_spill] sm:$0xff] %v12195_v38 }
 0x9b5   : > { %v5104_v29 = vpop.permute.xlu1 %5103 }
 0x9b6   : > { %v5112_v62 = vpack.i.b16 0, %v5104_v29  ;;  %v5113_v11 = vshrl.u32 %v5104_v29, 16 }
 0x9b7   : > { %v12197_v44 = vpop.permute.xlu0 %5027 }
 0x9b8   : > { %14852 = vst [vmem:[#allocation55_spill] sm:$0xff] %v12197_v44  ;;  %v5114_v46 = vpack.i.b16 0, %v5113_v11  ;;  %v12200_v52 = vperm.slane %v5112_v62, %v14805_v30 }
 0x9ba   : > { %v12204_v48 = vperm.slane %v12200_v52, %v14808_v47  ;;  %v12207_v61 = vperm.slane %v5114_v46, %v14805_v30 }
 0x9bc   : > { %14853 = vst [vmem:[#allocation64_spill] sm:$0xff] %v12204_v48  ;;  %v5142_v58 = vrot.slane %v12204_v48, 4  ;;  %v5156_v0 = vperm.slane %v12207_v61, %v14808_v47 }
 0x9bd   : > { %v5110_v29 = vpop.permute.xlu1 %5109 }
 0x9be   : > { %v5124_v11 = vpack.i.b16 0, %v5110_v29  ;;  %v5125_v1 = vshrl.u32 %v5110_v29, 16  ;;  %v5283_v44 = vunpack.c.l.b16 %v5156_v0  ;;  %v5143_v18 = vsel %vm14821_vm1, 0, %v5142_v58 }
 0x9bf   : > { %v5108_v62 = vpop.permute.xlu0 %5107  ;;  %v5303_v15 = vunpack.c.l.b16 %v5143_v18 }
 0x9c0   : > { %v5120_v55 = vpack.i.b16 0, %v5108_v62  ;;  %v5121_v33 = vshrl.u32 %v5108_v62, 16  ;;  %v5126_v2 = vpack.i.b16 0, %v5125_v1  ;;  %v12215_v46 = vperm.slane %v5124_v11, %v14805_v30 }
 0x9c1   : > { %v5287_v3 = vpack.c.b16 %v5283_v44, %v5283_v44  ;;  %v5307_v58 = vpack.c.b16 %v5303_v15, %v5303_v15  ;;  %v5180_v15 = vrot.slane %v12221_v13, 4 }
 0x9c2   : > { %v5122_v20 = vpack.i.b16 0, %v5121_v33  ;;  %v12218_v38 = vperm.slane %v5120_v55, %v14805_v30  ;;  %v12225_v29 = vperm.slane %v12215_v46, %v14808_v47  ;;  %v12228_v62 = vperm.slane %v5126_v2, %v14805_v30 }
 0x9c3   : > { %5291 = vrot.lane.b32.xlu2 %v5287_v3, %s8964_s27  ;;  %5311 = vrot.lane.b32.xlu0 %v5307_v58, %s8978_s12  ;;  %v5181_v58 = vsel %vm14859_vm7, 0, %v5180_v15  ;;  %vm14868_vm7 = vmmov %vm14821_vm1 }
 0x9c4   : > { %14855 = vst [vmem:[#allocation28_spill] sm:$0xff] %v12225_v29  ;;  %v12232_v1 = vperm.slane %v12218_v38, %v14808_v47  ;;  %v12235_v18 = vperm.slane %v5122_v20, %v14805_v30  ;;  %v5256_v55 = vrot.slane %v12225_v29, 4  ;;  %v5270_v44 = vperm.slane %v12228_v62, %v14808_v47 }
 0x9c5   : > { %v5304_v26 = vunpack.c.l.b16 %v5181_v58 }
 0x9c6   : > { %14856 = vst [vmem:[#allocation67_spill] sm:$0xff] %v12232_v1  ;;  %v5232_v2 = vperm.slane %v12235_v18, %v14808_v47  ;;  %v5218_v11 = vrot.slane %v12232_v1, 4  ;;  %v5286_v33 = vunpack.c.l.b16 %v5270_v44  ;;  %v5257_v20 = vsel %vm14857_vm13, 0, %v5256_v55  ;;  %vm14866_vm13 = vmmov %vm14821_vm1 }
 0x9c7   : > { %v5306_v24 = vunpack.c.l.b16 %v5257_v20 }
 0x9c8   : > { %v5237_v22 = vrot.slane %v5232_v2, 4  ;;  %v5285_v3 = vunpack.c.l.b16 %v5232_v2  ;;  %v5290_v41 = vpack.c.b16 %v5286_v33, %v5286_v33  ;;  %v5219_v27 = vsel %vm14858_vm9, 0, %v5218_v11  ;;  %vm14867_vm9 = vmmov %vm14821_vm1 }
 0x9c9   : > { %v5310_v29 = vpack.c.b16 %v5306_v24, %v5306_v24  ;;  %v5305_v55 = vunpack.c.l.b16 %v5219_v27  ;;  %v5171_v2 = vsel %vm14861_vm8, 0, %v5170_v56  ;;  %v5199_v24 = vrot.slane %v12185_v51, 4  ;;  %vm14870_vm8 = vmmov %vm14821_vm1 }
 0x9ca   : > { %v5289_v48 = vpack.c.b16 %v5285_v3, %v5285_v3  ;;  %v5238_v13 = vsel %vm14860_vm12, 0, %v5237_v22  ;;  %v5161_v33 = vrot.slane %v5156_v0, 4  ;;  %v5308_v11 = vpack.c.b16 %v5304_v26, %v5304_v26  ;;  %vm14869_vm12 = vmmov %vm14821_vm1 }
 0x9cb   : > { %5297 = vrot.lane.b32.xlu2 %v5290_v41, %s8964_s27  ;;  %5317 = vrot.lane.b32.xlu0 %v5310_v29, %s8978_s12  ;;  %v5325_v32 = vunpack.c.l.b16 %v5238_v13  ;;  %v5309_v20 = vpack.c.b16 %v5305_v55, %v5305_v55  ;;  %v12256_v15 = vperm.slane %v5171_v2, %v14808_v47  ;;  %v5132_v41 = vrot.slane %v12200_v52, 4 }
 0x9cc   : > { %5295 = vrot.lane.b32.xlu1 %v5289_v48, %s8964_s27  ;;  %v5200_v22 = vsel %vm14862_vm4, 0, %v5199_v24  ;;  %v5162_v29 = vsel %vm14863_vm2, 0, %v5161_v33  ;;  %v5151_v27 = vrot.slane %v12207_v61, 4  ;;  %v5275_v52 = vrot.slane %v5270_v44, 4  ;;  %vm14871_vm4 = vmmov %vm14821_vm1 }
 0x9cd   : > { %v5329_v48 = vpack.c.b16 %v5325_v32, %v5325_v32  ;;  %v5324_v0 = vunpack.c.l.b16 %v5200_v22  ;;  %v5344_v56 = vunpack.c.l.b16 %v12256_v15  ;;  %v5323_v26 = vunpack.c.l.b16 %v5162_v29  ;;  %vm14872_vm2 = vmmov %vm14821_vm1 }
 0x9ce   : > { %v5133_v51 = vsel %vm14864_vm14, 0, %v5132_v41  ;;  %v5152_v13 = vsel %vm14865_vm15, 0, %v5151_v27  ;;  %v5246_v2 = vrot.slane %v12215_v46, 4  ;;  %v5208_v24 = vrot.slane %v12218_v38, 4  ;;  %vm14873_vm14 = vmmov %vm14821_vm1 }
 0x9cf   : > { %v5328_v3 = vpack.c.b16 %v5324_v0, %v5324_v0  ;;  %v5348_v58 = vpack.c.b16 %v5344_v56, %v5344_v56  ;;  %v5327_v55 = vpack.c.b16 %v5323_v26, %v5323_v26  ;;  %v5141_v61 = vperm.slane %v5133_v51, %v14808_v47  ;;  %vm14874_vm15 = vmmov %vm14821_vm1 }
 0x9d0   : > { %v5160_v33 = vperm.slane %v5152_v13, %v14808_v47  ;;  %v5276_v32 = vsel %vm14821_vm1, 0, %v5275_v52  ;;  %v5247_v41 = vsel %vm14866_vm13, 0, %v5246_v2  ;;  %v5209_v46 = vsel %vm14867_vm9, 0, %v5208_v24  ;;  %vm14875_vm13 = vmmov %vm14821_vm1 }
 0x9d1   : > { %v5343_v44 = vunpack.c.l.b16 %v5141_v61  ;;  %v5255_v27 = vperm.slane %v5247_v41, %v14808_v47  ;;  %v5189_v0 = vrot.slane %v12179_v31, 4  ;;  %v5227_v56 = vrot.slane %v12235_v18, 4  ;;  %vm14876_vm9 = vmmov %vm14821_vm1 }
 0x9d3   : > { %5315 = vrot.lane.b32.xlu2 %v5309_v20, %s8978_s12  ;;  %5335 = vrot.lane.b32.xlu0 %v5329_v48, %s8979_s13  ;;  %v5265_v20 = vrot.slane %v12228_v62, 4  ;;  %v5363_v48 = vunpack.c.l.b16 %v5160_v33  ;;  %v5347_v22 = vpack.c.b16 %v5343_v44, %v5343_v44  ;;  %v5217_v62 = vperm.slane %v5209_v46, %v14808_v47 }
 0x9d4   : > { %5313 = vrot.lane.b32.xlu1 %v5308_v11, %s8978_s12  ;;  %v5326_v11 = vunpack.c.l.b16 %v5276_v32  ;;  %v5346_v52 = vunpack.c.l.b16 %v5255_v27 }
 0x9d5   : > { %v5266_v38 = vsel %vm14868_vm7, 0, %v5265_v20  ;;  %v5367_v26 = vpack.c.b16 %v5363_v48, %v5363_v48  ;;  %v5345_v13 = vunpack.c.l.b16 %v5217_v62  ;;  %v5220_v2 = vrot.slane %v5217_v62, 4  ;;  %vm14877_vm7 = vmmov %vm14821_vm1 }
 0x9d6   : > { %v5330_v29 = vpack.c.b16 %v5326_v11, %v5326_v11  ;;  %v5274_v51 = vperm.slane %v5266_v38, %v14808_v47  ;;  %v5350_v31 = vpack.c.b16 %v5346_v52, %v5346_v52  ;;  %v5182_v48 = vrot.slane %v12256_v15, 4 }
 0x9d7   : > { %v5349_v24 = vpack.c.b16 %v5345_v13, %v5345_v13  ;;  %v5221_v44 = vsel %vm14871_vm4, 0, %v5220_v2  ;;  %v5144_v38 = vrot.slane %v5141_v61, 4  ;;  %v5163_v61 = vrot.slane %v5160_v33, 4  ;;  %vm14912_vm4 = vmmov %vm14821_vm1 }
 0x9d8   : > { %v5385_v46 = vunpack.c.l.b16 %v5221_v44 }
 0x9db   : > { %5333 = vrot.lane.b32.xlu2 %v5328_v3, %s8979_s13  ;;  %5353 = vrot.lane.b32.xlu0 %v5348_v58, %s8980_s16  ;;  %v5190_v3 = vsel %vm14869_vm12, 0, %v5189_v0  ;;  %v5228_v58 = vsel %vm14870_vm8, 0, %v5227_v56  ;;  %v5389_v0 = vpack.c.b16 %v5385_v46, %v5385_v46  ;;  %v5183_v56 = vsel %vm14872_vm2, 0, %v5182_v48  ;;  %vm14909_vm12 = vmmov %vm14821_vm1 }
 0x9dc   : > { %5331 = vrot.lane.b32.xlu1 %v5327_v55, %s8979_s13  ;;  %v5366_v55 = vunpack.c.l.b16 %v5274_v51  ;;  %v5236_v18 = vperm.slane %v5228_v58, %v14808_v47  ;;  %v5198_v32 = vperm.slane %v5190_v3, %v14808_v47  ;;  %v5384_v13 = vunpack.c.l.b16 %v5183_v56  ;;  %vm14910_vm8 = vmmov %vm14821_vm1 }
 0x9dd   : > { %v5258_v58 = vrot.slane %v5255_v27, 4  ;;  %vm14913_vm2 = vmmov %vm14821_vm1 }
 0x9de   : > { %v5370_v20 = vpack.c.b16 %v5366_v55, %v5366_v55  ;;  %v5365_v11 = vunpack.c.l.b16 %v5236_v18  ;;  %v5364_v41 = vunpack.c.l.b16 %v5198_v32  ;;  %v5388_v55 = vpack.c.b16 %v5384_v13, %v5384_v13 }
 0x9e0   : > { %v5368_v62 = vpack.c.b16 %v5364_v41, %v5364_v41  ;;  %v5239_v41 = vrot.slane %v5236_v18, 4 }
 0x9e2   : > { %v5240_v48 = vsel %vm14877_vm7, 0, %v5239_v41  ;;  %vm14918_vm7 = vmmov %vm14821_vm1 }
 0x9e3   : > { %5351 = vrot.lane.b32.xlu2 %v5347_v22, %s8980_s16  ;;  %5371 = vrot.lane.b32.xlu0 %v5367_v26, %s8981_s29  ;;  %v5201_v22 = vrot.slane %v5198_v32, 4  ;;  %v5145_v26 = vsel %vm14873_vm14, 0, %v5144_v38  ;;  %v5259_v32 = vsel %vm14875_vm13, 0, %v5258_v58  ;;  %vm14914_vm14 = vmmov %vm14821_vm1 }
 0x9e4   : > { %5337 = vrot.lane.b32.xlu1 %v5330_v29, %s8979_s13  ;;  %v5369_v29 = vpack.c.b16 %v5365_v11, %v5365_v11  ;;  %v5383_v3 = vunpack.c.l.b16 %v5145_v26  ;;  %v5386_v44 = vunpack.c.l.b16 %v5259_v32  ;;  %v5277_v11 = vrot.slane %v5274_v51, 4  ;;  %vm14916_vm13 = vmmov %vm14821_vm1 }
 0x9e5   : > { %v5202_v52 = vsel %vm14874_vm15, 0, %v5201_v22  ;;  %v5405_v22 = vunpack.c.l.b16 %v5240_v48  ;;  %vm14915_vm15 = vmmov %vm14821_vm1 }
 0x9e6   : > { %v5404_v15 = vunpack.c.l.b16 %v5202_v52  ;;  %v5387_v2 = vpack.c.b16 %v5383_v3, %v5383_v3  ;;  %v5390_v33 = vpack.c.b16 %v5386_v44, %v5386_v44  ;;  %v5278_v27 = vsel %vm14876_vm9, 0, %v5277_v11  ;;  %vm14917_vm9 = vmmov %vm14821_vm1 }
 0x9e7   : > { %v5406_v38 = vunpack.c.l.b16 %v5278_v27 }
 0x9eb   : > { %5357 = vrot.lane.b32.xlu2 %v5350_v31, %s8980_s16  ;;  %5377 = vrot.lane.b32.xlu0 %v5370_v20, %s8981_s29  ;;  %v5408_v31 = vpack.c.b16 %v5404_v15, %v5404_v15 }
 0x9ec   : > { %5355 = vrot.lane.b32.xlu1 %v5349_v24, %s8980_s16  ;;  %v5164_v24 = vsel %vm14821_vm1, 0, %v5163_v61 }
 0x9ed   : > { %v5403_v20 = vunpack.c.l.b16 %v5164_v24 }
 0x9ef   : > { %v5407_v46 = vpack.c.b16 %v5403_v20, %v5403_v20 }
 0x9f3   : > { %5375 = vrot.lane.b32.xlu2 %v5369_v29, %s8981_s29  ;;  %5395 = vrot.lane.b32.xlu0 %v5389_v0, %s8982_s14  ;;  %v5410_v29 = vpack.c.b16 %v5406_v38, %v5406_v38 }
 0x9f4   : > { %5373 = vrot.lane.b32.xlu1 %v5368_v62, %s8981_s29  ;;  %v5409_v62 = vpack.c.b16 %v5405_v22, %v5405_v22 }
 0x9fb   : > { %5393 = vrot.lane.b32.xlu2 %v5388_v55, %s8982_s14  ;;  %5413 = vrot.lane.b32.xlu0 %v5408_v31, %s8975_s8 }
 0x9fc   : > { %5391 = vrot.lane.b32.xlu1 %v5387_v2, %s8982_s14 }
 0xa03   : > { %5411 = vrot.lane.b32.xlu2 %v5407_v46, %s8975_s8  ;;  %5479 = vrot.lane.b32.xlu0 %v11952_v60, %s8963_s10 }
 0xa04   : > { %5397 = vrot.lane.b32.xlu1 %v5390_v33, %s8982_s14 }
 0xa0b   : > { %5417 = vrot.lane.b32.xlu2 %v5410_v29, %s8975_s8  ;;  %5485 = vrot.lane.b32.xlu0 %v11963_v12, %s8963_s10 }
 0xa0c   : > { %5415 = vrot.lane.b32.xlu1 %v5409_v62, %s8975_s8 }
 0xa13   : > { %5483 = vrot.lane.b32.xlu2 %v11948_v8, %s8963_s10 }
 0xa14   : > { %5481 = vrot.lane.b32.xlu1 %v11954_v39, %s8963_s10 }
 0xa1c   : > { %v12328_v56 = vpop.permute.xlu0 %5293 }
 0xa1d   : > { %v12322_v51 = vpop.permute.xlu2 %5291  ;;  %14881 = vst [vmem:[#allocation38_spill] sm:$0xff] %v12328_v56 }
 0xa1e   : > { %14878 = vst [vmem:[#allocation58_spill] sm:$0xff] %v12322_v51 }
 0xa25   : > { %v12324_v18 = vpop.permute.xlu2 %5297 }
 0xa26   : > { %14879 = vst [vmem:[#allocation69_spill] sm:$0xff] %v12324_v18 }
 0xa2d   : > { %v12326_v0 = vpop.permute.xlu2 %5315 }
 0xa2e   : > { %14880 = vst [vmem:[#allocation53_spill] sm:$0xff] %v12326_v0 }
 0xa35   : > { %v12330_v26 = vpop.permute.xlu2 %5333  ;;  %v12332_v52 = vpop.permute.xlu0 %5311 }
 0xa36   : > { %14882 = vst [vmem:[#allocation27_spill] sm:$0xff] %v12330_v26 }
 0xa37   : > { %14883 = vst [vmem:[#allocation33_spill] sm:$0xff] %v12332_v52 }
 0xa3d   : > { %v12334_v13 = vpop.permute.xlu2 %5351  ;;  %v12338_v15 = vpop.permute.xlu0 %5317 }
 0xa3e   : > { %14884 = vst [vmem:[#allocation32_spill] sm:$0xff] %v12334_v13  ;;  %v12336_v3 = vpop.permute.xlu1 %5295 }
 0xa3f   : > { %14885 = vst [vmem:[#allocation34_spill] sm:$0xff] %v12336_v3 }
 0xa40   : > { %14886 = vst [vmem:[#allocation21_spill] sm:$0xff] %v12338_v15 }
 0xa45   : > { %v12340_v61 = vpop.permute.xlu2 %5357  ;;  %v12344_v55 = vpop.permute.xlu0 %5335 }
 0xa46   : > { %14887 = vst [vmem:[#allocation71_spill] sm:$0xff] %v12340_v61  ;;  %v12342_v58 = vpop.permute.xlu1 %5313 }
 0xa47   : > { %14888 = vst [vmem:[#allocation61_spill] sm:$0xff] %v12342_v58 }
 0xa48   : > { %14889 = vst [vmem:[#allocation63_spill] sm:$0xff] %v12344_v55 }
 0xa4d   : > { %v12346_v2 = vpop.permute.xlu2 %5375  ;;  %v12350_v24 = vpop.permute.xlu0 %5353 }
 0xa4e   : > { %14890 = vst [vmem:[#allocation42_spill] sm:$0xff] %v12346_v2  ;;  %v12348_v31 = vpop.permute.xlu1 %5331 }
 0xa4f   : > { %14891 = vst [vmem:[#allocation39_spill] sm:$0xff] %v12348_v31 }
 0xa50   : > { %14892 = vst [vmem:[#allocation68_spill] sm:$0xff] %v12350_v24 }
 0xa55   : > { %v12352_v32 = vpop.permute.xlu2 %5393  ;;  %v12356_v44 = vpop.permute.xlu0 %5371 }
 0xa56   : > { %14893 = vst [vmem:[#allocation43_spill] sm:$0xff] %v12352_v32  ;;  %v12354_v20 = vpop.permute.xlu1 %5337 }
 0xa57   : > { %14894 = vst [vmem:[#allocation57_spill] sm:$0xff] %v12354_v20 }
 0xa58   : > { %14895 = vst [vmem:[#allocation41_spill] sm:$0xff] %v12356_v44 }
 0xa5d   : > { %v12358_v11 = vpop.permute.xlu2 %5411  ;;  %v12362_v46 = vpop.permute.xlu0 %5377 }
 0xa5e   : > { %14896 = vst [vmem:[#allocation70_spill] sm:$0xff] %v12358_v11  ;;  %v12360_v41 = vpop.permute.xlu1 %5355 }
 0xa5f   : > { %14897 = vst [vmem:[#allocation30_spill] sm:$0xff] %v12360_v41 }
 0xa60   : > { %14898 = vst [vmem:[#allocation35_spill] sm:$0xff] %v12362_v46 }
 0xa65   : > { %v12364_v33 = vpop.permute.xlu2 %5417  ;;  %v12368_v48 = vpop.permute.xlu0 %5395 }
 0xa66   : > { %14899 = vst [vmem:[#allocation36_spill] sm:$0xff] %v12364_v33  ;;  %v12366_v27 = vpop.permute.xlu1 %5373 }
 0xa67   : > { %14900 = vst [vmem:[#allocation52_spill] sm:$0xff] %v12366_v27 }
 0xa68   : > { %14901 = vst [vmem:[#allocation26_spill] sm:$0xff] %v12368_v48 }
 0xa6d   : > { %v5484_v38 = vpop.permute.xlu2 %5483  ;;  %v12372_v62 = vpop.permute.xlu0 %5413 }
 0xa6e   : > { %v12370_v22 = vpop.permute.xlu1 %5391  ;;  %v5497_v29 = vshrl.u32 %v5484_v38, 16  ;;  %14903 = vst [vmem:[#allocation51_spill] sm:$0xff] %v12372_v62 }
 0xa6f   : > { %14902 = vst [vmem:[#allocation37_spill] sm:$0xff] %v12370_v22  ;;  %v5496_v22 = vpack.i.b16 0, %v5484_v38 }
 0xa70   : > { %v5498_v32 = vpack.i.b16 0, %v5497_v29 }
 0xa72   : > { %v12375_v44 = vperm.slane %v5498_v32, %v14805_v30 }
 0xa74   : > { %v12379_v11 = vperm.slane %v12375_v44, %v14808_v47 }
 0xa75   : > { %v5480_v33 = vpop.permute.xlu0 %5479 }
 0xa76   : > { %v12381_v46 = vpop.permute.xlu1 %5397  ;;  %v5661_v61 = vunpack.c.l.b16 %v12379_v11  ;;  %v5489_v48 = vshrl.u32 %v5480_v33, 16  ;;  %v5488_v26 = vpack.i.b16 0, %v5480_v33 }
 0xa77   : > { %14904 = vst [vmem:[#allocation84_spill] sm:$0xff] %v12381_v46  ;;  %v12393_v46 = vperm.slane %v5496_v22, %v14805_v30 }
 0xa78   : > { %v5665_v27 = vpack.c.b16 %v5661_v61, %v5661_v61  ;;  %v5490_v2 = vpack.i.b16 0, %v5489_v48  ;;  %v5507_v38 = vperm.slane %v5488_v26, %v14805_v30 }
 0xa7a   : > { %5671 = vrot.lane.b32.xlu0 %v5665_v27, %s8964_s27  ;;  %v12386_v29 = vperm.slane %v5490_v2, %v14805_v30  ;;  %v12397_v27 = vperm.slane %v12393_v46, %v14808_v47 }
 0xa7c   : > { %v5532_v32 = vperm.slane %v12386_v29, %v14808_v47  ;;  %14906 = vst [vmem:[#allocation40_spill] sm:$0xff] %v12397_v27 }
 0xa7d   : > { %v5486_v13 = vpop.permute.xlu0 %5485 }
 0xa7e   : > { %v12390_v62 = vpop.permute.xlu1 %5415  ;;  %v5501_v20 = vshrl.u32 %v5486_v13, 16  ;;  %v5659_v24 = vunpack.c.l.b16 %v5532_v32  ;;  %v5500_v18 = vpack.i.b16 0, %v5486_v13 }
 0xa7f   : > { %14905 = vst [vmem:[#allocation46_spill] sm:$0xff] %v12390_v62 }
 0xa80   : > { %v5502_v61 = vpack.i.b16 0, %v5501_v20  ;;  %v5663_v48 = vpack.c.b16 %v5659_v24, %v5659_v24  ;;  %v5594_v20 = vrot.slane %v12397_v27, 4  ;;  %v5621_v13 = vperm.slane %v5500_v18, %v14805_v30 }
 0xa81   : > { %v5508_v18 = vrot.slane %v5507_v38, 4 }
 0xa82   : > { %v12400_v2 = vperm.slane %v5502_v61, %v14805_v30  ;;  %5667 = vrot.lane.b32.xlu1 %v5663_v48, %s8964_s27  ;;  %v12411_v61 = vperm.slane %v5507_v38, %v14808_v47  ;;  %v5584_v38 = vrot.slane %v12393_v46, 4 }
 0xa84   : > { %v5646_v22 = vperm.slane %v12400_v2, %v14808_v47  ;;  %14907 = vst [vmem:[#allocation56_spill] sm:$0xff] %v12411_v61 }
 0xa86   : > { %v5482_v62 = vpop.permute.xlu1 %5481  ;;  %v5662_v24 = vunpack.c.l.b16 %v5646_v22 }
 0xa87   : > { %v5492_v15 = vpack.i.b16 0, %v5482_v62  ;;  %v5493_v41 = vshrl.u32 %v5482_v62, 16  ;;  %v5595_v62 = vsel %vm14909_vm12, 0, %v5594_v20  ;;  %v12429_v20 = vperm.slane %v5621_v13, %v14808_v47  ;;  %vm14919_vm12 = vmmov %vm14821_vm1 }
 0xa88   : > { %v5666_v48 = vpack.c.b16 %v5662_v24, %v5662_v24  ;;  %v5537_v24 = vrot.slane %v5532_v32, 4  ;;  %v5681_v52 = vunpack.c.l.b16 %v5595_v62  ;;  %v5651_v62 = vrot.slane %v5646_v22, 4 }
 0xa89   : > { %v5494_v33 = vpack.i.b16 0, %v5493_v41  ;;  %v12408_v31 = vperm.slane %v5492_v15, %v14805_v30  ;;  %v5518_v41 = vrot.slane %v12411_v61, 4  ;;  %14911 = vst [vmem:[#allocation86_spill] sm:$0xff] %v12429_v20 }
 0xa8a   : > { %5673 = vrot.lane.b32.xlu1 %v5666_v48, %s8964_s27  ;;  %v5685_v21 = vpack.c.b16 %v5681_v52, %v5681_v52  ;;  %v5538_v48 = vsel %vm14913_vm2, 0, %v5537_v24  ;;  %vm14922_vm2 = vmmov %vm14821_vm1 }
 0xa8b   : > { %v12415_v26 = vperm.slane %v12408_v31, %v14808_v47  ;;  %v12418_v55 = vperm.slane %v5494_v33, %v14805_v30  ;;  %v5519_v5 = vsel %vm14912_vm4, 0, %v5518_v41  ;;  %vm14921_vm4 = vmmov %vm14821_vm1 }
 0xa8d   : > { %14908 = vst [vmem:[#allocation22_spill] sm:$0xff] %v12415_v26  ;;  %v5556_v27 = vrot.slane %v12415_v26, 4  ;;  %v5570_v15 = vperm.slane %v12418_v55, %v14808_v47 }
 0xa8f   : > { %v5660_v58 = vunpack.c.l.b16 %v5570_v15  ;;  %v5557_v0 = vsel %vm14910_vm8, 0, %v5556_v27  ;;  %v5575_v33 = vrot.slane %v5570_v15, 4  ;;  %v5699_v27 = vunpack.c.l.b16 %v5538_v48  ;;  %vm14920_vm8 = vmmov %vm14821_vm1 }
 0xa90   : > { %v5680_v51 = vunpack.c.l.b16 %v5557_v0  ;;  %v5679_v0 = vunpack.c.l.b16 %v5519_v5  ;;  %v5509_v15 = vsel %vm14915_vm15, 0, %v5508_v18  ;;  %v5622_v5 = vrot.slane %v5621_v13, 4  ;;  %vm14924_vm15 = vmmov %vm14821_vm1 }
 0xa91   : > { %v5664_v56 = vpack.c.b16 %v5660_v58, %v5660_v58  ;;  %v5576_v32 = vsel %vm14914_vm14, 0, %v5575_v33  ;;  %v5632_v58 = vrot.slane %v12429_v20, 4  ;;  %v5703_v41 = vpack.c.b16 %v5699_v27, %v5699_v27  ;;  %vm14923_vm14 = vmmov %vm14821_vm1 }
 0xa92   : > { %v5684_v26 = vpack.c.b16 %v5680_v51, %v5680_v51  ;;  %5691 = vrot.lane.b32.xlu1 %v5685_v21, %s8978_s12  ;;  %v5700_v51 = vunpack.c.l.b16 %v5576_v32  ;;  %v5683_v52 = vpack.c.b16 %v5679_v0, %v5679_v0  ;;  %v5652_v21 = vsel %vm14916_vm13, 0, %v5651_v62  ;;  %vm14927_vm13 = vmmov %vm14821_vm1 }
 0xa93   : > { %5669 = vrot.lane.b32.xlu2 %v5664_v56, %s8964_s27  ;;  %v5633_v56 = vsel %vm14821_vm1, 0, %v5632_v58  ;;  %v5613_v33 = vrot.slane %v12379_v11, 4  ;;  %v5702_v48 = vunpack.c.l.b16 %v5652_v21  ;;  %v5585_v18 = vsel %vm14917_vm9, 0, %v5584_v38  ;;  %vm14928_vm9 = vmmov %vm14821_vm1 }
 0xa94   : > { %5689 = vrot.lane.b32.xlu0 %v5684_v26, %s8978_s12  ;;  %v5704_v24 = vpack.c.b16 %v5700_v51, %v5700_v51  ;;  %v12443_v26 = vperm.slane %v5509_v15, %v14808_v47  ;;  %v5682_v22 = vunpack.c.l.b16 %v5633_v56  ;;  %v5623_v32 = vsel %vm14918_vm7, 0, %v5622_v5  ;;  %vm14929_vm7 = vmmov %vm14821_vm1 }
 0xa95   : > { %v5546_v58 = vrot.slane %v12408_v31, 4  ;;  %v5706_v27 = vpack.c.b16 %v5702_v48, %v5702_v48  ;;  %v5614_v13 = vsel %vm14919_vm12, 0, %v5613_v33  ;;  %v12455_v62 = vperm.slane %v5585_v18, %v14808_v47  ;;  %vm14930_vm12 = vmmov %vm14821_vm1 }
 0xa96   : > { %v5719_v46 = vunpack.c.l.b16 %v12443_v26  ;;  %v5686_v0 = vpack.c.b16 %v5682_v22, %v5682_v22  ;;  %v4687_v51 = vrot.slane %v12027_v34, 4  ;;  %v5565_v11 = vrot.slane %v12418_v55, 4 }
 0xa97   : > { %v5701_v31 = vunpack.c.l.b16 %v5614_v13  ;;  %v5547_v56 = vsel %vm14920_vm8, 0, %v5546_v58  ;;  %v5721_v38 = vunpack.c.l.b16 %v12455_v62  ;;  %v4697_v55 = vrot.slane %v12047_v4, 4  ;;  %vm14931_vm8 = vmmov %vm14821_vm1 }
 0xa98   : > { %v5723_v15 = vpack.c.b16 %v5719_v46, %v5719_v46  ;;  %v4688_v34 = vsel %vm14921_vm4, %v12017_v42, %v4687_v51  ;;  %v5555_v22 = vperm.slane %v5547_v56, %v14808_v47  ;;  %v5527_v48 = vrot.slane %v12386_v29, 4 }
 0xa99   : > { %v5705_v5 = vpack.c.b16 %v5701_v31, %v5701_v31  ;;  %v4696_v33 = vperm.slane %v4688_v34, %v14808_v47  ;;  %v5725_v18 = vpack.c.b16 %v5721_v38, %v5721_v38  ;;  %v4698_v42 = vsel %vm14924_vm15, 0.0, %v4697_v55 }
 0xa9a   : > { %5709 = vrot.lane.b32.xlu1 %v5704_v24, %s8979_s13  ;;  %v5566_v24 = vsel %vm14922_vm2, 0, %v5565_v11  ;;  %v5869_v4 = vshll.u32 %v11954_v39, 16  ;;  %v5881_v58 = vshll.u32 %v11948_v8, 16  ;;  %v5720_v29 = vunpack.c.l.b16 %v5555_v22 }
 0xa9b   : > { %5687 = vrot.lane.b32.xlu2 %v5683_v52, %s8978_s12  ;;  %v12461_v52 = vperm.slane %v5623_v32, %v14808_v47  ;;  %v12478_v46 = vperm.slane %v5566_v24, %v14808_v47  ;;  %v4710_v13 = vsel %vm11923_vm0, %v4696_v33, 0.0  ;;  %v5528_v51 = vsel %vm14821_vm1, 0, %v5527_v48 }
 0xa9c   : > { %5707 = vrot.lane.b32.xlu0 %v5703_v41, %s8979_s13  ;;  %v5603_v41 = vrot.slane %v12375_v44, 4  ;;  %v5871_v31 = vrot.slane %v5869_v4, 5  ;;  %v5520_v38 = vrot.slane %v12443_v26, 4  ;;  %v14926_v34 = vshrl.u32 %v11948_v8, 16 }
 0xa9d   : > { %v5722_v21 = vunpack.c.l.b16 %v12461_v52  ;;  %v5740_v11 = vunpack.c.l.b16 %v12478_v46  ;;  %v5883_v24 = vrot.slane %v5881_v58, 5  ;;  %v5536_v48 = vperm.slane %v5528_v51, %v14808_v47 }
 0xa9e   : > { %v5604_v44 = vsel %vm14923_vm14, 0, %v5603_v41  ;;  %v5880_v55 = vrot.slane %v14926_v34, 4  ;;  %v5521_v26 = vsel %vm14927_vm13, 0, %v5520_v38 }
 0xa9f   : > { %v5726_v32 = vpack.c.b16 %v5722_v21, %v5722_v21  ;;  %v5558_v21 = vrot.slane %v5555_v22, 4  ;;  %v5744_v4 = vpack.c.b16 %v5740_v11, %v5740_v11 }
 0xaa0   : > { %v5884_v34 = vor.u32 %v5883_v24, %v5880_v55 }
 0xaa1   : > { %v5559_v22 = vsel %vm14928_vm9, 0, %v5558_v21 }
 0xaa2   : > { %5727 = vrot.lane.b32.xlu1 %v5723_v15, %s8980_s16  ;;  %v14925_v15 = vshrl.u32 %v11954_v39, 16  ;;  %v5760_v11 = vunpack.c.l.b16 %v5559_v22 }
 0xaa3   : > { %5693 = vrot.lane.b32.xlu2 %v5686_v0, %s8978_s12  ;;  %v12484_v0 = vperm.slane %v5604_v44, %v14808_v47 }
 0xaa4   : > { %5713 = vrot.lane.b32.xlu0 %v5706_v27, %s8979_s13  ;;  %v4708_v27 = vsel %vm11923_vm0, %v4698_v42, 0.0  ;;  %v5868_v41 = vrot.slane %v14925_v15, 4  ;;  %v12504_v42 = vpack.c.bf16 %v4710_v13, %v4710_v13  ;;  %v5759_v13 = vunpack.c.l.b16 %v5521_v26 }
 0xaa5   : > { %v5741_v56 = vunpack.c.l.b16 %v12484_v0  ;;  %v12501_v44 = vpack.c.bf16 %v4708_v27, %v4708_v27  ;;  %v14933_v26 = vshrl.u32 %v11963_v12, 16 }
 0xaa6   : > { %v5872_v15 = vor.u32 %v5871_v31, %v5868_v41  ;;  %v5634_v41 = vrot.slane %v12461_v52, 4  ;;  %v5885_v31 = vrot.slane %v5884_v34, 4 }
 0xaa7   : > { %v5745_v20 = vpack.c.b16 %v5741_v56, %v5741_v56  ;;  %v5875_v58 = vshll.u32 %v12501_v44, 16  ;;  %v5539_v56 = vrot.slane %v5536_v48, 4  ;;  %v5892_v34 = vrot.slane %v14933_v26, 4 }
 0xaa8   : > { %v5873_v51 = vrot.slane %v5872_v15, 4 }
 0xaa9   : > { %v5877_v55 = vrot.slane %v5875_v58, 5 }
 0xaaa   : > { %5733 = vrot.lane.b32.xlu1 %v5726_v32, %s8980_s16  ;;  %v5641_v32 = vrot.slane %v12400_v2, 4  ;;  %v5887_v2 = vshll.u32 %v12504_v42, 16 }
 0xaab   : > { %5711 = vrot.lane.b32.xlu2 %v5705_v5, %s8979_s13  ;;  %v5724_v5 = vpack.c.b16 %v5720_v29, %v5720_v29  ;;  %v12525_v52 = vsel %vm9668_vm11, %v5873_v51, %v5877_v55 }
 0xaac   : > { %5731 = vrot.lane.b32.xlu0 %v5725_v18, %s8980_s16  ;;  %v4699_v18 = vrot.slane %v4696_v33, 4  ;;  %v5739_v33 = vunpack.c.l.b16 %v5536_v48  ;;  %v5642_v27 = vsel %vm14930_vm12, 0, %v5641_v32  ;;  %v5889_v21 = vrot.slane %v5887_v2, 5 }
 0xaad   : > { %v5635_v32 = vsel %vm14931_vm8, 0, %v5634_v41  ;;  %v5909_v2 = vshrl.u32 %v12525_v52, 16 }
 0xaae   : > { %v4700_v29 = vsel %vm14929_vm7, 0.0, %v4699_v18  ;;  %v5743_v24 = vpack.c.b16 %v5739_v33, %v5739_v33  ;;  %v5763_v18 = vpack.c.b16 %v5759_v13, %v5759_v13  ;;  %v12533_v15 = vsel %vm9668_vm11, %v5885_v31, %v5889_v21 }
 0xaaf   : > { %v4712_v38 = vsel %vm11923_vm0, %v4700_v29, 0.0  ;;  %vm14932_vm0 = vmmov %vm14821_vm1  ;;  %v5762_v33 = vunpack.c.l.b16 %v5635_v32  ;;  %v5596_v29 = vrot.slane %v12455_v62, 4  ;;  %v5615_v13 = vrot.slane %v12484_v0, 4 }
 0xab0   : > { %v12527_v48 = vpack.c.bf16 %v4712_v38, %v4712_v38  ;;  %v5540_v37 = vsel %vm14932_vm0, 0, %v5539_v56  ;;  %v5913_v51 = vshrl.u32 %v12533_v15, 16  ;;  %vm14934_vm4 = vmmov %vm14932_vm0 }
 0xab1   : > { %v5766_v38 = vpack.c.b16 %v5762_v33, %v5762_v33  ;;  %v5597_v55 = vsel %vm14934_vm4, 0, %v5596_v29  ;;  %vm14935_vm2 = vmmov %vm14932_vm0 }
 0xab2   : > { %5751 = vrot.lane.b32.xlu1 %v5745_v20, %s8981_s29  ;;  %v5650_v20 = vperm.slane %v5642_v27, %v14808_v47  ;;  %v5779_v27 = vunpack.c.l.b16 %v5540_v37  ;;  %v5616_v62 = vsel %vm14935_vm2, 0, %v5615_v13  ;;  %vm14936_vm14 = vmmov %vm14932_vm0  ;;  %v5761_v32 = vunpack.c.l.b16 %v5597_v55 }
 0xab3   : > { %5729 = vrot.lane.b32.xlu2 %v5724_v5, %s8980_s16  ;;  %v5893_v5 = vshll.u32 %v11963_v12, 16  ;;  %v5905_v37 = vshrl.u32 %v12089_v57, 16  ;;  %vm14937_vm15 = vmmov %vm14932_vm0 }
 0xab4   : > { %5749 = vrot.lane.b32.xlu0 %v5744_v4, %s8981_s29  ;;  %v5764_v4 = vpack.c.b16 %v5760_v11, %v5760_v11  ;;  %v5742_v22 = vunpack.c.l.b16 %v5650_v20  ;;  %v5899_v11 = vshll.u32 %v12527_v48, 16  ;;  %v5653_v41 = vrot.slane %v5650_v20, 4  ;;  %vm14942_vm1 = vmmov %vm14932_vm0 }
 0xab5   : > { %v5895_v58 = vrot.slane %v5893_v5, 5  ;;  %v5783_v21 = vpack.c.b16 %v5779_v27, %v5779_v27  ;;  %v5914_v5 = vpack.i.b16 0, %v5913_v51  ;;  %v5908_v20 = vpack.i.b16 0, %v12525_v52  ;;  %vm14944_vm13 = vmmov %vm14932_vm0 }
 0xab6   : > { %v5746_v31 = vpack.c.b16 %v5742_v22, %v5742_v22  ;;  %v5901_v0 = vrot.slane %v5899_v11, 5  ;;  %v5577_v22 = vrot.slane %v12478_v46, 4  ;;  %v5765_v51 = vpack.c.b16 %v5761_v32, %v5761_v32  ;;  %vm14945_vm9 = vmmov %vm14932_vm0 }
 0xab7   : > { %v5896_v56 = vor.u32 %v5895_v58, %v5892_v34  ;;  %v5781_v34 = vunpack.c.l.b16 %v5616_v62  ;;  %v12557_v29 = vperm.slane %v5914_v5, %v14805_v30  ;;  %v12563_v27 = vperm.slane %v5908_v20, %v14805_v30  ;;  %vm14946_vm7 = vmmov %vm14932_vm0 }
 0xab8   : > { %v5906_v11 = vpack.i.b16 0, %v5905_v37  ;;  %vm14947_vm12 = vmmov %vm14932_vm0 }
 0xab9   : > { %v5897_v26 = vrot.slane %v5896_v56, 4  ;;  %v5785_v46 = vpack.c.b16 %v5781_v34, %v5781_v34  ;;  %vm14948_vm8 = vmmov %vm14932_vm0 }
 0xaba   : > { %5769 = vrot.lane.b32.xlu1 %v5764_v4, %s8982_s14  ;;  %v5654_v4 = vsel %vm14936_vm14, 0, %v5653_v41  ;;  %v5578_v41 = vsel %vm14937_vm15, 0, %v5577_v22  ;;  %v12589_v62 = vperm.slane %v5906_v11, %v14805_v30  ;;  %vm14949_vm4 = vmmov %vm14932_vm0 }
 0xabb   : > { %5747 = vrot.lane.b32.xlu2 %v5743_v24, %s8981_s29  ;;  %v5910_v24 = vpack.i.b16 0, %v5909_v2  ;;  %v5782_v33 = vunpack.c.l.b16 %v5654_v4  ;;  %v12567_v13 = vsel %vm9668_vm11, %v5897_v26, %v5901_v0  ;;  %vm14940_vm11 = vmmov %vm14932_vm0 }
 0xabc   : > { %5767 = vrot.lane.b32.xlu0 %v5763_v18, %s8982_s14  ;;  %v5904_v18 = vpack.i.b16 0, %v12089_v57  ;;  %v5916_v55 = vpack.i.b16 0, %v12567_v13  ;;  %v5917_v5 = vshrl.u32 %v12567_v13, 16  ;;  %v5948_v26 = vperm.slane %v12589_v62, %v14808_v47  ;;  %vm14950_vm2 = vmmov %vm14932_vm0 }
 0xabd   : > { %v12554_v58 = vperm.slane %v5910_v24, %v14805_v30  ;;  %v5786_v56 = vpack.c.b16 %v5782_v33, %v5782_v33  ;;  %v12585_v24 = vperm.slane %v12563_v27, %v14808_v47  ;;  %v5912_v33 = vpack.i.b16 0, %v12533_v15  ;;  %vm14952_vm14 = vmmov %vm14932_vm0 }
 0xabe   : > { %v12560_v2 = vperm.slane %v5904_v18, %v14805_v30  ;;  %v12595_v20 = vperm.slane %v5916_v55, %v14805_v30  ;;  %v5918_v34 = vpack.i.b16 0, %v5917_v5  ;;  %vm14953_vm15 = vmmov %vm14932_vm0 }
 0xabf   : > { %14939 = vst [vmem:[#allocation87_spill] sm:$0xff] %v12585_v24  ;;  %v5972_v32 = vrot.slane %v12585_v24, 4  ;;  %v5999_v5 = vperm.slane %v5912_v33, %v14805_v30 }
 0xac0   : > { %v12579_v14 = vperm.slane %v12560_v2, %v14808_v47  ;;  %v12611_v55 = vperm.slane %v5918_v34, %v14805_v30 }
 0xac2   : > { %5787 = vrot.lane.b32.xlu1 %v5783_v21, %s8975_s8  ;;  %14938 = vst [vmem:[#allocation18_spill] sm:$0xff] %v12579_v14  ;;  %v5780_v21 = vunpack.c.l.b16 %v5578_v41  ;;  %v5934_v4 = vrot.slane %v12579_v14, 4  ;;  %v5973_v41 = vsel %vm14942_vm1, 0, %v5972_v32  ;;  %v6062_v14 = vperm.slane %v12611_v55, %v14808_v47  ;;  %vm14956_vm1 = vmmov %vm14932_vm0 }
 0xac3   : > { %5753 = vrot.lane.b32.xlu2 %v5746_v31, %s8981_s29  ;;  %v12572_v31 = vperm.slane %v12554_v58, %v14808_v47  ;;  %v12618_v32 = vperm.slane %v5999_v5, %v14808_v47 }
 0xac4   : > { %5773 = vrot.lane.b32.xlu0 %v5766_v38, %s8982_s14  ;;  %v6024_v38 = vperm.slane %v12557_v29, %v14808_v47  ;;  %v5784_v37 = vpack.c.b16 %v5780_v21, %v5780_v21  ;;  %v5935_v11 = vsel %vm14940_vm11, 0, %v5934_v4  ;;  %v5953_v4 = vrot.slane %v5948_v26, 4  ;;  %vm14954_vm11 = vmmov %vm14932_vm0 }
 0xac5   : > { %v6076_v18 = vunpack.c.l.b16 %v12572_v31  ;;  %v6095_v21 = vunpack.c.l.b16 %v5935_v11  ;;  %14943 = vst [vmem:[#allocation83_spill] sm:$0xff] %v12618_v32 }
 0xac6   : > { %v6077_v0 = vunpack.c.l.b16 %v6024_v38  ;;  %v5954_v33 = vsel %vm14945_vm9, 0, %v5953_v4  ;;  %v5962_v4 = vrot.slane %v12563_v27, 4  ;;  %vm14959_vm9 = vmmov %vm14932_vm0 }
 0xac7   : > { %v6080_v22 = vpack.c.b16 %v6076_v18, %v6076_v18  ;;  %v6096_v18 = vunpack.c.l.b16 %v5973_v41  ;;  %v6010_v41 = vrot.slane %v12618_v32, 4 }
 0xaca   : > { %5793 = vrot.lane.b32.xlu1 %v5786_v56, %s8975_s8  ;;  %v6075_v56 = vunpack.c.l.b16 %v5948_v26  ;;  %v6078_v26 = vunpack.c.l.b16 %v6062_v14 }
 0xacb   : > { %5771 = vrot.lane.b32.xlu2 %v5765_v51, %s8982_s14  ;;  %v6081_v51 = vpack.c.b16 %v6077_v0, %v6077_v0 }
 0xacc   : > { %5791 = vrot.lane.b32.xlu0 %v5785_v46, %s8975_s8  ;;  %v12605_v46 = vperm.slane %v12595_v20, %v14808_v47  ;;  %v6082_v61 = vpack.c.b16 %v6078_v26, %v6078_v26  ;;  %v5963_v26 = vsel %vm14932_vm0, 0, %v5962_v4 }
 0xace   : > { %14941 = vst [vmem:[#allocation60_spill] sm:$0xff] %v12605_v46  ;;  %v6048_v0 = vrot.slane %v12605_v46, 4  ;;  %v6067_v46 = vrot.slane %v6062_v14, 4 }
 0xad0   : > { %v6049_v34 = vsel %vm14944_vm13, 0, %v6048_v0  ;;  %vm14958_vm13 = vmmov %vm14932_vm0 }
 0xad1   : > { %v6098_v11 = vunpack.c.l.b16 %v6049_v34  ;;  %v5991_v34 = vrot.slane %v12572_v31, 4  ;;  %v5943_v31 = vrot.slane %v12589_v62, 4 }
 0xad2   : > { %6087 = vrot.lane.b32.xlu1 %v6081_v51, %s8964_s27  ;;  %v6100_v51 = vpack.c.b16 %v6096_v18, %v6096_v18  ;;  %v6011_v18 = vsel %vm14946_vm7, 0, %v6010_v41  ;;  %vm14962_vm7 = vmmov %vm14932_vm0 }
 0xad3   : > { %5789 = vrot.lane.b32.xlu2 %v5784_v37, %s8975_s8  ;;  %v6079_v37 = vpack.c.b16 %v6075_v56, %v6075_v56  ;;  %v6115_v56 = vunpack.c.l.b16 %v5954_v33  ;;  %v6102_v24 = vpack.c.b16 %v6098_v11, %v6098_v11  ;;  %v5992_v27 = vsel %vm14950_vm2, 0, %v5991_v34  ;;  %vm14970_vm2 = vmmov %vm14932_vm0 }
 0xad4   : > { %6085 = vrot.lane.b32.xlu0 %v6080_v22, %s8964_s27  ;;  %v6099_v22 = vpack.c.b16 %v6095_v21, %v6095_v21  ;;  %v6029_v21 = vrot.slane %v6024_v38, 4  ;;  %v6097_v38 = vunpack.c.l.b16 %v6011_v18  ;;  %v6038_v34 = vrot.slane %v12595_v20, 4 }
 0xad6   : > { %v6030_v0 = vsel %vm14947_vm12, 0, %v6029_v21  ;;  %v6101_v11 = vpack.c.b16 %v6097_v38, %v6097_v38  ;;  %v5981_v21 = vrot.slane %v12554_v58, 4  ;;  %vm14964_vm12 = vmmov %vm14932_vm0 }
 0xad7   : > { %v6117_v14 = vunpack.c.l.b16 %v6030_v0 }
 0xad9   : > { %v6121_v41 = vpack.c.b16 %v6117_v14, %v6117_v14 }
 0xada   : > { %6105 = vrot.lane.b32.xlu1 %v6100_v51, %s8978_s12  ;;  %v6000_v51 = vrot.slane %v5999_v5, 4 }
 0xadb   : > { %6083 = vrot.lane.b32.xlu2 %v6079_v37, %s8964_s27  ;;  %v6119_v37 = vpack.c.b16 %v6115_v56, %v6115_v56 }
 0xadc   : > { %6103 = vrot.lane.b32.xlu0 %v6099_v22, %s8978_s12  ;;  %v6068_v22 = vsel %vm14948_vm8, 0, %v6067_v46  ;;  %v5924_v46 = vrot.slane %v12560_v2, 4  ;;  %vm14965_vm8 = vmmov %vm14932_vm0 }
 0xadd   : > { %v6118_v33 = vunpack.c.l.b16 %v6068_v22  ;;  %v5944_v22 = vsel %vm14953_vm15, 0, %v5943_v31  ;;  %vm14978_vm15 = vmmov %vm14932_vm0 }
 0xade   : > { %v5925_v2 = vsel %vm14952_vm14, 0, %v5924_v46  ;;  %v12655_v58 = vperm.slane %v5944_v22, %v14808_v47  ;;  %v6039_v46 = vsel %vm14956_vm1, 0, %v6038_v34  ;;  %vm14974_vm14 = vmmov %vm14932_vm0 }
 0xadf   : > { %v6122_v5 = vpack.c.b16 %v6118_v33, %v6118_v33  ;;  %v5933_v62 = vperm.slane %v5925_v2, %v14808_v47  ;;  %vm15021_vm1 = vmmov %vm14932_vm0 }
 0xae2   : > { %6123 = vrot.lane.b32.xlu1 %v6119_v37, %s8979_s13  ;;  %v6116_v37 = vunpack.c.l.b16 %v5992_v27  ;;  %v6155_v27 = vunpack.c.l.b16 %v12655_v58 }
 0xae3   : > { %6089 = vrot.lane.b32.xlu2 %v6082_v61, %s8964_s27  ;;  %v6001_v61 = vsel %vm14949_vm4, 0, %v6000_v51  ;;  %v5982_v51 = vsel %vm14954_vm11, 0, %v5981_v21  ;;  %v5936_v21 = vrot.slane %v5933_v62, 4  ;;  %vm14969_vm4 = vmmov %vm14932_vm0 }
 0xae4   : > { %6109 = vrot.lane.b32.xlu0 %v6102_v24, %s8978_s12  ;;  %v12638_v24 = vperm.slane %v5963_v26, %v14808_v47  ;;  %v6009_v56 = vperm.slane %v6001_v61, %v14808_v47  ;;  %v6120_v38 = vpack.c.b16 %v6116_v37, %v6116_v37  ;;  %v5990_v26 = vperm.slane %v5982_v51, %v14808_v47  ;;  %vm15020_vm11 = vmmov %vm14932_vm0 }
 0xae5   : > { %v6057_v61 = vrot.slane %v12611_v55, 4  ;;  %v6047_v55 = vperm.slane %v6039_v46, %v14808_v47  ;;  %v5937_v51 = vsel %vm14959_vm9, 0, %v5936_v21  ;;  %vm15023_vm9 = vmmov %vm14932_vm0 }
 0xae6   : > { %v6136_v0 = vunpack.c.l.b16 %v12638_v24  ;;  %v6137_v4 = vunpack.c.l.b16 %v6009_v56  ;;  %v6156_v20 = vunpack.c.l.b16 %v5990_v26 }
 0xae7   : > { %v6058_v31 = vsel %vm14958_vm13, 0, %v6057_v61  ;;  %vm15022_vm13 = vmmov %vm14932_vm0 }
 0xae8   : > { %v6140_v14 = vpack.c.b16 %v6136_v0, %v6136_v0  ;;  %v6141_v33 = vpack.c.b16 %v6137_v4, %v6137_v4  ;;  %v6159_v0 = vpack.c.b16 %v6155_v27, %v6155_v27  ;;  %v12672_v2 = vperm.slane %v6058_v31, %v14808_v47 }
 0xae9   : > { %v6019_v4 = vrot.slane %v12557_v29, 4  ;;  %v6160_v22 = vpack.c.b16 %v6156_v20, %v6156_v20  ;;  %v6175_v29 = vunpack.c.l.b16 %v5937_v51  ;;  %v6050_v27 = vrot.slane %v6047_v55, 4 }
 0xaea   : > { %6129 = vrot.lane.b32.xlu1 %v6122_v5, %s8979_s13  ;;  %v6158_v34 = vunpack.c.l.b16 %v12672_v2  ;;  %v5974_v51 = vrot.slane %v12638_v24, 4 }
 0xaeb   : > { %6107 = vrot.lane.b32.xlu2 %v6101_v11, %s8978_s12  ;;  %v6179_v21 = vpack.c.b16 %v6175_v29, %v6175_v29 }
 0xaec   : > { %6127 = vrot.lane.b32.xlu0 %v6121_v41, %s8979_s13  ;;  %v6135_v41 = vunpack.c.l.b16 %v5933_v62  ;;  %v6138_v62 = vunpack.c.l.b16 %v6047_v55  ;;  %v6162_v31 = vpack.c.b16 %v6158_v34, %v6158_v34 }
 0xaed   : > { %v12647_v18 = vpop.permute.xlu2 %5669 }
 0xaee   : > { %14951 = vst [vmem:[#allocation47_spill] sm:$0xff] %v12647_v18  ;;  %v6139_v37 = vpack.c.b16 %v6135_v41, %v6135_v41  ;;  %v6012_v41 = vrot.slane %v6009_v56, 4  ;;  %v6142_v46 = vpack.c.b16 %v6138_v62, %v6138_v62 }
 0xaf2   : > { %6147 = vrot.lane.b32.xlu1 %v6141_v33, %s8980_s16  ;;  %v6020_v33 = vsel %vm14962_vm7, 0, %v6019_v4  ;;  %vm15024_vm7 = vmmov %vm14932_vm0 }
 0xaf3   : > { %6125 = vrot.lane.b32.xlu2 %v6120_v38, %s8979_s13  ;;  %v6028_v20 = vperm.slane %v6020_v33, %v14808_v47  ;;  %v5993_v33 = vrot.slane %v5990_v26, 4 }
 0xaf4   : > { %6145 = vrot.lane.b32.xlu0 %v6140_v14, %s8980_s16  ;;  %v12667_v5 = vpop.permute.xlu1 %5667  ;;  %v12681_v14 = vpop.permute.xlu0 %5671 }
 0xaf5   : > { %v12663_v11 = vpop.permute.xlu2 %5687  ;;  %14957 = vst [vmem:[#allocation23_spill] sm:$0xff] %v12667_v5  ;;  %v6031_v29 = vrot.slane %v6028_v20, 4 }
 0xaf6   : > { %14955 = vst [vmem:[#allocation82_spill] sm:$0xff] %v12663_v11 }
 0xaf7   : > { %14961 = vst [vmem:[#allocation92_spill] sm:$0xff] %v12681_v14 }
 0xafa   : > { %6165 = vrot.lane.b32.xlu1 %v6160_v22, %s8981_s29  ;;  %v6157_v22 = vunpack.c.l.b16 %v6028_v20 }
 0xafb   : > { %6143 = vrot.lane.b32.xlu2 %v6139_v37, %s8980_s16  ;;  %v6013_v37 = vsel %vm14964_vm12, 0, %v6012_v41  ;;  %vm15025_vm12 = vmmov %vm14932_vm0 }
 0xafc   : > { %6163 = vrot.lane.b32.xlu0 %v6159_v0, %s8981_s29  ;;  %v12685_v61 = vpop.permute.xlu1 %5673  ;;  %v6051_v0 = vsel %vm14965_vm8, 0, %v6050_v27  ;;  %v6177_v55 = vunpack.c.l.b16 %v6013_v37  ;;  %v6161_v41 = vpack.c.b16 %v6157_v22, %v6157_v22  ;;  %v6032_v37 = vsel %vm14970_vm2, 0, %v6031_v29  ;;  %vm15026_vm8 = vmmov %vm14932_vm0 }
 0xafd   : > { %v12679_v38 = vpop.permute.xlu2 %5693  ;;  %14963 = vst [vmem:[#allocation45_spill] sm:$0xff] %v12685_v61  ;;  %v6178_v34 = vunpack.c.l.b16 %v6051_v0  ;;  %v5955_v22 = vrot.slane %v12655_v58, 4  ;;  %v6069_v58 = vrot.slane %v12672_v2, 4  ;;  %vm15028_vm2 = vmmov %vm14932_vm0 }
 0xafe   : > { %14960 = vst [vmem:[#allocation19_spill] sm:$0xff] %v12679_v38 }
 0xaff   : > { %v6182_v27 = vpack.c.b16 %v6178_v34, %v6178_v34 }
 0xb02   : > { %6183 = vrot.lane.b32.xlu1 %v6179_v21, %s8982_s14  ;;  %v5994_v21 = vsel %vm14969_vm4, 0, %v5993_v33  ;;  %v5956_v33 = vsel %vm14974_vm14, 0, %v5955_v22  ;;  %vm15027_vm4 = vmmov %vm14932_vm0 }
 0xb03   : > { %6149 = vrot.lane.b32.xlu2 %v6142_v46, %s8980_s16  ;;  %v6181_v46 = vpack.c.b16 %v6177_v55, %v6177_v55  ;;  %v6196_v20 = vunpack.c.l.b16 %v5994_v21  ;;  %vm15029_vm14 = vmmov %vm14932_vm0 }
 0xb04   : > { %6169 = vrot.lane.b32.xlu0 %v6162_v31, %s8981_s29  ;;  %v12698_v62 = vpop.permute.xlu1 %5691  ;;  %v5975_v31 = vsel %vm14932_vm0, 0, %v5974_v51  ;;  %v6197_v51 = vunpack.c.l.b16 %v6032_v37 }
 0xb05   : > { %v12693_v4 = vpop.permute.xlu2 %5711  ;;  %14968 = vst [vmem:[#allocation59_spill] sm:$0xff] %v12698_v62  ;;  %v6176_v0 = vunpack.c.l.b16 %v5975_v31  ;;  %v6195_v31 = vunpack.c.l.b16 %v5956_v33 }
 0xb06   : > { %14966 = vst [vmem:[#allocation99_spill] sm:$0xff] %v12693_v4  ;;  %v12695_v56 = vpop.permute.xlu0 %5689 }
 0xb07   : > { %14967 = vst [vmem:[#allocation17_spill] sm:$0xff] %v12695_v56  ;;  %v6180_v34 = vpack.c.b16 %v6176_v0, %v6176_v0  ;;  %v6199_v37 = vpack.c.b16 %v6195_v31, %v6195_v31  ;;  %v6070_v0 = vsel %vm14978_vm15, 0, %v6069_v58  ;;  %vm15030_vm15 = vmmov %vm14932_vm0 }
 0xb08   : > { %v6198_v22 = vunpack.c.l.b16 %v6070_v0 }
 0xb0a   : > { %6189 = vrot.lane.b32.xlu1 %v6182_v27, %s8982_s14  ;;  %v6202_v2 = vpack.c.b16 %v6198_v22, %v6198_v22 }
 0xb0b   : > { %6167 = vrot.lane.b32.xlu2 %v6161_v41, %s8981_s29  ;;  %v6200_v41 = vpack.c.b16 %v6196_v20, %v6196_v20 }
 0xb0c   : > { %6187 = vrot.lane.b32.xlu0 %v6181_v46, %s8982_s14  ;;  %v12711_v55 = vpop.permute.xlu1 %5709  ;;  %v6201_v46 = vpack.c.b16 %v6197_v51, %v6197_v51 }
 0xb0d   : > { %v12706_v24 = vpop.permute.xlu2 %5729  ;;  %14973 = vst [vmem:[#allocation76_spill] sm:$0xff] %v12711_v55 }
 0xb0e   : > { %14971 = vst [vmem:[#allocation80_spill] sm:$0xff] %v12706_v24  ;;  %v12708_v26 = vpop.permute.xlu0 %5707 }
 0xb0f   : > { %14972 = vst [vmem:[#allocation72_spill] sm:$0xff] %v12708_v26 }
 0xb12   : > { %6207 = vrot.lane.b32.xlu1 %v6201_v46, %s8975_s8 }
 0xb13   : > { %6185 = vrot.lane.b32.xlu2 %v6180_v34, %s8982_s14 }
 0xb14   : > { %6205 = vrot.lane.b32.xlu0 %v6200_v41, %s8975_s8  ;;  %v12722_v21 = vpop.permute.xlu1 %5727 }
 0xb15   : > { %v12717_v29 = vpop.permute.xlu2 %5747  ;;  %14977 = vst [vmem:[#allocation44_spill] sm:$0xff] %v12722_v21 }
 0xb16   : > { %14975 = vst [vmem:[#allocation111_spill] sm:$0xff] %v12717_v29  ;;  %v12719_v27 = vpop.permute.xlu0 %5713 }
 0xb17   : > { %14976 = vst [vmem:[#allocation97_spill] sm:$0xff] %v12719_v27 }
 0xb1a   : > { %6273 = vrot.lane.b32.xlu1 %v12525_v52, %s8966_s17 }
 0xb1b   : > { %6203 = vrot.lane.b32.xlu2 %v6199_v37, %s8975_s8 }
 0xb1c   : > { %6271 = vrot.lane.b32.xlu0 %v12089_v57, %s8966_s17  ;;  %v12734_v34 = vpop.permute.xlu1 %5733 }
 0xb1d   : > { %v12730_v20 = vpop.permute.xlu2 %5753  ;;  %14981 = vst [vmem:[#allocation109_spill] sm:$0xff] %v12734_v34 }
 0xb1e   : > { %14979 = vst [vmem:[#allocation116_spill] sm:$0xff] %v12730_v20  ;;  %v12732_v51 = vpop.permute.xlu0 %5731 }
 0xb1f   : > { %14980 = vst [vmem:[#allocation20_spill] sm:$0xff] %v12732_v51 }
 0xb23   : > { %6209 = vrot.lane.b32.xlu2 %v6202_v2, %s8975_s8 }
 0xb24   : > { %6277 = vrot.lane.b32.xlu0 %v12567_v13, %s8966_s17  ;;  %v12743_v46 = vpop.permute.xlu1 %5751 }
 0xb25   : > { %v12739_v41 = vpop.permute.xlu2 %5771  ;;  %14984 = vst [vmem:[#allocation102_spill] sm:$0xff] %v12743_v46 }
 0xb26   : > { %14982 = vst [vmem:[#allocation25_spill] sm:$0xff] %v12739_v41  ;;  %v12741_v33 = vpop.permute.xlu0 %5749 }
 0xb27   : > { %14983 = vst [vmem:[#allocation91_spill] sm:$0xff] %v12741_v33 }
 0xb2b   : > { %6275 = vrot.lane.b32.xlu2 %v12533_v15, %s8966_s17 }
 0xb2c   : > { %v12751_v37 = vpop.permute.xlu1 %5769 }
 0xb2d   : > { %v12747_v31 = vpop.permute.xlu2 %5789  ;;  %14987 = vst [vmem:[#allocation114_spill] sm:$0xff] %v12751_v37 }
 0xb2e   : > { %14985 = vst [vmem:[#allocation95_spill] sm:$0xff] %v12747_v31  ;;  %v12749_v58 = vpop.permute.xlu0 %5767 }
 0xb2f   : > { %14986 = vst [vmem:[#allocation48_spill] sm:$0xff] %v12749_v58 }
 0xb34   : > { %v12757_v2 = vpop.permute.xlu1 %5787 }
 0xb35   : > { %v12753_v0 = vpop.permute.xlu2 %6083  ;;  %14990 = vst [vmem:[#allocation118_spill] sm:$0xff] %v12757_v2 }
 0xb36   : > { %14988 = vst [vmem:[#allocation108_spill] sm:$0xff] %v12753_v0  ;;  %v12755_v22 = vpop.permute.xlu0 %5773 }
 0xb37   : > { %14989 = vst [vmem:[#allocation101_spill] sm:$0xff] %v12755_v22 }
 0xb3c   : > { %v12763_v29 = vpop.permute.xlu1 %5793 }
 0xb3d   : > { %v12759_v20 = vpop.permute.xlu2 %6089  ;;  %14993 = vst [vmem:[#allocation104_spill] sm:$0xff] %v12763_v29 }
 0xb3e   : > { %14991 = vst [vmem:[#allocation90_spill] sm:$0xff] %v12759_v20  ;;  %v12761_v34 = vpop.permute.xlu0 %5791 }
 0xb3f   : > { %14992 = vst [vmem:[#allocation110_spill] sm:$0xff] %v12761_v34 }
 0xb44   : > { %v12769_v31 = vpop.permute.xlu1 %6087 }
 0xb45   : > { %v12765_v21 = vpop.permute.xlu2 %6107  ;;  %14996 = vst [vmem:[#allocation117_spill] sm:$0xff] %v12769_v31 }
 0xb46   : > { %14994 = vst [vmem:[#allocation113_spill] sm:$0xff] %v12765_v21  ;;  %v12767_v27 = vpop.permute.xlu0 %6085 }
 0xb47   : > { %14995 = vst [vmem:[#allocation105_spill] sm:$0xff] %v12767_v27 }
 0xb4c   : > { %v12775_v33 = vpop.permute.xlu1 %6105 }
 0xb4d   : > { %v12771_v58 = vpop.permute.xlu2 %6125  ;;  %14999 = vst [vmem:[#allocation98_spill] sm:$0xff] %v12775_v33 }
 0xb4e   : > { %14997 = vst [vmem:[#allocation54_spill] sm:$0xff] %v12771_v58  ;;  %v12773_v37 = vpop.permute.xlu0 %6103 }
 0xb4f   : > { %14998 = vst [vmem:[#allocation94_spill] sm:$0xff] %v12773_v37 }
 0xb54   : > { %v12781_v20 = vpop.permute.xlu1 %6123 }
 0xb55   : > { %v12777_v22 = vpop.permute.xlu2 %6143  ;;  %15002 = vst [vmem:[#allocation73_spill] sm:$0xff] %v12781_v20 }
 0xb56   : > { %15000 = vst [vmem:[#allocation79_spill] sm:$0xff] %v12777_v22  ;;  %v12779_v2 = vpop.permute.xlu0 %6109 }
 0xb57   : > { %15001 = vst [vmem:[#allocation85_spill] sm:$0xff] %v12779_v2 }
 0xb5c   : > { %v12787_v38 = vpop.permute.xlu1 %6129 }
 0xb5d   : > { %v12783_v26 = vpop.permute.xlu2 %6149  ;;  %15005 = vst [vmem:[#allocation89_spill] sm:$0xff] %v12787_v38 }
 0xb5e   : > { %15003 = vst [vmem:[#allocation77_spill] sm:$0xff] %v12783_v26  ;;  %v12785_v29 = vpop.permute.xlu0 %6127 }
 0xb5f   : > { %15004 = vst [vmem:[#allocation100_spill] sm:$0xff] %v12785_v29 }
 0xb64   : > { %v12793_v11 = vpop.permute.xlu1 %6147 }
 0xb65   : > { %v12789_v34 = vpop.permute.xlu2 %6167  ;;  %15008 = vst [vmem:[#allocation115_spill] sm:$0xff] %v12793_v11 }
 0xb66   : > { %15006 = vst [vmem:[#allocation107_spill] sm:$0xff] %v12789_v34  ;;  %v12791_v24 = vpop.permute.xlu0 %6145 }
 0xb67   : > { %15007 = vst [vmem:[#allocation112_spill] sm:$0xff] %v12791_v24 }
 0xb6c   : > { %v12799_v22 = vpop.permute.xlu1 %6165 }
 0xb6d   : > { %v12795_v41 = vpop.permute.xlu2 %6185  ;;  %15011 = vst [vmem:[#allocation74_spill] sm:$0xff] %v12799_v22 }
 0xb6e   : > { %15009 = vst [vmem:[#allocation15_spill] sm:$0xff] %v12795_v41  ;;  %v12797_v61 = vpop.permute.xlu0 %6163 }
 0xb6f   : > { %15010 = vst [vmem:[#allocation16_spill] sm:$0xff] %v12797_v61 }
 0xb74   : > { %v12805_v26 = vpop.permute.xlu1 %6183 }
 0xb75   : > { %v12801_v2 = vpop.permute.xlu2 %6203  ;;  %15014 = vst [vmem:[#allocation122_spill] sm:$0xff] %v12805_v26 }
 0xb76   : > { %15012 = vst [vmem:[#allocation120_spill] sm:$0xff] %v12801_v2  ;;  %v12803_v20 = vpop.permute.xlu0 %6169 }
 0xb77   : > { %15013 = vst [vmem:[#allocation121_spill] sm:$0xff] %v12803_v20 }
 0xb7c   : > { %v12811_v58 = vpop.permute.xlu1 %6189 }
 0xb7d   : > { %v12807_v37 = vpop.permute.xlu2 %6209  ;;  %15017 = vst [vmem:[#allocation125_spill] sm:$0xff] %v12811_v58 }
 0xb7e   : > { %15015 = vst [vmem:[#allocation123_spill] sm:$0xff] %v12807_v37  ;;  %v12809_v38 = vpop.permute.xlu0 %6187 }
 0xb7f   : > { %15016 = vst [vmem:[#allocation124_spill] sm:$0xff] %v12809_v38 }
 0xb84   : > { %v12815_v41 = vpop.permute.xlu1 %6207 }
 0xb85   : > { %v6276_v24 = vpop.permute.xlu2 %6275  ;;  %15019 = vst [vmem:[#allocation127_spill] sm:$0xff] %v12815_v41 }
 0xb86   : > { %v6289_v0 = vshrl.u32 %v6276_v24, 16  ;;  %v12813_v46 = vpop.permute.xlu0 %6205 }
 0xb87   : > { %15018 = vst [vmem:[#allocation126_spill] sm:$0xff] %v12813_v46 }
 0xb88   : > { %v6290_v61 = vpack.i.b16 0, %v6289_v0 }
 0xb8a   : > { %v12818_v22 = vperm.slane %v6290_v61, %v14805_v30 }
 0xb8c   : > { %v12822_v20 = vperm.slane %v12818_v22, %v14808_v47  ;;  %v6274_v26 = vpop.permute.xlu1 %6273 }
 0xb8d   : > { %v6284_v34 = vpack.i.b16 0, %v6274_v26  ;;  %v6285_v51 = vshrl.u32 %v6274_v26, 16 }
 0xb8e   : > { %v6272_v2 = vpop.permute.xlu0 %6271  ;;  %v6453_v37 = vunpack.c.l.b16 %v12822_v20 }
 0xb8f   : > { %v6280_v38 = vpack.i.b16 0, %v6272_v2  ;;  %v6281_v58 = vshrl.u32 %v6272_v2, 16  ;;  %v6286_v0 = vpack.i.b16 0, %v6285_v51  ;;  %v12829_v61 = vperm.slane %v6284_v34, %v14805_v30 }
 0xb90   : > { %v6457_v55 = vpack.c.b16 %v6453_v37, %v6453_v37  ;;  %v6288_v2 = vpack.i.b16 0, %v6276_v24 }
 0xb91   : > { %v6282_v46 = vpack.i.b16 0, %v6281_v58  ;;  %v12826_v41 = vperm.slane %v6280_v38, %v14805_v30  ;;  %v12841_v26 = vperm.slane %v12829_v61, %v14808_v47  ;;  %v12844_v38 = vperm.slane %v6286_v0, %v14805_v30 }
 0xb92   : > { %6463 = vrot.lane.b32.xlu0 %v6457_v55, %s8964_s27  ;;  %v6375_v56 = vperm.slane %v6288_v2, %v14805_v30 }
 0xb93   : > { %v12834_v5 = vperm.slane %v12826_v41, %v14808_v47  ;;  %v12837_v33 = vperm.slane %v6282_v46, %v14805_v30  ;;  %v6348_v55 = vrot.slane %v12841_v26, 4  ;;  %v6362_v34 = vperm.slane %v12844_v38, %v14808_v47 }
 0xb94   : > { %v6376_v3 = vrot.slane %v6375_v56, 4 }
 0xb95   : > { %v6324_v51 = vperm.slane %v12837_v33, %v14808_v47  ;;  %v6310_v46 = vrot.slane %v12834_v5, 4  ;;  %v6452_v27 = vunpack.c.l.b16 %v6362_v34  ;;  %v6349_v0 = vsel %vm15020_vm11, 0, %v6348_v55  ;;  %vm15031_vm11 = vmmov %vm14932_vm0 }
 0xb96   : > { %v6278_v58 = vpop.permute.xlu0 %6277  ;;  %v6472_v29 = vunpack.c.l.b16 %v6349_v0 }
 0xb97   : > { %v6292_v37 = vpack.i.b16 0, %v6278_v58  ;;  %v6293_v24 = vshrl.u32 %v6278_v58, 16  ;;  %v6329_v4 = vrot.slane %v6324_v51, 4  ;;  %v6451_v62 = vunpack.c.l.b16 %v6324_v51 }
 0xb98   : > { %v6456_v21 = vpack.c.b16 %v6452_v27, %v6452_v27  ;;  %v6476_v58 = vpack.c.b16 %v6472_v29, %v6472_v29  ;;  %v6311_v2 = vsel %vm15021_vm1, 0, %v6310_v46  ;;  %vm15032_vm1 = vmmov %vm14932_vm0 }
 0xb99   : > { %v6294_v18 = vpack.i.b16 0, %v6293_v24  ;;  %v12855_v11 = vperm.slane %v6292_v37, %v14805_v30  ;;  %v6455_v55 = vpack.c.b16 %v6451_v62, %v6451_v62  ;;  %v6330_v24 = vsel %vm15022_vm13, 0, %v6329_v4  ;;  %vm15033_vm13 = vmmov %vm14932_vm0 }
 0xb9a   : > { %6461 = vrot.lane.b32.xlu2 %v6456_v21, %s8964_s27  ;;  %v12868_v37 = vperm.slane %v6375_v56, %v14808_v47  ;;  %6481 = vrot.lane.b32.xlu0 %v6476_v58, %s8978_s12  ;;  %v6491_v51 = vunpack.c.l.b16 %v6330_v24  ;;  %v6405_v24 = vrot.slane %v12822_v20, 4  ;;  %v6338_v56 = vrot.slane %v12829_v61, 4 }
 0xb9b   : > { %v12859_v14 = vperm.slane %v12855_v11, %v14808_v47  ;;  %v12862_v32 = vperm.slane %v6294_v18, %v14805_v30  ;;  %6459 = vrot.lane.b32.xlu1 %v6455_v55, %s8964_s27  ;;  %v6471_v18 = vunpack.c.l.b16 %v6311_v2  ;;  %v6300_v20 = vrot.slane %v12826_v41, 4 }
 0xb9c   : > { %v6386_v62 = vrot.slane %v12868_v37, 4  ;;  %v6495_v31 = vpack.c.b16 %v6491_v51, %v6491_v51  ;;  %v6319_v41 = vrot.slane %v12837_v33, 4 }
 0xb9d   : > { %v6438_v27 = vperm.slane %v12862_v32, %v14808_v47  ;;  %v6424_v29 = vrot.slane %v12859_v14, 4  ;;  %v6475_v21 = vpack.c.b16 %v6471_v18, %v6471_v18  ;;  %v6377_v18 = vsel %vm15026_vm8, 0, %v6376_v3  ;;  %vm15037_vm8 = vmmov %vm14932_vm0 }
 0xb9e   : > { %v6387_v2 = vsel %vm15025_vm12, 0, %v6386_v62  ;;  %v6357_v62 = vrot.slane %v12844_v38, 4  ;;  %v6301_v38 = vsel %vm15030_vm15, 0, %v6300_v20  ;;  %vm15036_vm12 = vmmov %vm14932_vm0 }
 0xb9f   : > { %v6454_v46 = vunpack.c.l.b16 %v6438_v27  ;;  %v6443_v0 = vrot.slane %v6438_v27, 4  ;;  %v6425_v1 = vsel %vm15023_vm9, 0, %v6424_v29  ;;  %v6473_v51 = vunpack.c.l.b16 %v6387_v2  ;;  %vm15034_vm9 = vmmov %vm14932_vm0 }
 0xba0   : > { %v6474_v55 = vunpack.c.l.b16 %v6425_v1  ;;  %vm15041_vm15 = vmmov %vm14932_vm0 }
 0xba1   : > { %v6458_v4 = vpack.c.b16 %v6454_v46, %v6454_v46  ;;  %v6444_v58 = vsel %vm15024_vm7, 0, %v6443_v0  ;;  %v6367_v46 = vrot.slane %v6362_v34, 4  ;;  %v6406_v0 = vsel %vm14932_vm0, 0, %v6405_v24  ;;  %vm15035_vm7 = vmmov %vm14932_vm0 }
 0xba2   : > { %6479 = vrot.lane.b32.xlu2 %v6475_v21, %s8978_s12  ;;  %6499 = vrot.lane.b32.xlu0 %v6495_v31, %s8979_s13  ;;  %v6494_v27 = vunpack.c.l.b16 %v6444_v58  ;;  %v6478_v29 = vpack.c.b16 %v6474_v55, %v6474_v55  ;;  %v12887_v31 = vperm.slane %v6377_v18, %v14808_v47  ;;  %v6477_v1 = vpack.c.b16 %v6473_v51, %v6473_v51 }
 0xba3   : > { %6465 = vrot.lane.b32.xlu1 %v6458_v4, %s8964_s27  ;;  %v6368_v3 = vsel %vm15027_vm4, 0, %v6367_v46  ;;  %v6493_v61 = vunpack.c.l.b16 %v6406_v0  ;;  %v6339_v34 = vsel %vm15028_vm2, 0, %v6338_v56  ;;  %v6358_v58 = vsel %vm15029_vm14, 0, %v6357_v62  ;;  %vm15038_vm4 = vmmov %vm14932_vm0 }
 0xba4   : > { %v6498_v21 = vpack.c.b16 %v6494_v27, %v6494_v27  ;;  %v6513_v4 = vunpack.c.l.b16 %v12887_v31  ;;  %v6492_v2 = vunpack.c.l.b16 %v6368_v3  ;;  %v6347_v24 = vperm.slane %v6339_v34, %v14808_v47  ;;  %vm15039_vm2 = vmmov %vm14932_vm0 }
 0xba5   : > { %v6497_v55 = vpack.c.b16 %v6493_v61, %v6493_v61  ;;  %v6366_v18 = vperm.slane %v6358_v58, %v14808_v47  ;;  %v6309_v46 = vperm.slane %v6301_v38, %v14808_v47  ;;  %v6433_v61 = vrot.slane %v12862_v32, 4  ;;  %vm15040_vm14 = vmmov %vm14932_vm0 }
 0xba6   : > { %v6517_v27 = vpack.c.b16 %v6513_v4, %v6513_v4  ;;  %v6496_v51 = vpack.c.b16 %v6492_v2, %v6492_v2  ;;  %v6512_v56 = vunpack.c.l.b16 %v6347_v24  ;;  %v6395_v2 = vrot.slane %v12818_v22, 4 }
 0xba7   : > { %v6532_v0 = vunpack.c.l.b16 %v6366_v18  ;;  %v6511_v62 = vunpack.c.l.b16 %v6309_v46  ;;  %v6312_v33 = vrot.slane %v6309_v46, 4 }
 0xba8   : > { %v6516_v20 = vpack.c.b16 %v6512_v56, %v6512_v56 }
 0xba9   : > { %v6536_v34 = vpack.c.b16 %v6532_v0, %v6532_v0  ;;  %v6313_v4 = vsel %vm15033_vm13, 0, %v6312_v33  ;;  %vm5050_vm13 = vcmask 392192  }
 0xbaa   : > { %6485 = vrot.lane.b32.xlu2 %v6478_v29, %s8978_s12  ;;  %6505 = vrot.lane.b32.xlu0 %v6498_v21, %s8979_s13  ;;  %v6414_v29 = vrot.slane %v12855_v11, 4  ;;  %v6320_v21 = vsel %vm15031_vm11, 0, %v6319_v41  ;;  %v6515_v11 = vpack.c.b16 %v6511_v62, %v6511_v62  ;;  %v6551_v41 = vunpack.c.l.b16 %v6313_v4 }
 0xbab   : > { %6483 = vrot.lane.b32.xlu1 %v6477_v1, %s8978_s12  ;;  %v6328_v3 = vperm.slane %v6320_v21, %v14808_v47  ;;  %vm15042_vm11 = vcmask 130048  }
 0xbac   : > { %v6415_v1 = vsel %vm15032_vm1, 0, %v6414_v29  ;;  %v6555_v56 = vpack.c.b16 %v6551_v41, %v6551_v41  ;;  %vm5041_vm1 = vcmask 261120  }
 0xbad   : > { %v6423_v58 = vperm.slane %v6415_v1, %v14808_v47  ;;  %v6531_v38 = vunpack.c.l.b16 %v6328_v3  ;;  %v6388_v1 = vrot.slane %v12887_v31, 4 }
 0xbaf   : > { %v6426_v32 = vrot.slane %v6423_v58, 4  ;;  %v6535_v46 = vpack.c.b16 %v6531_v38, %v6531_v38 }
 0xbb1   : > { %v6427_v22 = vsel %vm15036_vm12, 0, %v6426_v32 }
 0xbb2   : > { %6503 = vrot.lane.b32.xlu2 %v6497_v55, %s8979_s13  ;;  %6523 = vrot.lane.b32.xlu0 %v6517_v27, %s8980_s16  ;;  %v6434_v55 = vsel %vm15034_vm9, 0, %v6433_v61  ;;  %v6514_v27 = vunpack.c.l.b16 %v6423_v58  ;;  %v6554_v33 = vunpack.c.l.b16 %v6427_v22  ;;  %v6389_v58 = vsel %vm15037_vm8, 0, %v6388_v1  ;;  %vm15043_vm9 = vmmov %vm15042_vm11 }
 0xbb3   : > { %6501 = vrot.lane.b32.xlu1 %v6496_v51, %s8979_s13  ;;  %v6396_v51 = vsel %vm15035_vm7, 0, %v6395_v2  ;;  %v6442_v29 = vperm.slane %v6434_v55, %v14808_v47  ;;  %v6553_v41 = vunpack.c.l.b16 %v6389_v58  ;;  %vm5059_vm7 = vcmask 523264   ;;  %vm15044_vm12 = vmmov %vm15043_vm9 }
 0xbb4   : > { %v6518_v21 = vpack.c.b16 %v6514_v27, %v6514_v27  ;;  %v6404_v0 = vperm.slane %v6396_v51, %v14808_v47  ;;  %v6558_v4 = vpack.c.b16 %v6554_v33, %v6554_v33  ;;  %v6369_v27 = vrot.slane %v6366_v18, 4  ;;  %vm15045_vm8 = vmmov %vm15043_vm9 }
 0xbb5   : > { %v6534_v62 = vunpack.c.l.b16 %v6442_v29  ;;  %v6557_v51 = vpack.c.b16 %v6553_v41, %v6553_v41  ;;  %v6445_v33 = vrot.slane %v6442_v29, 4 }
 0xbb6   : > { %v6407_v61 = vrot.slane %v6404_v0, 4 }
 0xbb8   : > { %v6408_v38 = vsel %vm14932_vm0, 0, %v6407_v61  ;;  %vm5068_vm0 = vcmask 654336  }
 0xbb9   : > { %v6573_v31 = vunpack.c.l.b16 %v6408_v38 }
 0xbba   : > { %6521 = vrot.lane.b32.xlu2 %v6516_v20, %s8980_s16  ;;  %6541 = vrot.lane.b32.xlu0 %v6536_v34, %s8981_s29  ;;  %v6533_v20 = vunpack.c.l.b16 %v6404_v0  ;;  %v6350_v34 = vrot.slane %v6347_v24, 4  ;;  %v6331_v24 = vrot.slane %v6328_v3, 4  ;;  %v6446_v3 = vsel %vm15041_vm15, 0, %v6445_v33  ;;  %vm15047_vm15 = vmmov %vm15040_vm14 }
 0xbbb   : > { %6519 = vrot.lane.b32.xlu1 %v6515_v11, %s8980_s16  ;;  %v6538_v11 = vpack.c.b16 %v6534_v62, %v6534_v62 }
 0xbbc   : > { %v6537_v2 = vpack.c.b16 %v6533_v20, %v6533_v20  ;;  %v6351_v55 = vsel %vm15038_vm4, 0, %v6350_v34  ;;  %v6332_v22 = vsel %vm15040_vm14, 0, %v6331_v24  ;;  %v6574_v20 = vunpack.c.l.b16 %v6446_v3 }
 0xbbd   : > { %v6552_v32 = vunpack.c.l.b16 %v6351_v55  ;;  %v6571_v62 = vunpack.c.l.b16 %v6332_v22  ;;  %vm5077_vm4 = vcmask 785408  }
 0xbbe   : > { %v6578_v61 = vpack.c.b16 %v6574_v20, %v6574_v20 }
 0xbbf   : > { %v6575_v18 = vpack.c.b16 %v6571_v62, %v6571_v62 }
 0xbc2   : > { %6539 = vrot.lane.b32.xlu2 %v6535_v46, %s8981_s29  ;;  %6559 = vrot.lane.b32.xlu0 %v6555_v56, %s8982_s14  ;;  %v6577_v46 = vpack.c.b16 %v6573_v31, %v6573_v31  ;;  %v6370_v56 = vsel %vm15039_vm2, 0, %v6369_v27  ;;  %vm5086_vm2 = vcmask 916480  }
 0xbc3   : > { %6525 = vrot.lane.b32.xlu1 %v6518_v21, %s8980_s16  ;;  %v6556_v21 = vpack.c.b16 %v6552_v32, %v6552_v32  ;;  %v6572_v0 = vunpack.c.l.b16 %v6370_v56 }
 0xbc5   : > { %v6576_v1 = vpack.c.b16 %v6572_v0, %v6572_v0 }
 0xbca   : > { %6545 = vrot.lane.b32.xlu2 %v6538_v11, %s8981_s29  ;;  %6565 = vrot.lane.b32.xlu0 %v6558_v4, %s8982_s14 }
 0xbcb   : > { %6543 = vrot.lane.b32.xlu1 %v6537_v2, %s8981_s29 }
 0xbd2   : > { %6563 = vrot.lane.b32.xlu2 %v6557_v51, %s8982_s14  ;;  %6583 = vrot.lane.b32.xlu0 %v6577_v46, %s8975_s8 }
 0xbd3   : > { %6561 = vrot.lane.b32.xlu1 %v6556_v21, %s8982_s14 }
 0xbda   : > { %6581 = vrot.lane.b32.xlu2 %v6576_v1, %s8975_s8  ;;  %6649 = vrot.lane.b32.xlu0 %v12525_v52, %s8963_s10 }
 0xbdb   : > { %6579 = vrot.lane.b32.xlu1 %v6575_v18, %s8975_s8 }
 0xbe2   : > { %6647 = vrot.lane.b32.xlu2 %v12089_v57, %s8963_s10 }
 0xbe3   : > { %6585 = vrot.lane.b32.xlu1 %v6578_v61, %s8975_s8 }
 0xbea   : > { %6653 = vrot.lane.b32.xlu2 %v12567_v13, %s8963_s10 }
 0xbeb   : > { %6651 = vrot.lane.b32.xlu1 %v12533_v15, %s8963_s10 }
 0xbf4   : > { %v6462_v29 = vpop.permute.xlu2 %6461 }
 0xbf5   : > { %v6592_v56 = vsel %vm15044_vm12, %v12841_v26, %v6462_v29 }
 0xbfc   : > { %v6480_v34 = vpop.permute.xlu2 %6479 }
 0xc04   : > { %v6464_v52 = vpop.permute.xlu0 %6463  ;;  %v6486_v11 = vpop.permute.xlu2 %6485 }
 0xc05   : > { %v6595_v24 = vsel %vm15043_vm9, %v12868_v37, %v6464_v52 }
 0xc0c   : > { %v6504_v4 = vpop.permute.xlu2 %6503  ;;  %v6482_v58 = vpop.permute.xlu0 %6481 }
 0xc0d   : > { %v6460_v2 = vpop.permute.xlu1 %6459  ;;  %v6602_v22 = vsel %vm5041_vm1, %v6592_v56, %v6482_v58 }
 0xc0e   : > { %v6589_v37 = vsel %vm15045_vm8, %v12834_v5, %v6460_v2 }
 0xc0f   : > { %v6600_v3 = vsel %vm5041_vm1, %v6589_v37, %v6480_v34 }
 0xc14   : > { %v6522_v38 = vpop.permute.xlu2 %6521  ;;  %v6500_v55 = vpop.permute.xlu0 %6499 }
 0xc15   : > { %v6466_v41 = vpop.permute.xlu1 %6465  ;;  %v6608_v20 = vsel %vm5050_vm13, %v6600_v3, %v6500_v55 }
 0xc16   : > { %v6598_v57 = vsel %vm15042_vm11, %v12859_v14, %v6466_v41  ;;  %vm15048_vm11 = vmmov %vm15040_vm14 }
 0xc17   : > { %v6606_v27 = vsel %vm5041_vm1, %v6598_v57, %v6486_v11  ;;  %vm15049_vm9 = vmmov %vm15048_vm11 }
 0xc18   : > { %vm15050_vm12 = vmmov %vm15049_vm9 }
 0xc19   : > { %vm15051_vm8 = vmmov %vm15049_vm9 }
 0xc1c   : > { %v6540_v31 = vpop.permute.xlu2 %6539  ;;  %v6506_v13 = vpop.permute.xlu0 %6505 }
 0xc1d   : > { %v6614_v15 = vsel %vm5050_vm13, %v6606_v27, %v6506_v13  ;;  %v6484_v32 = vpop.permute.xlu1 %6483 }
 0xc1e   : > { %v6604_v51 = vsel %vm5041_vm1, %v6595_v24, %v6484_v32 }
 0xc1f   : > { %v6612_v21 = vsel %vm5050_vm13, %v6604_v51, %v6504_v4 }
 0xc24   : > { %v6546_v46 = vpop.permute.xlu2 %6545  ;;  %v6524_v14 = vpop.permute.xlu0 %6523 }
 0xc25   : > { %v6620_v0 = vsel %vm5059_vm7, %v6612_v21, %v6524_v14  ;;  %v6502_v62 = vpop.permute.xlu1 %6501 }
 0xc26   : > { %v6610_v33 = vsel %vm5050_vm13, %v6602_v22, %v6502_v62 }
 0xc27   : > { %v6618_v1 = vsel %vm5059_vm7, %v6610_v33, %v6522_v38 }
 0xc2c   : > { %v6564_v18 = vpop.permute.xlu2 %6563  ;;  %v6542_v26 = vpop.permute.xlu0 %6541 }
 0xc2d   : > { %v6626_v61 = vsel %vm5068_vm0, %v6618_v1, %v6542_v26  ;;  %v6520_v29 = vpop.permute.xlu1 %6519 }
 0xc2e   : > { %v6616_v52 = vsel %vm5059_vm7, %v6608_v20, %v6520_v29 }
 0xc2f   : > { %v6624_v11 = vsel %vm5068_vm0, %v6616_v52, %v6540_v31 }
 0xc34   : > { %v6582_v4 = vpop.permute.xlu2 %6581  ;;  %v6560_v58 = vpop.permute.xlu0 %6559 }
 0xc35   : > { %v6632_v38 = vsel %vm5077_vm4, %v6624_v11, %v6560_v58  ;;  %v6526_v5 = vpop.permute.xlu1 %6525 }
 0xc36   : > { %v6622_v2 = vsel %vm5059_vm7, %v6614_v15, %v6526_v5 }
 0xc37   : > { %v6630_v34 = vsel %vm5068_vm0, %v6622_v2, %v6546_v46 }
 0xc3c   : > { %v6648_v41 = vpop.permute.xlu2 %6647  ;;  %v6566_v55 = vpop.permute.xlu0 %6565 }
 0xc3d   : > { %v6657_v57 = vshrl.u32 %v6648_v41, 16  ;;  %v6638_v13 = vsel %vm5077_vm4, %v6630_v34, %v6566_v55  ;;  %v6544_v27 = vpop.permute.xlu1 %6543 }
 0xc3e   : > { %v6628_v24 = vsel %vm5068_vm0, %v6620_v0, %v6544_v27 }
 0xc3f   : > { %v6658_v32 = vpack.i.b16 0, %v6657_v57  ;;  %v6636_v31 = vsel %vm5077_vm4, %v6628_v24, %v6564_v18  ;;  %v6656_v18 = vpack.i.b16 0, %v6648_v41 }
 0xc41   : > { %v12977_v51 = vperm.slane %v6658_v32, %v14805_v30  ;;  %v13000_v20 = vperm.slane %v6656_v18, %v14805_v30 }
 0xc43   : > { %v12981_v56 = vperm.slane %v12977_v51, %v14808_v47  ;;  %v13008_v2 = vperm.slane %v13000_v20, %v14808_v47 }
 0xc44   : > { %v6654_v15 = vpop.permute.xlu2 %6653  ;;  %v6584_v14 = vpop.permute.xlu0 %6583 }
 0xc45   : > { %v6669_v46 = vshrl.u32 %v6654_v15, 16  ;;  %v12984_v21 = vsel %vm5086_vm2, %v6636_v31, %v6584_v14  ;;  %v6562_v22 = vpop.permute.xlu1 %6561  ;;  %v6827_v62 = vunpack.c.l.b16 %v12981_v56  ;;  %v6668_v34 = vpack.i.b16 0, %v6654_v15 }
 0xc46   : > { %v6634_v33 = vsel %vm5077_vm4, %v6626_v61, %v6562_v22  ;;  %v6686_v55 = vrot.slane %v13008_v2, 4 }
 0xc47   : > { %v6670_v0 = vpack.i.b16 0, %v6669_v46  ;;  %v12989_v1 = vsel %vm5086_vm2, %v6634_v33, %v6582_v4  ;;  %v6831_v37 = vpack.c.b16 %v6827_v62, %v6827_v62 }
 0xc48   : > { %v6687_v46 = vsel %vm15040_vm14, 0, %v6686_v55  ;;  %vm15052_vm14 = vmmov %vm15051_vm8 }
 0xc49   : > { %v12992_v3 = vperm.slane %v6670_v0, %v14805_v30  ;;  %6835 = vrot.lane.b32.xlu0 %v6831_v37, %s8964_s27  ;;  %v6847_v22 = vunpack.c.l.b16 %v6687_v46 }
 0xc4b   : > { %v12997_v26 = vperm.slane %v12992_v3, %v14808_v47 }
 0xc4c   : > { %v6650_v29 = vpop.permute.xlu0 %6649 }
 0xc4d   : > { %v6830_v61 = vunpack.c.l.b16 %v12997_v26  ;;  %v6661_v52 = vshrl.u32 %v6650_v29, 16  ;;  %v6580_v11 = vpop.permute.xlu1 %6579  ;;  %v6660_v14 = vpack.i.b16 0, %v6650_v29 }
 0xc4e   : > { %v13004_v4 = vsel %vm5086_vm2, %v6632_v38, %v6580_v11  ;;  %v13018_v38 = vperm.slane %v6668_v34, %v14805_v30 }
 0xc4f   : > { %v6834_v58 = vpack.c.b16 %v6830_v61, %v6830_v61  ;;  %v6662_v5 = vpack.i.b16 0, %v6661_v52  ;;  %v6713_v0 = vperm.slane %v6660_v14, %v14805_v30 }
 0xc50   : > { %v13025_v15 = vperm.slane %v13018_v38, %v14808_v47 }
 0xc51   : > { %v13011_v41 = vperm.slane %v6662_v5, %v14805_v30  ;;  %6841 = vrot.lane.b32.xlu0 %v6834_v58, %s8964_s27  ;;  %v13036_v58 = vperm.slane %v6713_v0, %v14808_v47 }
 0xc52   : > { %v6800_v62 = vrot.slane %v13025_v15, 4 }
 0xc53   : > { %v6738_v57 = vperm.slane %v13011_v41, %v14808_v47 }
 0xc54   : > { %v6801_v11 = vsel %vm15047_vm15, 0, %v6800_v62  ;;  %vm15053_vm15 = vmmov %vm15051_vm8 }
 0xc55   : > { %v6586_v27 = vpop.permute.xlu1 %6585  ;;  %v6828_v32 = vunpack.c.l.b16 %v6738_v57  ;;  %v6850_v34 = vunpack.c.l.b16 %v6801_v11 }
 0xc56   : > { %v13021_v24 = vsel %vm5086_vm2, %v6638_v13, %v6586_v27  ;;  %v6851_v13 = vpack.c.b16 %v6847_v22, %v6847_v22 }
 0xc57   : > { %15046 = vst [vmem:[#allocation128_spill] sm:$0xff] %v13021_v24  ;;  %v6832_v31 = vpack.c.b16 %v6828_v32, %v6828_v32  ;;  %v6724_v32 = vrot.slane %v13036_v58, 4  ;;  %v6854_v62 = vpack.c.b16 %v6850_v34, %v6850_v34  ;;  %v6676_v24 = vrot.slane %v13000_v20, 4 }
 0xc58   : > { %v6695_v20 = vrot.slane %v12977_v51, 4  ;;  %v6819_v51 = vrot.slane %v12997_v26, 4 }
 0xc59   : > { %6837 = vrot.lane.b32.xlu1 %v6832_v31, %s8964_s27  ;;  %v6743_v31 = vrot.slane %v6738_v57, 4  ;;  %v6725_v11 = vsel %vm15050_vm12, 0, %v6724_v32  ;;  %vm15056_vm12 = vmmov %vm15051_vm8 }
 0xc5a   : > { %v6820_v26 = vsel %vm15051_vm8, 0, %v6819_v51 }
 0xc5b   : > { %v6744_v57 = vsel %vm15051_vm8, 0, %v6743_v31 }
 0xc5d   : > { %v6652_v33 = vpop.permute.xlu1 %6651 }
 0xc5e   : > { %v6664_v37 = vpack.i.b16 0, %v6652_v33  ;;  %v6665_v18 = vshrl.u32 %v6652_v33, 16 }
 0xc60   : > { %v6666_v61 = vpack.i.b16 0, %v6665_v18  ;;  %v13032_v52 = vperm.slane %v6664_v37, %v14805_v30  ;;  %v6714_v37 = vrot.slane %v6713_v0, 4  ;;  %v6848_v0 = vunpack.c.l.b16 %v6725_v11 }
 0xc61   : > { %6855 = vrot.lane.b32.xlu1 %v6851_v13, %s8978_s12 }
 0xc62   : > { %v13041_v29 = vperm.slane %v13032_v52, %v14808_v47  ;;  %v6770_v5 = vperm.slane %v6666_v61, %v14805_v30  ;;  %v6715_v34 = vsel %vm15052_vm14, 0, %v6714_v37  ;;  %vm15057_vm14 = vmmov %vm15051_vm8 }
 0xc64   : > { %v6762_v55 = vrot.slane %v13041_v29, 4  ;;  %v6776_v27 = vperm.slane %v6770_v5, %v14808_v47 }
 0xc66   : > { %v6781_v46 = vrot.slane %v6776_v27, 4  ;;  %v6829_v14 = vunpack.c.l.b16 %v6776_v27  ;;  %v6763_v22 = vsel %vm15048_vm11, 0, %v6762_v55  ;;  %v6705_v27 = vrot.slane %v12981_v56, 4  ;;  %vm15054_vm11 = vmmov %vm15051_vm8 }
 0xc67   : > { %v6849_v33 = vunpack.c.l.b16 %v6763_v22  ;;  %v6723_v22 = vperm.slane %v6715_v34, %v14808_v47  ;;  %v6809_v34 = vrot.slane %v12992_v3, 4  ;;  %v6870_v3 = vunpack.c.l.b16 %v6820_v26 }
 0xc68   : > { %v6833_v18 = vpack.c.b16 %v6829_v14, %v6829_v14  ;;  %v6782_v13 = vsel %vm15049_vm9, 0, %v6781_v46  ;;  %v6868_v46 = vunpack.c.l.b16 %v6744_v57  ;;  %v6677_v14 = vsel %vm15053_vm15, 0, %v6676_v24  ;;  %vm15055_vm9 = vmmov %vm15051_vm8 }
 0xc69   : > { %6861 = vrot.lane.b32.xlu1 %v6854_v62, %s8978_s12  ;;  %v6853_v61 = vpack.c.b16 %v6849_v33, %v6849_v33  ;;  %v6869_v55 = vunpack.c.l.b16 %v6782_v13  ;;  %v6852_v62 = vpack.c.b16 %v6848_v0, %v6848_v0  ;;  %v13061_v33 = vperm.slane %v6677_v14, %v14808_v47  ;;  %vm15058_vm15 = vmmov %vm15051_vm8 }
 0xc6a   : > { %6839 = vrot.lane.b32.xlu2 %v6833_v18, %s8964_s27  ;;  %v6872_v31 = vpack.c.b16 %v6868_v46, %v6868_v46  ;;  %v6706_v37 = vsel %vm15054_vm11, 0, %v6705_v27  ;;  %v6790_v18 = vrot.slane %v13018_v38, 4  ;;  %v6888_v56 = vunpack.c.l.b16 %v6723_v22  ;;  %vm15059_vm11 = vmmov %vm15051_vm8 }
 0xc6b   : > { %6859 = vrot.lane.b32.xlu0 %v6853_v61, %s8978_s12  ;;  %v6873_v32 = vpack.c.b16 %v6869_v55, %v6869_v55  ;;  %v6696_v24 = vsel %vm15055_vm9, 0, %v6695_v20  ;;  %v6867_v13 = vunpack.c.l.b16 %v6706_v37  ;;  %v6887_v61 = vunpack.c.l.b16 %v13061_v33  ;;  %vm15060_vm9 = vmmov %vm15051_vm8 }
 0xc6c   : > { %v6791_v11 = vsel %vm15056_vm12, 0, %v6790_v18  ;;  %v6704_v57 = vperm.slane %v6696_v24, %v14808_v47  ;;  %v6892_v55 = vpack.c.b16 %v6888_v56, %v6888_v56  ;;  %v6752_v27 = vrot.slane %v13032_v52, 4  ;;  %vm15062_vm12 = vmmov %vm15051_vm8 }
 0xc6d   : > { %v6871_v38 = vpack.c.b16 %v6867_v13, %v6867_v13  ;;  %v13075_v0 = vperm.slane %v6791_v11, %v14808_v47  ;;  %v6891_v46 = vpack.c.b16 %v6887_v61, %v6887_v61  ;;  %v6771_v14 = vrot.slane %v6770_v5, 4 }
 0xc6e   : > { %v6810_v20 = vsel %vm15057_vm14, 0, %v6809_v34  ;;  %v6874_v5 = vpack.c.b16 %v6870_v3, %v6870_v3  ;;  %v6733_v24 = vrot.slane %v13011_v41, 4  ;;  %v8620_v11 = vrot.slane %v11952_v60, 9  ;;  %vm15063_vm14 = vmmov %vm15051_vm8 }
 0xc6f   : > { %v6772_v52 = vsel %vm15059_vm11, 0, %v6771_v14  ;;  %v6818_v37 = vperm.slane %v6810_v20, %v14808_v47  ;;  %v7029_v41 = vrot.slane %v12064_v28, 5  ;;  %vm15065_vm11 = vmmov %vm15051_vm8 }
 0xc70   : > { %v13090_v13 = vperm.slane %v6772_v52, %v14808_v47 }
 0xc71   : > { %6879 = vrot.lane.b32.xlu1 %v6873_v32, %s8979_s13  ;;  %v6907_v32 = vunpack.c.l.b16 %v6704_v57  ;;  %v6910_v61 = vunpack.c.l.b16 %v6818_v37 }
 0xc72   : > { %6857 = vrot.lane.b32.xlu2 %v6852_v62, %s8978_s12  ;;  %v6753_v62 = vsel %vm15058_vm15, 0, %v6752_v27  ;;  %v6909_v27 = vunpack.c.l.b16 %v13090_v13  ;;  %vm15064_vm15 = vmmov %vm15051_vm8 }
 0xc73   : > { %6877 = vrot.lane.b32.xlu0 %v6872_v31, %s8979_s13  ;;  %v6890_v31 = vunpack.c.l.b16 %v13075_v0  ;;  %v6911_v18 = vpack.c.b16 %v6907_v32, %v6907_v32  ;;  %v6761_v56 = vperm.slane %v6753_v62, %v14808_v47  ;;  %v6914_v26 = vpack.c.b16 %v6910_v61, %v6910_v61 }
 0xc74   : > { %v13101_v32 = vsel %vm10620_vm6, %v8620_v11, %v7029_v41  ;;  %v6913_v60 = vpack.c.b16 %v6909_v27, %v6909_v27 }
 0xc75   : > { %v6894_v51 = vpack.c.b16 %v6890_v31, %v6890_v31  ;;  %v6764_v34 = vrot.slane %v6761_v56, 4 }
 0xc77   : > { %v6765_v62 = vsel %vm15062_vm12, 0, %v6764_v34  ;;  %vm15067_vm12 = vmmov %vm15051_vm8 }
 0xc78   : > { %v6929_v28 = vunpack.c.l.b16 %v6765_v62 }
 0xc79   : > { %6897 = vrot.lane.b32.xlu1 %v6892_v55, %s8980_s16  ;;  %v6889_v55 = vunpack.c.l.b16 %v6761_v56 }
 0xc7a   : > { %6875 = vrot.lane.b32.xlu2 %v6871_v38, %s8979_s13  ;;  %v6734_v38 = vsel %vm15060_vm9, 0, %v6733_v24  ;;  %v6707_v24 = vrot.slane %v6704_v57, 4  ;;  %vm15066_vm9 = vmmov %vm15051_vm8 }
 0xc7b   : > { %6895 = vrot.lane.b32.xlu0 %v6891_v46, %s8980_s16  ;;  %v6726_v46 = vrot.slane %v6723_v22, 4  ;;  %v6742_v20 = vperm.slane %v6734_v38, %v14808_v47  ;;  %v6893_v3 = vpack.c.b16 %v6889_v55, %v6889_v55  ;;  %v7045_v22 = vshrl.u32 %v13101_v32, 16 }
 0xc7c   : > { %v6708_v27 = vsel %vm15065_vm11, 0, %v6707_v24 }
 0xc7d   : > { %v6727_v31 = vsel %vm15051_vm8, 0, %v6726_v46  ;;  %v6908_v52 = vunpack.c.l.b16 %v6742_v20  ;;  %v7046_v61 = vpack.i.b16 0, %v7045_v22  ;;  %v6947_v46 = vunpack.c.l.b16 %v6708_v27 }
 0xc7e   : > { %v6928_v56 = vunpack.c.l.b16 %v6727_v31  ;;  %v8623_v27 = vrot.slane %v11963_v12, 9 }
 0xc7f   : > { %v6912_v11 = vpack.c.b16 %v6908_v52, %v6908_v52  ;;  %v6951_v31 = vpack.c.b16 %v6947_v46, %v6947_v46  ;;  %v7033_v52 = vrot.slane %v12501_v44, 5 }
 0xc80   : > { %v6932_v34 = vpack.c.b16 %v6928_v56, %v6928_v56  ;;  %v6783_v56 = vrot.slane %v13090_v13, 4  ;;  %v7041_v13 = vrot.slane %v12527_v48, 5  ;;  %v8622_v48 = vrot.slane %v11948_v8, 9 }
 0xc81   : > { %6915 = vrot.lane.b32.xlu1 %v6911_v18, %s8981_s29  ;;  %v6745_v18 = vrot.slane %v6742_v20, 4  ;;  %v6821_v20 = vrot.slane %v6818_v37, 4 }
 0xc82   : > { %6881 = vrot.lane.b32.xlu2 %v6874_v5, %s8979_s13  ;;  %v6688_v5 = vrot.slane %v13061_v33, 4  ;;  %v13118_v33 = vperm.slane %v7046_v61, %v14805_v30 }
 0xc83   : > { %6901 = vrot.lane.b32.xlu0 %v6894_v51, %s8980_s16  ;;  %v6933_v51 = vpack.c.b16 %v6929_v28, %v6929_v28  ;;  %v6746_v55 = vsel %vm15063_vm14, 0, %v6745_v18  ;;  %v6822_v22 = vsel %vm15067_vm12, 0, %v6821_v20  ;;  %vm15073_vm12 = vcmask 130048  }
 0xc84   : > { %v6689_v38 = vsel %vm15064_vm15, 0, %v6688_v5  ;;  %v6948_v41 = vunpack.c.l.b16 %v6746_v55  ;;  %v13123_v62 = vperm.slane %v13118_v33, %v14808_v47  ;;  %v6950_v18 = vunpack.c.l.b16 %v6822_v22 }
 0xc85   : > { %v6927_v57 = vunpack.c.l.b16 %v6689_v38  ;;  %v8621_v5 = vrot.slane %v11954_v39, 9  ;;  %v6784_v55 = vsel %vm15051_vm8, 0, %v6783_v56 }
 0xc87   : > { %v7034_v61 = vsel %vm10620_vm6, %v8621_v5, %v7033_v52 }
 0xc88   : > { %v7049_v44 = vshrl.u32 %v7034_v61, 16 }
 0xc89   : > { %6921 = vrot.lane.b32.xlu1 %v6914_v26, %s8981_s29  ;;  %v6802_v26 = vrot.slane %v13075_v0, 4  ;;  %v7215_v0 = vunpack.c.l.b16 %v13123_v62 }
 0xc8a   : > { %6899 = vrot.lane.b32.xlu2 %v6893_v3, %s8980_s16  ;;  %v6952_v3 = vpack.c.b16 %v6948_v41, %v6948_v41  ;;  %v7050_v38 = vpack.i.b16 0, %v7049_v44  ;;  %v7044_v41 = vpack.i.b16 0, %v13101_v32 }
 0xc8b   : > { %6919 = vrot.lane.b32.xlu0 %v6913_v60, %s8981_s29  ;;  %v6931_v60 = vpack.c.b16 %v6927_v57, %v6927_v57  ;;  %v6803_v28 = vsel %vm15066_vm9, 0, %v6802_v26  ;;  %v7219_v24 = vpack.c.b16 %v7215_v0, %v7215_v0  ;;  %v7042_v57 = vsel %vm10620_vm6, %v8623_v27, %v7041_v13 }
 0xc8c   : > { %v6930_v37 = vunpack.c.l.b16 %v6803_v28  ;;  %v13148_v46 = vperm.slane %v7050_v38, %v14805_v30  ;;  %v7037_v26 = vrot.slane %v12504_v42, 5  ;;  %v13155_v12 = vperm.slane %v7044_v41, %v14805_v30 }
 0xc8d   : > { %v7057_v20 = vshrl.u32 %v7042_v57, 16 }
 0xc8e   : > { %v13163_v28 = vperm.slane %v13155_v12, %v14808_v47 }
 0xc8f   : > { %v7058_v8 = vpack.i.b16 0, %v7057_v20 }
 0xc91   : > { %6939 = vrot.lane.b32.xlu1 %v6933_v51, %s8982_s14  ;;  %v6934_v51 = vpack.c.b16 %v6930_v37, %v6930_v37  ;;  %v7074_v37 = vrot.slane %v13163_v28, 4  ;;  %v13173_v52 = vperm.slane %v7058_v8, %v14805_v30 }
 0xc92   : > { %6917 = vrot.lane.b32.xlu2 %v6912_v11, %s8981_s29  ;;  %v6954_v11 = vpack.c.b16 %v6950_v18, %v6950_v18 }
 0xc93   : > { %6937 = vrot.lane.b32.xlu0 %v6932_v34, %s8982_s14  ;;  %v6949_v34 = vunpack.c.l.b16 %v6784_v55  ;;  %v13186_v55 = vperm.slane %v13173_v52, %v14808_v47 }
 0xc95   : > { %v6953_v39 = vpack.c.b16 %v6949_v34, %v6949_v34 }
 0xc99   : > { %6957 = vrot.lane.b32.xlu1 %v6952_v3, %s8975_s8  ;;  %v7038_v3 = vsel %vm10620_vm6, %v8622_v48, %v7037_v26  ;;  %vm15068_vm6 = vmmov %vm15051_vm8 }
 0xc9a   : > { %6935 = vrot.lane.b32.xlu2 %v6931_v60, %s8982_s14  ;;  %v7126_v60 = vperm.slane %v13148_v46, %v14808_v47  ;;  %v7052_v22 = vpack.i.b16 0, %v7038_v3  ;;  %v7053_v0 = vshrl.u32 %v7038_v3, 16  ;;  %vm15069_vm14 = vmmov %vm15068_vm6 }
 0xc9b   : > { %6955 = vrot.lane.b32.xlu0 %v6951_v31, %s8975_s8  ;;  %v7056_v31 = vpack.i.b16 0, %v7042_v57  ;;  %vm15070_vm15 = vmmov %vm15068_vm6 }
 0xc9c   : > { %v7216_v42 = vunpack.c.l.b16 %v7126_v60  ;;  %v13176_v18 = vperm.slane %v7052_v22, %v14805_v30  ;;  %v7054_v5 = vpack.i.b16 0, %v7053_v0  ;;  %vm15071_vm11 = vmmov %vm15068_vm6 }
 0xc9d   : > { %v13169_v14 = vperm.slane %v7056_v31, %v14805_v30  ;;  %vm15072_vm9 = vmmov %vm15068_vm6 }
 0xc9e   : > { %v7220_v56 = vpack.c.b16 %v7216_v42, %v7216_v42  ;;  %v13190_v44 = vperm.slane %v13176_v18, %v14808_v47  ;;  %v13196_v13 = vperm.slane %v7054_v5, %v14805_v30  ;;  %vm15074_vm8 = vmmov %vm15068_vm6 }
 0xca0   : > { %v7150_v27 = vrot.slane %v13190_v44, 4 }
 0xca1   : > { %7223 = vrot.lane.b32.xlu1 %v7219_v24, %s8964_s27  ;;  %v13180_v24 = vperm.slane %v13169_v14, %v14808_v47 }
 0xca2   : > { %6941 = vrot.lane.b32.xlu2 %v6934_v51, %s8982_s14  ;;  %v7075_v51 = vsel %vm15068_vm6, 0, %v7074_v37  ;;  %v7131_v37 = vrot.slane %v7126_v60, 4  ;;  %vm15075_vm6 = vmmov %vm15073_vm12 }
 0xca3   : > { %6961 = vrot.lane.b32.xlu0 %v6954_v11, %s8975_s8  ;;  %v7048_v11 = vpack.i.b16 0, %v7034_v61  ;;  %v7235_v34 = vunpack.c.l.b16 %v7075_v51 }
 0xca5   : > { %v13200_v38 = vperm.slane %v7048_v11, %v14805_v30  ;;  %v7239_v41 = vpack.c.b16 %v7235_v34, %v7235_v34 }
 0xca7   : > { %v13211_v26 = vperm.slane %v13200_v38, %v14808_v47 }
 0xca9   : > { %7789 = vrot.lane.b32.xlu1 %v7034_v61, %s8963_s10  ;;  %v7112_v0 = vrot.slane %v13211_v26, 4 }
 0xcaa   : > { %6959 = vrot.lane.b32.xlu2 %v6953_v39, %s8975_s8  ;;  %v7218_v39 = vunpack.c.l.b16 %v13186_v55 }
 0xcab   : > { %7411 = vrot.lane.b32.xlu0 %v13101_v32, %s8966_s17  ;;  %v7113_v11 = vsel %vm15071_vm11, 0, %v7112_v0  ;;  %vm15078_vm11 = vmmov %vm15075_vm6 }
 0xcac   : > { %v7222_v20 = vpack.c.b16 %v7218_v39, %v7218_v39  ;;  %v7236_v60 = vunpack.c.l.b16 %v7113_v11 }
 0xcb1   : > { %7415 = vrot.lane.b32.xlu1 %v7038_v3, %s8966_s17 }
 0xcb2   : > { %7413 = vrot.lane.b32.xlu2 %v7034_v61, %s8966_s17  ;;  %v7188_v61 = vrot.slane %v13180_v24, 4 }
 0xcb3   : > { %7417 = vrot.lane.b32.xlu0 %v7042_v57, %s8966_s17 }
 0xcb4   : > { %v7189_v48 = vsel %vm15069_vm14, 0, %v7188_v61  ;;  %vm15076_vm14 = vmmov %vm15075_vm6 }
 0xcb5   : > { %v7238_v31 = vunpack.c.l.b16 %v7189_v48 }
 0xcb9   : > { %7225 = vrot.lane.b32.xlu1 %v7220_v56, %s8964_s27  ;;  %v7242_v56 = vpack.c.b16 %v7238_v31, %v7238_v31 }
 0xcba   : > { %7787 = vrot.lane.b32.xlu2 %v13101_v32, %s8963_s10  ;;  %v13207_v32 = vperm.slane %v13196_v13, %v14808_v47 }
 0xcbb   : > { %7791 = vrot.lane.b32.xlu0 %v7038_v3, %s8963_s10  ;;  %v7151_v3 = vsel %vm15070_vm15, 0, %v7150_v27  ;;  %v6836_v34 = vpop.permute.xlu0 %6835  ;;  %vm15077_vm15 = vmmov %vm15075_vm6 }
 0xcbc   : > { %v7217_v22 = vunpack.c.l.b16 %v13207_v32  ;;  %v7237_v42 = vunpack.c.l.b16 %v7151_v3  ;;  %v7240_v3 = vpack.c.b16 %v7236_v60, %v7236_v60 }
 0xcbe   : > { %v7221_v5 = vpack.c.b16 %v7217_v22, %v7217_v22  ;;  %v7241_v51 = vpack.c.b16 %v7237_v42, %v7237_v42  ;;  %v6965_v42 = vsel %vm15075_vm6, %v13008_v2, %v6836_v34 }
 0xcc1   : > { %7243 = vrot.lane.b32.xlu1 %v7239_v41, %s8978_s12 }
 0xcc2   : > { %7793 = vrot.lane.b32.xlu2 %v7042_v57, %s8963_s10  ;;  %v7132_v57 = vsel %vm15072_vm9, 0, %v7131_v37  ;;  %vm15079_vm9 = vmmov %vm15075_vm6 }
 0xcc3   : > { %7229 = vrot.lane.b32.xlu0 %v7222_v20, %s8964_s27  ;;  %v7256_v48 = vunpack.c.l.b16 %v7132_v57  ;;  %v7093_v20 = vrot.slane %v13123_v62, 4 }
 0xcc4   : > { %v6840_v8 = vpop.permute.xlu2 %6839 }
 0xcc5   : > { %v7260_v31 = vpack.c.b16 %v7256_v48, %v7256_v48  ;;  %v7094_v22 = vsel %vm15074_vm8, 0, %v7093_v20  ;;  %v6971_v34 = vsel %vm15077_vm15, %v13041_v29, %v6840_v8  ;;  %v5037_v29 = vsel %vm15078_vm11, %v12039_v10, %v12134_v54  ;;  %vm15081_vm8 = vmmov %vm15075_vm6 }
 0xcc6   : > { %v5034_v8 = vsel %vm15079_vm9, %v11992_v59, %v12142_v6  ;;  %v5040_v10 = vsel %vm15081_vm8, %v12032_v23, %v12150_v9  ;;  %vm15094_vm15 = vmmov %vm15075_vm6 }
 0xcc7   : > { %v5045_v59 = vsel %vm5041_vm1, %v5034_v8, %v12136_v49  ;;  %v5049_v54 = vsel %vm5041_vm1, %v5040_v10, %v12154_v35  ;;  %v15099_v10 = vld [vmem:[#allocation33_spill] sm:$0xff]  ;;  %vm15104_vm11 = vmmov %vm15075_vm6 }
 0xcc8   : > { %vm15112_vm9 = vmmov %vm15075_vm6 }
 0xcc9   : > { %7249 = vrot.lane.b32.xlu1 %v7242_v56, %s8978_s12  ;;  %v7255_v56 = vunpack.c.l.b16 %v7094_v22  ;;  %vm15136_vm8 = vmmov %vm15075_vm6 }
 0xcca   : > { %7227 = vrot.lane.b32.xlu2 %v7221_v5, %s8964_s27  ;;  %v6842_v5 = vpop.permute.xlu0 %6841 }
 0xccb   : > { %v6838_v61 = vpop.permute.xlu1 %6837  ;;  %7247 = vrot.lane.b32.xlu0 %v7241_v51, %s8978_s12  ;;  %v7259_v62 = vpack.c.b16 %v7255_v56, %v7255_v56  ;;  %v6974_v11 = vsel %vm15076_vm14, %v13025_v15, %v6842_v5  ;;  %v15084_v56 = vld [vmem:[#allocation103_spill] sm:$0xff]  ;;  %v15085_v5 = vld [vmem:[#allocation62_spill] sm:$0xff]  ;;  %vm15090_vm14 = vmmov %vm15075_vm6 }
 0xccc   : > { %v6968_v39 = vsel %vm15073_vm12, %v13036_v58, %v6838_v61  ;;  %v6858_v27 = vpop.permute.xlu2 %6857  ;;  %vm15080_vm12 = vmmov %vm15075_vm6 }
 0xccd   : > { %v6978_v41 = vsel %vm5041_vm1, %v6968_v39, %v6858_v27 }
 0xcd2   : > { %7245 = vrot.lane.b32.xlu2 %v7240_v3, %s8978_s12 }
 0xcd3   : > { %v6856_v0 = vpop.permute.xlu1 %6855  ;;  %7265 = vrot.lane.b32.xlu0 %v7260_v31, %s8979_s13 }
 0xcd4   : > { %v6976_v58 = vsel %vm5041_vm1, %v6965_v42, %v6856_v0  ;;  %v6876_v37 = vpop.permute.xlu2 %6875  ;;  %v5031_v42 = vsel %vm15080_vm12, %v12006_v63, %v12144_v40  ;;  %v5054_v63 = vsel %vm5050_vm13, %v5045_v59, %v12162_v16  ;;  %v15083_v16 = vld [vmem:[#allocation67_spill] sm:$0xff]  ;;  %vm15122_vm12 = vmmov %vm15075_vm6 }
 0xcd5   : > { %v6984_v51 = vsel %vm5050_vm13, %v6976_v58, %v6876_v37  ;;  %v5043_v0 = vsel %vm5041_vm1, %v5031_v42, %v12148_v7  ;;  %v5047_v58 = vsel %vm5041_vm1, %v5037_v29, %v12156_v19  ;;  %v5063_v7 = vsel %vm5059_vm7, %v5054_v63, %v12166_v43  ;;  %v15096_v29 = vld [vmem:[#allocation61_spill] sm:$0xff]  ;;  %v15097_v42 = vld [vmem:[#allocation66_spill] sm:$0xff] }
 0xcd6   : > { %v5052_v6 = vsel %vm5050_vm13, %v5043_v0, %v12138_v50  ;;  %v15082_v50 = vld [vmem:[#allocation34_spill] sm:$0xff] }
 0xcd7   : > { %v5061_v19 = vsel %vm5059_vm7, %v5052_v6, %v12168_v45  ;;  %v5427_v37 = vsel %vm15075_vm6, %v15083_v16, %v15082_v50  ;;  %v15101_v6 = vld [vmem:[#allocation31_spill] sm:$0xff]  ;;  %v15107_v50 = vld [vmem:[#allocation29_spill] sm:$0xff] }
 0xcd8   : > { %v5070_v35 = vsel %vm5068_vm0, %v5061_v19, %v12172_v17  ;;  %v15086_v17 = vld [vmem:[#allocation96_spill] sm:$0xff] }
 0xcd9   : > { %v15103_v19 = vld [vmem:[#allocation28_spill] sm:$0xff] }
 0xcda   : > { %7263 = vrot.lane.b32.xlu2 %v7259_v62, %s8979_s13 }
 0xcdb   : > { %v6862_v57 = vpop.permute.xlu1 %6861 }
 0xcdc   : > { %v6982_v61 = vsel %vm5041_vm1, %v6974_v11, %v6862_v57  ;;  %v6882_v2 = vpop.permute.xlu2 %6881 }
 0xcdd   : > { %v13242_v39 = vsel %vm5050_vm13, %v6982_v61, %v6882_v2  ;;  %v6860_v27 = vpop.permute.xlu0 %6859  ;;  %v15088_v2 = vld [vmem:[#allocation38_spill] sm:$0xff] }
 0xcde   : > { %v6980_v60 = vsel %vm5041_vm1, %v6971_v34, %v6860_v27  ;;  %v15089_v34 = vld [vmem:[#allocation24_spill] sm:$0xff] }
 0xcdf   : > { %v5424_v27 = vsel %vm15090_vm14, %v15089_v34, %v15088_v2  ;;  %v15114_v2 = vld [vmem:[#allocation68_spill] sm:$0xff]  ;;  %vm15144_vm14 = vmmov %vm15075_vm6 }
 0xce0   : > { %v5434_v8 = vsel %vm5041_vm1, %v5424_v27, %v15096_v29  ;;  %v15115_v27 = vld [vmem:[#allocation57_spill] sm:$0xff] }
 0xce3   : > { %v6880_v48 = vpop.permute.xlu1 %6879 }
 0xce4   : > { %v6988_v20 = vsel %vm5050_vm13, %v6980_v60, %v6880_v48  ;;  %v6900_v3 = vpop.permute.xlu2 %6899  ;;  %v15091_v60 = vld [vmem:[#allocation81_spill] sm:$0xff] }
 0xce5   : > { %v13247_v31 = vsel %vm5059_vm7, %v6988_v20, %v6900_v3  ;;  %v6878_v15 = vpop.permute.xlu0 %6877  ;;  %v5079_v48 = vsel %vm5077_vm4, %v5070_v35, %v15091_v60  ;;  %v15092_v20 = vld [vmem:[#allocation58_spill] sm:$0xff]  ;;  %v15093_v3 = vld [vmem:[#allocation64_spill] sm:$0xff] }
 0xce6   : > { %v6986_v22 = vsel %vm5050_vm13, %v6978_v41, %v6878_v15  ;;  %v5056_v41 = vsel %vm5050_vm13, %v5047_v58, %v12160_v53  ;;  %v5421_v15 = vsel %vm15094_vm15, %v15093_v3, %v15092_v20  ;;  %v15098_v58 = vld [vmem:[#allocation78_spill] sm:$0xff]  ;;  %vm15151_vm15 = vmmov %vm15075_vm6 }
 0xce7   : > { %v5065_v23 = vsel %vm5059_vm7, %v5056_v41, %v12146_v25  ;;  %v5058_v25 = vsel %vm5050_vm13, %v5049_v54, %v15084_v56  ;;  %v5432_v59 = vsel %vm5041_vm1, %v5421_v15, %v15099_v10  ;;  %v15100_v54 = vld [vmem:[#allocation63_spill] sm:$0xff]  ;;  %v15106_v35 = vld [vmem:[#allocation30_spill] sm:$0xff]  ;;  %v15116_v15 = vld [vmem:[#allocation32_spill] sm:$0xff] }
 0xce8   : > { %v5074_v53 = vsel %vm5068_vm0, %v5065_v23, %v12181_v36  ;;  %v5067_v57 = vsel %vm5059_vm7, %v5058_v25, %v15086_v17  ;;  %v15087_v36 = vld [vmem:[#allocation106_spill] sm:$0xff]  ;;  %v15109_v56 = vld [vmem:[#allocation27_spill] sm:$0xff] }
 0xce9   : > { %v5083_v62 = vsel %vm5077_vm4, %v5074_v53, %v15085_v5  ;;  %v5072_v61 = vsel %vm5068_vm0, %v5063_v7, %v15087_v36  ;;  %v13316_v0 = vsel %vm5068_vm0, %v5067_v57, %v15097_v42  ;;  %v15102_v7 = vld [vmem:[#allocation69_spill] sm:$0xff]  ;;  %v5442_v25 = vsel %vm5050_vm13, %v5434_v8, %v15109_v56  ;;  %v15118_v8 = vld [vmem:[#allocation52_spill] sm:$0xff]  ;;  %v15119_v10 = vld [vmem:[#allocation26_spill] sm:$0xff] }
 0xcea   : > { %v13320_v41 = vsel %vm5086_vm2, %v5083_v62, %v15098_v58  ;;  %v5430_v23 = vsel %vm15104_vm11, %v15103_v19, %v15102_v7  ;;  %v15110_v5 = vld [vmem:[#allocation117_spill] sm:$0xff]  ;;  %v15111_v62 = vld [vmem:[#allocation83_spill] sm:$0xff]  ;;  %v5450_v34 = vsel %vm5059_vm7, %v5442_v25, %v15114_v2  ;;  %vm15158_vm11 = vmmov %vm15075_vm6 }
 0xceb   : > { %v6898_v40 = vpop.permute.xlu1 %6897  ;;  %v6219_v17 = vsel %vm15112_vm9, %v15111_v62, %v15110_v5  ;;  %v15113_v36 = vld [vmem:[#allocation65_spill] sm:$0xff]  ;;  %v5458_v42 = vsel %vm5068_vm0, %v5450_v34, %v15118_v8  ;;  %v15124_v19 = vld [vmem:[#allocation71_spill] sm:$0xff]  ;;  %vm15178_vm9 = vmmov %vm15075_vm6 }
 0xcec   : > { %v6994_v49 = vsel %vm5059_vm7, %v6986_v22, %v6898_v40  ;;  %v6918_v9 = vpop.permute.xlu2 %6917  ;;  %v15095_v22 = vld [vmem:[#allocation53_spill] sm:$0xff]  ;;  %v5081_v40 = vsel %vm5077_vm4, %v5072_v61, %v15101_v6  ;;  %v13348_v61 = vsel %vm5086_vm2, %v5079_v48, %v15113_v36  ;;  %v15129_v25 = vld [vmem:[#allocation35_spill] sm:$0xff] }
 0xced   : > { %v13291_v43 = vsel %vm5068_vm0, %v6994_v49, %v6918_v9  ;;  %v6896_v45 = vpop.permute.xlu0 %6895  ;;  %v15105_v49 = vld [vmem:[#allocation39_spill] sm:$0xff]  ;;  %v13337_v16 = vsel %vm5086_vm2, %v5081_v40, %v15107_v50  ;;  %v15123_v6 = vld [vmem:[#allocation113_spill] sm:$0xff]  ;;  %v15127_v50 = vld [vmem:[#allocation100_spill] sm:$0xff] }
 0xcee   : > { %v6992_v11 = vsel %vm5059_vm7, %v6984_v51, %v6896_v45  ;;  %v5436_v51 = vsel %vm5041_vm1, %v5427_v37, %v15095_v22  ;;  %v5440_v9 = vsel %vm5050_vm13, %v5432_v59, %v15105_v49  ;;  %v15108_v37 = vld [vmem:[#allocation21_spill] sm:$0xff]  ;;  %v6228_v40 = vsel %vm5041_vm1, %v6219_v17, %v15123_v6  ;;  %v15125_v49 = vld [vmem:[#allocation46_spill] sm:$0xff]  ;;  %v15131_v17 = vld [vmem:[#allocation115_spill] sm:$0xff] }
 0xcef   : > { %v5444_v63 = vsel %vm5050_vm13, %v5436_v51, %v15100_v54  ;;  %v5438_v45 = vsel %vm5041_vm1, %v5430_v23, %v15108_v37  ;;  %v5448_v22 = vsel %vm5059_vm7, %v5440_v9, %v15116_v15  ;;  %v15117_v51 = vld [vmem:[#allocation42_spill] sm:$0xff]  ;;  %v15120_v54 = vld [vmem:[#allocation92_spill] sm:$0xff]  ;;  %v6236_v37 = vsel %vm5050_vm13, %v6228_v40, %v15127_v50  ;;  %v15132_v36 = vld [vmem:[#allocation51_spill] sm:$0xff] }
 0xcf0   : > { %v5452_v53 = vsel %vm5059_vm7, %v5444_v63, %v15106_v35  ;;  %v5446_v60 = vsel %vm5050_vm13, %v5438_v45, %v15115_v27  ;;  %v15121_v63 = vld [vmem:[#allocation40_spill] sm:$0xff]  ;;  %v15126_v35 = vld [vmem:[#allocation59_spill] sm:$0xff]  ;;  %v15128_v45 = vld [vmem:[#allocation41_spill] sm:$0xff] }
 0xcf1   : > { %v5460_v29 = vsel %vm5068_vm0, %v5452_v53, %v15117_v51  ;;  %v5454_v23 = vsel %vm5059_vm7, %v5446_v60, %v15124_v19  ;;  %v5456_v56 = vsel %vm5068_vm0, %v5448_v22, %v15128_v45  ;;  %v15133_v34 = vld [vmem:[#allocation37_spill] sm:$0xff]  ;;  %v15134_v60 = vld [vmem:[#allocation47_spill] sm:$0xff]  ;;  %v15145_v40 = vld [vmem:[#allocation76_spill] sm:$0xff] }
 0xcf2   : > { %v5468_v59 = vsel %vm5077_vm4, %v5460_v29, %v15119_v10  ;;  %v13385_v5 = vsel %vm5068_vm0, %v5454_v23, %v15129_v25  ;;  %v5464_v27 = vsel %vm5077_vm4, %v5456_v56, %v15133_v34  ;;  %v15137_v15 = vld [vmem:[#allocation105_spill] sm:$0xff]  ;;  %v15138_v22 = vld [vmem:[#allocation87_spill] sm:$0xff]  ;;  %v15146_v23 = vld [vmem:[#allocation20_spill] sm:$0xff] }
 0xcf3   : > { %v6916_v57 = vpop.permute.xlu1 %6915  ;;  %v5476_v9 = vsel %vm5086_vm2, %v5468_v59, %v15125_v49  ;;  %v6216_v51 = vsel %vm15075_vm6, %v15138_v22, %v15137_v15  ;;  %v15139_v8 = vld [vmem:[#allocation99_spill] sm:$0xff]  ;;  %v15141_v59 = vld [vmem:[#allocation98_spill] sm:$0xff]  ;;  %v15149_v45 = vld [vmem:[#allocation108_spill] sm:$0xff] }
 0xcf4   : > { %v7000_v20 = vsel %vm5068_vm0, %v6992_v11, %v6916_v57  ;;  %v6936_v3 = vpop.permute.xlu2 %6935  ;;  %v5803_v11 = vsel %vm15122_vm12, %v15121_v63, %v15120_v54  ;;  %v6244_v57 = vsel %vm5059_vm7, %v6236_v37, %v15131_v17  ;;  %v8167_v29 = vshll.u32 %v5476_v9, 16  ;;  %v15142_v63 = vld [vmem:[#allocation23_spill] sm:$0xff]  ;;  %v15148_v50 = vld [vmem:[#allocation102_spill] sm:$0xff] }
 0xcf5   : > { %v13362_v48 = vsel %vm5077_vm4, %v7000_v20, %v6936_v3  ;;  %v6902_v58 = vpop.permute.xlu0 %6901  ;;  %v5812_v53 = vsel %vm5041_vm1, %v5803_v11, %v15126_v35  ;;  %v15135_v20 = vld [vmem:[#allocation22_spill] sm:$0xff]  ;;  %v6226_v54 = vsel %vm5041_vm1, %v6216_v51, %v15141_v59  ;;  %v15143_v11 = vld [vmem:[#allocation56_spill] sm:$0xff]  ;;  %v15147_v9 = vld [vmem:[#allocation107_spill] sm:$0xff]  ;;  %vm15188_vm12 = vcmask 1040384  }
 0xcf6   : > { %v6998_v7 = vsel %vm5059_vm7, %v13242_v39, %v6902_v58  ;;  %v15130_v39 = vld [vmem:[#allocation43_spill] sm:$0xff]  ;;  %v5800_v3 = vsel %vm15136_vm8, %v15135_v20, %v15134_v60  ;;  %v15140_v58 = vld [vmem:[#allocation17_spill] sm:$0xff]  ;;  %v5797_v6 = vsel %vm15144_vm14, %v15143_v11, %v15142_v63  ;;  %v6252_v35 = vsel %vm5068_vm0, %v6244_v57, %v15147_v9  ;;  %v15150_v56 = vld [vmem:[#allocation18_spill] sm:$0xff] }
 0xcf7   : > { %v5466_v62 = vsel %vm5077_vm4, %v5458_v42, %v15130_v39  ;;  %v5820_v42 = vsel %vm5050_vm13, %v5812_v53, %v15139_v8  ;;  %v5810_v10 = vsel %vm5041_vm1, %v5800_v3, %v15140_v58  ;;  %v6213_v25 = vsel %vm15151_vm15, %v15150_v56, %v15149_v45  ;;  %v15152_v39 = vld [vmem:[#allocation124_spill] sm:$0xff]  ;;  %v15153_v34 = vld [vmem:[#allocation54_spill] sm:$0xff]  ;;  %v15155_v3 = vld [vmem:[#allocation127_spill] sm:$0xff] }
 0xcf8   : > { %v13393_v2 = vsel %vm5086_vm2, %v5466_v62, %v15132_v36  ;;  %v5818_v19 = vsel %vm5050_vm13, %v5810_v10, %v15145_v40  ;;  %v5828_v49 = vsel %vm5059_vm7, %v5820_v42, %v15146_v23  ;;  %v6260_v62 = vsel %vm5077_vm4, %v6252_v35, %v15152_v39  ;;  %v15154_v20 = vld [vmem:[#allocation94_spill] sm:$0xff]  ;;  %v15156_v8 = vld [vmem:[#allocation45_spill] sm:$0xff]  ;;  %v15160_v59 = vld [vmem:[#allocation112_spill] sm:$0xff] }
 0xcf9   : > { %v5836_v37 = vsel %vm5068_vm0, %v5828_v49, %v15148_v50  ;;  %v6234_v60 = vsel %vm5050_vm13, %v6226_v54, %v15153_v34  ;;  %v6224_v57 = vsel %vm5041_vm1, %v6213_v25, %v15154_v20  ;;  %v6268_v15 = vsel %vm5086_vm2, %v6260_v62, %v15155_v3  ;;  %v15157_v42 = vld [vmem:[#allocation86_spill] sm:$0xff]  ;;  %v15159_v10 = vld [vmem:[#allocation73_spill] sm:$0xff]  ;;  %v15166_v25 = vld [vmem:[#allocation80_spill] sm:$0xff] }
 0xcfa   : > { %v5806_v58 = vsel %vm15158_vm11, %v15157_v42, %v15156_v8  ;;  %v6242_v54 = vsel %vm5059_vm7, %v6234_v60, %v15160_v59  ;;  %v15161_v11 = vld [vmem:[#allocation70_spill] sm:$0xff]  ;;  %v8257_v49 = vsel %vm10002_vm5, %v13320_v41, %v8167_v29  ;;  %v15163_v9 = vld [vmem:[#allocation25_spill] sm:$0xff]  ;;  %v8189_v62 = vshll.u32 %v6268_v15, 16  ;;  %v15169_v41 = vld [vmem:[#allocation72_spill] sm:$0xff] }
 0xcfb   : > { %v6922_v53 = vpop.permute.xlu1 %6921  ;;  %v13446_v40 = vsel %vm5086_vm2, %v5464_v27, %v15161_v11  ;;  %v5844_v35 = vsel %vm5077_vm4, %v5836_v37, %v15163_v9  ;;  %v15165_v45 = vld [vmem:[#allocation82_spill] sm:$0xff]  ;;  %v15170_v37 = vld [vmem:[#allocation91_spill] sm:$0xff]  ;;  %v15175_v8 = vld [vmem:[#allocation16_spill] sm:$0xff]  ;;  %vm15193_vm8 = vcmask 1041408  }
 0xcfc   : > { %v7006_v17 = vsel %vm5068_vm0, %v6998_v7, %v6922_v53  ;;  %v6942_v36 = vpop.permute.xlu2 %6941  ;;  %v6232_v7 = vsel %vm5050_vm13, %v6224_v57, %v15159_v10  ;;  %v15164_v53 = vld [vmem:[#allocation74_spill] sm:$0xff]  ;;  %v5808_v56 = vsel %vm5041_vm1, %v5797_v6, %v15165_v45  ;;  %v15171_v60 = vld [vmem:[#allocation79_spill] sm:$0xff]  ;;  %v15172_v6 = vld [vmem:[#allocation97_spill] sm:$0xff] }
 0xcfd   : > { %v13433_v22 = vsel %vm5077_vm4, %v7006_v17, %v6942_v36  ;;  %v6920_v51 = vpop.permute.xlu0 %6919  ;;  %v6250_v50 = vsel %vm5068_vm0, %v6242_v54, %v15164_v53  ;;  %v15167_v39 = vld [vmem:[#allocation110_spill] sm:$0xff]  ;;  %v15168_v17 = vld [vmem:[#allocation19_spill] sm:$0xff]  ;;  %v5816_v29 = vsel %vm5050_vm13, %v5808_v56, %v15169_v41  ;;  %v6240_v20 = vsel %vm5059_vm7, %v6232_v7, %v15171_v60  ;;  %v15177_v10 = vld [vmem:[#allocation60_spill] sm:$0xff] }
 0xcfe   : > { %v7004_v63 = vsel %vm5068_vm0, %v13247_v31, %v6920_v51  ;;  %v5826_v31 = vsel %vm5059_vm7, %v5818_v19, %v15166_v25  ;;  %v5852_v27 = vsel %vm5086_vm2, %v5844_v35, %v15167_v39  ;;  %v5814_v36 = vsel %vm5041_vm1, %v5806_v58, %v15168_v17  ;;  %v15173_v19 = vld [vmem:[#allocation114_spill] sm:$0xff]  ;;  %v15174_v51 = vld [vmem:[#allocation15_spill] sm:$0xff]  ;;  %v15181_v45 = vld [vmem:[#allocation44_spill] sm:$0xff] }
 0xcff   : > { %v5834_v34 = vsel %vm5068_vm0, %v5826_v31, %v15170_v37  ;;  %v5822_v57 = vsel %vm5050_vm13, %v5814_v36, %v15172_v6  ;;  %v6258_v15 = vsel %vm5077_vm4, %v6250_v50, %v15174_v51  ;;  %v6248_v42 = vsel %vm5068_vm0, %v6240_v20, %v15175_v8  ;;  %v15176_v58 = vld [vmem:[#allocation90_spill] sm:$0xff]  ;;  %v15182_v25 = vld [vmem:[#allocation85_spill] sm:$0xff]  ;;  %v15183_v36 = vld [vmem:[#allocation95_spill] sm:$0xff] }
 0xd00   : > { %v5842_v3 = vsel %vm5077_vm4, %v5834_v34, %v15173_v19  ;;  %v6222_v59 = vsel %vm15178_vm9, %v15177_v10, %v15176_v58  ;;  %v8181_v54 = vrot.slane %v5852_v27, 7  ;;  %v15179_v11 = vld [vmem:[#allocation122_spill] sm:$0xff]  ;;  %v5824_v56 = vsel %vm5059_vm7, %v5816_v29, %v15181_v45  ;;  %v15184_v41 = vld [vmem:[#allocation89_spill] sm:$0xff]  ;;  %v15185_v6 = vld [vmem:[#allocation120_spill] sm:$0xff] }
 0xd01   : > { %v6256_v7 = vsel %vm5077_vm4, %v6248_v42, %v15179_v11  ;;  %v15180_v9 = vld [vmem:[#allocation126_spill] sm:$0xff]  ;;  %v6230_v50 = vsel %vm5041_vm1, %v6222_v59, %v15182_v25  ;;  %v8191_v31 = vrot.slane %v8189_v62, 7  ;;  %v5850_v27 = vsel %vm5086_vm2, %v5842_v3, %v15183_v36  ;;  %v15187_v8 = vld [vmem:[#allocation109_spill] sm:$0xff]  ;;  %v15189_v10 = vld [vmem:[#allocation48_spill] sm:$0xff] }
 0xd02   : > { %v6266_v35 = vsel %vm5086_vm2, %v6258_v15, %v15180_v9  ;;  %v6238_v37 = vsel %vm5050_vm13, %v6230_v50, %v15184_v41  ;;  %v8205_v34 = vrot.slane %v12984_v21, 6  ;;  %v6264_v29 = vsel %vm5086_vm2, %v6256_v7, %v15185_v6  ;;  %v15186_v15 = vld [vmem:[#allocation111_spill] sm:$0xff]  ;;  %v15198_v41 = vld [vmem:[#allocation125_spill] sm:$0xff]  ;;  %vm15199_vm6 = vmmov %vm15188_vm12 }
 0xd03   : > { %v6940_v53 = vpop.permute.xlu1 %6939  ;;  %v8186_v19 = vshll.u32 %v6266_v35, 16  ;;  %v8165_v62 = vshll.u32 %v13393_v2, 16  ;;  %v5832_v3 = vsel %vm5068_vm0, %v5824_v56, %v15186_v15  ;;  %v5830_v42 = vsel %vm5059_vm7, %v5822_v57, %v15187_v8  ;;  %v15192_v35 = vld [vmem:[#allocation77_spill] sm:$0xff]  ;;  %vm15203_vm14 = vmmov %vm15193_vm8 }
 0xd04   : > { %v7012_v39 = vsel %vm5077_vm4, %v7004_v63, %v6940_v53  ;;  %v6960_v17 = vpop.permute.xlu2 %6959  ;;  %v8269_v21 = vsel %vm15188_vm12, %v8257_v49, %v8181_v54  ;;  %v8180_v58 = vrot.slane %v5850_v27, 7  ;;  %v5840_v59 = vsel %vm5077_vm4, %v5832_v3, %v15189_v10  ;;  %v15194_v54 = vld [vmem:[#allocation121_spill] sm:$0xff]  ;;  %v15197_v27 = vld [vmem:[#allocation116_spill] sm:$0xff]  ;;  %v15200_v3 = vld [vmem:[#allocation123_spill] sm:$0xff] }
 0xd05   : > { %v7020_v60 = vsel %vm5086_vm2, %v7012_v39, %v6960_v17  ;;  %v6938_v20 = vpop.permute.xlu0 %6937  ;;  %v8277_v7 = vsel %vm10468_vm10, %v8269_v21, %v8191_v31  ;;  %v6246_v53 = vsel %vm5059_vm7, %v6238_v37, %v15192_v35  ;;  %v8183_v45 = vshll.u32 %v6264_v29, 16  ;;  %v15196_v17 = vld [vmem:[#allocation84_spill] sm:$0xff]  ;;  %v15202_v35 = vld [vmem:[#allocation101_spill] sm:$0xff]  ;;  %vm15204_vm15 = vmmov %vm15199_vm6 }
 0xd06   : > { %v8213_v51 = vshll.u32 %v7020_v60, 16  ;;  %v7010_v63 = vsel %vm5077_vm4, %v13291_v43, %v6938_v20  ;;  %v15191_v43 = vld [vmem:[#allocation118_spill] sm:$0xff]  ;;  %v13516_v57 = vsel %vm15193_vm8, %v8277_v7, %v8205_v34  ;;  %v8163_v49 = vshll.u32 %v13446_v40, 16  ;;  %v15201_v7 = vld [vmem:[#allocation36_spill] sm:$0xff]  ;;  %vm15206_vm11 = vmmov %vm15193_vm8 }
 0xd07   : > { %v5848_v2 = vsel %vm5086_vm2, %v5840_v59, %v15191_v43  ;;  %v6254_v56 = vsel %vm5068_vm0, %v6246_v53, %v15194_v54  ;;  %v8188_v25 = vrot.slane %v8186_v19, 7  ;;  %v8256_v39 = vsel %vm10002_vm5, %v13337_v16, %v8165_v62  ;;  %vm15211_vm12 = vmmov %vm15199_vm6 }
 0xd08   : > { %v13509_v9 = vrot.slane %v8213_v51, 6  ;;  %v5470_v36 = vsel %vm5077_vm4, %v13385_v5, %v15196_v17  ;;  %v5838_v40 = vsel %vm5068_vm0, %v5830_v42, %v15197_v27  ;;  %v6262_v37 = vsel %vm5077_vm4, %v6254_v56, %v15198_v41 }
 0xd09   : > { %v8265_v60 = vsel %vm15199_vm6, %v8256_v39, %v8180_v58  ;;  %v8179_v20 = vrot.slane %v5848_v2, 7  ;;  %v8204_v6 = vrot.slane %v12989_v1, 6  ;;  %v8185_v16 = vrot.slane %v8183_v45, 7  ;;  %vm15213_vm6 = vmmov %vm15206_vm11 }
 0xd0a   : > { %v8297_v31 = vsel %vm10894_vm3, %v13516_v57, %v13509_v9  ;;  %v6270_v8 = vsel %vm5086_vm2, %v6262_v37, %v15200_v3  ;;  %v8276_v42 = vsel %vm10468_vm10, %v8265_v60, %v8188_v25  ;;  %v8203_v21 = vrot.slane %v13004_v4, 6  ;;  %v15209_v3 = vld [vmem:[#allocation55_spill] sm:$0xff] }
 0xd0b   : > { %v6958_v34 = vpop.permute.xlu1 %6957  ;;  %v5478_v43 = vsel %vm5086_vm2, %v5470_v36, %v15201_v7  ;;  %v8255_v2 = vsel %vm10002_vm5, %v13348_v61, %v8163_v49  ;;  %v5846_v4 = vsel %vm5077_vm4, %v5838_v40, %v15202_v35  ;;  %v13558_v53 = vsel %vm15203_vm14, %v8276_v42, %v8204_v6  ;;  %v15205_v61 = vld [vmem:[#allocation104_spill] sm:$0xff] }
 0xd0c   : > { %v7018_v29 = vsel %vm5086_vm2, %v7010_v63, %v6958_v34  ;;  %v7414_v19 = vpop.permute.xlu2 %7413  ;;  %v5854_v49 = vsel %vm5086_vm2, %v5846_v4, %v15205_v61  ;;  %v8192_v39 = vshll.u32 %v6270_v8, 16  ;;  %v8169_v37 = vshll.u32 %v5478_v43, 16  ;;  %v15210_v42 = vld [vmem:[#allocation128_spill] sm:$0xff] }
 0xd0d   : > { %v8210_v51 = vshll.u32 %v7018_v29, 16  ;;  %v7424_v62 = vpack.i.b16 0, %v7414_v19  ;;  %v7425_v15 = vshrl.u32 %v7414_v19, 16  ;;  %v6956_v5 = vpop.permute.xlu0 %6955  ;;  %v8182_v29 = vrot.slane %v5854_v49, 7 }
 0xd0e   : > { %v7016_v58 = vsel %vm5086_vm2, %v13362_v48, %v6956_v5  ;;  %v8261_v48 = vsel %vm15204_vm15, %v8255_v2, %v8179_v20  ;;  %v15207_v20 = vld [vmem:[#allocation93_spill] sm:$0xff]  ;;  %vm15208_vm9 = vcmask 1047556   ;;  %vm15216_vm14 = vcmask 130048  }
 0xd0f   : > { %v13545_v1 = vrot.slane %v8210_v51, 6  ;;  %v7426_v63 = vpack.i.b16 0, %v7425_v15  ;;  %v13548_v10 = vperm.slane %v7424_v62, %v14805_v30  ;;  %v8207_v59 = vshll.u32 %v7016_v58, 16  ;;  %vm15212_vm8 = vmmov %vm15208_vm9 }
 0xd10   : > { %v8275_v25 = vsel %vm10468_vm10, %v8261_v48, %v8185_v16  ;;  %v5085_v6 = vsel %vm5077_vm4, %v13316_v0, %v15207_v20  ;;  %v8194_v51 = vrot.slane %v8192_v39, 7 }
 0xd11   : > { %v8296_v45 = vsel %vm10894_vm3, %v13558_v53, %v13545_v1  ;;  %v13567_v54 = vperm.slane %v13548_v10, %v14808_v47  ;;  %v7496_v56 = vperm.slane %v7426_v63, %v14805_v30  ;;  %v13574_v17 = vrot.slane %v8207_v59, 6 }
 0xd12   : > { %v13577_v36 = vsel %vm15206_vm11, %v8275_v25, %v8203_v21  ;;  %v5097_v8 = vsel %vm5086_vm2, %v5085_v6, %v15209_v3  ;;  %v8206_v21 = vrot.slane %v15210_v42, 6 }
 0xd13   : > { %v7488_v27 = vrot.slane %v13567_v54, 4  ;;  %v7502_v40 = vperm.slane %v7496_v56, %v14808_v47  ;;  %v13581_v41 = vpop.permute.xlu1 %7223  ;;  %v8295_v34 = vsel %vm10894_vm3, %v13577_v36, %v13574_v17  ;;  %v8258_v0 = vsel %vm10002_vm5, %v5097_v8, %v8169_v37  ;;  %vm15214_vm5 = vmmov %vm15212_vm8 }
 0xd14   : > { %v13587_v60 = vpop.permute.xlu2 %7787  ;;  %v8273_v7 = vsel %vm15211_vm12, %v8258_v0, %v8182_v29  ;;  %v7497_v3 = vrot.slane %v7496_v56, 4  ;;  %vm15217_vm15 = vmmov %vm15214_vm5 }
 0xd15   : > { %v7507_v19 = vrot.slane %v7502_v40, 4  ;;  %v6962_v16 = vpop.permute.xlu0 %6961  ;;  %v7592_v15 = vunpack.c.l.b16 %v7502_v40  ;;  %v7489_v5 = vsel %vm15208_vm9, 0, %v7488_v27  ;;  %v8278_v2 = vsel %vm10468_vm10, %v8273_v7, %v8194_v51  ;;  %vm15215_vm10 = vmmov %vm15214_vm5 }
 0xd16   : > { %v7022_v62 = vsel %vm5086_vm2, %v13433_v22, %v6962_v16  ;;  %v7612_v63 = vunpack.c.l.b16 %v7489_v5  ;;  %v13608_v4 = vsel %vm15213_vm6, %v8278_v2, %v8206_v21  ;;  %v7478_v5 = vrot.slane %v13548_v10, 4  ;;  %vm15218_vm11 = vmmov %vm15214_vm5 }
 0xd17   : > { %v8216_v58 = vshll.u32 %v7022_v62, 16  ;;  %v7596_v59 = vpack.c.b16 %v7592_v15, %v7592_v15  ;;  %v7508_v22 = vsel %vm15212_vm8, 0, %v7507_v19  ;;  %v7102_v7 = vrot.slane %v13200_v38, 4  ;;  %vm15219_vm9 = vmmov %vm15214_vm5 }
 0xd18   : > { %v7616_v35 = vpack.c.b16 %v7612_v63, %v7612_v63  ;;  %v7632_v25 = vunpack.c.l.b16 %v7508_v22  ;;  %v7498_v63 = vsel %vm15215_vm10, 0, %v7497_v3  ;;  %vm15220_vm12 = vmmov %vm15216_vm14 }
 0xd19   : > { %v13601_v43 = vrot.slane %v8216_v58, 6  ;;  %7601 = vrot.lane.b32.xlu1 %v7596_v59, %s8964_s27  ;;  %v7479_v58 = vsel %vm15214_vm5, 0, %v7478_v5  ;;  %vm15221_vm8 = vmmov %vm15214_vm5 }
 0xd1a   : > { %7621 = vrot.lane.b32.xlu2 %v7616_v35, %s8978_s12  ;;  %v7636_v37 = vpack.c.b16 %v7632_v25, %v7632_v25  ;;  %v13648_v25 = vperm.slane %v7498_v63, %v14808_v47  ;;  %vm15222_vm6 = vmmov %vm15214_vm5 }
 0xd1b   : > { %v7790_v48 = vpop.permute.xlu1 %7789  ;;  %v8298_v23 = vsel %vm10894_vm3, %v13608_v4, %v13601_v43  ;;  %vm15223_vm10 = vmmov %vm15220_vm12 }
 0xd1c   : > { %v7801_v61 = vshrl.u32 %v7790_v48, 16  ;;  %v13615_v49 = vpop.permute.xlu2 %7793  ;;  %v7800_v22 = vpack.i.b16 0, %v7790_v48  ;;  %v7672_v5 = vunpack.c.l.b16 %v13648_v25 }
 0xd1d   : > { %v7412_v11 = vpop.permute.xlu0 %7411 }
 0xd1e   : > { %v7802_v39 = vpack.i.b16 0, %v7801_v61  ;;  %v7420_v27 = vpack.i.b16 0, %v7412_v11  ;;  %v7421_v40 = vshrl.u32 %v7412_v11, 16  ;;  %v7487_v61 = vperm.slane %v7479_v58, %v14808_v47 }
 0xd1f   : > { %v13655_v48 = vperm.slane %v7800_v22, %v14805_v30  ;;  %v7676_v22 = vpack.c.b16 %v7672_v5, %v7672_v5 }
 0xd20   : > { %v13618_v20 = vperm.slane %v7802_v39, %v14805_v30  ;;  %v7422_v6 = vpack.i.b16 0, %v7421_v40  ;;  %v7439_v29 = vperm.slane %v7420_v27, %v14805_v30  ;;  %v7103_v40 = vsel %vm15218_vm11, 0, %v7102_v7  ;;  %vm15226_vm11 = vmmov %vm15214_vm5 }
 0xd21   : > { %7641 = vrot.lane.b32.xlu1 %v7636_v37, %s8979_s13  ;;  %v7652_v3 = vunpack.c.l.b16 %v7487_v61 }
 0xd22   : > { %v13626_v51 = vperm.slane %v13618_v20, %v14808_v47  ;;  %v13631_v15 = vperm.slane %v7422_v6, %v14805_v30  ;;  %v13635_v8 = vperm.slane %v7439_v29, %v14808_v47  ;;  %v7440_v2 = vrot.slane %v7439_v29, 4 }
 0xd23   : > { %v13622_v19 = vpop.permute.xlu1 %7415 }
 0xd24   : > { %v7228_v16 = vpop.permute.xlu2 %7227  ;;  %v7464_v42 = vperm.slane %v13631_v15, %v14808_v47  ;;  %v7968_v21 = vunpack.c.l.b16 %v13626_v51  ;;  %v7450_v0 = vrot.slane %v13635_v8, 4  ;;  %v7441_v37 = vsel %vm15219_vm9, 0, %v7440_v2  ;;  %vm15227_vm9 = vmmov %vm15214_vm5 }
 0xd25   : > { %v13628_v62 = vpop.permute.xlu0 %7417  ;;  %v13675_v7 = vperm.slane %v7441_v37, %v14808_v47 }
 0xd26   : > { %v7972_v10 = vpack.c.b16 %v7968_v21, %v7968_v21  ;;  %v7591_v56 = vunpack.c.l.b16 %v7464_v42  ;;  %v7451_v38 = vsel %vm15217_vm15, 0, %v7450_v0  ;;  %v7469_v21 = vrot.slane %v7464_v42, 4  ;;  %vm15225_vm15 = vmmov %vm15214_vm5 }
 0xd27   : > { %v7611_v6 = vunpack.c.l.b16 %v7451_v38  ;;  %v13668_v0 = vperm.slane %v7103_v40, %v14808_v47  ;;  %v7121_v42 = vrot.slane %v13148_v46, 4  ;;  %v7797_v38 = vshrl.u32 %v13587_v60, 16 }
 0xd28   : > { %v7595_v11 = vpack.c.b16 %v7591_v56, %v7591_v56  ;;  %v7470_v2 = vsel %vm15221_vm8, 0, %v7469_v21  ;;  %vm15229_vm8 = vmmov %vm15214_vm5 }
 0xd29   : > { %7977 = vrot.lane.b32.xlu1 %v7972_v10, %s8964_s27  ;;  %v7615_v58 = vpack.c.b16 %v7611_v6, %v7611_v6  ;;  %v7276_v56 = vunpack.c.l.b16 %v13668_v0  ;;  %v7631_v40 = vunpack.c.l.b16 %v7470_v2  ;;  %v7122_v6 = vsel %vm15222_vm6, 0, %v7121_v42  ;;  %vm15230_vm6 = vmmov %vm15214_vm5 }
 0xd2a   : > { %7599 = vrot.lane.b32.xlu0 %v7595_v11, %s8964_s27 }
 0xd2b   : > { %v7226_v59 = vpop.permute.xlu1 %7225  ;;  %7619 = vrot.lane.b32.xlu2 %v7615_v58, %s8978_s12  ;;  %v7280_v37 = vpack.c.b16 %v7276_v56, %v7276_v56 }
 0xd2c   : > { %v7356_v39 = vsel %vm15216_vm14, %v13211_v26, %v7226_v59  ;;  %v7246_v27 = vpop.permute.xlu2 %7245  ;;  %v7353_v26 = vsel %vm15220_vm12, %v13163_v28, %v13581_v41  ;;  %v13672_v59 = vperm.slane %v13655_v48, %v14808_v47  ;;  %v7656_v41 = vpack.c.b16 %v7652_v3, %v7652_v3  ;;  %vm15224_vm14 = vmmov %vm15214_vm5 }
 0xd2d   : > { %v13644_v35 = vpop.permute.xlu0 %7791  ;;  %v13661_v29 = vsel %vm5041_vm1, %v7356_v39, %v7246_v27  ;;  %v7651_v39 = vunpack.c.l.b16 %v13675_v7  ;;  %v7883_v27 = vrot.slane %v13626_v51, 4  ;;  %v7459_v3 = vrot.slane %v13631_v15, 4  ;;  %vm15228_vm12 = vmmov %vm15214_vm5 }
 0xd2e   : > { %v7864_v11 = vrot.slane %v13672_v59, 4  ;;  %v7798_v51 = vpack.i.b16 0, %v7797_v38 }
 0xd2f   : > { %v7655_v5 = vpack.c.b16 %v7651_v39, %v7651_v39  ;;  %v7884_v58 = vsel %vm15224_vm14, 0, %v7883_v27  ;;  %vm15232_vm14 = vmmov %vm15214_vm5 }
 0xd30   : > { %v7865_v46 = vsel %vm15214_vm5, 0, %v7864_v11  ;;  %v8008_v15 = vunpack.c.l.b16 %v7884_v58  ;;  %v13709_v56 = vperm.slane %v7798_v51, %v14805_v30 }
 0xd31   : > { %7681 = vrot.lane.b32.xlu1 %v7676_v22, %s8981_s29  ;;  %v7988_v42 = vunpack.c.l.b16 %v7865_v46 }
 0xd32   : > { %7661 = vrot.lane.b32.xlu0 %v7656_v41, %s8980_s16  ;;  %v13704_v41 = vperm.slane %v7122_v6, %v14808_v47  ;;  %v8012_v27 = vpack.c.b16 %v8008_v15, %v8008_v15 }
 0xd33   : > { %v7244_v63 = vpop.permute.xlu1 %7243  ;;  %7285 = vrot.lane.b32.xlu2 %v7280_v37, %s8980_s16  ;;  %v7992_v11 = vpack.c.b16 %v7988_v42, %v7988_v42  ;;  %v7854_v37 = vrot.slane %v13655_v48, 4 }
 0xd34   : > { %v13678_v10 = vsel %vm5041_vm1, %v7353_v26, %v7244_v63  ;;  %v7359_v26 = vsel %vm15223_vm10, %v13190_v44, %v7228_v16  ;;  %v7635_v63 = vpack.c.b16 %v7631_v40, %v7631_v40  ;;  %v7490_v44 = vrot.slane %v7487_v61, 4  ;;  %vm15231_vm10 = vmmov %vm15214_vm5 }
 0xd35   : > { %v13681_v28 = vpop.permute.xlu0 %7229  ;;  %v7460_v16 = vsel %vm15225_vm15, 0, %v7459_v3  ;;  %v7296_v2 = vunpack.c.l.b16 %v13704_v41  ;;  %v7064_v40 = vrot.slane %v13155_v12, 4  ;;  %v13721_v61 = vperm.slane %v13709_v56, %v14808_v47  ;;  %vm15233_vm15 = vmmov %vm15214_vm5 }
 0xd36   : > { %v13713_v39 = vperm.slane %v7460_v16, %v14808_v47  ;;  %v7491_v38 = vsel %vm15226_vm11, 0, %v7490_v44  ;;  %v7855_v48 = vsel %vm15228_vm12, 0, %v7854_v37  ;;  %vm15234_vm11 = vmmov %vm15214_vm5 }
 0xd37   : > { %v7300_v6 = vpack.c.b16 %v7296_v2, %v7296_v2  ;;  %v7692_v46 = vunpack.c.l.b16 %v7491_v38  ;;  %v7065_v12 = vsel %vm15227_vm9, 0, %v7064_v40  ;;  %vm15235_vm9 = vmmov %vm15214_vm5 }
 0xd38   : > { %v7671_v3 = vunpack.c.l.b16 %v13713_v39  ;;  %v7073_v51 = vperm.slane %v7065_v12, %v14808_v47  ;;  %vm15236_vm12 = vmmov %vm15214_vm5 }
 0xd39   : > { %7659 = vrot.lane.b32.xlu1 %v7655_v5, %s8980_s16  ;;  %v7796_v5 = vpack.i.b16 0, %v13587_v60  ;;  %v7696_v58 = vpack.c.b16 %v7692_v46, %v7692_v46  ;;  %v13734_v60 = vperm.slane %v7855_v48, %v14808_v47  ;;  %v7083_v46 = vrot.slane %v13118_v33, 4 }
 0xd3a   : > { %7639 = vrot.lane.b32.xlu0 %v7635_v63, %s8979_s13  ;;  %v7114_v63 = vrot.slane %v13668_v0, 4  ;;  %v7675_v42 = vpack.c.b16 %v7671_v3, %v7671_v3  ;;  %v7275_v16 = vunpack.c.l.b16 %v7073_v51  ;;  %v7509_v0 = vrot.slane %v13648_v25, 4 }
 0xd3b   : > { %7997 = vrot.lane.b32.xlu2 %v7992_v11, %s8978_s12  ;;  %v8028_v11 = vunpack.c.l.b16 %v13734_v60 }
 0xd3c   : > { %v7115_v2 = vsel %vm15229_vm8, 0, %v7114_v63  ;;  %v7279_v37 = vpack.c.b16 %v7275_v16, %v7275_v16  ;;  %vm15237_vm8 = vmmov %vm15214_vm5 }
 0xd3d   : > { %v7248_v21 = vpop.permute.xlu0 %7247  ;;  %v7316_v38 = vunpack.c.l.b16 %v7115_v2 }
 0xd3e   : > { %v13701_v22 = vsel %vm5041_vm1, %v7359_v26, %v7248_v21  ;;  %v7967_v26 = vunpack.c.l.b16 %v13721_v61  ;;  %v7815_v21 = vperm.slane %v7796_v5, %v14805_v30  ;;  %v7510_v5 = vsel %vm15230_vm6, 0, %v7509_v0  ;;  %vm15238_vm6 = vmmov %vm15214_vm5 }
 0xd3f   : > { %v7320_v12 = vpack.c.b16 %v7316_v38, %v7316_v38  ;;  %v7712_v48 = vunpack.c.l.b16 %v7510_v5  ;;  %v7433_v38 = vshrl.u32 %v13628_v62, 16 }
 0xd40   : > { %v7971_v15 = vpack.c.b16 %v7967_v26, %v7967_v26  ;;  %v13739_v44 = vperm.slane %v7815_v21, %v14808_v47  ;;  %v7084_v26 = vsel %vm15232_vm14, 0, %v7083_v46  ;;  %v7816_v2 = vrot.slane %v7815_v21, 4  ;;  %vm15240_vm14 = vmmov %vm15214_vm5 }
 0xd41   : > { %8017 = vrot.lane.b32.xlu1 %v8012_v27, %s8979_s13  ;;  %v7452_v27 = vrot.slane %v13675_v7, 4  ;;  %v13756_v33 = vperm.slane %v7084_v26, %v14808_v47 }
 0xd42   : > { %7305 = vrot.lane.b32.xlu0 %v7300_v6, %s8981_s29  ;;  %v7826_v40 = vrot.slane %v13739_v44, 4  ;;  %v8032_v6 = vpack.c.b16 %v8028_v11, %v8028_v11  ;;  %v7432_v11 = vpack.i.b16 0, %v13628_v62 }
 0xd43   : > { %7701 = vrot.lane.b32.xlu2 %v7696_v58, %s8982_s14  ;;  %v7453_v3 = vsel %vm15214_vm5, 0, %v7452_v27  ;;  %v7076_v58 = vrot.slane %v7073_v51, 4  ;;  %v7873_v51 = vrot.slane %v13618_v20, 4  ;;  %v7434_v20 = vpack.i.b16 0, %v7433_v38 }
 0xd44   : > { %v7827_v25 = vsel %vm15231_vm10, 0, %v7826_v40  ;;  %v7691_v7 = vunpack.c.l.b16 %v7453_v3  ;;  %v7295_v40 = vunpack.c.l.b16 %v13756_v33  ;;  %v13771_v5 = vperm.slane %v7432_v11, %v14805_v30  ;;  %vm15239_vm10 = vmmov %vm15214_vm5 }
 0xd45   : > { %v7987_v63 = vunpack.c.l.b16 %v7827_v25  ;;  %v7077_v0 = vsel %vm15233_vm15, 0, %v7076_v58  ;;  %v7874_v3 = vsel %vm15236_vm12, 0, %v7873_v51  ;;  %v13786_v58 = vperm.slane %v7434_v20, %v14805_v30  ;;  %vm15241_vm15 = vmmov %vm15214_vm5 }
 0xd46   : > { %v7695_v16 = vpack.c.b16 %v7691_v7, %v7691_v7  ;;  %v7315_v21 = vunpack.c.l.b16 %v7077_v0  ;;  %v7882_v7 = vperm.slane %v7874_v3, %v14808_v47  ;;  %vm15244_vm12 = vmmov %vm15214_vm5 }
 0xd47   : > { %v7991_v27 = vpack.c.b16 %v7987_v63, %v7987_v63  ;;  %v7578_v11 = vperm.slane %v13786_v58, %v14808_v47 }
 0xd49   : > { %7679 = vrot.lane.b32.xlu1 %v7675_v42, %s8981_s29  ;;  %v7716_v42 = vpack.c.b16 %v7712_v48, %v7712_v48  ;;  %v7319_v48 = vpack.c.b16 %v7315_v21, %v7315_v21 }
 0xd4a   : > { %7975 = vrot.lane.b32.xlu0 %v7971_v15, %s8964_s27  ;;  %v7133_v15 = vrot.slane %v13704_v41, 4  ;;  %v7845_v41 = vrot.slane %v13721_v61, 4  ;;  %v13780_v61 = vperm.slane %v13771_v5, %v14808_v47 }
 0xd4b   : > { %7283 = vrot.lane.b32.xlu2 %v7279_v37, %s8980_s16 }
 0xd4c   : > { %v7134_v37 = vsel %vm15234_vm11, 0, %v7133_v15  ;;  %v7846_v25 = vsel %vm15237_vm8, 0, %v7845_v41  ;;  %v7594_v41 = vunpack.c.l.b16 %v7578_v11  ;;  %vm15242_vm11 = vmmov %vm15214_vm5 }
 0xd4d   : > { %v7336_v46 = vunpack.c.l.b16 %v7134_v37  ;;  %v8007_v63 = vunpack.c.l.b16 %v7846_v25  ;;  %vm15245_vm8 = vmmov %vm15214_vm5 }
 0xd4e   : > { %v7598_v20 = vpack.c.b16 %v7594_v41, %v7594_v41 }
 0xd4f   : > { %v7340_v26 = vpack.c.b16 %v7336_v46, %v7336_v46  ;;  %v8011_v0 = vpack.c.b16 %v8007_v63, %v8007_v63 }
 0xd51   : > { %8037 = vrot.lane.b32.xlu1 %v8032_v6, %s8980_s16  ;;  %v7817_v6 = vsel %vm15235_vm9, 0, %v7816_v2  ;;  %v8048_v2 = vunpack.c.l.b16 %v7882_v7  ;;  %vm15243_vm9 = vmmov %vm15214_vm5 }
 0xd52   : > { %7325 = vrot.lane.b32.xlu0 %v7320_v12, %s8982_s14  ;;  %v7299_v12 = vpack.c.b16 %v7295_v40, %v7295_v40  ;;  %v13775_v62 = vperm.slane %v7817_v6, %v14808_v47 }
 0xd53   : > { %7721 = vrot.lane.b32.xlu2 %v7716_v42, %s8975_s8  ;;  %v7429_v42 = vshrl.u32 %v13622_v19, 16  ;;  %v8052_v37 = vpack.c.b16 %v8048_v2, %v8048_v2  ;;  %v7207_v2 = vrot.slane %v13186_v55, 4 }
 0xd54   : > { %v8027_v15 = vunpack.c.l.b16 %v13775_v62 }
 0xd55   : > { %v7430_v51 = vpack.i.b16 0, %v7429_v42 }
 0xd56   : > { %v8031_v38 = vpack.c.b16 %v8027_v15, %v8027_v15 }
 0xd57   : > { %v13800_v6 = vperm.slane %v7430_v51, %v14805_v30 }
 0xd59   : > { %7699 = vrot.lane.b32.xlu1 %v7695_v16, %s8982_s14  ;;  %v7564_v16 = vrot.slane %v13780_v61, 4  ;;  %v7540_v25 = vperm.slane %v13800_v6, %v14808_v47 }
 0xd5a   : > { %7995 = vrot.lane.b32.xlu0 %v7991_v27, %s8978_s12  ;;  %v7471_v27 = vrot.slane %v13713_v39, 4  ;;  %v7866_v39 = vrot.slane %v13734_v60, 4 }
 0xd5b   : > { %7303 = vrot.lane.b32.xlu2 %v7299_v12, %s8981_s29  ;;  %v7565_v40 = vsel %vm15238_vm6, 0, %v7564_v16  ;;  %v7095_v12 = vrot.slane %v13756_v33, 4  ;;  %v7809_v33 = vshrl.u32 %v13615_v49, 16  ;;  %vm15246_vm6 = vmmov %vm15214_vm5 }
 0xd5c   : > { %v7472_v21 = vsel %vm15214_vm5, 0, %v7471_v27  ;;  %v7614_v46 = vunpack.c.l.b16 %v7565_v40  ;;  %v7867_v63 = vsel %vm15239_vm10, 0, %v7866_v39  ;;  %v13823_v39 = vpop.permute.xlu2 %7263  ;;  %vm15247_vm10 = vcmask 130048  }
 0xd5d   : > { %v7711_v3 = vunpack.c.l.b16 %v7472_v21  ;;  %v8068_v15 = vunpack.c.l.b16 %v7867_v63  ;;  %v7096_v60 = vsel %vm15240_vm14, 0, %v7095_v12  ;;  %v7810_v40 = vpack.i.b16 0, %v7809_v33  ;;  %vm15248_vm14 = vmmov %vm15214_vm5 }
 0xd5e   : > { %v7208_v21 = vsel %vm15242_vm11, 0, %v7207_v2  ;;  %v7828_v63 = vrot.slane %v13775_v62, 4  ;;  %v7554_v62 = vrot.slane %v13771_v5, 4  ;;  %vm15250_vm11 = vmmov %vm15214_vm5 }
 0xd5f   : > { %v7715_v42 = vpack.c.b16 %v7711_v3, %v7711_v3  ;;  %v8072_v51 = vpack.c.b16 %v8068_v15, %v8068_v15  ;;  %v7258_v12 = vunpack.c.l.b16 %v7208_v21 }
 0xd61   : > { %7323 = vrot.lane.b32.xlu1 %v7319_v48, %s8982_s14  ;;  %v7835_v48 = vrot.slane %v13709_v56, 4  ;;  %v7593_v56 = vunpack.c.l.b16 %v7540_v25 }
 0xd62   : > { %7345 = vrot.lane.b32.xlu0 %v7340_v26, %s8975_s8  ;;  %v7618_v26 = vpack.c.b16 %v7614_v46, %v7614_v46 }
 0xd63   : > { %8015 = vrot.lane.b32.xlu2 %v8011_v0, %s8979_s13  ;;  %v7836_v16 = vsel %vm15241_vm15, 0, %v7835_v48  ;;  %v7335_v0 = vunpack.c.l.b16 %v7096_v60  ;;  %v7597_v41 = vpack.c.b16 %v7593_v56, %v7593_v56  ;;  %v13843_v60 = vpop.permute.xlu1 %7249  ;;  %vm15249_vm15 = vmmov %vm15214_vm5 }
 0xd64   : > { %v13817_v27 = vperm.slane %v7836_v16, %v14808_v47  ;;  %v7262_v16 = vpack.c.b16 %v7258_v12, %v7258_v12 }
 0xd65   : > { %v7339_v46 = vpack.c.b16 %v7335_v0, %v7335_v0  ;;  %v7829_v0 = vsel %vm15245_vm8, 0, %v7828_v63  ;;  %v7808_v63 = vpack.i.b16 0, %v13615_v49  ;;  %v7266_v49 = vpop.permute.xlu0 %7265  ;;  %vm15253_vm8 = vmmov %vm15214_vm5 }
 0xd66   : > { %v8047_v55 = vunpack.c.l.b16 %v13817_v27 }
 0xd69   : > { %8035 = vrot.lane.b32.xlu1 %v8031_v38, %s8980_s16  ;;  %v7885_v38 = vrot.slane %v7882_v7, 4 }
 0xd6a   : > { %8057 = vrot.lane.b32.xlu0 %v8052_v37, %s8981_s29  ;;  %v7428_v37 = vpack.i.b16 0, %v13622_v19  ;;  %v7583_v19 = vrot.slane %v7578_v11, 4 }
 0xd6b   : > { %7605 = vrot.lane.b32.xlu2 %v7598_v20, %s8964_s27  ;;  %v7886_v3 = vsel %vm15243_vm9, 0, %v7885_v38  ;;  %v13828_v20 = vperm.slane %v7810_v40, %v14805_v30  ;;  %v7545_v40 = vrot.slane %v7540_v25, 4  ;;  %vm15251_vm9 = vmmov %vm15214_vm5 }
 0xd6c   : > { %v13831_v7 = vperm.slane %v7428_v37, %v14805_v30  ;;  %v8088_v48 = vunpack.c.l.b16 %v7886_v3  ;;  %v7584_v11 = vsel %vm15244_vm12, 0, %v7583_v19  ;;  %v8067_v37 = vunpack.c.l.b16 %v7829_v0  ;;  %vm15252_vm12 = vmmov %vm15214_vm5 }
 0xd6d   : > { %v7634_v2 = vunpack.c.l.b16 %v7584_v11  ;;  %v7546_v19 = vsel %vm15248_vm14, 0, %v7545_v40  ;;  %v13870_v0 = vperm.slane %v7808_v63, %v14805_v30  ;;  %vm15255_vm14 = vmmov %vm15214_vm5 }
 0xd6e   : > { %v13841_v15 = vperm.slane %v13831_v7, %v14808_v47  ;;  %v8092_v33 = vpack.c.b16 %v8088_v48, %v8088_v48  ;;  %v8071_v25 = vpack.c.b16 %v8067_v37, %v8067_v37 }
 0xd6f   : > { %v7638_v21 = vpack.c.b16 %v7634_v2, %v7634_v2 }
 0xd71   : > { %7625 = vrot.lane.b32.xlu1 %v7618_v26, %s8978_s12  ;;  %v8051_v26 = vpack.c.b16 %v8047_v55, %v8047_v55 }
 0xd72   : > { %7719 = vrot.lane.b32.xlu0 %v7715_v42, %s8975_s8  ;;  %v13837_v42 = vperm.slane %v13828_v20, %v14808_v47 }
 0xd73   : > { %8077 = vrot.lane.b32.xlu2 %v8072_v51, %s8982_s14  ;;  %v7526_v51 = vrot.slane %v13841_v15, 4 }
 0xd74   : > { %v7622_v56 = vpop.permute.xlu2 %7621  ;;  %v7970_v38 = vunpack.c.l.b16 %v13837_v42 }
 0xd75   : > { %v7527_v3 = vsel %vm15214_vm5, 0, %v7526_v51 }
 0xd76   : > { %v7613_v11 = vunpack.c.l.b16 %v7527_v3 }
 0xd78   : > { %v7617_v51 = vpack.c.b16 %v7613_v11, %v7613_v11 }
 0xd79   : > { %7603 = vrot.lane.b32.xlu1 %v7597_v41, %s8964_s27  ;;  %v7555_v41 = vsel %vm15246_vm6, 0, %v7554_v62  ;;  %v7169_v62 = vrot.slane %v13207_v32, 4  ;;  %vm15254_vm6 = vmmov %vm15214_vm5 }
 0xd7a   : > { %7343 = vrot.lane.b32.xlu0 %v7339_v46, %s8975_s8  ;;  %v7974_v46 = vpack.c.b16 %v7970_v38, %v7970_v38  ;;  %v7563_v12 = vperm.slane %v7555_v41, %v14808_v47 }
 0xd7b   : > { %8055 = vrot.lane.b32.xlu2 %v8051_v26, %s8981_s29  ;;  %v7178_v26 = vrot.slane %v13169_v14, 4  ;;  %v7573_v14 = vrot.slane %v13786_v58, 4  ;;  %v7170_v32 = vsel %vm15251_vm9, 0, %v7169_v62  ;;  %v13886_v58 = vperm.slane %v13870_v0, %v14808_v47  ;;  %vm15258_vm9 = vmmov %vm15214_vm5 }
 0xd7c   : > { %v7654_v2 = vunpack.c.l.b16 %v7563_v12  ;;  %v7140_v62 = vrot.slane %v13176_v18, 4 }
 0xd7d   : > { %v7940_v11 = vrot.slane %v13886_v58, 4 }
 0xd7e   : > { %v7658_v41 = vpack.c.b16 %v7654_v2, %v7654_v2 }
 0xd81   : > { %7269 = vrot.lane.b32.xlu1 %v7262_v16, %s8979_s13 }
 0xd82   : > { %8097 = vrot.lane.b32.xlu0 %v8092_v33, %s8975_s8  ;;  %v7633_v33 = vunpack.c.l.b16 %v7546_v19 }
 0xd83   : > { %7645 = vrot.lane.b32.xlu2 %v7638_v21, %s8979_s13 }
 0xd84   : > { %v7637_v38 = vpack.c.b16 %v7633_v33, %v7633_v33 }
 0xd85   : > { %v13864_v16 = vpop.permute.xlu2 %7619 }
 0xd89   : > { %7981 = vrot.lane.b32.xlu1 %v7974_v46, %s8964_s27  ;;  %v7374_v46 = vsel %vm5050_vm13, %v13661_v29, %v7266_v49 }
 0xd8a   : > { %8075 = vrot.lane.b32.xlu0 %v8071_v25, %s8982_s14  ;;  %v7257_v25 = vunpack.c.l.b16 %v7170_v32  ;;  %v7141_v32 = vsel %vm15255_vm14, 0, %v7140_v62  ;;  %vm15263_vm14 = vmmov %vm15214_vm5 }
 0xd8b   : > { %v7602_v55 = vpop.permute.xlu1 %7601  ;;  %7623 = vrot.lane.b32.xlu2 %v7617_v51, %s8978_s12 }
 0xd8c   : > { %v7732_v5 = vsel %vm15247_vm10, %v13567_v54, %v7602_v55  ;;  %v7847_v54 = vrot.slane %v13817_v27, 4 }
 0xd8d   : > { %v7742_v48 = vsel %vm5041_vm1, %v7732_v5, %v7622_v56  ;;  %v7179_v56 = vsel %vm15249_vm15, 0, %v7178_v26  ;;  %v7286_v55 = vpop.permute.xlu2 %7285  ;;  %v7574_v5 = vsel %vm15252_vm12, 0, %v7573_v14  ;;  %v7197_v26 = vrot.slane %v13173_v52, 4  ;;  %vm15256_vm15 = vmmov %vm15214_vm5 }
 0xd8e   : > { %v7848_v37 = vsel %vm15250_vm11, 0, %v7847_v54  ;;  %v13882_v21 = vperm.slane %v7179_v56, %v14808_v47  ;;  %v13892_v19 = vsel %vm5059_vm7, %v7374_v46, %v7286_v55  ;;  %v7582_v33 = vperm.slane %v7574_v5, %v14808_v47  ;;  %vm15257_vm11 = vmmov %vm15247_vm10 }
 0xd8f   : > { %v8087_v3 = vunpack.c.l.b16 %v7848_v37  ;;  %v7261_v54 = vpack.c.b16 %v7257_v25, %v7257_v25  ;;  %v7516_v52 = vrot.slane %v13831_v7, 4  ;;  %v7805_v56 = vshrl.u32 %v13644_v35, 16  ;;  %vm15259_vm12 = vmmov %vm15214_vm5 }
 0xd90   : > { %v7278_v63 = vunpack.c.l.b16 %v13882_v21  ;;  %v7674_v49 = vunpack.c.l.b16 %v7582_v33 }
 0xd91   : > { %7643 = vrot.lane.b32.xlu1 %v7637_v38, %s8979_s13  ;;  %v8091_v29 = vpack.c.b16 %v8087_v3, %v8087_v3  ;;  %v7941_v38 = vsel %vm15214_vm5, 0, %v7940_v11  ;;  %v7517_v3 = vsel %vm15256_vm15, 0, %v7516_v52  ;;  %v7806_v5 = vpack.i.b16 0, %v7805_v56  ;;  %vm15264_vm15 = vmmov %vm15214_vm5 }
 0xd92   : > { %7665 = vrot.lane.b32.xlu0 %v7658_v41, %s8980_s16  ;;  %v7282_v51 = vpack.c.b16 %v7278_v63, %v7278_v63  ;;  %v7990_v46 = vunpack.c.l.b16 %v7941_v38  ;;  %v7678_v25 = vpack.c.b16 %v7674_v49, %v7674_v49  ;;  %v13927_v11 = vperm.slane %v7517_v3, %v14808_v47 }
 0xd93   : > { %v7642_v40 = vpop.permute.xlu1 %7641  ;;  %8095 = vrot.lane.b32.xlu2 %v8091_v29, %s8975_s8 }
 0xd94   : > { %v13877_v27 = vsel %vm5050_vm13, %v7742_v48, %v7642_v40  ;;  %v7566_v48 = vrot.slane %v7563_v12, 4  ;;  %v7198_v12 = vsel %vm15254_vm6, 0, %v7197_v26  ;;  %v7994_v29 = vpack.c.b16 %v7990_v46, %v7990_v46  ;;  %vm15261_vm6 = vmmov %vm15214_vm5 }
 0xd95   : > { %v7998_v14 = vpop.permute.xlu2 %7997  ;;  %v13912_v55 = vperm.slane %v7198_v12, %v14808_v47  ;;  %v7159_v12 = vrot.slane %v13196_v13, 4  ;;  %v7653_v56 = vunpack.c.l.b16 %v13927_v11  ;;  %v7535_v46 = vrot.slane %v13800_v6, 4 }
 0xd96   : > { %v7567_v2 = vsel %vm15253_vm8, 0, %v7566_v48  ;;  %vm15260_vm8 = vmmov %vm15214_vm5  ;;  %v7190_v6 = vrot.slane %v13882_v21, 4 }
 0xd97   : > { %v7694_v40 = vunpack.c.l.b16 %v7567_v2 }
 0xd99   : > { %7267 = vrot.lane.b32.xlu1 %v7261_v54, %s8979_s13  ;;  %v7698_v26 = vpack.c.b16 %v7694_v40, %v7694_v40  ;;  %v13931_v54 = vperm.slane %v7806_v5, %v14805_v30  ;;  %v7804_v40 = vpack.i.b16 0, %v13644_v35  ;;  %v7372_v35 = vsel %vm5050_vm13, %v13678_v10, %v13823_v39 }
 0xd9a   : > { %7289 = vrot.lane.b32.xlu0 %v7282_v51, %s8980_s16  ;;  %v7536_v10 = vsel %vm15261_vm6, 0, %v7535_v46  ;;  %vm15269_vm6 = vmmov %vm15214_vm5 }
 0xd9b   : > { %v7978_v18 = vpop.permute.xlu1 %7977  ;;  %7685 = vrot.lane.b32.xlu2 %v7678_v25, %s8981_s29  ;;  %v7916_v49 = vperm.slane %v13931_v54, %v14808_v47  ;;  %v13958_v25 = vperm.slane %v7804_v40, %v14805_v30  ;;  %v7544_v21 = vperm.slane %v7536_v10, %v14808_v47 }
 0xd9c   : > { %v8108_v37 = vsel %vm15247_vm10, %v13672_v59, %v7978_v18  ;;  %v7600_v41 = vpop.permute.xlu0 %7599  ;;  %v13921_v59 = vperm.slane %v7141_v32, %v14808_v47  ;;  %vm15262_vm10 = vmmov %vm15214_vm5 }
 0xd9d   : > { %v13915_v7 = vsel %vm5041_vm1, %v8108_v37, %v7998_v14  ;;  %v7729_v48 = vsel %vm15257_vm11, %v13635_v8, %v7600_v41  ;;  %v7702_v62 = vpop.permute.xlu2 %7701  ;;  %v7298_v8 = vunpack.c.l.b16 %v13912_v55  ;;  %v7959_v14 = vrot.slane %v13837_v42, 4  ;;  %vm15265_vm11 = vmmov %vm15214_vm5 }
 0xd9e   : > { %v7740_v63 = vsel %vm5041_vm1, %v7729_v48, %v13864_v16  ;;  %v7277_v51 = vunpack.c.l.b16 %v13921_v59  ;;  %v7585_v16 = vrot.slane %v7582_v33, 4  ;;  %v7657_v42 = vpack.c.b16 %v7653_v56, %v7653_v56 }
 0xd9f   : > { %v7302_v38 = vpack.c.b16 %v7298_v8, %v7298_v8  ;;  %v7160_v41 = vsel %vm15259_vm12, 0, %v7159_v12  ;;  %v7969_v3 = vunpack.c.l.b16 %v7916_v49  ;;  %v7960_v5 = vsel %vm15260_vm8, 0, %v7959_v14  ;;  %vm15267_vm12 = vmmov %vm15214_vm5 }
 0xda0   : > { %v7281_v32 = vpack.c.b16 %v7277_v51, %v7277_v51  ;;  %v7586_v33 = vsel %vm15258_vm9, 0, %v7585_v16  ;;  %v8010_v8 = vunpack.c.l.b16 %v7960_v5  ;;  %v13968_v51 = vperm.slane %v7160_v41, %v14808_v47  ;;  %vm15266_vm9 = vmmov %vm15214_vm5 }
 0xda1   : > { %7705 = vrot.lane.b32.xlu1 %v7698_v26, %s8982_s14  ;;  %v7973_v39 = vpack.c.b16 %v7969_v3, %v7969_v3  ;;  %v13972_v30 = vperm.slane %v13958_v25, %v14808_v47  ;;  %v7191_v12 = vsel %vm15214_vm5, 0, %v7190_v6  ;;  %v7930_v56 = vrot.slane %v13870_v0, 4  ;;  %vm15268_vm8 = vmmov %vm15214_vm5 }
 0xda2   : > { %8001 = vrot.lane.b32.xlu0 %v7994_v29, %s8978_s12  ;;  %v7714_v29 = vunpack.c.l.b16 %v7586_v33 }
 0xda3   : > { %v7682_v2 = vpop.permute.xlu1 %7681  ;;  %7309 = vrot.lane.b32.xlu2 %v7302_v38, %s8981_s29  ;;  %v7318_v38 = vunpack.c.l.b16 %v7191_v12  ;;  %v7931_v41 = vsel %vm15262_vm10, 0, %v7930_v56  ;;  %v7949_v12 = vrot.slane %v13828_v20, 4  ;;  %vm15270_vm10 = vmmov %vm15214_vm5 }
 0xda4   : > { %v7662_v52 = vpop.permute.xlu0 %7661  ;;  %v7718_v16 = vpack.c.b16 %v7714_v29, %v7714_v29  ;;  %v13996_v3 = vperm.slane %v7931_v41, %v14808_v47  ;;  %v7171_v41 = vrot.slane %v13968_v51, 4 }
 0xda5   : > { %v7758_v18 = vsel %vm5059_vm7, %v13877_v27, %v7662_v52  ;;  %v7284_v27 = vpop.permute.xlu2 %7283  ;;  %v7322_v46 = vpack.c.b16 %v7318_v38, %v7318_v38 }
 0xda6   : > { %v7766_v37 = vsel %vm5068_vm0, %v7758_v18, %v7682_v2  ;;  %v13961_v48 = vsel %vm5059_vm7, %v7372_v35, %v7284_v27  ;;  %v7902_v18 = vrot.slane %v13972_v30, 4 }
 0xda7   : > { %v13947_v13 = vsel %vm5077_vm4, %v7766_v37, %v7702_v62  ;;  %v7297_v37 = vunpack.c.l.b16 %v13968_v51 }
 0xda8   : > { %v7903_v0 = vsel %vm15263_vm14, 0, %v7902_v18  ;;  %v7892_v18 = vrot.slane %v13958_v25, 4  ;;  %vm15271_vm14 = vmmov %vm15214_vm5 }
 0xda9   : > { %7287 = vrot.lane.b32.xlu1 %v7281_v32, %s8980_s16  ;;  %v7921_v32 = vrot.slane %v7916_v49, 4  ;;  %v7301_v35 = vpack.c.b16 %v7297_v37, %v7297_v37 }
 0xdaa   : > { %7663 = vrot.lane.b32.xlu0 %v7657_v42, %s8980_s16  ;;  %v7673_v42 = vunpack.c.l.b16 %v7544_v21 }
 0xdab   : > { %v7660_v26 = vpop.permute.xlu1 %7659  ;;  %7979 = vrot.lane.b32.xlu2 %v7973_v39, %s8964_s27  ;;  %v7922_v27 = vsel %vm15264_vm15, 0, %v7921_v32  ;;  %v8030_v39 = vunpack.c.l.b16 %v13996_v3  ;;  %vm15272_vm15 = vmmov %vm15214_vm5 }
 0xdac   : > { %v7640_v62 = vpop.permute.xlu0 %7639  ;;  %v7677_v5 = vpack.c.b16 %v7673_v42, %v7673_v42  ;;  %v8009_v6 = vunpack.c.l.b16 %v7922_v27 }
 0xdad   : > { %v7748_v2 = vsel %vm5050_vm13, %v7740_v63, %v7640_v62  ;;  %v8014_v63 = vpack.c.b16 %v8010_v8, %v8010_v8  ;;  %v13982_v14 = vpop.permute.xlu2 %7721  ;;  %v7209_v62 = vrot.slane %v13912_v55, 4  ;;  %v7547_v8 = vrot.slane %v7544_v21, 4 }
 0xdae   : > { %v13976_v52 = vsel %vm5059_vm7, %v7748_v2, %v7660_v26  ;;  %v7989_v26 = vunpack.c.l.b16 %v7903_v0  ;;  %v8034_v55 = vpack.c.b16 %v8030_v39, %v8030_v39 }
 0xdaf   : > { %v7210_v56 = vsel %vm15265_vm11, 0, %v7209_v62  ;;  %v7548_v38 = vsel %vm15266_vm9, 0, %v7547_v8  ;;  %v7172_v62 = vsel %vm15214_vm5, 0, %v7171_v41  ;;  %vm15273_vm11 = vmmov %vm15214_vm5  ;;  %vm15274_vm9 = vcmask 1042432  }
 0xdb0   : > { %v7993_v2 = vpack.c.b16 %v7989_v26, %v7989_v26  ;;  %v7338_v37 = vunpack.c.l.b16 %v7210_v56  ;;  %v7713_v42 = vunpack.c.l.b16 %v7548_v38 }
 0xdb1   : > { %7725 = vrot.lane.b32.xlu1 %v7718_v16, %s8975_s8  ;;  %v7528_v16 = vrot.slane %v13927_v11, 4  ;;  %v7950_v11 = vsel %vm15268_vm8, 0, %v7949_v12  ;;  %v7337_v12 = vunpack.c.l.b16 %v7172_v62 }
 0xdb2   : > { %8021 = vrot.lane.b32.xlu0 %v8014_v63, %s8979_s13  ;;  %v8013_v63 = vpack.c.b16 %v8009_v6, %v8009_v6  ;;  %v7958_v0 = vperm.slane %v7950_v11, %v14808_v47  ;;  %v7342_v27 = vpack.c.b16 %v7338_v37, %v7338_v37  ;;  %v7717_v26 = vpack.c.b16 %v7713_v42, %v7713_v42 }
 0xdb3   : > { %v13986_v40 = vpop.permute.xlu1 %8017  ;;  %7329 = vrot.lane.b32.xlu2 %v7322_v46, %s8982_s14  ;;  %v7529_v32 = vsel %vm15267_vm12, 0, %v7528_v16  ;;  %v7893_v46 = vsel %vm15269_vm6, 0, %v7892_v18  ;;  %v7942_v18 = vrot.slane %v13996_v3, 4  ;;  %v7341_v37 = vpack.c.b16 %v7337_v12, %v7337_v12  ;;  %vm15275_vm12 = vmmov %vm15214_vm5 }
 0xdb4   : > { %v13989_v33 = vpop.permute.xlu0 %7305  ;;  %v7901_v6 = vperm.slane %v7893_v46, %v14808_v47  ;;  %v8050_v39 = vunpack.c.l.b16 %v7958_v0  ;;  %v7782_v11 = vsel %vm5086_vm2, %v13947_v13, %v13982_v14  ;;  %vm15278_vm6 = vmmov %vm15214_vm5  ;;  %vm15279_vm5 = vcmask 130048  }
 0xdb5   : > { %v13999_v49 = vpop.permute.xlu2 %7303 }
 0xdb6   : > { %v8054_v38 = vpack.c.b16 %v8050_v39, %v8050_v39  ;;  %v8029_v46 = vunpack.c.l.b16 %v7901_v6 }
 0xdb9   : > { %7307 = vrot.lane.b32.xlu1 %v7301_v35, %s8981_s29  ;;  %v7693_v35 = vunpack.c.l.b16 %v7529_v32 }
 0xdba   : > { %7683 = vrot.lane.b32.xlu0 %v7677_v5, %s8981_s29  ;;  %v7152_v5 = vrot.slane %v13921_v59, 4 }
 0xdbb   : > { %v14002_v29 = vpop.permute.xlu1 %7679  ;;  %7999 = vrot.lane.b32.xlu2 %v7993_v2, %s8978_s12  ;;  %v7697_v8 = vpack.c.b16 %v7693_v35, %v7693_v35  ;;  %v7943_v35 = vsel %vm15272_vm15, 0, %v7942_v18  ;;  %vm15282_vm15 = vmmov %vm15279_vm5 }
 0xdbc   : > { %v14005_v10 = vpop.permute.xlu0 %7975  ;;  %v7153_v2 = vsel %vm15270_vm10, 0, %v7152_v5  ;;  %v8234_v5 = vshll.u32 %v7782_v11, 16  ;;  %v8070_v62 = vunpack.c.l.b16 %v7943_v35  ;;  %vm15280_vm10 = vmmov %vm15279_vm5 }
 0xdbd   : > { %v14015_v21 = vpop.permute.xlu2 %8015  ;;  %v7317_v56 = vunpack.c.l.b16 %v7153_v2  ;;  %v7961_v2 = vrot.slane %v7958_v0, 4 }
 0xdbf   : > { %v7321_v42 = vpack.c.b16 %v7317_v56, %v7317_v56  ;;  %v14053_v56 = vrot.slane %v8234_v5, 5  ;;  %v7962_v0 = vsel %vm15275_vm12, 0, %v7961_v2 }
 0xdc1   : > { %8019 = vrot.lane.b32.xlu1 %v8013_v63, %s8979_s13  ;;  %v7904_v63 = vrot.slane %v7901_v6, 4  ;;  %v8033_v6 = vpack.c.b16 %v8029_v46, %v8029_v46 }
 0xdc2   : > { %8041 = vrot.lane.b32.xlu0 %v8034_v55, %s8980_s16  ;;  %v7911_v55 = vrot.slane %v13931_v54, 4 }
 0xdc3   : > { %v14020_v20 = vpop.permute.xlu1 %8037  ;;  %7349 = vrot.lane.b32.xlu2 %v7342_v27, %s8975_s8  ;;  %v7905_v32 = vsel %vm15271_vm14, 0, %v7904_v63  ;;  %vm15281_vm14 = vmmov %vm15274_vm9 }
 0xdc4   : > { %v7326_v25 = vpop.permute.xlu0 %7325  ;;  %v7912_v3 = vsel %vm15273_vm11, 0, %v7911_v55  ;;  %v8069_v27 = vunpack.c.l.b16 %v7905_v32  ;;  %v8472_v32 = vld [vmem:[%s14261_s4] sm:$0xff]  ;;  %vm15284_vm11 = vmmov %vm15279_vm5 }
 0xdc5   : > { %v7606_v51 = vpop.permute.xlu2 %7605  ;;  %v8105_v36 = vsel %vm15284_vm11, %v13739_v44, %v14005_v10 }
 0xdc6   : > { %v8073_v63 = vpack.c.b16 %v8069_v27, %v8069_v27 }
 0xdc9   : > { %7723 = vrot.lane.b32.xlu1 %v7717_v26, %s8975_s8  ;;  %v7390_v26 = vsel %vm5068_vm0, %v13892_v19, %v13989_v33 }
 0xdca   : > { %7703 = vrot.lane.b32.xlu0 %v7697_v8, %s8982_s14  ;;  %v7398_v13 = vsel %vm5077_vm4, %v7390_v26, %v7326_v25  ;;  %v7920_v8 = vperm.slane %v7912_v3, %v14808_v47  ;;  %v8074_v47 = vpack.c.b16 %v8070_v62, %v8070_v62  ;;  %v7738_v3 = vsel %vm15279_vm5, %v13780_v61, %v7606_v51 }
 0xdcb   : > { %v7700_v16 = vpop.permute.xlu1 %7699  ;;  %8061 = vrot.lane.b32.xlu2 %v8054_v38, %s8981_s29  ;;  %v15276_v38 = vld [vmem:[#allocation119_spill] sm:$0xff]  ;;  %v7388_v51 = vsel %vm5068_vm0, %v13961_v48, %v13999_v49  ;;  %v7362_v49 = vsel %vm15282_vm15, %v13180_v24, %v13681_v28 }
 0xdcc   : > { %v14032_v59 = vpop.permute.xlu0 %7995  ;;  %v8049_v25 = vunpack.c.l.b16 %v7920_v8  ;;  %vm15277_vm8 = vnez %v15276_v38  ;;  %v7923_v1 = vrot.slane %v7920_v8, 4 }
 0xdcd   : > { %v14042_v41 = vpop.permute.xlu2 %8077  ;;  %v8116_v28 = vsel %vm5041_vm1, %v8105_v36, %v14032_v59 }
 0xdce   : > { %v7924_v11 = vsel %vm15278_vm6, 0, %v7923_v1  ;;  %vm15287_vm6 = vmmov %vm15281_vm14 }
 0xdcf   : > { %v8089_v35 = vunpack.c.l.b16 %v7924_v11 }
 0xdd1   : > { %7347 = vrot.lane.b32.xlu1 %v7341_v37, %s8975_s8  ;;  %v8053_v37 = vpack.c.b16 %v8049_v25, %v8049_v25 }
 0xdd2   : > { %7327 = vrot.lane.b32.xlu0 %v7321_v42, %s8982_s14 }
 0xdd3   : > { %v7324_v54 = vpop.permute.xlu1 %7323  ;;  %8039 = vrot.lane.b32.xlu2 %v8033_v6, %s8980_s16  ;;  %s8500_s16 = scalar_lea.hbm %s14262_s5, %s8637_s7 }
 0xdd4   : > { %v7346_v14 = vpop.permute.xlu0 %7345  ;;  %v7396_v2 = vsel %vm5077_vm4, %v7388_v51, %v7324_v54 }
 0xdd5   : > { %v7406_v39 = vsel %vm5086_vm2, %v7398_v13, %v7346_v14  ;;  %v14065_v33 = vpop.permute.xlu2 %8055  ;;  %v8093_v13 = vpack.c.b16 %v8089_v35, %v8089_v35  ;;  %v7764_v14 = vsel %vm5068_vm0, %v13976_v52, %v14002_v29 }
 0xdd6   : > { %v8228_v12 = vrot.slane %v7406_v39, 5  ;;  %v7772_v62 = vsel %vm5077_vm4, %v7764_v14, %v7700_v16 }
 0xdd8   : > { %v14062_v19 = vsel %vm15274_vm9, %v8296_v45, %v8228_v12  ;;  %v8090_v45 = vunpack.c.l.b16 %v7962_v0  ;;  %v15283_v0 = vmov 1   ;;  %vm15285_vm9 = vcmask 1043456  }
 0xdd9   : > { %8079 = vrot.lane.b32.xlu1 %v8073_v63, %s8982_s14  ;;  %v8316_v18 = vsel %vm15277_vm8, %v14062_v19, %v14053_v56  ;;  %v8126_v63 = vsel %vm5050_vm13, %v13915_v7, %v13986_v40  ;;  %vm15286_vm12 = vmmov %vm15285_vm9 }
 0xdda   : > { %8081 = vrot.lane.b32.xlu0 %v8074_v47, %s8982_s14  ;;  %v8094_v42 = vpack.c.b16 %v8090_v45, %v8090_v45  ;;  %v8134_v48 = vsel %vm5059_vm7, %v8126_v63, %v14020_v20  ;;  %v7370_v20 = vsel %vm5041_vm1, %v7362_v49, %v13843_v60  ;;  %v8124_v60 = vsel %vm5050_vm13, %v8116_v28, %v14015_v21  ;;  %vm15290_vm3 = vmmov %vm15285_vm9  ;;  %s8504_s14 = sshll.u32 %s8500_s16, 4  ;;  %s8505_s14 = int_to_ptr.hbm [resolvable:$true] %s8504_s14 }
 0xddb   : > { %v8036_v55 = vpop.permute.xlu1 %8035  ;;  %8059 = vrot.lane.b32.xlu2 %v8053_v37, %s8981_s29  ;;  %s8502_s29 = sshll.u32 %s258_s9, 4  ;;  %s8841_s25 = sshra.s32 %s8505_s14, 4  ;;  %s8503_s29 = int_to_ptr.vmem [resolvable:$true] %s8502_s29  ;;  %s8842_s25 = int_to_ptr.hbm [resolvable:$true] %s8841_s25 }
 0xddc   : > { %v8058_v53 = vpop.permute.xlu0 %8057  ;;  %v8132_v37 = vsel %vm5059_vm7, %v8124_v60, %v8036_v55  ;;  %s8843_s10 = scalar_lea.hbm %s8842_s25, 4  ;;  %p8848_p11 = scmp.lt.s32.totalorder %s8842_s25, %s14262_s5 }
 0xddd   : > { %v7646_v46 = vpop.permute.xlu2 %7645  ;;  %v8142_v7 = vsel %vm5068_vm0, %v8134_v48, %v8058_v53  ;;  %p8844_p7 = scmp.ne.s32.totalorder %s8842_s25, %s8843_s10 }
 0xdde   : > { %v8150_v24 = vsel %vm5077_vm4, %v8142_v7, %v14042_v41 }
 0xddf   : > { %p8845_p9 = pnand %p8844_p7, %p9095_p12 }
 0xde1   : > { %8480 = vperm.xlu1 %8776, %v8472_v32   ;;  %p8846_p10 = pneg %p8845_p9 }
 0xde2   : > { %8101 = vrot.lane.b32.xlu0 %v8094_v42, %s8975_s8 }
 0xde3   : > { %v7626_v27 = vpop.permute.xlu1 %7625  ;;  %8099 = vrot.lane.b32.xlu2 %v8093_v13, %s8975_s8  ;;  %s8847_s8 = scalar_lea.hbm %s14262_s5, 16 }
 0xde4   : > { %v7746_v5 = vsel %vm5041_vm1, %v7738_v3, %v7626_v27  ;;  %v7720_v26 = vpop.permute.xlu0 %7719  ;;  %v8140_v27 = vsel %vm5068_vm0, %v8132_v37, %v14065_v33  ;;  %p8849_p13 = scmp.lt.s32.totalorder %s8847_s8, %s8843_s10 }
 0xde5   : > { %v7780_v8 = vsel %vm5086_vm2, %v7772_v62, %v7720_v26  ;;  %v7624_v6 = vpop.permute.xlu2 %7623  ;;  %v7754_v47 = vsel %vm5050_vm13, %v7746_v5, %v7646_v46 }
 0xde6   : > { %v8231_v39 = vshll.u32 %v7780_v8, 16  ;;  %p8850_p0 = por %p8849_p13, %p8848_p11 }
 0xde8   : > { %v8233_v56 = vrot.slane %v8231_v39, 5  ;;  %p8851_p1 = pnand %p8850_p0, %p8846_p10 }
 0xdea   : > { %8475 = vperm.xlu0 %8775, %v8472_v32  }
 0xdeb   : > { %v7604_v61 = vpop.permute.xlu1 %7603 }
 0xdec   : > { %v7735_v12 = vsel %vm15280_vm10, %v13841_v15, %v7604_v61  ;;  %v7344_v52 = vpop.permute.xlu0 %7343  ;;  %vm15288_vm10 = vmmov %vm15287_vm6 }
 0xded   : > { %v7404_v29 = vsel %vm5086_vm2, %v7396_v2, %v7344_v52  ;;  %v7744_v19 = vsel %vm5041_vm1, %v7735_v12, %v7624_v6  ;;  %v8096_v54 = vpop.permute.xlu2 %8095 }
 0xdee   : > { %v8227_v16 = vrot.slane %v7404_v29, 5 }
 0xdf0   : > { %v8301_v15 = vsel %vm15281_vm14, %v8295_v34, %v8227_v16  ;;  %vm15289_vm14 = vmmov %vm15279_vm5 }
 0xdf1   : > { %v8315_v40 = vsel %vm15277_vm8, %v8301_v15, %v8233_v56 }
 0xdf2   : > { %8782 = vset.pattern.permute.xlu0 %v15283_v0 }
 0xdf3   : > { %v7270_v25 = vpop.permute.xlu1 %7269 }
 0xdf4   : > { %v7378_v17 = vsel %vm5050_vm13, %v7370_v20, %v7270_v25  ;;  %v8098_v34 = vpop.permute.xlu0 %8097 }
 0xdf5   : > { %v8158_v1 = vsel %vm5086_vm2, %v8150_v24, %v8098_v34  ;;  %v7686_v44 = vpop.permute.xlu2 %7685 }
 0xdf6   : > { %v8252_v53 = vrot.slane %v8158_v1, 4 }
 0xdf8   : > { %v8324_v45 = vsel %vm15285_vm9, %v8316_v18, %v8252_v53 }
 0xdf9   : > { %v8339_v32 = vrot.slane %v8324_v45, 1  ;;  %v8340_v11 = vrot.slane %v8324_v45, 2  ;;  %v8361_v10 = vunpack.i.h.s16 %v8324_v45  ;;  %v8341_v41 = vrot.slane %v8324_v45, 3 }
 0xdfa   : > { %v8342_v56 = vrot.slane %v8324_v45, 4 }
 0xdfb   : > { %v14130_v42 = vpop.permute.xlu1 %7981  ;;  %v8363_v46 = vunpack.i.h.s16 %v8339_v32  ;;  %v8365_v35 = vunpack.i.h.s16 %v8340_v11  ;;  %v8625_v59 = vpack.i.b16 %v8339_v32, %v8361_v10  ;;  %v8367_v29 = vunpack.i.h.s16 %v8341_v41 }
 0xdfc   : > { %v8076_v3 = vpop.permute.xlu0 %8075  ;;  %v8114_v50 = vsel %vm15289_vm14, %v13886_v58, %v14130_v42 }
 0xdfd   : > { %v8626_v5 = vpack.i.b16 %v8340_v11, %v8363_v46  ;;  %v8627_v21 = vpack.i.b16 %v8341_v41, %v8365_v35  ;;  %v8148_v18 = vsel %vm5077_vm4, %v8140_v27, %v8076_v3  ;;  %8422 = vst [vmem:[#allocation1 + $0x5] ss:$9 sm:$0xff] %v8625_v59  ;;  %v7310_v14 = vpop.permute.xlu2 %7309  ;;  %v8628_v15 = vpack.i.b16 %v8342_v56, %v8367_v29 }
 0xdfe   : > { %v8156_v55 = vsel %vm5086_vm2, %v8148_v18, %v8096_v54 }
 0xdff   : > { %8425 = vst [vmem:[#allocation1 + $0x6] ss:$9 sm:$0xff] %v8626_v5  ;;  %v8251_v26 = vrot.slane %v8156_v55, 4 }
 0xe00   : > { %8428 = vst [vmem:[#allocation1 + $0x7] ss:$9 sm:$0xff] %v8627_v21 }
 0xe01   : > { %v8321_v13 = vsel %vm15286_vm12, %v8315_v40, %v8251_v26 }
 0xe02   : > { %v8335_v62 = vrot.slane %v8321_v13, 1  ;;  %v8336_v8 = vrot.slane %v8321_v13, 2  ;;  %v8337_v6 = vrot.slane %v8321_v13, 3  ;;  %v8338_v61 = vrot.slane %v8321_v13, 4  ;;  %8407 = vst [vmem:[#allocation1] ss:$9 sm:$0xff] %v8321_v13 }
 0xe03   : > { %v7644_v51 = vpop.permute.xlu1 %7643 }
 0xe04   : > { %v7752_v33 = vsel %vm5050_vm13, %v7744_v19, %v7644_v51  ;;  %v8624_v39 = vpack.i.b16 %v8324_v45, %v8338_v61  ;;  %8410 = vst [vmem:[#allocation1 + $0x1] ss:$9 sm:$0xff] %v8335_v62  ;;  %v7666_v2 = vpop.permute.xlu0 %7665 }
 0xe05   : > { %8413 = vst [vmem:[#allocation1 + $0x2] ss:$9 sm:$0xff] %v8336_v8  ;;  %v7762_v12 = vsel %vm5059_vm7, %v7754_v47, %v7666_v2  ;;  %v7980_v16 = vpop.permute.xlu2 %7979 }
 0xe06   : > { %8416 = vst [vmem:[#allocation1 + $0x3] ss:$9 sm:$0xff] %v8337_v6  ;;  %v7770_v52 = vsel %vm5068_vm0, %v7762_v12, %v7686_v44  ;;  %v8111_v18 = vsel %vm15279_vm5, %v13972_v30, %v7980_v16 }
 0xe07   : > { %8419 = vst [vmem:[#allocation1 + $0x4] ss:$9 sm:$0xff] %v8624_v39 }
 0xe0b   : > { %v7268_v63 = vpop.permute.xlu1 %7267 }
 0xe0c   : > { %v7290_v48 = vpop.permute.xlu0 %7289  ;;  %v7376_v55 = vsel %vm5050_vm13, %v13701_v22, %v7268_v63 }
 0xe0d   : > { %v7386_v49 = vsel %vm5059_vm7, %v7378_v17, %v7290_v48  ;;  %v7330_v40 = vpop.permute.xlu2 %7329 }
 0xe0e   : > { %v14141_v7 = vld [vmem:[#allocation1] sm:$0xff]  ;;  %v7394_v19 = vsel %vm5068_vm0, %v7386_v49, %v7310_v14 }
 0xe0f   : > { %8431 = vst [vmem:[#allocation1] ss:$9 sm:$0xff] %v8628_v15  ;;  %v7402_v36 = vsel %vm5077_vm4, %v7394_v19, %v7330_v40 }
 0xe13   : > { %v7706_v54 = vpop.permute.xlu1 %7705 }
 0xe14   : > { %v8002_v47 = vpop.permute.xlu0 %8001  ;;  %v7778_v24 = vsel %vm5077_vm4, %v7770_v52, %v7706_v54 }
 0xe15   : > { %v8000_v20 = vpop.permute.xlu2 %7999  ;;  %v8122_v9 = vsel %vm5041_vm1, %v8114_v50, %v8002_v47 }
 0xe16   : > { %v8120_v13 = vsel %vm5041_vm1, %v8111_v18, %v8000_v20  ;;  %vm15291_vm1 = vmmov %vm15290_vm3 }
 0xe1b   : > { %v7288_v25 = vpop.permute.xlu1 %7287 }
 0xe1c   : > { %v7664_v0 = vpop.permute.xlu0 %7663  ;;  %v7384_v14 = vsel %vm5059_vm7, %v7376_v55, %v7288_v25 }
 0xe1d   : > { %v7350_v34 = vpop.permute.xlu2 %7349  ;;  %v7760_v27 = vsel %vm5059_vm7, %v7752_v33, %v7664_v0 }
 0xe1e   : > { %v7410_v28 = vsel %vm5086_vm2, %v7402_v36, %v7350_v34 }
 0xe1f   : > { %v8230_v17 = vrot.slane %v7410_v28, 5 }
 0xe21   : > { %v8313_v37 = vsel %vm15287_vm6, %v8298_v23, %v8230_v17 }
 0xe23   : > { %v7726_v1 = vpop.permute.xlu1 %7725 }
 0xe24   : > { %v7786_v53 = vsel %vm5086_vm2, %v7778_v24, %v7726_v1  ;;  %v8022_v45 = vpop.permute.xlu0 %8021 }
 0xe25   : > { %v8240_v60 = vshll.u32 %v7786_v53, 16  ;;  %v8062_v41 = vpop.permute.xlu2 %8061  ;;  %v8130_v57 = vsel %vm5050_vm13, %v8122_v9, %v8022_v45 }
 0xe27   : > { %v8242_v32 = vrot.slane %v8240_v60, 5 }
 0xe29   : > { %v8318_v11 = vsel %vm15277_vm8, %v8313_v37, %v8242_v32 }
 0xe2b   : > { %v7308_v44 = vpop.permute.xlu1 %7307 }
 0xe2c   : > { %v7684_v10 = vpop.permute.xlu0 %7683  ;;  %v7392_v62 = vsel %vm5068_vm0, %v7384_v14, %v7308_v44 }
 0xe2d   : > { %v8040_v59 = vpop.permute.xlu2 %8039  ;;  %v7768_v21 = vsel %vm5068_vm0, %v7760_v27, %v7684_v10 }
 0xe33   : > { %v8020_v46 = vpop.permute.xlu1 %8019 }
 0xe34   : > { %v8042_v35 = vpop.permute.xlu0 %8041  ;;  %v8128_v8 = vsel %vm5050_vm13, %v8120_v13, %v8020_v46  ;;  %vm15292_vm13 = vcmask 1041408  }
 0xe35   : > { %v8060_v4 = vpop.permute.xlu2 %8059  ;;  %v8136_v30 = vsel %vm5059_vm7, %v8128_v8, %v8040_v59  ;;  %v8138_v38 = vsel %vm5059_vm7, %v8130_v57, %v8042_v35  ;;  %v8387_v35 = vld [vmem:[%s14260_s3] sm:$0xf]  ;;  %vm15293_vm7 = vcmask 293888  }
 0xe36   : > { %v8144_v12 = vsel %vm5068_vm0, %v8136_v30, %v8060_v4  ;;  %v8146_v54 = vsel %vm5068_vm0, %v8138_v38, %v8062_v41 }
 0xe3b   : > { %v7724_v3 = vpop.permute.xlu1 %7723 }
 0xe3c   : > { %v7704_v5 = vpop.permute.xlu0 %7703 }
 0xe3d   : > { %v7776_v43 = vsel %vm5077_vm4, %v7768_v21, %v7704_v5  ;;  %v8100_v16 = vpop.permute.xlu2 %8099 }
 0xe3e   : > { %v7784_v23 = vsel %vm5086_vm2, %v7776_v43, %v7724_v3 }
 0xe3f   : > { %v8237_v6 = vshll.u32 %v7784_v23, 16 }
 0xe41   : > { %v8239_v2 = vrot.slane %v8237_v6, 5 }
 0xe43   : > { %v7348_v26 = vpop.permute.xlu1 %7347 }
 0xe44   : > { %v7328_v61 = vpop.permute.xlu0 %7327 }
 0xe45   : > { %v7400_v51 = vsel %vm5077_vm4, %v7392_v62, %v7328_v61 }
 0xe46   : > { %v7408_v33 = vsel %vm5086_vm2, %v7400_v51, %v7348_v26 }
 0xe47   : > { %v8229_v39 = vrot.slane %v7408_v33, 5 }
 0xe49   : > { %v8309_v22 = vsel %vm15288_vm10, %v8297_v31, %v8229_v39 }
 0xe4a   : > { %v8317_v29 = vsel %vm15277_vm8, %v8309_v22, %v8239_v2 }
 0xe4b   : > { %v8080_v52 = vpop.permute.xlu1 %8079 }
 0xe4c   : > { %v8152_v63 = vsel %vm5077_vm4, %v8144_v12, %v8080_v52  ;;  %v8082_v48 = vpop.permute.xlu0 %8081 }
 0xe4d   : > { %v8160_v56 = vsel %vm5086_vm2, %v8152_v63, %v8100_v16  ;;  %v8154_v58 = vsel %vm5077_vm4, %v8146_v54, %v8082_v48 }
 0xe4e   : > { %v8253_v15 = vrot.slane %v8160_v56, 4 }
 0xe50   : > { %v8327_v31 = vsel %vm15290_vm3, %v8317_v29, %v8253_v15 }
 0xe51   : > { %v8343_v49 = vrot.slane %v8327_v31, 1  ;;  %v8344_v19 = vrot.slane %v8327_v31, 2  ;;  %v8345_v40 = vrot.slane %v8327_v31, 3  ;;  %8433 = vst [vmem:[#allocation1 + $0x1] ss:$9 sm:$0xff] %v8327_v31  ;;  %v8346_v25 = vrot.slane %v8327_v31, 4 }
 0xe53   : > { %8435 = vst [vmem:[#allocation1 + $0x2] ss:$9 sm:$0xff] %v8343_v49 }
 0xe54   : > { %8437 = vst [vmem:[#allocation1 + $0x3] ss:$9 sm:$0xff] %v8344_v19  ;;  %v8102_v42 = vpop.permute.xlu0 %8101 }
 0xe55   : > { %8439 = vst [vmem:[#allocation1 + $0x4] ss:$9 sm:$0xff] %v8345_v40  ;;  %v8162_v47 = vsel %vm5086_vm2, %v8154_v58, %v8102_v42 }
 0xe56   : > { %v8254_v20 = vrot.slane %v8162_v47, 4 }
 0xe58   : > { %v8330_v0 = vsel %vm15291_vm1, %v8318_v11, %v8254_v20 }
 0xe59   : > { %v8347_v36 = vrot.slane %v8330_v0, 1  ;;  %v8379_v34 = vunpack.i.h.s16 %v8330_v0  ;;  %v8629_v24 = vpack.i.b16 %v8330_v0, %v8346_v25  ;;  %v8348_v28 = vrot.slane %v8330_v0, 2 }
 0xe5a   : > { %v8349_v60 = vrot.slane %v8330_v0, 3  ;;  %v8350_v32 = vrot.slane %v8330_v0, 4 }
 0xe5b   : > { %v8381_v1 = vunpack.i.h.s16 %v8347_v36  ;;  %v8630_v17 = vpack.i.b16 %v8347_v36, %v8379_v34  ;;  %8441 = vst [vmem:[#allocation1 + $0x5] ss:$9 sm:$0xff] %v8629_v24  ;;  %v8383_v45 = vunpack.i.h.s16 %v8348_v28 }
 0xe5c   : > { %v8385_v37 = vunpack.i.h.s16 %v8349_v60  ;;  %v8476_v59 = vpop.permute.xlu0 %8475 }
 0xe5d   : > { %v8631_v53 = vpack.i.b16 %v8348_v28, %v8381_v1  ;;  %8443 = vst [vmem:[#allocation1 + $0x6] ss:$9 sm:$0xff] %v8630_v17  ;;  %v8632_v44 = vpack.i.b16 %v8349_v60, %v8383_v45 }
 0xe5e   : > { %v8633_v10 = vpack.i.b16 %v8350_v32, %v8385_v37 }
 0xe5f   : > { %8445 = vst [vmem:[#allocation1 + $0x7] ss:$9 sm:$0xff] %v8631_v53 }
 0xe66   : > { %v8446_v41 = vld [vmem:[#allocation1] sm:$0xff] }
 0xe67   : > { %8448 = vst [vmem:[#allocation1] ss:$9 sm:$0xff] %v8632_v44 }
 0xe68   : > { %8450 = vst [vmem:[#allocation1 + $0x1] ss:$9 sm:$0xff] %v8633_v10 }
 0xe6f   : > { %v8451_v11 = vld [vmem:[#allocation1] sm:$0xff] }
 0xe70   : > { %v8457_v46 = vsel %vm15292_vm13, %v8451_v11, 0 }
 0xe71   : > { %8464 = vmatpush.bf16.msra.mxu2 %v8457_v46 }
 0xe75   : > { %8465 = vmatpush.bf16.msra.mxu2 %v8446_v41 }
 0xe79   : > { %8466 = vmatpush.bf16.msra.mxu2 %v14141_v7  ;;  %v8481_v7 = vpop.permute.xlu1 %8480 }
 0xe7c   : > { %8634 = vmatmul.msk.bf16.vlgmr.msra.gmra.mxu2 %vm15293_vm7, %v8387_v35 }
 0xeff   : > { %v8468_v3 = vpop.f32.mrf.mxu2 }
 0xf00   : > { %v8478_v27 = vmul.f32 %v8476_v59, %v8468_v3 }
 0xf02   : > { %v8483_v5 = vadd.f32 %v8481_v7, %v8478_v27 }
 0xf04   : > { %v8484_v21 = vmax.f32 %v8483_v5, 0.0 }
 0xf06   : > { %v8485_v43 = vpack.c.bf16 %v8484_v21, %v8484_v21 }
 0xf07   : > { %v8470_v4 = vpop.f32.mrf.mxu2 }
 0xf08   : > { %8486 = vst [vmem:[%s258_s9] sm:$0xf] %v8485_v43 }
 0xf09   : > { %8854 = shalt.err (!%p8851_p1)
}
 0xf0a   : > { %8643 = dma.vmem_to_hbm [thread:$0]  (%p9095_p12), %s8503_s29, 64, %s8505_s14, %s8488_s24  }
 0xf0b PF: > { %p8654_p4 = scmp.ge.s32.totalorder %s8949_s28, 2  ;;  %s8516_s6 = sand.u32 1, %s8909_s18  }
 0xf0c   : > { %s8517_s26 = scalar_lea.sflag [#allocation5], %s8516_s6 }
 0xf0d   : > { %p8650_p5 = pnand %p8654_p4, %p9108_p2 }
 0xf0f   : > { %p8651_p6 = pneg %p8650_p5 }
 0xf11   : > { %8904 = dma.done.wait (%p8651_p6), %s8517_s26, 64  }
 0xf12   : > { %8906 = vsyncadd (%p8651_p6), %s8517_s26, 4294967232  ;;  %s21_s28 = sadd.s32 1, %s8949_s28   ;;  %s15294_s9 = sld [smem:[#allocation14_spill]] }
 0xf13   : > { %p18_p8 = scmp.ge.s32.totalorder %s21_s28, 6   ;;  %s15295_s15 = sld [smem:[#allocation13_spill]] }
 0xf14   : > { %s15296_s24 = sld [smem:[#allocation9_spill]]  ;;  %s15300_s18 = smov %s8913_s19 }
 0xf15   : > { %s15297_s25 = sld [smem:[#allocation10_spill]]  ;;  %s15301_s19 = smov %s8917_s20 }
 0xf16   : > { %s15298_s26 = sld [smem:[#allocation11_spill]]  ;;  %s15303_s21 = smov %s8925_s22 }
 0xf17   : > { %s15299_s27 = sld [smem:[#allocation12_spill]]  ;;  %s15304_s22 = smov %s8929_s23 }
 0xf18   : > { %s15302_s20 = smov %s15294_s9  ;;  %20 = sbr.rel (!%p18_p8) target bundleno = 9 (0x9), region = 104 }
 0xf19   : > { %s15305_s23 = smov %s15295_s15 }
 0xf1d   :  { %8523 = vsyncpa [#allocation4], 1 }
 0xf1e   :  { %8525 = vsyncpa [#allocation4 + $0x1], 1 }
 0xf1f   :  { %8526 = vsyncpa [#allocation5], 1 }
 0xf20   :  { %8528 = vsyncpa [#allocation5 + $0x1], 1 }

</bundles_post_ra>
